<compile_context>
chip_gen: v7x
topology: tpu7x:2x2x1
jax: 0.10.0
libtpu: 0.0.40
codegen_flags: <defaults>
</compile_context>

<pallas_src>
import functools

import jax
import jax.numpy as jnp
from jax.experimental import pallas as pl
from jax.experimental.pallas import tpu as pltpu

HIDDEN = 128          # hidden channels of the synthetic CVNetwork (lane-dense)
NPAD = 128            # conv2 MXU output width (only the first C lanes are stored)


# -----------------------------------------------------------------------------
# Fused kernel:  [concat nv] -> conv3x3+SiLU -> conv3x3 -> denoise epilogue
# -----------------------------------------------------------------------------
def _fused_cv_denoise_kernel(x_ref, w1_ref, b1_ref, w2p_ref, w2l_ref, b2_ref,
                             nr_ref, isr_ref,
                             pn_ref, pi_ref,
                             xp_ref, xcol_ref, hp_ref, acc_ref,
                             *, H, W, C):
    b = pl.program_id(0)
    Cin = C + 1
    M = H * W

    nr = nr_ref[b]                      # noise rate         (SMEM scalar)
    isr = isr_ref[b]                    # 1 / signal rate    (SMEM scalar)
    nv = nr * nr                        # noise variance channel value

    # --- zero only the 1-pixel halo of the padded scratches (the interiors are
    #     fully overwritten every grid step) -----------------------------------
    xp_ref[0:1, :, :] = jnp.zeros((1, W + 2, Cin), xp_ref.dtype)
    xp_ref[H + 1:H + 2, :, :] = jnp.zeros((1, W + 2, Cin), xp_ref.dtype)
    xp_ref[:, 0:1, :] = jnp.zeros((H + 2, 1, Cin), xp_ref.dtype)
    xp_ref[:, W + 1:W + 2, :] = jnp.zeros((H + 2, 1, Cin), xp_ref.dtype)

    hp_ref[0:1, :, :] = jnp.zeros((1, W + 2, HIDDEN), hp_ref.dtype)
    hp_ref[H + 1:H + 2, :, :] = jnp.zeros((1, W + 2, HIDDEN), hp_ref.dtype)
    hp_ref[:, 0:1, :] = jnp.zeros((H + 2, 1, HIDDEN), hp_ref.dtype)
    hp_ref[:, W + 1:W + 2, :] = jnp.zeros((H + 2, 1, HIDDEN), hp_ref.dtype)

    # --- CVNetwork input: x (cast once to bf16) + broadcast noise-variance ch. -
    x_hwc = x_ref[0]                                              # (H, W, C) f32
    xp_ref[1:H + 1, 1:W + 1, 0:C] = x_hwc.astype(xp_ref.dtype)
    xp_ref[1:H + 1, 1:W + 1, C:C + 1] = jnp.full((H, W, 1), nv, xp_ref.dtype)

    # --- conv1: 3x3 'same' conv as ONE im2col MXU dot (K = 9*Cin) --------------
    for k in range(9):
        dy, dx = divmod(k, 3)
        xcol_ref[:, k * Cin:(k + 1) * Cin] = (
            xp_ref[dy:dy + H, dx:dx + W, :].reshape(M, Cin))
    h = jnp.dot(xcol_ref[...], w1_ref[...], preferred_element_type=jnp.float32)
    h += b1_ref[...].astype(jnp.float32)
    h = h * jax.nn.sigmoid(h)                                     # SiLU
    hp_ref[1:H + 1, 1:W + 1, :] = h.reshape(H, W, HIDDEN).astype(hp_ref.dtype)

    # --- conv2: taps paired along K (K=256 dots) into an f32 VMEM accumulator --
    def tap(k):
        dy, dx = divmod(k, 3)
        return hp_ref[dy:dy + H, dx:dx + W, :].reshape(M, HIDDEN)  # bf16

    acc_ref[...] = jnp.zeros_like(acc_ref)
    for p in range(4):
        patch = jnp.concatenate([tap(2 * p), tap(2 * p + 1)], axis=-1)  # (M, 256)
        acc_ref[...] += jnp.dot(patch, w2p_ref[p],
                                preferred_element_type=jnp.float32)
    acc_ref[...] += jnp.dot(tap(8), w2l_ref[...],
                            preferred_element_type=jnp.float32)

    # Store only the C real output channels (no padded HBM output).
    pn = acc_ref[:, 0:C] + b2_ref[...].astype(jnp.float32)         # (M, C) f32
    pn_ref[...] = pn.reshape(1, H, W, C).astype(pn_ref.dtype)

    # --- fused denoise epilogue: (x - nr * pred_noise) * (1 / signal_rate) -----
    x_flat = x_hwc.reshape(M, C).astype(jnp.float32)
    pi = (x_flat - nr * pn) * isr
    pi_ref[...] = pi.reshape(1, H, W, C).astype(pi_ref.dtype)


def fused_cv_denoise(x_nhwc, packed, nr, isr):
    """x_nhwc: (B,H,W,C) f32, packed: kernel-layout params, nr/isr: (B,) f32.
    Returns (pred_noises_nhwc, pred_imgs_nhwc), both (B,H,W,C) f32."""
    B, H, W, C = x_nhwc.shape
    Cin = C + 1
    kernel = functools.partial(_fused_cv_denoise_kernel, H=H, W=W, C=C)
    return pl.pallas_call(
        kernel,
        out_shape=(jax.ShapeDtypeStruct((B, H, W, C), jnp.float32),
                   jax.ShapeDtypeStruct((B, H, W, C), jnp.float32)),
        grid_spec=pltpu.PrefetchScalarGridSpec(
            num_scalar_prefetch=0,
            grid=(B,),
            in_specs=[
                pl.BlockSpec((1, H, W, C), lambda b: (b, 0, 0, 0)),          # x
                pl.BlockSpec((9 * Cin, HIDDEN), lambda b: (0, 0)),           # w1 flat
                pl.BlockSpec((1, HIDDEN), lambda b: (0, 0)),                 # b1
                pl.BlockSpec((4, 2 * HIDDEN, NPAD), lambda b: (0, 0, 0)),    # w2 pairs
                pl.BlockSpec((HIDDEN, NPAD), lambda b: (0, 0)),              # w2 last tap
                pl.BlockSpec((1, C), lambda b: (0, 0)),                      # b2
                pl.BlockSpec(memory_space=pltpu.MemorySpace.SMEM),           # nr
                pl.BlockSpec(memory_space=pltpu.MemorySpace.SMEM),           # 1/sr
            ],
            out_specs=(pl.BlockSpec((1, H, W, C), lambda b: (b, 0, 0, 0)),
                       pl.BlockSpec((1, H, W, C), lambda b: (b, 0, 0, 0))),
            scratch_shapes=[
                pltpu.VMEM((H + 2, W + 2, Cin), jnp.bfloat16),     # padded input
                pltpu.VMEM((H * W, 9 * Cin), jnp.bfloat16),        # conv1 im2col tile
                pltpu.VMEM((H + 2, W + 2, HIDDEN), jnp.bfloat16),  # padded hidden
                pltpu.VMEM((H * W, NPAD), jnp.float32),            # conv2 accumulator
            ],
        ),
        compiler_params=pltpu.CompilerParams(dimension_semantics=("parallel",)),
    )(x_nhwc, packed["w1"], packed["b1"], packed["w2p"], packed["w2l"],
      packed["b2"], nr, isr)


# -----------------------------------------------------------------------------
# DiffusionModel.forward wrapper (NCHW in/out like PyTorch)
# -----------------------------------------------------------------------------
@functools.partial(jax.jit, static_argnames=("training",))
def diffusion_forward(params_cv, params_ema, noisy_imgs, noise_rates, signal_rates,
                      training):
    system = params_cv if training else params_ema           # ema_model = deepcopy(cv_model)
    x = jnp.transpose(noisy_imgs, (0, 2, 3, 1)).astype(jnp.float32)   # NCHW -> NHWC
    B = x.shape[0]
    nr = noise_rates.reshape(B).astype(jnp.float32)
    isr = (1.0 / signal_rates.reshape(B)).astype(jnp.float32)
    pn_nhwc, pi_nhwc = fused_cv_denoise(x, system, nr, isr)
    pred_noises = jnp.transpose(pn_nhwc, (0, 3, 1, 2))                 # NHWC -> NCHW
    pred_imgs = jnp.transpose(pi_nhwc, (0, 3, 1, 2))
    return pred_noises, pred_imgs


# -----------------------------------------------------------------------------
# Parameters
# -----------------------------------------------------------------------------
def init_cv_params(key, channels=3, hidden=HIDDEN):
    """Raw f32 parameters of the synthetic CVNetwork (reference layout)."""
    cin = channels + 1
    k1, k2, k3, k4 = jax.random.split(key, 4)
    w1 = jax.random.normal(k1, (9, cin, hidden), jnp.float32) / jnp.sqrt(9.0 * cin)
    b1 = 0.1 * jax.random.normal(k3, (1, hidden), jnp.float32)
    w2 = jax.random.normal(k2, (9, hidden, channels), jnp.float32) / jnp.sqrt(9.0 * hidden)
    b2 = 0.1 * jax.random.normal(k4, (1, channels), jnp.float32)
    return {"w1": w1, "b1": b1, "w2": w2, "b2": b2}


def pack_cv_params(params):
    """Re-layout raw params for the fused kernel (bf16 MXU weights, paired taps)."""
    nine, cin, hidden = params["w1"].shape
    channels = params["w2"].shape[-1]
    w1f = params["w1"].reshape(nine * cin, hidden).astype(jnp.bfloat16)
    w2_pad = (jnp.zeros((9, hidden, NPAD), jnp.float32)
              .at[..., :channels].set(params["w2"]))
    w2p = jnp.concatenate([w2_pad[0:8:2], w2_pad[1:8:2]], axis=1).astype(jnp.bfloat16)
    w2l = w2_pad[8].astype(jnp.bfloat16)
    return {"w1": w1f, "b1": params["b1"], "w2p": w2p, "w2l": w2l,
            "b2": params["b2"]}


# -----------------------------------------------------------------------------
# Pure-JAX reference of the same math (emulating the kernel's bf16 MXU inputs)
# -----------------------------------------------------------------------------
def ref_forward(params, x_nchw, noise_rates, signal_rates):
    x = jnp.transpose(x_nchw, (0, 2, 3, 1)).astype(jnp.float32)
    B, H, W, C = x.shape
    nv = jnp.broadcast_to((noise_rates ** 2).reshape(B, 1, 1, 1), (B, H, W, 1))
    xin = jnp.concatenate([x, nv], axis=-1)
    xin = xin.astype(jnp.bfloat16).astype(jnp.float32)        # kernel stores x/nv as bf16

    def conv(z, w, bias):
        zp = jnp.pad(z, ((0, 0), (1, 1), (1, 1), (0, 0)))
        n = w.shape[-1]
        acc = jnp.zeros((B, H, W, n), jnp.float32)
        for k in range(9):
            dy, dx = divmod(k, 3)
            patch = zp[:, dy:dy + H, dx:dx + W, :]
            acc = acc + jnp.einsum(
                "bhwc,cn->bhwn", patch,
                w[k].astype(jnp.bfloat16).astype(jnp.float32),
                precision=jax.lax.Precision.HIGHEST)
        return acc + bias.reshape(1, 1, 1, n)

    h = conv(xin, params["w1"], params["b1"])
    h = h * jax.nn.sigmoid(h)
    h = h.astype(jnp.bfloat16).astype(jnp.float32)            # hidden kept bf16 in VMEM
    pn = conv(h, params["w2"], params["b2"])
    nr = noise_rates.reshape(B, 1, 1, 1)
    sr = signal_rates.reshape(B, 1, 1, 1)
    pi = (x - nr * pn) / sr
    return (jnp.transpose(pn, (0, 3, 1, 2)), jnp.transpose(pi, (0, 3, 1, 2)))


if __name__ == "__main__":
    B, C, H, W = 2, 3, 16, 16

    key = jax.random.PRNGKey(0)
    kp, kx, kn = jax.random.split(key, 3)

    raw_cv = init_cv_params(kp, channels=C, hidden=HIDDEN)
    raw_ema = jax.tree_util.tree_map(jnp.copy, raw_cv)        # deepcopy of CVNetwork
    params_cv = pack_cv_params(raw_cv)
    params_ema = pack_cv_params(raw_ema)

    noisy_imgs = jax.random.normal(kx, (B, C, H, W), jnp.float32)            # NCHW
    noise_rates = jax.random.uniform(kn, (B, 1, 1, 1), jnp.float32, 0.1, 0.9)
    signal_rates = jnp.sqrt(1.0 - noise_rates ** 2)

    pred_noises, pred_imgs = diffusion_forward(
        params_cv, params_ema, noisy_imgs, noise_rates, signal_rates, training=True)
    jax.block_until_ready((pred_noises, pred_imgs))

    # EMA path (training=False) uses the identical copied params -> identical output.
    pn_ema, pi_ema = diffusion_forward(
        params_cv, params_ema, noisy_imgs, noise_rates, signal_rates, training=False)
    jax.block_until_ready((pn_ema, pi_ema))

    ref_pn, ref_pi = ref_forward(raw_cv, noisy_imgs, noise_rates, signal_rates)

    assert pred_noises.shape == (B, C, H, W) and pred_imgs.shape == (B, C, H, W)
    assert jnp.allclose(pred_noises, ref_pn, atol=5e-3, rtol=5e-3)
    assert jnp.allclose(pred_imgs, ref_pi, atol=5e-3, rtol=5e-3)
    assert jnp.allclose(pn_ema, pred_noises, atol=1e-6, rtol=1e-6)
    assert jnp.allclose(pi_ema, pred_imgs, atol=1e-6, rtol=1e-6)

    print("KERNEL_OK")
</pallas_src>

<mosaic_0001>
module attributes {stable_mosaic.version = 11 : i64} {
  func.func @_fused_cv_denoise_kernel(%arg0: i32, %arg1: memref<1x16x16x3xf32, #tpu.memory_space<vmem>>, %arg2: memref<36x128xbf16, #tpu.memory_space<vmem>>, %arg3: memref<1x128xf32, #tpu.memory_space<vmem>>, %arg4: memref<4x256x128xbf16, #tpu.memory_space<vmem>>, %arg5: memref<128x128xbf16, #tpu.memory_space<vmem>>, %arg6: memref<1x3xf32, #tpu.memory_space<vmem>>, %arg7: memref<2xf32, #tpu.memory_space<smem>>, %arg8: memref<2xf32, #tpu.memory_space<smem>>, %arg9: memref<1x16x16x3xf32, #tpu.memory_space<vmem>>, %arg10: memref<1x16x16x3xf32, #tpu.memory_space<vmem>>, %arg11: memref<18x18x4xbf16, #tpu.memory_space<vmem>>, %arg12: memref<256x36xbf16, #tpu.memory_space<vmem>>, %arg13: memref<18x18x128xbf16, #tpu.memory_space<vmem>>, %arg14: memref<256x128xf32, #tpu.memory_space<vmem>>) attributes {dimension_semantics = [#tpu.dimension_semantics<parallel>], iteration_bounds = array<i64: 2>, scalar_prefetch = 0 : i64, scratch_operands = 4 : i64, tpu.core_type = #tpu.core_type<tc>, window_params = [{transform_indices = @transform_0, window_bounds = array<i64: 1, 16, 16, 3>}, {pipeline_mode = #tpu.pipeline_mode<synchronous>, transform_indices = @transform_1, window_bounds = array<i64: 36, 128>}, {pipeline_mode = #tpu.pipeline_mode<synchronous>, transform_indices = @transform_2, window_bounds = array<i64: 1, 128>}, {pipeline_mode = #tpu.pipeline_mode<synchronous>, transform_indices = @transform_3, window_bounds = array<i64: 4, 256, 128>}, {pipeline_mode = #tpu.pipeline_mode<synchronous>, transform_indices = @transform_4, window_bounds = array<i64: 128, 128>}, {pipeline_mode = #tpu.pipeline_mode<synchronous>, transform_indices = @transform_5, window_bounds = array<i64: 1, 3>}, {transform_indices = @transform_6, window_bounds = array<i64: 2>}, {transform_indices = @transform_7, window_bounds = array<i64: 2>}, {transform_indices = @transform_8, window_bounds = array<i64: 1, 16, 16, 3>}, {transform_indices = @transform_9, window_bounds = array<i64: 1, 16, 16, 3>}]} {
    %0 = arith.index_cast %arg0 : i32 to index
    %1 = memref.load %arg7[%0] : memref<2xf32, #tpu.memory_space<smem>>
    %2 = arith.index_cast %arg0 : i32 to index
    %3 = memref.load %arg8[%2] : memref<2xf32, #tpu.memory_space<smem>>
    %4 = arith.mulf %1, %1 : f32
    %cst = arith.constant 0.000000e+00 : bf16
    %5 = vector.broadcast %cst : bf16 to vector<1x18x4xbf16>
    %c0 = arith.constant 0 : index
    %c0_0 = arith.constant 0 : index
    %c0_1 = arith.constant 0 : index
    %6 = vector.load %arg11[%c0, %c0_0, %c0_1] : memref<18x18x4xbf16, #tpu.memory_space<vmem>>, vector<1x18x4xbf16>
    tpu.vector_store %arg11[%c0, %c0_0, %c0_1], %5 {strides = array<i32>} : memref<18x18x4xbf16, #tpu.memory_space<vmem>>, vector<1x18x4xbf16>,
    %cst_2 = arith.constant 0.000000e+00 : bf16
    %7 = vector.broadcast %cst_2 : bf16 to vector<1x18x4xbf16>
    %c17 = arith.constant 17 : index
    %c0_3 = arith.constant 0 : index
    %c0_4 = arith.constant 0 : index
    %8 = vector.load %arg11[%c17, %c0_3, %c0_4] : memref<18x18x4xbf16, #tpu.memory_space<vmem>>, vector<1x18x4xbf16>
    tpu.vector_store %arg11[%c17, %c0_3, %c0_4], %7 {strides = array<i32>} : memref<18x18x4xbf16, #tpu.memory_space<vmem>>, vector<1x18x4xbf16>,
    %cst_5 = arith.constant 0.000000e+00 : bf16
    %9 = vector.broadcast %cst_5 : bf16 to vector<18x1x4xbf16>
    %c0_6 = arith.constant 0 : index
    %c0_7 = arith.constant 0 : index
    %c0_8 = arith.constant 0 : index
    %10 = vector.load %arg11[%c0_6, %c0_7, %c0_8] : memref<18x18x4xbf16, #tpu.memory_space<vmem>>, vector<18x1x4xbf16>
    tpu.vector_store %arg11[%c0_6, %c0_7, %c0_8], %9 {strides = array<i32>} : memref<18x18x4xbf16, #tpu.memory_space<vmem>>, vector<18x1x4xbf16>,
    %cst_9 = arith.constant 0.000000e+00 : bf16
    %11 = vector.broadcast %cst_9 : bf16 to vector<18x1x4xbf16>
    %c0_10 = arith.constant 0 : index
    %c17_11 = arith.constant 17 : index
    %c0_12 = arith.constant 0 : index
    %12 = vector.load %arg11[%c0_10, %c17_11, %c0_12] : memref<18x18x4xbf16, #tpu.memory_space<vmem>>, vector<18x1x4xbf16>
    tpu.vector_store %arg11[%c0_10, %c17_11, %c0_12], %11 {strides = array<i32>} : memref<18x18x4xbf16, #tpu.memory_space<vmem>>, vector<18x1x4xbf16>,
    %cst_13 = arith.constant 0.000000e+00 : bf16
    %13 = vector.broadcast %cst_13 : bf16 to vector<1x18x128xbf16>
    %c0_14 = arith.constant 0 : index
    %c0_15 = arith.constant 0 : index
    %c0_16 = arith.constant 0 : index
    %14 = vector.load %arg13[%c0_14, %c0_15, %c0_16] : memref<18x18x128xbf16, #tpu.memory_space<vmem>>, vector<1x18x128xbf16>
    tpu.vector_store %arg13[%c0_14, %c0_15, %c0_16], %13 {strides = array<i32>} : memref<18x18x128xbf16, #tpu.memory_space<vmem>>, vector<1x18x128xbf16>,
    %cst_17 = arith.constant 0.000000e+00 : bf16
    %15 = vector.broadcast %cst_17 : bf16 to vector<1x18x128xbf16>
    %c17_18 = arith.constant 17 : index
    %c0_19 = arith.constant 0 : index
    %c0_20 = arith.constant 0 : index
    %16 = vector.load %arg13[%c17_18, %c0_19, %c0_20] : memref<18x18x128xbf16, #tpu.memory_space<vmem>>, vector<1x18x128xbf16>
    tpu.vector_store %arg13[%c17_18, %c0_19, %c0_20], %15 {strides = array<i32>} : memref<18x18x128xbf16, #tpu.memory_space<vmem>>, vector<1x18x128xbf16>,
    %cst_21 = arith.constant 0.000000e+00 : bf16
    %17 = vector.broadcast %cst_21 : bf16 to vector<18x1x128xbf16>
    %c0_22 = arith.constant 0 : index
    %c0_23 = arith.constant 0 : index
    %c0_24 = arith.constant 0 : index
    %18 = vector.load %arg13[%c0_22, %c0_23, %c0_24] : memref<18x18x128xbf16, #tpu.memory_space<vmem>>, vector<18x1x128xbf16>
    tpu.vector_store %arg13[%c0_22, %c0_23, %c0_24], %17 {strides = array<i32>} : memref<18x18x128xbf16, #tpu.memory_space<vmem>>, vector<18x1x128xbf16>,
    %cst_25 = arith.constant 0.000000e+00 : bf16
    %19 = vector.broadcast %cst_25 : bf16 to vector<18x1x128xbf16>
    %c0_26 = arith.constant 0 : index
    %c17_27 = arith.constant 17 : index
    %c0_28 = arith.constant 0 : index
    %20 = vector.load %arg13[%c0_26, %c17_27, %c0_28] : memref<18x18x128xbf16, #tpu.memory_space<vmem>>, vector<18x1x128xbf16>
    tpu.vector_store %arg13[%c0_26, %c17_27, %c0_28], %19 {strides = array<i32>} : memref<18x18x128xbf16, #tpu.memory_space<vmem>>, vector<18x1x128xbf16>,
    %c0_29 = arith.constant 0 : index
    %c0_30 = arith.constant 0 : index
    %c0_31 = arith.constant 0 : index
    %c0_32 = arith.constant 0 : index
    %21 = vector.load %arg1[%c0_29, %c0_30, %c0_31, %c0_32] : memref<1x16x16x3xf32, #tpu.memory_space<vmem>>, vector<1x16x16x3xf32>
    %22 = vector.shape_cast %21 : vector<1x16x16x3xf32> to vector<16x16x3xf32>
    %23 = arith.truncf %22 : vector<16x16x3xf32> to vector<16x16x3xbf16>
    %c1 = arith.constant 1 : index
    %c1_33 = arith.constant 1 : index
    %c0_34 = arith.constant 0 : index
    %24 = vector.load %arg11[%c1, %c1_33, %c0_34] : memref<18x18x4xbf16, #tpu.memory_space<vmem>>, vector<16x16x3xbf16>
    tpu.vector_store %arg11[%c1, %c1_33, %c0_34], %23 {strides = array<i32>} : memref<18x18x4xbf16, #tpu.memory_space<vmem>>, vector<16x16x3xbf16>,
    %25 = arith.truncf %4 : f32 to bf16
    %26 = vector.broadcast %25 : bf16 to vector<16x16x1xbf16>
    %c1_35 = arith.constant 1 : index
    %c1_36 = arith.constant 1 : index
    %c3 = arith.constant 3 : index
    %27 = vector.load %arg11[%c1_35, %c1_36, %c3] : memref<18x18x4xbf16, #tpu.memory_space<vmem>>, vector<16x16x1xbf16>
    tpu.vector_store %arg11[%c1_35, %c1_36, %c3], %26 {strides = array<i32>} : memref<18x18x4xbf16, #tpu.memory_space<vmem>>, vector<16x16x1xbf16>,
    %c0_37 = arith.constant 0 : index
    %c0_38 = arith.constant 0 : index
    %c0_39 = arith.constant 0 : index
    %28 = vector.load %arg11[%c0_37, %c0_38, %c0_39] : memref<18x18x4xbf16, #tpu.memory_space<vmem>>, vector<16x16x4xbf16>
    %29 = vector.shape_cast %28 : vector<16x16x4xbf16> to vector<256x4xbf16>
    %c0_40 = arith.constant 0 : index
    %c0_41 = arith.constant 0 : index
    %30 = vector.load %arg12[%c0_40, %c0_41] : memref<256x36xbf16, #tpu.memory_space<vmem>>, vector<256x4xbf16>
    tpu.vector_store %arg12[%c0_40, %c0_41], %29 {strides = array<i32>} : memref<256x36xbf16, #tpu.memory_space<vmem>>, vector<256x4xbf16>,
    %c0_42 = arith.constant 0 : index
    %c1_43 = arith.constant 1 : index
    %c0_44 = arith.constant 0 : index
    %31 = vector.load %arg11[%c0_42, %c1_43, %c0_44] : memref<18x18x4xbf16, #tpu.memory_space<vmem>>, vector<16x16x4xbf16>
    %32 = vector.shape_cast %31 : vector<16x16x4xbf16> to vector<256x4xbf16>
    %c0_45 = arith.constant 0 : index
    %c4 = arith.constant 4 : index
    %33 = vector.load %arg12[%c0_45, %c4] : memref<256x36xbf16, #tpu.memory_space<vmem>>, vector<256x4xbf16>
    tpu.vector_store %arg12[%c0_45, %c4], %32 {strides = array<i32>} : memref<256x36xbf16, #tpu.memory_space<vmem>>, vector<256x4xbf16>,
    %c0_46 = arith.constant 0 : index
    %c2 = arith.constant 2 : index
    %c0_47 = arith.constant 0 : index
    %34 = vector.load %arg11[%c0_46, %c2, %c0_47] : memref<18x18x4xbf16, #tpu.memory_space<vmem>>, vector<16x16x4xbf16>
    %35 = vector.shape_cast %34 : vector<16x16x4xbf16> to vector<256x4xbf16>
    %c0_48 = arith.constant 0 : index
    %c8 = arith.constant 8 : index
    %36 = vector.load %arg12[%c0_48, %c8] : memref<256x36xbf16, #tpu.memory_space<vmem>>, vector<256x4xbf16>
    tpu.vector_store %arg12[%c0_48, %c8], %35 {strides = array<i32>} : memref<256x36xbf16, #tpu.memory_space<vmem>>, vector<256x4xbf16>,
    %c1_49 = arith.constant 1 : index
    %c0_50 = arith.constant 0 : index
    %c0_51 = arith.constant 0 : index
    %37 = vector.load %arg11[%c1_49, %c0_50, %c0_51] : memref<18x18x4xbf16, #tpu.memory_space<vmem>>, vector<16x16x4xbf16>
    %38 = vector.shape_cast %37 : vector<16x16x4xbf16> to vector<256x4xbf16>
    %c0_52 = arith.constant 0 : index
    %c12 = arith.constant 12 : index
    %39 = vector.load %arg12[%c0_52, %c12] : memref<256x36xbf16, #tpu.memory_space<vmem>>, vector<256x4xbf16>
    tpu.vector_store %arg12[%c0_52, %c12], %38 {strides = array<i32>} : memref<256x36xbf16, #tpu.memory_space<vmem>>, vector<256x4xbf16>,
    %c1_53 = arith.constant 1 : index
    %c1_54 = arith.constant 1 : index
    %c0_55 = arith.constant 0 : index
    %40 = vector.load %arg11[%c1_53, %c1_54, %c0_55] : memref<18x18x4xbf16, #tpu.memory_space<vmem>>, vector<16x16x4xbf16>
    %41 = vector.shape_cast %40 : vector<16x16x4xbf16> to vector<256x4xbf16>
    %c0_56 = arith.constant 0 : index
    %c16 = arith.constant 16 : index
    %42 = vector.load %arg12[%c0_56, %c16] : memref<256x36xbf16, #tpu.memory_space<vmem>>, vector<256x4xbf16>
    tpu.vector_store %arg12[%c0_56, %c16], %41 {strides = array<i32>} : memref<256x36xbf16, #tpu.memory_space<vmem>>, vector<256x4xbf16>,
    %c1_57 = arith.constant 1 : index
    %c2_58 = arith.constant 2 : index
    %c0_59 = arith.constant 0 : index
    %43 = vector.load %arg11[%c1_57, %c2_58, %c0_59] : memref<18x18x4xbf16, #tpu.memory_space<vmem>>, vector<16x16x4xbf16>
    %44 = vector.shape_cast %43 : vector<16x16x4xbf16> to vector<256x4xbf16>
    %c0_60 = arith.constant 0 : index
    %c20 = arith.constant 20 : index
    %45 = vector.load %arg12[%c0_60, %c20] : memref<256x36xbf16, #tpu.memory_space<vmem>>, vector<256x4xbf16>
    tpu.vector_store %arg12[%c0_60, %c20], %44 {strides = array<i32>} : memref<256x36xbf16, #tpu.memory_space<vmem>>, vector<256x4xbf16>,
    %c2_61 = arith.constant 2 : index
    %c0_62 = arith.constant 0 : index
    %c0_63 = arith.constant 0 : index
    %46 = vector.load %arg11[%c2_61, %c0_62, %c0_63] : memref<18x18x4xbf16, #tpu.memory_space<vmem>>, vector<16x16x4xbf16>
    %47 = vector.shape_cast %46 : vector<16x16x4xbf16> to vector<256x4xbf16>
    %c0_64 = arith.constant 0 : index
    %c24 = arith.constant 24 : index
    %48 = vector.load %arg12[%c0_64, %c24] : memref<256x36xbf16, #tpu.memory_space<vmem>>, vector<256x4xbf16>
    tpu.vector_store %arg12[%c0_64, %c24], %47 {strides = array<i32>} : memref<256x36xbf16, #tpu.memory_space<vmem>>, vector<256x4xbf16>,
    %c2_65 = arith.constant 2 : index
    %c1_66 = arith.constant 1 : index
    %c0_67 = arith.constant 0 : index
    %49 = vector.load %arg11[%c2_65, %c1_66, %c0_67] : memref<18x18x4xbf16, #tpu.memory_space<vmem>>, vector<16x16x4xbf16>
    %50 = vector.shape_cast %49 : vector<16x16x4xbf16> to vector<256x4xbf16>
    %c0_68 = arith.constant 0 : index
    %c28 = arith.constant 28 : index
    %51 = vector.load %arg12[%c0_68, %c28] : memref<256x36xbf16, #tpu.memory_space<vmem>>, vector<256x4xbf16>
    tpu.vector_store %arg12[%c0_68, %c28], %50 {strides = array<i32>} : memref<256x36xbf16, #tpu.memory_space<vmem>>, vector<256x4xbf16>,
    %c2_69 = arith.constant 2 : index
    %c2_70 = arith.constant 2 : index
    %c0_71 = arith.constant 0 : index
    %52 = vector.load %arg11[%c2_69, %c2_70, %c0_71] : memref<18x18x4xbf16, #tpu.memory_space<vmem>>, vector<16x16x4xbf16>
    %53 = vector.shape_cast %52 : vector<16x16x4xbf16> to vector<256x4xbf16>
    %c0_72 = arith.constant 0 : index
    %c32 = arith.constant 32 : index
    %54 = vector.load %arg12[%c0_72, %c32] : memref<256x36xbf16, #tpu.memory_space<vmem>>, vector<256x4xbf16>
    tpu.vector_store %arg12[%c0_72, %c32], %53 {strides = array<i32>} : memref<256x36xbf16, #tpu.memory_space<vmem>>, vector<256x4xbf16>,
    %c0_73 = arith.constant 0 : index
    %c0_74 = arith.constant 0 : index
    %55 = vector.load %arg12[%c0_73, %c0_74] : memref<256x36xbf16, #tpu.memory_space<vmem>>, vector<256x36xbf16>
    %c0_75 = arith.constant 0 : index
    %c0_76 = arith.constant 0 : index
    %56 = vector.load %arg2[%c0_75, %c0_76] : memref<36x128xbf16, #tpu.memory_space<vmem>>, vector<36x128xbf16>
    %cst_77 = arith.constant dense<0.000000e+00> : vector<256x128xf32>
    %57 = tpu.matmul %55, %56, %cst_77 {dimension_numbers = #tpu.dot_dimension_numbers<[1], [0], [0], [1], [0, 0, 1, 1], [], []>} : vector<256x36xbf16>, vector<36x128xbf16>, vector<256x128xf32> -> vector<256x128xf32>
    %c0_78 = arith.constant 0 : index
    %c0_79 = arith.constant 0 : index
    %58 = vector.load %arg3[%c0_78, %c0_79] : memref<1x128xf32, #tpu.memory_space<vmem>>, vector<1x128xf32>
    %59 = vector.broadcast %58 : vector<1x128xf32> to vector<256x128xf32>
    %60 = arith.addf %57, %59 : vector<256x128xf32>
    %61 = arith.negf %60 : vector<256x128xf32>
    %62 = math.exp %61 : vector<256x128xf32>
    %cst_80 = arith.constant 1.000000e+00 : f32
    %63 = vector.broadcast %cst_80 : f32 to vector<256x128xf32>
    %64 = arith.addf %63, %62 : vector<256x128xf32>
    %65 = arith.divf %63, %64 : vector<256x128xf32>
    %66 = arith.mulf %60, %65 : vector<256x128xf32>
    %67 = vector.shape_cast %66 : vector<256x128xf32> to vector<16x16x128xf32>
    %68 = arith.truncf %67 : vector<16x16x128xf32> to vector<16x16x128xbf16>
    %c1_81 = arith.constant 1 : index
    %c1_82 = arith.constant 1 : index
    %c0_83 = arith.constant 0 : index
    %69 = vector.load %arg13[%c1_81, %c1_82, %c0_83] : memref<18x18x128xbf16, #tpu.memory_space<vmem>>, vector<16x16x128xbf16>
    tpu.vector_store %arg13[%c1_81, %c1_82, %c0_83], %68 {strides = array<i32>} : memref<18x18x128xbf16, #tpu.memory_space<vmem>>, vector<16x16x128xbf16>,
    %cst_84 = arith.constant 0.000000e+00 : f32
    %70 = vector.broadcast %cst_84 : f32 to vector<256x128xf32>
    %c0_85 = arith.constant 0 : index
    %c0_86 = arith.constant 0 : index
    %71 = vector.load %arg14[%c0_85, %c0_86] : memref<256x128xf32, #tpu.memory_space<vmem>>, vector<256x128xf32>
    tpu.vector_store %arg14[%c0_85, %c0_86], %70 {strides = array<i32>} : memref<256x128xf32, #tpu.memory_space<vmem>>, vector<256x128xf32>,
    %c0_87 = arith.constant 0 : index
    %c0_88 = arith.constant 0 : index
    %c0_89 = arith.constant 0 : index
    %72 = vector.load %arg13[%c0_87, %c0_88, %c0_89] : memref<18x18x128xbf16, #tpu.memory_space<vmem>>, vector<16x16x128xbf16>
    %73 = vector.shape_cast %72 : vector<16x16x128xbf16> to vector<256x128xbf16>
    %c0_90 = arith.constant 0 : index
    %c1_91 = arith.constant 1 : index
    %c0_92 = arith.constant 0 : index
    %74 = vector.load %arg13[%c0_90, %c1_91, %c0_92] : memref<18x18x128xbf16, #tpu.memory_space<vmem>>, vector<16x16x128xbf16>
    %75 = vector.shape_cast %74 : vector<16x16x128xbf16> to vector<256x128xbf16>
    %76 = tpu.concatenate %73, %75 in 1 : vector<256x128xbf16>, vector<256x128xbf16> -> vector<256x256xbf16>
    %c0_93 = arith.constant 0 : index
    %c0_94 = arith.constant 0 : index
    %77 = vector.load %arg14[%c0_93, %c0_94] : memref<256x128xf32, #tpu.memory_space<vmem>>, vector<256x128xf32>
    %c0_95 = arith.constant 0 : index
    %c0_96 = arith.constant 0 : index
    %c0_97 = arith.constant 0 : index
    %78 = vector.load %arg4[%c0_95, %c0_96, %c0_97] : memref<4x256x128xbf16, #tpu.memory_space<vmem>>, vector<1x256x128xbf16>
    %79 = vector.shape_cast %78 : vector<1x256x128xbf16> to vector<256x128xbf16>
    %cst_98 = arith.constant dense<0.000000e+00> : vector<256x128xf32>
    %80 = tpu.matmul %76, %79, %cst_98 {dimension_numbers = #tpu.dot_dimension_numbers<[1], [0], [0], [1], [0, 0, 1, 1], [], []>} : vector<256x256xbf16>, vector<256x128xbf16>, vector<256x128xf32> -> vector<256x128xf32>
    %81 = arith.addf %77, %80 : vector<256x128xf32>
    %c0_99 = arith.constant 0 : index
    %c0_100 = arith.constant 0 : index
    %82 = vector.load %arg14[%c0_99, %c0_100] : memref<256x128xf32, #tpu.memory_space<vmem>>, vector<256x128xf32>
    tpu.vector_store %arg14[%c0_99, %c0_100], %81 {strides = array<i32>} : memref<256x128xf32, #tpu.memory_space<vmem>>, vector<256x128xf32>,
    %c0_101 = arith.constant 0 : index
    %c2_102 = arith.constant 2 : index
    %c0_103 = arith.constant 0 : index
    %83 = vector.load %arg13[%c0_101, %c2_102, %c0_103] : memref<18x18x128xbf16, #tpu.memory_space<vmem>>, vector<16x16x128xbf16>
    %84 = vector.shape_cast %83 : vector<16x16x128xbf16> to vector<256x128xbf16>
    %c1_104 = arith.constant 1 : index
    %c0_105 = arith.constant 0 : index
    %c0_106 = arith.constant 0 : index
    %85 = vector.load %arg13[%c1_104, %c0_105, %c0_106] : memref<18x18x128xbf16, #tpu.memory_space<vmem>>, vector<16x16x128xbf16>
    %86 = vector.shape_cast %85 : vector<16x16x128xbf16> to vector<256x128xbf16>
    %87 = tpu.concatenate %84, %86 in 1 : vector<256x128xbf16>, vector<256x128xbf16> -> vector<256x256xbf16>
    %c0_107 = arith.constant 0 : index
    %c0_108 = arith.constant 0 : index
    %88 = vector.load %arg14[%c0_107, %c0_108] : memref<256x128xf32, #tpu.memory_space<vmem>>, vector<256x128xf32>
    %c1_109 = arith.constant 1 : index
    %c0_110 = arith.constant 0 : index
    %c0_111 = arith.constant 0 : index
    %89 = vector.load %arg4[%c1_109, %c0_110, %c0_111] : memref<4x256x128xbf16, #tpu.memory_space<vmem>>, vector<1x256x128xbf16>
    %90 = vector.shape_cast %89 : vector<1x256x128xbf16> to vector<256x128xbf16>
    %cst_112 = arith.constant dense<0.000000e+00> : vector<256x128xf32>
    %91 = tpu.matmul %87, %90, %cst_112 {dimension_numbers = #tpu.dot_dimension_numbers<[1], [0], [0], [1], [0, 0, 1, 1], [], []>} : vector<256x256xbf16>, vector<256x128xbf16>, vector<256x128xf32> -> vector<256x128xf32>
    %92 = arith.addf %88, %91 : vector<256x128xf32>
    %c0_113 = arith.constant 0 : index
    %c0_114 = arith.constant 0 : index
    %93 = vector.load %arg14[%c0_113, %c0_114] : memref<256x128xf32, #tpu.memory_space<vmem>>, vector<256x128xf32>
    tpu.vector_store %arg14[%c0_113, %c0_114], %92 {strides = array<i32>} : memref<256x128xf32, #tpu.memory_space<vmem>>, vector<256x128xf32>,
    %c1_115 = arith.constant 1 : index
    %c1_116 = arith.constant 1 : index
    %c0_117 = arith.constant 0 : index
    %94 = vector.load %arg13[%c1_115, %c1_116, %c0_117] : memref<18x18x128xbf16, #tpu.memory_space<vmem>>, vector<16x16x128xbf16>
    %95 = vector.shape_cast %94 : vector<16x16x128xbf16> to vector<256x128xbf16>
    %c1_118 = arith.constant 1 : index
    %c2_119 = arith.constant 2 : index
    %c0_120 = arith.constant 0 : index
    %96 = vector.load %arg13[%c1_118, %c2_119, %c0_120] : memref<18x18x128xbf16, #tpu.memory_space<vmem>>, vector<16x16x128xbf16>
    %97 = vector.shape_cast %96 : vector<16x16x128xbf16> to vector<256x128xbf16>
    %98 = tpu.concatenate %95, %97 in 1 : vector<256x128xbf16>, vector<256x128xbf16> -> vector<256x256xbf16>
    %c0_121 = arith.constant 0 : index
    %c0_122 = arith.constant 0 : index
    %99 = vector.load %arg14[%c0_121, %c0_122] : memref<256x128xf32, #tpu.memory_space<vmem>>, vector<256x128xf32>
    %c2_123 = arith.constant 2 : index
    %c0_124 = arith.constant 0 : index
    %c0_125 = arith.constant 0 : index
    %100 = vector.load %arg4[%c2_123, %c0_124, %c0_125] : memref<4x256x128xbf16, #tpu.memory_space<vmem>>, vector<1x256x128xbf16>
    %101 = vector.shape_cast %100 : vector<1x256x128xbf16> to vector<256x128xbf16>
    %cst_126 = arith.constant dense<0.000000e+00> : vector<256x128xf32>
    %102 = tpu.matmul %98, %101, %cst_126 {dimension_numbers = #tpu.dot_dimension_numbers<[1], [0], [0], [1], [0, 0, 1, 1], [], []>} : vector<256x256xbf16>, vector<256x128xbf16>, vector<256x128xf32> -> vector<256x128xf32>
    %103 = arith.addf %99, %102 : vector<256x128xf32>
    %c0_127 = arith.constant 0 : index
    %c0_128 = arith.constant 0 : index
    %104 = vector.load %arg14[%c0_127, %c0_128] : memref<256x128xf32, #tpu.memory_space<vmem>>, vector<256x128xf32>
    tpu.vector_store %arg14[%c0_127, %c0_128], %103 {strides = array<i32>} : memref<256x128xf32, #tpu.memory_space<vmem>>, vector<256x128xf32>,
    %c2_129 = arith.constant 2 : index
    %c0_130 = arith.constant 0 : index
    %c0_131 = arith.constant 0 : index
    %105 = vector.load %arg13[%c2_129, %c0_130, %c0_131] : memref<18x18x128xbf16, #tpu.memory_space<vmem>>, vector<16x16x128xbf16>
    %106 = vector.shape_cast %105 : vector<16x16x128xbf16> to vector<256x128xbf16>
    %c2_132 = arith.constant 2 : index
    %c1_133 = arith.constant 1 : index
    %c0_134 = arith.constant 0 : index
    %107 = vector.load %arg13[%c2_132, %c1_133, %c0_134] : memref<18x18x128xbf16, #tpu.memory_space<vmem>>, vector<16x16x128xbf16>
    %108 = vector.shape_cast %107 : vector<16x16x128xbf16> to vector<256x128xbf16>
    %109 = tpu.concatenate %106, %108 in 1 : vector<256x128xbf16>, vector<256x128xbf16> -> vector<256x256xbf16>
    %c0_135 = arith.constant 0 : index
    %c0_136 = arith.constant 0 : index
    %110 = vector.load %arg14[%c0_135, %c0_136] : memref<256x128xf32, #tpu.memory_space<vmem>>, vector<256x128xf32>
    %c3_137 = arith.constant 3 : index
    %c0_138 = arith.constant 0 : index
    %c0_139 = arith.constant 0 : index
    %111 = vector.load %arg4[%c3_137, %c0_138, %c0_139] : memref<4x256x128xbf16, #tpu.memory_space<vmem>>, vector<1x256x128xbf16>
    %112 = vector.shape_cast %111 : vector<1x256x128xbf16> to vector<256x128xbf16>
    %cst_140 = arith.constant dense<0.000000e+00> : vector<256x128xf32>
    %113 = tpu.matmul %109, %112, %cst_140 {dimension_numbers = #tpu.dot_dimension_numbers<[1], [0], [0], [1], [0, 0, 1, 1], [], []>} : vector<256x256xbf16>, vector<256x128xbf16>, vector<256x128xf32> -> vector<256x128xf32>
    %114 = arith.addf %110, %113 : vector<256x128xf32>
    %c0_141 = arith.constant 0 : index
    %c0_142 = arith.constant 0 : index
    %115 = vector.load %arg14[%c0_141, %c0_142] : memref<256x128xf32, #tpu.memory_space<vmem>>, vector<256x128xf32>
    tpu.vector_store %arg14[%c0_141, %c0_142], %114 {strides = array<i32>} : memref<256x128xf32, #tpu.memory_space<vmem>>, vector<256x128xf32>,
    %c0_143 = arith.constant 0 : index
    %c0_144 = arith.constant 0 : index
    %116 = vector.load %arg14[%c0_143, %c0_144] : memref<256x128xf32, #tpu.memory_space<vmem>>, vector<256x128xf32>
    %c2_145 = arith.constant 2 : index
    %c2_146 = arith.constant 2 : index
    %c0_147 = arith.constant 0 : index
    %117 = vector.load %arg13[%c2_145, %c2_146, %c0_147] : memref<18x18x128xbf16, #tpu.memory_space<vmem>>, vector<16x16x128xbf16>
    %118 = vector.shape_cast %117 : vector<16x16x128xbf16> to vector<256x128xbf16>
    %c0_148 = arith.constant 0 : index
    %c0_149 = arith.constant 0 : index
    %119 = vector.load %arg5[%c0_148, %c0_149] : memref<128x128xbf16, #tpu.memory_space<vmem>>, vector<128x128xbf16>
    %cst_150 = arith.constant dense<0.000000e+00> : vector<256x128xf32>
    %120 = tpu.matmul %118, %119, %cst_150 {dimension_numbers = #tpu.dot_dimension_numbers<[1], [0], [0], [1], [0, 0, 1, 1], [], []>} : vector<256x128xbf16>, vector<128x128xbf16>, vector<256x128xf32> -> vector<256x128xf32>
    %121 = arith.addf %116, %120 : vector<256x128xf32>
    %c0_151 = arith.constant 0 : index
    %c0_152 = arith.constant 0 : index
    %122 = vector.load %arg14[%c0_151, %c0_152] : memref<256x128xf32, #tpu.memory_space<vmem>>, vector<256x128xf32>
    tpu.vector_store %arg14[%c0_151, %c0_152], %121 {strides = array<i32>} : memref<256x128xf32, #tpu.memory_space<vmem>>, vector<256x128xf32>,
    %c0_153 = arith.constant 0 : index
    %c0_154 = arith.constant 0 : index
    %123 = vector.load %arg14[%c0_153, %c0_154] : memref<256x128xf32, #tpu.memory_space<vmem>>, vector<256x3xf32>
    %c0_155 = arith.constant 0 : index
    %c0_156 = arith.constant 0 : index
    %124 = vector.load %arg6[%c0_155, %c0_156] : memref<1x3xf32, #tpu.memory_space<vmem>>, vector<1x3xf32>
    %125 = vector.broadcast %124 : vector<1x3xf32> to vector<256x3xf32>
    %126 = arith.addf %123, %125 : vector<256x3xf32>
    %127 = vector.shape_cast %126 : vector<256x3xf32> to vector<1x16x16x3xf32>
    %c0_157 = arith.constant 0 : index
    %c0_158 = arith.constant 0 : index
    %c0_159 = arith.constant 0 : index
    %c0_160 = arith.constant 0 : index
    %128 = vector.load %arg9[%c0_157, %c0_158, %c0_159, %c0_160] : memref<1x16x16x3xf32, #tpu.memory_space<vmem>>, vector<1x16x16x3xf32>
    tpu.vector_store %arg9[%c0_157, %c0_158, %c0_159, %c0_160], %127 {strides = array<i32>} : memref<1x16x16x3xf32, #tpu.memory_space<vmem>>, vector<1x16x16x3xf32>,
    %129 = vector.shape_cast %22 : vector<16x16x3xf32> to vector<256x3xf32>
    %130 = vector.broadcast %1 : f32 to vector<256x3xf32>
    %131 = arith.mulf %130, %126 : vector<256x3xf32>
    %132 = arith.subf %129, %131 : vector<256x3xf32>
    %133 = vector.broadcast %3 : f32 to vector<256x3xf32>
    %134 = arith.mulf %132, %133 : vector<256x3xf32>
    %135 = vector.shape_cast %134 : vector<256x3xf32> to vector<1x16x16x3xf32>
    %c0_161 = arith.constant 0 : index
    %c0_162 = arith.constant 0 : index
    %c0_163 = arith.constant 0 : index
    %c0_164 = arith.constant 0 : index
    %136 = vector.load %arg10[%c0_161, %c0_162, %c0_163, %c0_164] : memref<1x16x16x3xf32, #tpu.memory_space<vmem>>, vector<1x16x16x3xf32>
    tpu.vector_store %arg10[%c0_161, %c0_162, %c0_163, %c0_164], %135 {strides = array<i32>} : memref<1x16x16x3xf32, #tpu.memory_space<vmem>>, vector<1x16x16x3xf32>,
    return
  }
  func.func @transform_0(%arg0: i32) -> (i32, i32, i32, i32) {
    %c0_i32 = arith.constant 0 : i32
    %c0_i32_0 = arith.constant 0 : i32
    %c0_i32_1 = arith.constant 0 : i32
    %c0_i32_2 = arith.constant 0 : i32
    return %arg0, %c0_i32, %c0_i32_0, %c0_i32_1 : i32, i32, i32, i32
  }
  func.func @transform_1(%arg0: i32) -> (i32, i32) {
    %c0_i32 = arith.constant 0 : i32
    %c0_i32_0 = arith.constant 0 : i32
    %c0_i32_1 = arith.constant 0 : i32
    return %c0_i32, %c0_i32_0 : i32, i32
  }
  func.func @transform_2(%arg0: i32) -> (i32, i32) {
    %c0_i32 = arith.constant 0 : i32
    %c0_i32_0 = arith.constant 0 : i32
    %c0_i32_1 = arith.constant 0 : i32
    return %c0_i32, %c0_i32_0 : i32, i32
  }
  func.func @transform_3(%arg0: i32) -> (i32, i32, i32) {
    %c0_i32 = arith.constant 0 : i32
    %c0_i32_0 = arith.constant 0 : i32
    %c0_i32_1 = arith.constant 0 : i32
    %c0_i32_2 = arith.constant 0 : i32
    return %c0_i32, %c0_i32_0, %c0_i32_1 : i32, i32, i32
  }
  func.func @transform_4(%arg0: i32) -> (i32, i32) {
    %c0_i32 = arith.constant 0 : i32
    %c0_i32_0 = arith.constant 0 : i32
    %c0_i32_1 = arith.constant 0 : i32
    return %c0_i32, %c0_i32_0 : i32, i32
  }
  func.func @transform_5(%arg0: i32) -> (i32, i32) {
    %c0_i32 = arith.constant 0 : i32
    %c0_i32_0 = arith.constant 0 : i32
    %c0_i32_1 = arith.constant 0 : i32
    return %c0_i32, %c0_i32_0 : i32, i32
  }
  func.func @transform_6(%arg0: i32) -> i32 {
    %c0_i32 = arith.constant 0 : i32
    %c0_i32_0 = arith.constant 0 : i32
    return %c0_i32 : i32
  }
  func.func @transform_7(%arg0: i32) -> i32 {
    %c0_i32 = arith.constant 0 : i32
    %c0_i32_0 = arith.constant 0 : i32
    return %c0_i32 : i32
  }
  func.func @transform_8(%arg0: i32) -> (i32, i32, i32, i32) {
    %c0_i32 = arith.constant 0 : i32
    %c0_i32_0 = arith.constant 0 : i32
    %c0_i32_1 = arith.constant 0 : i32
    %c0_i32_2 = arith.constant 0 : i32
    return %arg0, %c0_i32, %c0_i32_0, %c0_i32_1 : i32, i32, i32, i32
  }
  func.func @transform_9(%arg0: i32) -> (i32, i32, i32, i32) {
    %c0_i32 = arith.constant 0 : i32
    %c0_i32_0 = arith.constant 0 : i32
    %c0_i32_1 = arith.constant 0 : i32
    %c0_i32_2 = arith.constant 0 : i32
    return %arg0, %c0_i32, %c0_i32_0, %c0_i32_1 : i32, i32, i32, i32
  }
}

</mosaic_0001>

<bundles_post_ra>
// kernel: diffusion_forward.1
= control target key start
LH: loop header
LB: loop body
LE: loop exit
PB: predicated region body
PF: predicated region fallthrough
CT: control target
= control target key end

     0   :  { %15 = vsyncpa [#allocation7], 0  ;;  %s16600_s0 = inlined_call_operand.vmem [shape: f32[2,16,16,3], index: 0, kind: input, shape index: {}]   ;;  %s16601_s1 = inlined_call_operand.vmem [shape: bf16[36,128], index: 1, kind: input, shape index: {}]   ;;  %s16602_s2 = inlined_call_operand.vmem [shape: f32[1,128], index: 2, kind: input, shape index: {}]   ;;  %s16603_s3 = inlined_call_operand.vmem [shape: bf16[4,256,128], index: 3, kind: input, shape index: {}]   ;;  %s16604_s4 = inlined_call_operand.vmem [shape: bf16[128,128], index: 4, kind: input, shape index: {}]   ;;  %s16605_s5 = inlined_call_operand.vmem [shape: f32[1,3], index: 5, kind: input, shape index: {}]   ;;  %s16606_s6 = inlined_call_operand.vmem [shape: f32[2], index: 6, kind: input, shape index: {}]   ;;  %s16607_s7 = inlined_call_operand.vmem [shape: f32[2], index: 7, kind: input, shape index: {}]   ;;  %s16608_s8 = inlined_call_operand.vmem [shape: f32[2,16,16,3], index: 8, kind: output, shape index: {0}]   ;;  %s16609_s9 = inlined_call_operand.vmem [shape: f32[2,16,16,3], index: 9, kind: output, shape index: {1}]  }
   0x1   :  { %16 = vsyncpa [#allocation9], 0  ;;  %s12091_s30 = smov 0  }
   0x2 LB: > { %s12097_s10 = sadd.s32 4294967295, %s12028_s30   ;;  %p10267_p0 = scmp.ge.s32.totalorder %s12028_s30, 1  ;;  %s12028_s30 = sphi %s12091_s30, %s22_s30  }
   0x3   : > { %p252_p1 = scmp.lt.s32.totalorder %s12028_s30, 3  ;;  %s280_s13 = sshll.u32 %s16606_s6, 4  ;;  %s281_s13 = int_to_ptr.vmem [resolvable:$true] %s280_s13 }
   0x4   : > { %p16610_p3 = scmp.eq.s32.totalorder %s12097_s10, 0  ;;  %s291_s17 = sshll.u32 %s16607_s7, 4  ;;  %s292_s17 = int_to_ptr.vmem [resolvable:$true] %s291_s17 }
   0x5   : > { %p12104_p2 = pnand %p10267_p0, %p252_p1  ;;  %s11984_s19 = scalar_lea.vmem %s281_s13, 16 }
   0x6   : > { %p11985_p6 = scmp.ne.s32.totalorder %s281_s13, %s11984_s19  ;;  %p11992_p10 = scmp.lt.s32.totalorder %s281_s13, %s281_s13 }
   0x7   : > { %s16647_s14 = scalar_select %p12104_p2, 1, 0 }
   0x8   : > { %p11620_p4 = pneg %p12104_p2  ;;  %p11993_p11 = scmp.lt.s32.totalorder %s11984_s19, %s11984_s19 }
   0xa   : > { %p12116_p5 = pnand %p16610_p3, %p11620_p4  ;;  %p11994_p12 = por %p11993_p11, %p11992_p10 }
   0xc   : > { %p11986_p7 = pneg %p12116_p5 }
   0xe   : > { %p11987_p8 = pnand %p11986_p7, %p11985_p6 }
  0x10   : > { %p11988_p9 = pneg %p11987_p8 }
  0x12   : > { %p11995_p13 = pnand %p11994_p12, %p11988_p9 }
  0x14   : > { %11998 = shalt.err (!%p11995_p13)
}
  0x15   : > { %s12030_s20 = smov [#allocation6]   ;;  %s11999_s21 = scalar_lea.vmem %s292_s17, 16 }
  0x16   : > { %11623 = dma.vmem_to_smem (!%p12116_p5), %s281_s13, 16, %s12030_s20, [#allocation7]  }
  0x17   : > { %p12000_p0 = scmp.ne.s32.totalorder %s292_s17, %s11999_s21  ;;  %p12007_p3 = scmp.lt.s32.totalorder %s292_s17, %s292_s17 }
  0x18   : > { %p12008_p2 = scmp.lt.s32.totalorder %s11999_s21, %s11999_s21 }
  0x19   : > { %p12002_p1 = pnand %p12000_p0, %p11986_p7 }
  0x1a   : > { %p12009_p6 = por %p12008_p2, %p12007_p3 }
  0x1b   : > { %p12003_p4 = pneg %p12002_p1 }
  0x1d   : > { %p12010_p8 = pnand %p12009_p6, %p12003_p4 }
  0x1f   : > { %12013 = shalt.err (!%p12010_p8)
}
  0x20   : > { %s12031_s22 = smov [#allocation8]   ;;  %p16649_p9 = scmp.ne.s32.totalorder %s16647_s14, 0 }
  0x21   : > { %11626 = dma.vmem_to_smem (!%p12116_p5), %s292_s17, 16, %s12031_s22, [#allocation9]  }
  0x22   : > { %312 = sbr.rel (%p16649_p9) target bundleno = 1308 (0x51c), region = 52 }
  0x29   : > { %p16650_p10 = scmp.eq.s32.totalorder %s12097_s10, 0 }
  0x2b   : > { %12019 = dma.done.wait (%p16650_p10), [#allocation7], 16   ;;  %p16651_p11 = pmov %p16650_p10 }
  0x2c   : > { %p16652_p7 = pmov %p16650_p10 }
  0x2d   : > { %12021 = vsyncadd (%p16651_p11), [#allocation7], 4294967280 }
  0x2e   : > { %12023 = dma.done.wait (%p16652_p7), [#allocation9], 16   ;;  %p16653_p2 = pmov %p16652_p7 }
  0x30   : > { %12025 = vsyncadd (%p16653_p2), [#allocation9], 4294967280 }
  0x31   : > { %322 = sfence }
  0x32   : > { %vm377_vm0 = vcmask 27648   ;;  %vm380_vm1 = vcmask 24576   ;;  %vm16612_vm2 = vsmask.f32 256  ;;  %v12032_v0 = vmov 0   ;;  %p358_p3 = scmp.lt.s32.totalorder %s12097_s10, 1 }
  0x33   : > { %378 = vst.msk [vmem:[#allocation2] sm:$0xf] %vm377_vm0, %v12032_v0  ;;  %379 = vst.msk [vmem:[#allocation2 + $0x4] sm:$0xf] %vm377_vm0, %v12032_v0  ;;  %vm16613_vm3 = vsmask.f32 7938 }
  0x34   : > { %381 = vst.msk [vmem:[#allocation2 + $0x8] sm:$0x1] %vm380_vm1, %v12032_v0  ;;  %385 = vst.msk [vmem:[#allocation2 + $0xd4] sm:$0x1] %vm380_vm1, %v12032_v0  ;;  %vm2105_vm5 = vcmask 1042432   ;;  %s12146_s23 = sld [smem:[#allocation6 + %s12097_s10]] }
  0x35   : > { %383 = vst.msk [vmem:[#allocation2 + $0xcc] sm:$0xf] %vm377_vm0, %v12032_v0  ;;  %384 = vst.msk [vmem:[#allocation2 + $0xd0] sm:$0xf] %vm377_vm0, %v12032_v0  ;;  %vm2106_vm7 = vcmask 1046532   ;;  %s359_s24 = scalar_select %p358_p3, %s12097_s10, 1 }
  0x36   : > { %499 = vst [vmem:[#allocation4] sm:$0xf] %v12032_v0  ;;  %500 = vst [vmem:[#allocation4 + $0x4] sm:$0xf] %v12032_v0  ;;  %v395_v3 = vld [vmem:[#allocation2 + $0x18] sm:$0x1] }
  0x37   : > { %501 = vst [vmem:[#allocation4 + $0x8] sm:$0x1] %v12032_v0  ;;  %503 = vst [vmem:[#allocation4 + $0xcc] sm:$0xf] %v12032_v0  ;;  %v392_v4 = vld [vmem:[#allocation2 + $0xc] sm:$0x1] }
  0x38   : > { %504 = vst [vmem:[#allocation4 + $0xd0] sm:$0xf] %v12032_v0  ;;  %505 = vst [vmem:[#allocation4 + $0xd4] sm:$0x1] %v12032_v0  ;;  %v398_v7 = vld [vmem:[#allocation2 + $0x24] sm:$0x1] }
  0x39   : > { %vm12140_vm4 = vmand %vm380_vm1, %vm16612_vm2  ;;  %s12159_s25 = sshll.u32 %s359_s24, 8  ;;  %v401_v9 = vld [vmem:[#allocation2 + $0x30] sm:$0x1]  ;;  %v448_v10 = vld [vmem:[#allocation2 + $0x14] sm:$0x1]  ;;  %vm1068_vm12 = vcmask 19456  }
  0x3a   : > { %vm12150_vm6 = vmand %vm380_vm1, %vm16613_vm3  ;;  %v396_v5 = vsel %vm12140_vm4, 0, %v395_v3  ;;  %v393_v6 = vsel %vm12140_vm4, 0, %v392_v4  ;;  %v399_v8 = vsel %vm12140_vm4, 0, %v398_v7  ;;  %vm745_vm9 = vsmask.f32 4368  ;;  %s12172_s28 = scalar_lea.vmem %s16600_s0, %s12159_s25  ;;  %s12182_s29 = smul.f32 %s12146_s23, %s12146_s23 }
  0x3b   : > { %397 = vst [vmem:[#allocation2 + $0x18] sm:$0x1] %v396_v5  ;;  %394 = vst [vmem:[#allocation2 + $0xc] sm:$0x1] %v393_v6  ;;  %v402_v12 = vsel %vm12140_vm4, 0, %v401_v9  ;;  %v449_v13 = vsel %vm12150_vm6, 0, %v448_v10 }
  0x3c   : > { %vm12164_vm8 = vmor %vm2105_vm5, %vm2106_vm7  ;;  %400 = vst [vmem:[#allocation2 + $0x24] sm:$0x1] %v399_v8  ;;  %v451_v14 = vld [vmem:[#allocation2 + $0x20] sm:$0x1]  ;;  %v445_v15 = vld [vmem:[#allocation2 + $0x8] sm:$0x1]  ;;  %p1186_p5 = scmp.ne.f32.partialorder %s12182_s29, %s12182_s29 }
  0x3d   : > { %v2009_v16 = vld [vmem:[#allocation2] sm:$0xe]  ;;  %v2010_v17 = vld [vmem:[#allocation2 + $0x4] sm:$0xf]  ;;  %vm1509_vm10 = vsmask.f32 3328  ;;  %vm12210_vm15 = vmand %vm1068_vm12, %vm16613_vm3 }
  0x3e   : > { %vm1510_vm11 = vsmask.f32 7440  ;;  %403 = vst [vmem:[#allocation2 + $0x30] sm:$0x1] %v402_v12  ;;  %450 = vst [vmem:[#allocation2 + $0x14] sm:$0x1] %v449_v13 }
  0x3f   : > { %v446_v18 = vsel %vm12150_vm6, 0, %v445_v15  ;;  %v10344_v19 = vrot.slane %v2009_v16, 9  ;;  %v2110_v20 = vrot.slane %v2010_v17, 5  ;;  %v389_v21 = vld [vmem:[#allocation2] sm:$0x1]  ;;  %v619_v22 = vld [vmem:[%s12172_s28 + $0x10] sm:$0xff]  ;;  %vm12221_vm0 = vmor %vm16612_vm2, %vm745_vm9 }
  0x40   : > { %447 = vst [vmem:[#allocation2 + $0x8] sm:$0x1] %v446_v18  ;;  %v390_v23 = vsel %vm12140_vm4, 0, %v389_v21  ;;  %v1462_v24 = vld [vmem:[#allocation2 + $0x4] sm:$0xf]  ;;  %v620_v25 = vld [vmem:[%s12172_s28 + $0x18] sm:$0xff]  ;;  %v10956_v26 = vpack.c.bf16 %v619_v22, %v619_v22  ;;  %vm12235_vm1 = vmor %vm1509_vm10, %vm1510_vm11 }
  0x41   : > { %v452_v27 = vsel %vm12150_vm6, 0, %v451_v14  ;;  %v12192_v28 = vsel %vm12164_vm8, %v10344_v19, %v2110_v20  ;;  %v2112_v29 = vrot.slane %v2110_v20, 4  ;;  %391 = vst [vmem:[#allocation2] sm:$0x1] %v390_v23  ;;  %v1522_v30 = vshll.u32 %v1462_v24, 16  ;;  %s1187_s11 = sshrl.u32 %s12182_s29, 16 }
  0x42   : > { %v1526_v31 = vshrl.u32 %v1462_v24, 16  ;;  %v617_v32 = vld [vmem:[%s12172_s28] sm:$0xff]  ;;  %v618_v33 = vld [vmem:[%s12172_s28 + $0x8] sm:$0xff]  ;;  %453 = vst [vmem:[#allocation2 + $0x20] sm:$0x1] %v452_v27  ;;  %v10957_v34 = vpack.c.bf16 %v620_v25, %v620_v25  ;;  %v765_v35 = vshrl.u32 %v10956_v26, 16 }
  0x43   : > { %v768_v36 = vshll.u32 %v10956_v26, 16  ;;  %s1188_s12 = sand.u32 1, %s1187_s11  ;;  %v10954_v37 = vpack.c.bf16 %v617_v32, %v617_v32  ;;  %v621_v38 = vld [vmem:[%s12172_s28 + $0x20] sm:$0xff]  ;;  %vm1075_vm13 = vcmask 16384   ;;  %vm16617_vm14 = vcmask 27672   ;;  %v622_v47 = vld [vmem:[%s12172_s28 + $0x28] sm:$0xff] }
  0x44   : > { %v12200_v39 = vrot.slane %v1522_v30, 5  ;;  %v1528_v40 = vrot.slane %v1526_v31, 4  ;;  %s1189_s13 = sadd.s32 32767, %s1188_s12  ;;  %v10955_v41 = vpack.c.bf16 %v618_v33, %v618_v33  ;;  %v12202_v42 = vpack.c.bf16 %v621_v38, %v621_v38  ;;  %v623_v48 = vld [vmem:[%s12172_s28 + $0x30] sm:$0xff]  ;;  %v1080_v57 = vld [vmem:[#allocation2 + $0x18] sm:$0xf]  ;;  %vm12263_vm7 = vmand %vm1075_vm13, %vm16612_vm2 }
  0x45   : > { %v767_v43 = vrot.slane %v765_v35, 7  ;;  %v773_v44 = vshrl.u32 %v10957_v34, 16  ;;  %v776_v45 = vshll.u32 %v10957_v34, 16  ;;  %s1190_s14 = sadd.s32 %s1189_s13, %s12182_s29  ;;  %v748_v46 = vshrl.u32 %v10954_v37, 16  ;;  %v1070_v15 = vld [vmem:[#allocation2 + $0xc] sm:$0xf]  ;;  %vm12273_vm9 = vmand %vm16617_vm14, %vm16613_vm3 }
  0x46   : > { %v1529_v49 = vor.u32 %v1528_v40, %v12200_v39  ;;  %s1191_s15 = sand.u32 4294901760, %s1190_s14  ;;  %v751_v50 = vshll.u32 %v10954_v37, 16  ;;  %v756_v51 = vshrl.u32 %v10955_v41, 16  ;;  %v759_v52 = vshll.u32 %v10955_v41, 16  ;;  %v624_v24 = vld [vmem:[%s12172_s28 + $0x38] sm:$0xff]  ;;  %s12033_s19 = smov 8  }
  0x47   : > { %v770_v54 = vor.u32 %v768_v36, %v767_v43  ;;  %v771_v55 = vrot.slane %v767_v43, 4  ;;  %v12214_v56 = vrot.slane %v773_v44, 7  ;;  %s16887_s15 = smov (%p1186_p5, %s1191_s15), 2143289344  ;;  %v750_v58 = vrot.slane %v748_v46, 7  ;;  %v2011_v59 = vld [vmem:[#allocation2 + $0x8] sm:$0x1] }
  0x48   : > { %v16662_v60 = vmov 0  ;;  %v1463_v61 = vld [vmem:[#allocation2 + $0x8] sm:$0x1]  ;;  %v12225_v62 = vrot.slane %v1529_v49, 4  ;;  %v758_v63 = vrot.slane %v756_v51, 7  ;;  %v12227_v0 = vpack.c.bf16 %v622_v47, %v622_v47  ;;  %s1194_s16 = sshrl.u32 %s16887_s15, 16 }
  0x49   : > { %v16663_v60 = vsel %vm12221_vm0, 4294967295, %v16662_v60  ;;  %v12229_v3 = vpack.c.bf16 %v623_v48, %v623_v48  ;;  %v2113_v4 = vrot.slane %v2011_v59, 5  ;;  %v1461_v5 = vld [vmem:[#allocation2] sm:$0xf]  ;;  %v1532_v6 = vshll.u32 %v1463_v61, 16  ;;  %s1195_s17 = sshll.u32 %s1194_s16, 16 }
  0x4a   : > { %16664 = vst [vmem:[#allocation12_spill] sm:$0xff] %v16663_v60  ;;  %v778_v7 = vor.u32 %v776_v45, %v12214_v56  ;;  %v780_v8 = vrot.slane %v12214_v56, 4  ;;  %v1513_v10 = vshrl.u32 %v1461_v5, 16  ;;  %v1516_v12 = vshll.u32 %v1461_v5, 16  ;;  %s1196_s18 = sor.u32 %s1195_s17, %s1194_s16  ;;  %v1077_v34 = vld [vmem:[#allocation2 + $0x14] sm:$0x1]  ;;  %s16335_s16 = scalar_lea.vmem %s16609_s9, %s12159_s25 }
  0x4b   : > { %v1081_v13 = vsel %vm12210_vm15, %v770_v54, %v1080_v57  ;;  %v753_v14 = vor.u32 %v751_v50, %v750_v58  ;;  %v2114_v16 = vsel %vm12164_vm8, %v2112_v29, %v2113_v4  ;;  %v1534_v17 = vrot.slane %v1532_v6, 5  ;;  %v1087_v37 = vld [vmem:[#allocation2 + $0x24] sm:$0xf]  ;;  %v1094_v46 = vld [vmem:[#allocation2 + $0x30] sm:$0xf]  ;;  %s12034_s20 = smov 4  }
  0x4c   : > { %v779_v18 = vsel %vm12221_vm0, %v771_v55, %v778_v7  ;;  %1082 = vst [vmem:[#allocation2 + $0x18] sm:$0xf] %v1081_v13  ;;  %v754_v19 = vrot.slane %v750_v58, 4  ;;  %v10360_v20 = vcombine.low %v12192_v28, %v2114_v16  ;;  %v1515_v21 = vrot.slane %v1513_v10, 4  ;;  %v1084_v51 = vld [vmem:[#allocation2 + $0x20] sm:$0x1] }
  0x4d   : > { %v1518_v22 = vrot.slane %v1516_v12, 5  ;;  %1083 = vst.msk [vmem:[#allocation2 + $0x1c] sm:$0xf] %vm1068_vm12, %v779_v18  ;;  %v12247_v23 = vstv %s1196_s18  ;;  %vm1206_vm5 = vcmask 24600   ;;  %v1535_v25 = vsel %vm12235_vm1, %v12225_v62, %v1534_v17  ;;  %s12035_s21 = smov 12   ;;  %s12036_s22 = smov 24  }
  0x4e   : > { %1214 = vst.msk [vmem:[#allocation2 + $0x1c] sm:$0xf] %vm16617_vm14, %v12247_v23  ;;  %v761_v26 = vor.u32 %v759_v52, %v758_v63  ;;  %v763_v27 = vrot.slane %v758_v63, 4  ;;  %v1071_v28 = vsel %vm12210_vm15, %v753_v14, %v1070_v15  ;;  %2268 = vrot.lane.b32.xlu1 %v10360_v20, %s12033_s19  ;;  %v782_v30 = vshrl.u32 %v12202_v42, 16  ;;  %v454_v63 = vld [vmem:[#allocation2 + $0x2c] sm:$0x1]  ;;  %vm12323_vm10 = vmand %vm1206_vm5, %vm16612_vm2 }
  0x4f   : > { %v1519_v29 = vor.u32 %v1518_v22, %v1515_v21  ;;  %1072 = vst [vmem:[#allocation2 + $0xc] sm:$0xf] %v1071_v28  ;;  %v785_v31 = vshll.u32 %v12202_v42, 16  ;;  %v790_v32 = vshrl.u32 %v12227_v0, 16  ;;  %v793_v36 = vshll.u32 %v12227_v0, 16  ;;  %s12037_s24 = smov 20  }
  0x50   : > { %v762_v35 = vsel %vm12221_vm0, %v754_v19, %v761_v26  ;;  %v10961_v38 = vpack.c.bf16 %v624_v24, %v624_v24  ;;  %v799_v40 = vshrl.u32 %v12229_v3, 16  ;;  %v784_v43 = vrot.slane %v782_v30, 7  ;;  %s12038_s26 = smov 32   ;;  %s12039_s27 = smov 16  }
  0x51   : > { %v1520_v42 = vrot.slane %v1519_v29, 4  ;;  %1074 = vst.msk [vmem:[#allocation2 + $0x10] sm:$0xf] %vm1068_vm12, %v762_v35  ;;  %v12278_v44 = vrot.slane %v790_v32, 7  ;;  %v802_v45 = vshll.u32 %v12229_v3, 16  ;;  %v1078_v50 = vsel %vm12263_vm7, %v763_v27, %v1077_v34  ;;  %s12040_s29 = smov 28  }
  0x52   : > { %1205 = vst.msk [vmem:[#allocation2 + $0x10] sm:$0xf] %vm16617_vm14, %v12247_v23  ;;  %v801_v47 = vrot.slane %v799_v40, 7  ;;  %v807_v48 = vshrl.u32 %v10961_v38, 16  ;;  %v810_v49 = vshll.u32 %v10961_v38, 16  ;;  %v787_v55 = vor.u32 %v785_v31, %v784_v43 }
  0x53   : > { %v1525_v52 = vsel %vm12235_vm1, %v1520_v42, %v12200_v39  ;;  %v1211_v54 = vld [vmem:[#allocation2 + $0x18] sm:$0xf]  ;;  %v788_v57 = vrot.slane %v784_v43, 4  ;;  %v795_v58 = vor.u32 %v793_v36, %v12278_v44  ;;  %1079 = vst [vmem:[#allocation2 + $0x14] sm:$0x1] %v1078_v50  ;;  %v1085_v7 = vsel %vm12263_vm7, %v780_v8, %v1084_v51 }
  0x54   : > { %v10328_v59 = vcombine.low %v1525_v52, %v1535_v25  ;;  %v1212_v61 = vsel %vm12273_vm9, %v12247_v23, %v1211_v54  ;;  %v804_v62 = vor.u32 %v802_v45, %v801_v47  ;;  %v1088_v39 = vsel %vm12210_vm15, %v787_v55, %v1087_v37  ;;  %1086 = vst [vmem:[#allocation2 + $0x20] sm:$0x1] %v1085_v7 }
  0x55   : > { %1213 = vst [vmem:[#allocation2 + $0x18] sm:$0xf] %v1212_v61  ;;  %v796_v0 = vsel %vm12221_vm0, %v788_v57, %v795_v58  ;;  %v805_v3 = vrot.slane %v801_v47, 4  ;;  %v12296_v4 = vrot.slane %v807_v48, 7  ;;  %1089 = vst [vmem:[#allocation2 + $0x24] sm:$0xf] %v1088_v39 }
  0x56   : > { %1944 = vrot.lane.b32.xlu0 %v10328_v59, %s12034_s20  ;;  %v1201_v5 = vld [vmem:[#allocation2 + $0xc] sm:$0xf]  ;;  %1090 = vst.msk [vmem:[#allocation2 + $0x28] sm:$0xf] %vm1068_vm12, %v796_v0  ;;  %v1095_v6 = vsel %vm12210_vm15, %v804_v62, %v1094_v46  ;;  %v12306_v10 = vld [vmem:[#allocation2 + $0x1c] sm:$0xf] }
  0x57   : > { %v12308_v12 = vld [vmem:[#allocation2 + $0x1c] sm:$0xf]  ;;  %v1202_v13 = vsel %vm12273_vm9, %v12247_v23, %v1201_v5  ;;  %1221 = vst.msk [vmem:[#allocation2 + $0x28] sm:$0xf] %vm16617_vm14, %v12247_v23  ;;  %v812_v14 = vor.u32 %v810_v49, %v12296_v4  ;;  %1096 = vst [vmem:[#allocation2 + $0x30] sm:$0xf] %v1095_v6 }
  0x58   : > { %v4197_v56 = vrot.slane %v12306_v10, 5  ;;  %v12317_v15 = vld [vmem:[#allocation2 + $0x1c] sm:$0xf]  ;;  %1203 = vst [vmem:[#allocation2 + $0xc] sm:$0xf] %v1202_v13  ;;  %v3160_v17 = vrot.slane %v12308_v12, 5 }
  0x59   : > { %v12319_v8 = vld [vmem:[#allocation2 + $0x1c] sm:$0xf]  ;;  %v2124_v18 = vrot.slane %v12317_v15, 5  ;;  %v455_v19 = vsel %vm12150_vm6, 0, %v454_v63  ;;  %v813_v21 = vsel %vm12221_vm0, %v805_v3, %v812_v14  ;;  %v3056_v22 = vld [vmem:[#allocation2 + $0x10] sm:$0xf] }
  0x5a   : > { %v2592_v20 = vshll.u32 %v12319_v8, 16  ;;  %v12334_v24 = vld [vmem:[#allocation2 + $0x10] sm:$0xf]  ;;  %456 = vst [vmem:[#allocation2 + $0x2c] sm:$0x1] %v455_v19  ;;  %v797_v25 = vrot.slane %v12278_v44, 4 }
  0x5b   : > { %1097 = vst.msk [vmem:[#allocation2 + $0x34] sm:$0xf] %vm1068_vm12, %v813_v21  ;;  %v1208_v26 = vld [vmem:[#allocation2 + $0x14] sm:$0x1]  ;;  %v3153_v27 = vrot.slane %v3056_v22, 5  ;;  %v2117_v28 = vrot.slane %v12334_v24, 5 }
  0x5c   : > { %1228 = vst.msk [vmem:[#allocation2 + $0x34] sm:$0xf] %vm16617_vm14, %v12247_v23  ;;  %v1209_v29 = vsel %vm12323_vm10, %v12247_v23, %v1208_v26  ;;  %v12346_v30 = vrot.slane %v4197_v56, 4  ;;  %v12350_v31 = vrot.slane %v3160_v17, 4  ;;  %v12354_v32 = vrot.slane %v2124_v18, 4  ;;  %v11650_v34 = vld [vmem:[#allocation2 + $0x18] sm:$0xff]  }
  0x5d   : > { %1210 = vst [vmem:[#allocation2 + $0x14] sm:$0x1] %v1209_v29  ;;  %v12356_v35 = vld [vmem:[#allocation2 + $0x10] sm:$0xf]  ;;  %v12358_v36 = vrot.slane %v2592_v20, 5  ;;  %v3155_v38 = vrot.slane %v3153_v27, 4  ;;  %2447 = vrot.lane.b32.xlu1 %v11650_v34, %s12035_s21 }
  0x5e   : > { %v1218_v37 = vld [vmem:[#allocation2 + $0x24] sm:$0xf]  ;;  %v4099_v40 = vld [vmem:[#allocation2 + $0x18] sm:$0xe]  ;;  %v2596_v42 = vshrl.u32 %v12319_v8, 16  ;;  %v2119_v49 = vrot.slane %v2117_v28, 4 }
  0x5f   : > { %v1219_v43 = vsel %vm12273_vm9, %v12247_v23, %v1218_v37  ;;  %v1225_v44 = vld [vmem:[#allocation2 + $0x30] sm:$0xf]  ;;  %v11653_v46 = vld [vmem:[#allocation2 + $0x18] sm:$0xff]   ;;  %v3055_v48 = vld [vmem:[#allocation2 + $0xc] sm:$0xe]  ;;  %v10472_v54 = vrot.slane %v4099_v40, 9 }
  0x60   : > { %v11651_v45 = vld [vmem:[#allocation2 + $0xc] sm:$0xff]   ;;  %1220 = vst [vmem:[#allocation2 + $0x24] sm:$0xf] %v1219_v43  ;;  %v1226_v47 = vsel %vm12273_vm9, %v12247_v23, %v1225_v44  ;;  %v10408_v50 = vrot.slane %v3055_v48, 9  ;;  %v1215_v52 = vld [vmem:[#allocation2 + $0x20] sm:$0x1] }
  0x61   : > { %1227 = vst [vmem:[#allocation2 + $0x30] sm:$0xf] %v1226_v47  ;;  %v2012_v51 = vld [vmem:[#allocation2 + $0xc] sm:$0xe]  ;;  %2445 = vrot.lane.b32.xlu0 %v11651_v45, %s12035_s21  ;;  %v1216_v57 = vsel %vm12323_vm10, %v12247_v23, %v1215_v52  ;;  %v3058_v58 = vld [vmem:[#allocation2 + $0x18] sm:$0xe] }
  0x62   : > { %v10345_v55 = vrot.slane %v2012_v51, 9  ;;  %v2015_v59 = vld [vmem:[#allocation2 + $0x18] sm:$0xe]  ;;  %v1546_v61 = vshll.u32 %v12356_v35, 16  ;;  %1217 = vst [vmem:[#allocation2 + $0x20] sm:$0x1] %v1216_v57  ;;  %v3154_v7 = vsel %vm12164_vm8, %v10408_v50, %v3153_v27 }
  0x63   : > { %v10409_v62 = vrot.slane %v3058_v58, 9  ;;  %v1091_v63 = vld [vmem:[#allocation2 + $0x2c] sm:$0x1]  ;;  %v1550_v0 = vshrl.u32 %v12356_v35, 16  ;;  %v12376_v6 = vld [vmem:[#allocation2 + $0x28] sm:$0xf] }
  0x64   : > { %v3057_v39 = vld [vmem:[#allocation2 + $0x14] sm:$0x1]  ;;  %v1092_v5 = vsel %vm12263_vm7, %v797_v25, %v1091_v63  ;;  %v12380_v19 = vld [vmem:[#allocation2 + $0x28] sm:$0xf]  ;;  %v1464_v20 = vld [vmem:[#allocation2 + $0xc] sm:$0xf]  ;;  %v2118_v27 = vsel %vm12164_vm8, %v10345_v55, %v2117_v28 }
  0x65   : > { %v2014_v3 = vld [vmem:[#allocation2 + $0x14] sm:$0x1]  ;;  %v3156_v13 = vrot.slane %v3057_v39, 5  ;;  %1093 = vst [vmem:[#allocation2 + $0x2c] sm:$0x1] %v1092_v5  ;;  %3489 = vrot.lane.b32.xlu0 %v11653_v46, %s12036_s22  ;;  %v10346_v21 = vrot.slane %v2015_v59, 9  ;;  %v3161_v52 = vsel %vm12164_vm8, %v10409_v62, %v3160_v17 }
  0x66   : > { %v2120_v14 = vrot.slane %v2014_v3, 5  ;;  %v4204_v22 = vrot.slane %v12376_v6, 5  ;;  %v1537_v24 = vshrl.u32 %v1464_v20, 16  ;;  %v1540_v26 = vshll.u32 %v1464_v20, 16  ;;  %v1466_v40 = vld [vmem:[#allocation2 + $0x14] sm:$0x1] }
  0x67   : > { %v11652_v25 = vld [vmem:[#allocation2 + $0x24] sm:$0xff]   ;;  %v3157_v29 = vsel %vm12164_vm8, %v3155_v38, %v3156_v13  ;;  %v2131_v35 = vrot.slane %v12380_v19, 5  ;;  %v12391_v43 = vrot.slane %v1546_v61, 5  ;;  %v4198_v38 = vsel %vm12164_vm8, %v10472_v54, %v4197_v56 }
  0x68   : > { %v2121_v34 = vsel %vm12164_vm8, %v2119_v49, %v2120_v14  ;;  %v11655_v37 = vld [vmem:[#allocation2 + $0x24] sm:$0xff]   ;;  %3491 = vrot.lane.b32.xlu1 %v11652_v25, %s12036_s22  ;;  %v11654_v44 = vld [vmem:[#allocation2 + $0x30] sm:$0xff]   ;;  %v12398_v46 = vrot.slane %v4204_v22, 4  ;;  %v1539_v28 = vrot.slane %v1537_v24, 4  ;;  %v1542_v47 = vrot.slane %v1540_v26, 5 }
  0x69   : > { %v4102_v45 = vld [vmem:[#allocation2 + $0x24] sm:$0xe]  ;;  %2449 = vrot.lane.b32.xlu0 %v11655_v37, %s12035_s21  ;;  %v10424_v48 = vcombine.low %v3154_v7, %v3157_v29  ;;  %v10361_v49 = vcombine.low %v2118_v27, %v2121_v34  ;;  %v4101_v50 = vld [vmem:[#allocation2 + $0x20] sm:$0x1]  ;;  %v12409_v56 = vsel %vm12164_vm8, %v10346_v21, %v2124_v18  ;;  %v12413_v63 = vrot.slane %v2131_v35, 4 }
  0x6a   : > { %v3060_v51 = vld [vmem:[#allocation2 + $0x20] sm:$0x1]  ;;  %v4200_v54 = vrot.slane %v4101_v50, 5  ;;  %v10473_v58 = vrot.slane %v4102_v45, 9  ;;  %v2018_v59 = vld [vmem:[#allocation2 + $0x24] sm:$0xe]  ;;  %v1543_v12 = vor.u32 %v1542_v47, %v1539_v28 }
  0x6b   : > { %v2017_v10 = vld [vmem:[#allocation2 + $0x20] sm:$0x1]  ;;  %v3163_v55 = vrot.slane %v3060_v51, 5  ;;  %v1552_v39 = vrot.slane %v1550_v0, 4  ;;  %v1556_v17 = vshll.u32 %v1466_v40, 16  ;;  %v10347_v13 = vrot.slane %v2018_v59, 9 }
  0x6c   : > { %v2127_v57 = vrot.slane %v2017_v10, 5  ;;  %v1222_v61 = vld [vmem:[#allocation2 + $0x2c] sm:$0x1]  ;;  %2451 = vrot.lane.b32.xlu1 %v11654_v44, %s12035_s21  ;;  %v4201_v15 = vsel %vm12164_vm8, %v12346_v30, %v4200_v54  ;;  %v2513_v0 = vld [vmem:[#allocation2 + $0x18] sm:$0xf]  ;;  %v12432_v14 = vsel %vm12164_vm8, %v10473_v58, %v4204_v22  ;;  %v2598_v25 = vrot.slane %v2596_v42, 4 }
  0x6d   : > { %v3164_v18 = vsel %vm12164_vm8, %v12350_v31, %v3163_v55  ;;  %v1223_v3 = vsel %vm12323_vm10, %v12247_v23, %v1222_v61  ;;  %v2515_v5 = vld [vmem:[#allocation2 + $0x20] sm:$0x1]  ;;  %3311 = vrot.lane.b32.xlu0 %v10424_v48, %s12037_s24  ;;  %v10488_v6 = vcombine.low %v4198_v38, %v4201_v15  ;;  %v2510_v31 = vld [vmem:[#allocation2 + $0xc] sm:$0xf]  ;;  %v1553_v20 = vor.u32 %v1552_v39, %v12391_v43  ;;  %v2511_v27 = vld [vmem:[#allocation2 + $0x10] sm:$0xf] }
  0x6e   : > { %v2128_v62 = vsel %vm12164_vm8, %v12354_v32, %v2127_v57  ;;  %v10425_v7 = vcombine.low %v3161_v52, %v3164_v18  ;;  %1224 = vst [vmem:[#allocation2 + $0x2c] sm:$0x1] %v1223_v3  ;;  %v1544_v32 = vrot.slane %v1543_v12, 4  ;;  %v1558_v21 = vrot.slane %v1556_v17, 5  ;;  %v2512_v42 = vld [vmem:[#allocation2 + $0x14] sm:$0x1] }
  0x6f   : > { %v10362_v30 = vcombine.low %v12409_v56, %v2128_v62  ;;  %v2583_v24 = vshrl.u32 %v2513_v0, 16  ;;  %v2586_v26 = vshll.u32 %v2513_v0, 16  ;;  %v2602_v29 = vshll.u32 %v2515_v5, 16  ;;  %v3557_v10 = vld [vmem:[#allocation2 + $0x24] sm:$0xf] }
  0x70   : > { %2270 = vrot.lane.b32.xlu1 %v10361_v49, %s12033_s19  ;;  %v1549_v34 = vsel %vm12235_vm1, %v1544_v32, %v12391_v43  ;;  %v1554_v37 = vrot.slane %v1553_v20, 4  ;;  %v2559_v22 = vshrl.u32 %v2510_v31, 16  ;;  %v2562_v40 = vshll.u32 %v2510_v31, 16  ;;  %v3558_v18 = vld [vmem:[#allocation2 + $0x28] sm:$0xf] }
  0x71   : > { %4355 = vrot.lane.b32.xlu0 %v10488_v6, %s12038_s26  ;;  %v2585_v44 = vrot.slane %v2583_v24, 4  ;;  %v2588_v38 = vrot.slane %v2586_v26, 5  ;;  %v2599_v45 = vor.u32 %v2598_v25, %v12358_v36  ;;  %v2604_v8 = vrot.slane %v2602_v29, 5  ;;  %v3556_v29 = vld [vmem:[#allocation2 + $0x20] sm:$0x1] }
  0x72   : > { %v1559_v28 = vsel %vm12235_vm1, %v1554_v37, %v1558_v21  ;;  %v2561_v47 = vrot.slane %v2559_v22, 4  ;;  %v2564_v48 = vrot.slane %v2562_v40, 5  ;;  %v2568_v49 = vshll.u32 %v2511_v27, 16  ;;  %v3555_v21 = vld [vmem:[#allocation2 + $0x1c] sm:$0xf] }
  0x73   : > { %v2132_v43 = vsel %vm12164_vm8, %v10347_v13, %v2131_v35  ;;  %v2589_v50 = vor.u32 %v2588_v38, %v2585_v44  ;;  %v2600_v51 = vrot.slane %v2599_v45, 4  ;;  %v2572_v52 = vshrl.u32 %v2511_v27, 16  ;;  %v1470_v44 = vld [vmem:[#allocation2 + $0x24] sm:$0xf] }
  0x74   : > { %3313 = vrot.lane.b32.xlu1 %v10425_v7, %s12037_s24  ;;  %v10329_v55 = vcombine.low %v1549_v34, %v1559_v28  ;;  %v2565_v57 = vor.u32 %v2564_v48, %v2561_v47  ;;  %v2570_v58 = vrot.slane %v2568_v49, 5  ;;  %v2578_v59 = vshll.u32 %v2512_v42, 16  ;;  %v1471_v28 = vld [vmem:[#allocation2 + $0x28] sm:$0xf] }
  0x75   : > { %v4104_v56 = vld [vmem:[#allocation2 + $0x2c] sm:$0x1]  ;;  %2272 = vrot.lane.b32.xlu0 %v10362_v30, %s12033_s19  ;;  %v2590_v19 = vrot.slane %v2589_v50, 4  ;;  %v2605_v35 = vsel %vm12235_vm1, %v2600_v51, %v2604_v8  ;;  %v2574_v17 = vrot.slane %v2572_v52, 4  ;;  %v3627_v62 = vshrl.u32 %v3557_v10, 16 }
  0x76   : > { %v2020_v54 = vld [vmem:[#allocation2 + $0x2c] sm:$0x1]  ;;  %v4207_v61 = vrot.slane %v4104_v56, 5  ;;  %v2566_v39 = vrot.slane %v2565_v57, 4  ;;  %v2580_v15 = vrot.slane %v2578_v59, 5  ;;  %v3630_v7 = vshll.u32 %v3557_v10, 16 }
  0x77   : > { %v2134_v12 = vrot.slane %v2020_v54, 5  ;;  %v2595_v5 = vsel %vm12235_vm1, %v2590_v19, %v12358_v36  ;;  %v3559_v6 = vld [vmem:[#allocation2 + $0x2c] sm:$0x1]  ;;  %v3554_v30 = vld [vmem:[#allocation2 + $0x18] sm:$0xf]  ;;  %v3629_v24 = vrot.slane %v3627_v62, 4 }
  0x78   : > { %v4208_v3 = vsel %vm12164_vm8, %v12398_v46, %v4207_v61  ;;  %v10393_v32 = vcombine.low %v2595_v5, %v2605_v35  ;;  %v2571_v20 = vsel %vm12235_vm1, %v2566_v39, %v2570_v58  ;;  %v2575_v46 = vor.u32 %v2574_v17, %v2570_v58  ;;  %v1467_v35 = vld [vmem:[#allocation2 + $0x18] sm:$0xf]  ;;  %v1468_v62 = vld [vmem:[#allocation2 + $0x1c] sm:$0xf] }
  0x79   : > { %v2135_v0 = vsel %vm12164_vm8, %v12413_v63, %v2134_v12  ;;  %v10489_v13 = vcombine.low %v12432_v14, %v4208_v3  ;;  %1946 = vrot.lane.b32.xlu0 %v10329_v55, %s12034_s20  ;;  %v3632_v63 = vrot.slane %v3630_v7, 5  ;;  %v3636_v26 = vshll.u32 %v3558_v18, 16  ;;  %v1472_v55 = vld [vmem:[#allocation2 + $0x2c] sm:$0x1] }
  0x7a   : > { %v10363_v31 = vcombine.low %v2132_v43, %v2135_v0  ;;  %v3640_v36 = vshrl.u32 %v3558_v18, 16  ;;  %v3646_v25 = vshll.u32 %v3559_v6, 16  ;;  %v3603_v27 = vshrl.u32 %v3554_v30, 16 }
  0x7b   : > { %4357 = vrot.lane.b32.xlu1 %v10489_v13, %s12038_s26  ;;  %v3606_v34 = vshll.u32 %v3554_v30, 16  ;;  %v2576_v14 = vrot.slane %v2575_v46, 4  ;;  %v3633_v37 = vor.u32 %v3632_v63, %v3629_v24  ;;  %v3638_v22 = vrot.slane %v3636_v26, 5 }
  0x7c   : > { %v3612_v40 = vshll.u32 %v3555_v21, 16  ;;  %v3642_v38 = vrot.slane %v3640_v36, 4  ;;  %v3648_v45 = vrot.slane %v3646_v25, 5  ;;  %v3605_v8 = vrot.slane %v3603_v27, 4  ;;  %v2517_v27 = vld [vmem:[#allocation2 + $0x28] sm:$0xf] }
  0x7d   : > { %v3608_v42 = vrot.slane %v3606_v34, 5  ;;  %v2581_v47 = vsel %vm12235_vm1, %v2576_v14, %v2580_v15  ;;  %v3634_v48 = vrot.slane %v3633_v37, 4  ;;  %v3616_v43 = vshrl.u32 %v3555_v21, 16  ;;  %v1469_v21 = vld [vmem:[#allocation2 + $0x20] sm:$0x1] }
  0x7e   : > { %v3614_v49 = vrot.slane %v3612_v40, 5  ;;  %v10392_v50 = vcombine.low %v2571_v20, %v2581_v47  ;;  %v3643_v51 = vor.u32 %v3642_v38, %v3638_v22  ;;  %v3622_v10 = vshll.u32 %v3556_v29, 16  ;;  %v2516_v29 = vld [vmem:[#allocation2 + $0x24] sm:$0xf]  ;;  %v2518_v40 = vld [vmem:[#allocation2 + $0x2c] sm:$0x1] }
  0x7f   : > { %2274 = vrot.lane.b32.xlu1 %v10363_v31, %s12033_s19  ;;  %v3609_v52 = vor.u32 %v3608_v42, %v3605_v8  ;;  %v3639_v56 = vsel %vm12235_vm1, %v3634_v48, %v3638_v22  ;;  %v3618_v54 = vrot.slane %v3616_v43, 4  ;;  %v1585_v57 = vshrl.u32 %v1470_v44, 16  ;;  %v457_v42 = vld [vmem:[#allocation2 + $0x38] sm:$0x1] }
  0x80   : > { %v1588_v58 = vshll.u32 %v1470_v44, 16  ;;  %2990 = vrot.lane.b32.xlu0 %v10392_v50, %s12039_s27  ;;  %v3644_v59 = vrot.slane %v3643_v51, 4  ;;  %v3624_v12 = vrot.slane %v3622_v10, 5  ;;  %v1594_v19 = vshll.u32 %v1471_v28, 16 }
  0x81   : > { %v3610_v61 = vrot.slane %v3609_v52, 4  ;;  %v3619_v39 = vor.u32 %v3618_v54, %v3614_v49  ;;  %v1587_v17 = vrot.slane %v1585_v57, 4  ;;  %v1598_v18 = vshrl.u32 %v1471_v28, 16  ;;  %v2519_v28 = vld [vmem:[#allocation2 + $0x30] sm:$0xf] }
  0x82   : > { %v1590_v15 = vrot.slane %v1588_v58, 5  ;;  %v3649_v3 = vsel %vm12235_vm1, %v3644_v59, %v3648_v45  ;;  %v1596_v5 = vrot.slane %v1594_v19, 5  ;;  %v1604_v6 = vshll.u32 %v1472_v55, 16  ;;  %v2520_v58 = vld [vmem:[#allocation2 + $0x34] sm:$0xf] }
  0x83   : > { %2992 = vrot.lane.b32.xlu1 %v10393_v32, %s12039_s27  ;;  %v3615_v0 = vsel %vm12235_vm1, %v3610_v61, %v3614_v49  ;;  %v10457_v7 = vcombine.low %v3639_v56, %v3649_v3  ;;  %v3620_v30 = vrot.slane %v3619_v39, 4  ;;  %v1600_v31 = vrot.slane %v1598_v18, 4  ;;  %v3061_v59 = vld [vmem:[#allocation2 + $0x24] sm:$0xe] }
  0x84   : > { %v1591_v13 = vor.u32 %v1590_v15, %v1587_v17  ;;  %v1606_v20 = vrot.slane %v1604_v6, 5  ;;  %v1561_v46 = vshrl.u32 %v1467_v35, 16  ;;  %v1564_v24 = vshll.u32 %v1467_v35, 16  ;;  %v625_v61 = vld [vmem:[%s12172_s28 + $0x40] sm:$0xff]  ;;  %v3062_v17 = vld [vmem:[#allocation2 + $0x28] sm:$0xf] }
  0x85   : > { %v1570_v63 = vshll.u32 %v1468_v62, 16  ;;  %v3625_v32 = vsel %vm12235_vm1, %v3620_v30, %v3624_v12  ;;  %v1601_v36 = vor.u32 %v1600_v31, %v1596_v5  ;;  %v1574_v25 = vshrl.u32 %v1468_v62, 16  ;;  %v3063_v15 = vld [vmem:[#allocation2 + $0x2c] sm:$0x1] }
  0x86   : > { %v1592_v26 = vrot.slane %v1591_v13, 4  ;;  %v10456_v34 = vcombine.low %v3615_v0, %v3625_v32  ;;  %v1563_v14 = vrot.slane %v1561_v46, 4  ;;  %v1566_v37 = vrot.slane %v1564_v24, 5 }
  0x87   : > { %4036 = vrot.lane.b32.xlu1 %v10457_v7, %s12040_s29  ;;  %v1572_v22 = vrot.slane %v1570_v63, 5  ;;  %v1602_v38 = vrot.slane %v1601_v36, 4  ;;  %v1576_v45 = vrot.slane %v1574_v25, 4  ;;  %v1580_v8 = vshll.u32 %v1469_v21, 16 }
  0x88   : > { %v1597_v44 = vsel %vm12235_vm1, %v1592_v26, %v1596_v5  ;;  %4034 = vrot.lane.b32.xlu0 %v10456_v34, %s12040_s29  ;;  %v1567_v47 = vor.u32 %v1566_v37, %v1563_v14  ;;  %v2607_v48 = vshrl.u32 %v2516_v29, 16  ;;  %v2610_v49 = vshll.u32 %v2516_v29, 16  ;;  %v626_v26 = vld [vmem:[%s12172_s28 + $0x48] sm:$0xff]  ;;  %v3064_v34 = vld [vmem:[#allocation2 + $0x30] sm:$0xe] }
  0x89   : > { %v2616_v43 = vshll.u32 %v2517_v27, 16  ;;  %v1607_v50 = vsel %vm12235_vm1, %v1602_v38, %v1606_v20  ;;  %v1577_v51 = vor.u32 %v1576_v45, %v1572_v22  ;;  %v1582_v52 = vrot.slane %v1580_v8, 5  ;;  %v404_v20 = vld [vmem:[#allocation2 + $0x3c] sm:$0x1]  ;;  %v627_v14 = vld [vmem:[%s12172_s28 + $0x50] sm:$0xff] }
  0x8a   : > { %v2620_v10 = vshrl.u32 %v2517_v27, 16  ;;  %v10331_v56 = vcombine.low %v1597_v44, %v1607_v50  ;;  %v1568_v54 = vrot.slane %v1567_v47, 4  ;;  %v2609_v55 = vrot.slane %v2607_v48, 4  ;;  %v3560_v44 = vld [vmem:[#allocation2 + $0x30] sm:$0xf] }
  0x8b   : > { %v2612_v57 = vrot.slane %v2610_v49, 5  ;;  %v1578_v12 = vrot.slane %v1577_v51, 4  ;;  %v2618_v19 = vrot.slane %v2616_v43, 5  ;;  %v2626_v39 = vshll.u32 %v2518_v40, 16  ;;  %v3561_v49 = vld [vmem:[#allocation2 + $0x34] sm:$0xf] }
  0x8c   : > { %v2622_v35 = vrot.slane %v2620_v10, 4  ;;  %1950 = vrot.lane.b32.xlu1 %v10331_v56, %s12034_s20  ;;  %v1573_v18 = vsel %vm12235_vm1, %v1568_v54, %v1572_v22  ;;  %v458_v3 = vsel %vm12150_vm6, 0, %v457_v42  ;;  %v2631_v0 = vshrl.u32 %v2519_v28, 16  ;;  %v3065_v10 = vld [vmem:[#allocation2 + $0x34] sm:$0xf]  ;;  %v628_v54 = vld [vmem:[%s12172_s28 + $0x58] sm:$0xff] }
  0x8d   : > { %v2613_v62 = vor.u32 %v2612_v57, %v2609_v55  ;;  %v1583_v5 = vsel %vm12235_vm1, %v1578_v12, %v1582_v52  ;;  %v2628_v7 = vrot.slane %v2626_v39, 5  ;;  %459 = vst [vmem:[#allocation2 + $0x38] sm:$0x1] %v458_v3  ;;  %v2634_v30 = vshll.u32 %v2519_v28, 16  ;;  %v460_v28 = vld [vmem:[#allocation2 + $0x44] sm:$0x1] }
  0x8e   : > { %v2623_v6 = vor.u32 %v2622_v35, %v2618_v19  ;;  %v10330_v13 = vcombine.low %v1573_v18, %v1583_v5  ;;  %v10962_v21 = vpack.c.bf16 %v625_v61, %v625_v61  ;;  %v2633_v24 = vrot.slane %v2631_v0, 4  ;;  %v1473_v39 = vld [vmem:[#allocation2 + $0x30] sm:$0xf] }
  0x8f   : > { %v2614_v31 = vrot.slane %v2613_v62, 4  ;;  %v2640_v63 = vshll.u32 %v2520_v58, 16  ;;  %v10410_v32 = vrot.slane %v3061_v59, 9  ;;  %v2636_v25 = vrot.slane %v2634_v30, 5  ;;  %v11656_v0 = vld [vmem:[#allocation2 + $0x30] sm:$0xff]  }
  0x90   : > { %v2624_v46 = vrot.slane %v2623_v6, 4  ;;  %1948 = vrot.lane.b32.xlu0 %v10330_v13, %s12034_s20  ;;  %v3167_v29 = vrot.slane %v3062_v17, 5  ;;  %v3170_v27 = vrot.slane %v3063_v15, 5  ;;  %v814_v37 = vrot.slane %v12296_v4, 4  ;;  %v629_v17 = vld [vmem:[%s12172_s28 + $0x60] sm:$0xff] }
  0x91   : > { %v2619_v36 = vsel %vm12235_vm1, %v2614_v31, %v2618_v19  ;;  %v2644_v40 = vshrl.u32 %v2520_v58, 16  ;;  %v10963_v42 = vpack.c.bf16 %v626_v26, %v626_v26  ;;  %v405_v47 = vsel %vm12140_vm4, 0, %v404_v20  ;;  %v12529_v26 = vld [vmem:[#allocation2 + $0x34] sm:$0xf] }
  0x92   : > { %v2629_v22 = vsel %vm12235_vm1, %v2624_v46, %v2628_v7  ;;  %v3168_v45 = vsel %vm12164_vm8, %v10410_v32, %v3167_v29  ;;  %v3169_v8 = vrot.slane %v3167_v29, 4  ;;  %v816_v48 = vshrl.u32 %v10962_v21, 16  ;;  %406 = vst [vmem:[#allocation2 + $0x3c] sm:$0x1] %v405_v47  ;;  %v407_v29 = vld [vmem:[#allocation2 + $0x48] sm:$0x1] }
  0x93   : > { %v10394_v38 = vcombine.low %v2619_v36, %v2629_v22  ;;  %v12506_v43 = vpack.c.bf16 %v627_v14, %v627_v14  ;;  %v2637_v50 = vor.u32 %v2636_v25, %v2633_v24  ;;  %v12509_v51 = vrot.slane %v2640_v63, 5  ;;  %v1474_v36 = vld [vmem:[#allocation2 + $0x34] sm:$0xf] }
  0x94   : > { %v1098_v4 = vld [vmem:[#allocation2 + $0x38] sm:$0x1]  ;;  %v3171_v52 = vsel %vm12164_vm8, %v3169_v8, %v3170_v27  ;;  %v819_v56 = vshll.u32 %v10962_v21, 16  ;;  %v2646_v57 = vrot.slane %v2644_v40, 4  ;;  %v10411_v59 = vrot.slane %v3064_v34, 9 }
  0x95   : > { %2994 = vrot.lane.b32.xlu0 %v10394_v38, %s12039_s27  ;;  %v1099_v55 = vsel %vm12263_vm7, %v814_v37, %v1098_v4  ;;  %v10426_v58 = vcombine.low %v3168_v45, %v3171_v52  ;;  %v818_v61 = vrot.slane %v816_v48, 7  ;;  %v824_v12 = vshrl.u32 %v10963_v42, 16  ;;  %v12522_v21 = vld [vmem:[#allocation2 + $0x30] sm:$0xe]  ;;  %v12535_v22 = vld [vmem:[#allocation2 + $0x34] sm:$0xf] }
  0x96   : > { %1100 = vst [vmem:[#allocation2 + $0x38] sm:$0x1] %v1099_v55  ;;  %v827_v19 = vshll.u32 %v10963_v42, 16  ;;  %v3651_v35 = vshrl.u32 %v3560_v44, 16  ;;  %v3654_v15 = vshll.u32 %v3560_v44, 16  ;;  %v3660_v18 = vshll.u32 %v3561_v49, 16 }
  0x97   : > { %v3664_v62 = vshrl.u32 %v3561_v49, 16  ;;  %v461_v3 = vsel %vm12150_vm6, 0, %v460_v28  ;;  %v821_v5 = vor.u32 %v819_v56, %v818_v61  ;;  %v822_v6 = vrot.slane %v818_v61, 4  ;;  %v463_v4 = vld [vmem:[#allocation2 + $0x50] sm:$0x1] }
  0x98   : > { %v826_v7 = vrot.slane %v824_v12, 7  ;;  %v3653_v30 = vrot.slane %v3651_v35, 4  ;;  %462 = vst [vmem:[#allocation2 + $0x44] sm:$0x1] %v461_v3  ;;  %v12520_v13 = vrot.slane %v2637_v50, 4  ;;  %v3174_v31 = vrot.slane %v3065_v10, 5 }
  0x99   : > { %3315 = vrot.lane.b32.xlu0 %v10426_v58, %s12037_s24  ;;  %v3656_v20 = vrot.slane %v3654_v15, 5  ;;  %v12524_v46 = vpack.c.bf16 %v628_v54, %v628_v54  ;;  %v2647_v24 = vor.u32 %v2646_v57, %v12509_v51  ;;  %v12527_v32 = vrot.slane %v3660_v18, 5  ;;  %v1101_v34 = vld [vmem:[#allocation2 + $0x3c] sm:$0xf]  ;;  %v410_v54 = vld [vmem:[#allocation2 + $0x54] sm:$0x1] }
  0x9a   : > { %v829_v63 = vor.u32 %v827_v19, %v826_v7  ;;  %v1609_v25 = vshrl.u32 %v1473_v39, 16  ;;  %v12533_v27 = vsel %vm12164_vm8, %v10411_v59, %v3174_v31  ;;  %v3666_v14 = vrot.slane %v3664_v62, 4  ;;  %v12557_v61 = vld [vmem:[#allocation2 + $0x30] sm:$0xe] }
  0x9b   : > { %v1612_v37 = vshll.u32 %v1473_v39, 16  ;;  %v12537_v40 = vpack.c.bf16 %v629_v17, %v629_v17  ;;  %v831_v38 = vrot.slane %v826_v7, 4  ;;  %v1102_v45 = vsel %vm12210_vm15, %v821_v5, %v1101_v34 }
  0x9c   : > { %v830_v44 = vsel %vm12221_vm0, %v822_v6, %v829_v63  ;;  %v3657_v8 = vor.u32 %v3656_v20, %v3653_v30  ;;  %v12544_v28 = vrot.slane %v3174_v31, 4  ;;  %1103 = vst [vmem:[#allocation2 + $0x3c] sm:$0xf] %v1102_v45  ;;  %v1611_v47 = vrot.slane %v1609_v25, 4 }
  0x9d   : > { %3493 = vrot.lane.b32.xlu0 %v11656_v0, %s12036_s22  ;;  %v1229_v42 = vld [vmem:[#allocation2 + $0x38] sm:$0x1]  ;;  %1104 = vst.msk [vmem:[#allocation2 + $0x40] sm:$0xf] %vm1068_vm12, %v830_v44  ;;  %v1614_v48 = vrot.slane %v1612_v37, 5  ;;  %v1618_v49 = vshll.u32 %v1474_v36, 16  ;;  %v3667_v55 = vor.u32 %v3666_v14, %v12527_v32 }
  0x9e   : > { %v1230_v50 = vsel %vm12323_vm10, %v12247_v23, %v1229_v42  ;;  %v12550_v52 = vrot.slane %v2647_v24, 4  ;;  %1235 = vst.msk [vmem:[#allocation2 + $0x40] sm:$0xf] %vm16617_vm14, %v12247_v23  ;;  %v10474_v10 = vrot.slane %v12522_v21, 9  ;;  %v1622_v56 = vshrl.u32 %v1474_v36, 16 }
  0x9f   : > { %1231 = vst [vmem:[#allocation2 + $0x38] sm:$0x1] %v1230_v50  ;;  %v1105_v57 = vld [vmem:[#allocation2 + $0x44] sm:$0x1]  ;;  %v4211_v58 = vrot.slane %v12529_v26, 5  ;;  %v1615_v59 = vor.u32 %v1614_v48, %v1611_v47  ;;  %v408_v12 = vsel %vm12140_vm4, 0, %v407_v29  ;;  %v2643_v36 = vsel %vm12235_vm1, %v12520_v13, %v12509_v51 }
  0xa0   : > { %v12561_v19 = vrot.slane %v3657_v8, 4  ;;  %v1106_v35 = vsel %vm12263_vm7, %v831_v38, %v1105_v57  ;;  %v2138_v39 = vrot.slane %v12535_v22, 5  ;;  %409 = vst [vmem:[#allocation2 + $0x48] sm:$0x1] %v408_v12  ;;  %v833_v17 = vshrl.u32 %v12506_v43, 16 }
  0xa1   : > { %1107 = vst [vmem:[#allocation2 + $0x44] sm:$0x1] %v1106_v35  ;;  %v12567_v15 = vrot.slane %v1618_v49, 5  ;;  %v1624_v18 = vrot.slane %v1622_v56, 4  ;;  %v836_v62 = vshll.u32 %v12506_v43, 16  ;;  %v841_v3 = vshrl.u32 %v12524_v46, 16 }
  0xa2   : > { %v12571_v0 = vrot.slane %v1615_v59, 4  ;;  %v835_v5 = vrot.slane %v833_v17, 7  ;;  %v844_v6 = vshll.u32 %v12524_v46, 16  ;;  %v464_v7 = vsel %vm12150_vm6, 0, %v463_v4 }
  0xa3   : > { %v3668_v30 = vrot.slane %v3667_v55, 4  ;;  %v4213_v31 = vrot.slane %v4211_v58, 4  ;;  %v12576_v20 = vrot.slane %v841_v3, 7  ;;  %465 = vst [vmem:[#allocation2 + $0x50] sm:$0x1] %v464_v7  ;;  %v411_v21 = vsel %vm12140_vm4, 0, %v410_v54 }
  0xa4   : > { %v1232_v24 = vld [vmem:[#allocation2 + $0x3c] sm:$0xf]  ;;  %v10348_v43 = vrot.slane %v12557_v61, 9  ;;  %v12583_v63 = vrot.slane %v2138_v39, 4  ;;  %v839_v26 = vrot.slane %v835_v5, 4  ;;  %v850_v46 = vshrl.u32 %v12537_v40, 16 }
  0xa5   : > { %412 = vst [vmem:[#allocation2 + $0x54] sm:$0x1] %v411_v21  ;;  %v1233_v25 = vsel %vm12273_vm9, %v12247_v23, %v1232_v24  ;;  %v3564_v29 = vld [vmem:[#allocation2 + $0x40] sm:$0xf]  ;;  %v12595_v34 = vsel %vm12164_vm8, %v10474_v10, %v4211_v58  ;;  %v846_v37 = vor.u32 %v844_v6, %v12576_v20  ;;  %v3663_v51 = vsel %vm12235_vm1, %v12561_v19, %v12527_v32 }
  0xa6   : > { %v12597_v14 = vld [vmem:[#allocation2 + $0x40] sm:$0xf]  ;;  %v2521_v44 = vld [vmem:[#allocation2 + $0x38] sm:$0x1]  ;;  %1234 = vst [vmem:[#allocation2 + $0x3c] sm:$0xf] %v1233_v25  ;;  %v1621_v13 = vsel %vm12235_vm1, %v12571_v0, %v12567_v15  ;;  %v1625_v8 = vor.u32 %v1624_v18, %v12567_v15  ;;  %v838_v42 = vor.u32 %v836_v62, %v835_v5 }
  0xa7   : > { %v3066_v38 = vld [vmem:[#allocation2 + $0x38] sm:$0x1]  ;;  %v2650_v47 = vshll.u32 %v2521_v44, 16  ;;  %v3684_v4 = vshll.u32 %v3564_v29, 16  ;;  %v3688_v56 = vshrl.u32 %v3564_v29, 16  ;;  %v4218_v55 = vrot.slane %v12597_v14, 5 }
  0xa8   : > { %v3562_v45 = vld [vmem:[#allocation2 + $0x38] sm:$0x1]  ;;  %v3177_v48 = vrot.slane %v3066_v38, 5  ;;  %v1236_v10 = vld [vmem:[#allocation2 + $0x44] sm:$0x1]  ;;  %v847_v32 = vsel %vm12221_vm0, %v839_v26, %v846_v37  ;;  %v1626_v62 = vrot.slane %v1625_v8, 4 }
  0xa9   : > { %v3670_v49 = vshll.u32 %v3562_v45, 16  ;;  %v4107_v50 = vld [vmem:[#allocation2 + $0x38] sm:$0x1]  ;;  %v2652_v57 = vrot.slane %v2650_v47, 5  ;;  %v1237_v12 = vsel %vm12323_vm10, %v12247_v23, %v1236_v10  ;;  %1111 = vst.msk [vmem:[#allocation2 + $0x4c] sm:$0xf] %vm1068_vm12, %v847_v32 }
  0xaa   : > { %v4214_v54 = vrot.slane %v4107_v50, 5  ;;  %v3178_v58 = vsel %vm12164_vm8, %v12544_v28, %v3177_v48  ;;  %v1475_v19 = vld [vmem:[#allocation2 + $0x38] sm:$0x1]  ;;  %1238 = vst [vmem:[#allocation2 + $0x44] sm:$0x1] %v1237_v12  ;;  %v12619_v35 = vrot.slane %v3684_v4, 5 }
  0xab   : > { %v3672_v59 = vrot.slane %v3670_v49, 5  ;;  %v3690_v17 = vrot.slane %v3688_v56, 4  ;;  %v1477_v3 = vld [vmem:[#allocation2 + $0x40] sm:$0xf]  ;;  %1242 = vst.msk [vmem:[#allocation2 + $0x4c] sm:$0xf] %vm16617_vm14, %v12247_v23  ;;  %v2653_v28 = vsel %vm12235_vm1, %v12550_v52, %v2652_v57  ;;  %v10427_v5 = vcombine.low %v12533_v27, %v3178_v58 }
  0xac   : > { %v4215_v18 = vsel %vm12164_vm8, %v4213_v31, %v4214_v54  ;;  %v1108_v7 = vld [vmem:[#allocation2 + $0x48] sm:$0xf]  ;;  %v853_v21 = vshll.u32 %v12537_v40, 16  ;;  %v10395_v24 = vcombine.low %v2643_v36, %v2653_v28  ;;  %v1628_v25 = vshll.u32 %v1475_v19, 16  ;;  %v2023_v29 = vld [vmem:[#allocation2 + $0x38] sm:$0x1] }
  0xad   : > { %v3673_v6 = vsel %vm12235_vm1, %v3668_v30, %v3672_v59  ;;  %v3691_v31 = vor.u32 %v3690_v17, %v12619_v35  ;;  %v3563_v37 = vld [vmem:[#allocation2 + $0x3c] sm:$0xf]  ;;  %v10490_v44 = vcombine.low %v12595_v34, %v4215_v18  ;;  %v4220_v52 = vrot.slane %v4218_v55, 4  ;;  %v2025_v12 = vld [vmem:[#allocation2 + $0x40] sm:$0xf] }
  0xae   : > { %v10458_v26 = vcombine.low %v3663_v51, %v3673_v6  ;;  %v1642_v38 = vshll.u32 %v1477_v3, 16  ;;  %v1109_v27 = vsel %vm12210_vm15, %v838_v42, %v1108_v7  ;;  %2996 = vrot.lane.b32.xlu1 %v10395_v24, %s12039_s27  ;;  %v3675_v30 = vshrl.u32 %v3563_v37, 16  ;;  %v4108_v51 = vld [vmem:[#allocation2 + $0x3c] sm:$0xe] }
  0xaf   : > { %v3678_v36 = vshll.u32 %v3563_v37, 16  ;;  %v3692_v45 = vrot.slane %v3691_v31, 4  ;;  %v1630_v8 = vrot.slane %v1628_v25, 5  ;;  %1110 = vst [vmem:[#allocation2 + $0x48] sm:$0xf] %v1109_v27  ;;  %v10475_v47 = vrot.slane %v4108_v51, 9 }
  0xb0   : > { %4038 = vrot.lane.b32.xlu0 %v10458_v26, %s12040_s29  ;;  %v1476_v48 = vld [vmem:[#allocation2 + $0x3c] sm:$0xf]  ;;  %v12640_v34 = vrot.slane %v1642_v38, 5  ;;  %v1646_v49 = vshrl.u32 %v1477_v3, 16  ;;  %v2141_v4 = vrot.slane %v2023_v29, 5  ;;  %v3677_v50 = vrot.slane %v3675_v30, 4 }
  0xb1   : > { %v3680_v10 = vrot.slane %v3678_v36, 5  ;;  %v1631_v42 = vsel %vm12235_vm1, %v1626_v62, %v1630_v8  ;;  %v1633_v56 = vshrl.u32 %v1476_v48, 16  ;;  %v3565_v54 = vld [vmem:[#allocation2 + $0x44] sm:$0x1]  ;;  %v2139_v58 = vsel %vm12164_vm8, %v10348_v43, %v2138_v39  ;;  %v11657_v19 = vld [vmem:[#allocation2 + $0x3c] sm:$0xff]  }
  0xb2   : > { %v4110_v32 = vld [vmem:[#allocation2 + $0x44] sm:$0x1]  ;;  %v2142_v59 = vsel %vm12164_vm8, %v12583_v63, %v2141_v4  ;;  %3317 = vrot.lane.b32.xlu1 %v10427_v5, %s12037_s24  ;;  %v3694_v18 = vshll.u32 %v3565_v54, 16  ;;  %v10332_v22 = vcombine.low %v1621_v13, %v1631_v42  ;;  %v2024_v61 = vld [vmem:[#allocation2 + $0x3c] sm:$0xe]  ;;  %v1636_v43 = vshll.u32 %v1476_v48, 16 }
  0xb3   : > { %v1478_v57 = vld [vmem:[#allocation2 + $0x44] sm:$0x1]  ;;  %v3681_v17 = vor.u32 %v3680_v10, %v3677_v50  ;;  %v4221_v62 = vrot.slane %v4110_v32, 5  ;;  %v1635_v39 = vrot.slane %v1633_v56, 4  ;;  %v1648_v3 = vrot.slane %v1646_v49, 4  ;;  %v11658_v56 = vld [vmem:[#allocation2 + $0x3c] sm:$0xff]  }
  0xb4   : > { %4359 = vrot.lane.b32.xlu0 %v10490_v44, %s12038_s26  ;;  %v1652_v63 = vshll.u32 %v1478_v57, 16  ;;  %v3696_v6 = vrot.slane %v3694_v18, 5  ;;  %v4219_v5 = vsel %vm12164_vm8, %v10475_v47, %v4218_v55  ;;  %v10364_v7 = vcombine.low %v2139_v58, %v2142_v59  ;;  %v2026_v24 = vld [vmem:[#allocation2 + $0x44] sm:$0x1]  ;;  %v2522_v25 = vld [vmem:[#allocation2 + $0x3c] sm:$0xf] }
  0xb5   : > { %v3682_v28 = vrot.slane %v3681_v17, 4  ;;  %v4222_v26 = vsel %vm12164_vm8, %v4220_v52, %v4221_v62  ;;  %v1638_v31 = vrot.slane %v1636_v43, 5  ;;  %v1649_v15 = vor.u32 %v1648_v3, %v12640_v34  ;;  %v2523_v44 = vld [vmem:[#allocation2 + $0x40] sm:$0xf]  ;;  %v2524_v36 = vld [vmem:[#allocation2 + $0x44] sm:$0x1] }
  0xb6   : > { %v1654_v0 = vrot.slane %v1652_v63, 5  ;;  %v1239_v13 = vld [vmem:[#allocation2 + $0x48] sm:$0xf]  ;;  %3495 = vrot.lane.b32.xlu1 %v11657_v19, %s12036_s22  ;;  %v3697_v55 = vsel %vm12235_vm1, %v3692_v45, %v3696_v6  ;;  %v10349_v29 = vrot.slane %v2024_v61, 9  ;;  %v2145_v37 = vrot.slane %v2025_v12, 5 }
  0xb7   : > { %v3687_v14 = vsel %vm12235_vm1, %v3682_v28, %v12619_v35  ;;  %v1639_v38 = vor.u32 %v1638_v31, %v1635_v39  ;;  %v1650_v27 = vrot.slane %v1649_v15, 4  ;;  %v2148_v30 = vrot.slane %v2026_v24, 5  ;;  %v1112_v51 = vld [vmem:[#allocation2 + $0x50] sm:$0x1]  ;;  %v2526_v45 = vld [vmem:[#allocation2 + $0x4c] sm:$0xf] }
  0xb8   : > { %1952 = vrot.lane.b32.xlu0 %v10332_v22, %s12034_s20  ;;  %v10459_v52 = vcombine.low %v3687_v14, %v3697_v55  ;;  %v2147_v8 = vrot.slane %v2145_v37, 4  ;;  %v848_v47 = vrot.slane %v12576_v20, 4  ;;  %v1240_v35 = vsel %vm12273_vm9, %v12247_v23, %v1239_v13  ;;  %v3067_v57 = vld [vmem:[#allocation2 + $0x3c] sm:$0xe]  ;;  %v3068_v17 = vld [vmem:[#allocation2 + $0x40] sm:$0xf] }
  0xb9   : > { %v2655_v48 = vshrl.u32 %v2522_v25, 16  ;;  %v1640_v49 = vrot.slane %v1639_v38, 4  ;;  %v1655_v4 = vsel %vm12235_vm1, %v1650_v27, %v1654_v0  ;;  %1241 = vst [vmem:[#allocation2 + $0x48] sm:$0xf] %v1240_v35  ;;  %v2658_v50 = vshll.u32 %v2522_v25, 16 }
  0xba   : > { %v2664_v10 = vshll.u32 %v2523_v44, 16  ;;  %4040 = vrot.lane.b32.xlu1 %v10459_v52, %s12040_s29  ;;  %v10491_v42 = vcombine.low %v4219_v5, %v4222_v26  ;;  %v2668_v54 = vshrl.u32 %v2523_v44, 16  ;;  %v2674_v32 = vshll.u32 %v2524_v36, 16  ;;  %v3069_v18 = vld [vmem:[#allocation2 + $0x44] sm:$0x1]  ;;  %v630_v26 = vld [vmem:[%s12172_s28 + $0x68] sm:$0xff] }
  0xbb   : > { %v2657_v20 = vrot.slane %v2655_v48, 4  ;;  %v1645_v58 = vsel %vm12235_vm1, %v1640_v49, %v12640_v34  ;;  %v2146_v59 = vsel %vm12164_vm8, %v10349_v29, %v2145_v37  ;;  %v2660_v12 = vrot.slane %v2658_v50, 5  ;;  %v12691_v43 = vld [vmem:[#allocation2 + $0x4c] sm:$0xf]  ;;  %v466_v49 = vld [vmem:[#allocation2 + $0x5c] sm:$0x1] }
  0xbc   : > { %2276 = vrot.lane.b32.xlu0 %v10364_v7, %s12033_s19  ;;  %v2666_v19 = vrot.slane %v2664_v10, 5  ;;  %v10333_v62 = vcombine.low %v1645_v58, %v1655_v4  ;;  %v2149_v22 = vsel %vm12164_vm8, %v2147_v8, %v2148_v30  ;;  %v2670_v61 = vrot.slane %v2668_v54, 4  ;;  %v11671_v4 = vld [vmem:[%s16601_s1] sm:$0xff]   ;;  %v3567_v54 = vld [vmem:[#allocation2 + $0x4c] sm:$0xf] }
  0xbd   : > { %v1113_v39 = vsel %vm12263_vm7, %v848_v47, %v1112_v51  ;;  %v2661_v3 = vor.u32 %v2660_v12, %v2657_v20  ;;  %v2676_v34 = vrot.slane %v2674_v32, 5  ;;  %v2688_v63 = vshll.u32 %v2526_v45, 16  ;;  %11509 = vmatprep.subr.bf16.mxu0 %v11671_v4 }
  0xbe   : > { %1114 = vst [vmem:[#allocation2 + $0x50] sm:$0x1] %v1113_v39  ;;  %v2692_v28 = vshrl.u32 %v2526_v45, 16  ;;  %4361 = vrot.lane.b32.xlu1 %v10491_v42, %s12038_s26  ;;  %v2671_v6 = vor.u32 %v2670_v61, %v2666_v19  ;;  %v10412_v5 = vrot.slane %v3067_v57, 9  ;;  %v3181_v7 = vrot.slane %v3068_v17, 5  ;;  %11510 = vmatpush3.bf16.msra.mxu0 %v11671_v4  ;;  %v11673_v39 = vld [vmem:[%s16601_s1 + $0x8] sm:$0xff]  }
  0xbf   : > { %v3184_v24 = vrot.slane %v3069_v18, 5  ;;  %v2662_v31 = vrot.slane %v2661_v3, 4  ;;  %v12696_v15 = vrot.slane %v2688_v63, 5  ;;  %v3188_v13 = vrot.slane %v12691_v43, 5  ;;  %v4112_v17 = vld [vmem:[#allocation2 + $0x4c] sm:$0xf]  ;;  %11511 = vmatprep.subr.bf16.mxu0 %v11673_v39 }
  0xc0   : > { %2453 = vrot.lane.b32.xlu0 %v11658_v56, %s12035_s21  ;;  %v2694_v0 = vrot.slane %v2692_v28, 4  ;;  %v2672_v25 = vrot.slane %v2671_v6, 4  ;;  %v2525_v14 = vld [vmem:[#allocation2 + $0x48] sm:$0xf]  ;;  %v12701_v55 = vrot.slane %v850_v46, 7  ;;  %v10967_v38 = vpack.c.bf16 %v630_v26, %v630_v26 }
  0xc1   : > { %v2667_v29 = vsel %vm12235_vm1, %v2662_v31, %v2666_v19  ;;  %v2679_v37 = vshrl.u32 %v2525_v14, 16  ;;  %v2682_v44 = vshll.u32 %v2525_v14, 16  ;;  %v12705_v52 = vld [vmem:[#allocation2 + $0x48] sm:$0xe]  ;;  %v10365_v27 = vcombine.low %v2146_v59, %v2149_v22  ;;  %v1115_v46 = vld [vmem:[#allocation2 + $0x54] sm:$0xf] }
  0xc2   : > { %1954 = vrot.lane.b32.xlu1 %v10333_v62, %s12034_s20  ;;  %v2677_v30 = vsel %vm12235_vm1, %v2672_v25, %v2676_v34  ;;  %v3182_v36 = vsel %vm12164_vm8, %v10412_v5, %v3181_v7  ;;  %v3183_v51 = vrot.slane %v3181_v7, 4  ;;  %v2695_v48 = vor.u32 %v2694_v0, %v12696_v15  ;;  %v3566_v45 = vld [vmem:[#allocation2 + $0x48] sm:$0xf]  ;;  %v12735_v61 = vld [vmem:[#allocation2 + $0x4c] sm:$0xf]  ;;  %11512 = vmatpush3.bf16.msra.mxu0 %v11673_v39 }
  0xc3   : > { %v10396_v8 = vcombine.low %v2667_v29, %v2677_v30  ;;  %v2681_v47 = vrot.slane %v2679_v37, 4  ;;  %v2684_v35 = vrot.slane %v2682_v44, 5  ;;  %v10413_v42 = vrot.slane %v12705_v52, 9  ;;  %v11659_v32 = vld [vmem:[#allocation2 + $0x48] sm:$0xff]  }
  0xc4   : > { %v3185_v10 = vsel %vm12164_vm8, %v3183_v51, %v3184_v24  ;;  %v12721_v56 = vrot.slane %v3188_v13, 4  ;;  %v855_v20 = vor.u32 %v853_v21, %v12701_v55  ;;  %v858_v12 = vshrl.u32 %v10967_v38, 16  ;;  %v12730_v19 = vld [vmem:[#allocation2 + $0x48] sm:$0xe] }
  0xc5   : > { %v1243_v50 = vld [vmem:[#allocation2 + $0x50] sm:$0x1]  ;;  %2998 = vrot.lane.b32.xlu0 %v10396_v8, %s12039_s27  ;;  %v2685_v58 = vor.u32 %v2684_v35, %v2681_v47  ;;  %v10428_v59 = vcombine.low %v3182_v36, %v3185_v10  ;;  %v861_v40 = vshll.u32 %v10967_v38, 16  ;;  %v3699_v18 = vshrl.u32 %v3566_v45, 16  ;;  %v1479_v22 = vld [vmem:[#allocation2 + $0x48] sm:$0xf] }
  0xc6   : > { %v1244_v57 = vsel %vm12323_vm10, %v12247_v23, %v1243_v50  ;;  %2278 = vrot.lane.b32.xlu1 %v10365_v27, %s12033_s19  ;;  %v1116_v21 = vsel %vm12210_vm15, %v855_v20, %v1115_v46  ;;  %v3702_v62 = vshll.u32 %v3566_v45, 16  ;;  %v856_v3 = vrot.slane %v12701_v55, 4  ;;  %v11660_v31 = vld [vmem:[#allocation2 + $0x48] sm:$0xff]  }
  0xc7   : > { %1245 = vst [vmem:[#allocation2 + $0x50] sm:$0x1] %v1244_v57  ;;  %v860_v34 = vrot.slane %v858_v12, 7  ;;  %1117 = vst [vmem:[#allocation2 + $0x54] sm:$0xf] %v1116_v21  ;;  %v3708_v63 = vshll.u32 %v3567_v54, 16 }
  0xc8   : > { %v3712_v28 = vshrl.u32 %v3567_v54, 16  ;;  %v2696_v6 = vrot.slane %v2695_v48, 4  ;;  %v3701_v5 = vrot.slane %v3699_v18, 4  ;;  %v3704_v7 = vrot.slane %v3702_v62, 5  ;;  %v12765_v54 = vpop.permute.xlu1 %2268 }
  0xc9   : > { %v467_v24 = vsel %vm12150_vm6, 0, %v466_v49  ;;  %v2686_v26 = vrot.slane %v2685_v58, 4  ;;  %3319 = vrot.lane.b32.xlu0 %v10428_v59, %s12037_s24  ;;  %v863_v0 = vor.u32 %v861_v40, %v860_v34  ;;  %v3710_v25 = vrot.slane %v3708_v63, 5  ;;  %v12763_v49 = vpop.permute.xlu0 %1944 }
  0xca   : > { %468 = vst [vmem:[#allocation2 + $0x5c] sm:$0x1] %v467_v24  ;;  %v10476_v14 = vrot.slane %v12730_v19, 9  ;;  %2455 = vrot.lane.b32.xlu1 %v11659_v32, %s12035_s21  ;;  %v865_v55 = vrot.slane %v860_v34, 4  ;;  %v3705_v29 = vor.u32 %v3704_v7, %v3701_v5  ;;  %v3714_v37 = vrot.slane %v3712_v28, 4 }
  0xcb   : > { %v4225_v44 = vrot.slane %v4112_v17, 5  ;;  %v864_v52 = vsel %vm12221_vm0, %v856_v3, %v863_v0  ;;  %v1657_v38 = vshrl.u32 %v1479_v22, 16  ;;  %v1660_v27 = vshll.u32 %v1479_v22, 16 }
  0xcc   : > { %v1666_v30 = vshll.u32 %v12735_v61, 16  ;;  %1118 = vst.msk [vmem:[#allocation2 + $0x58] sm:$0xf] %vm1068_vm12, %v864_v52  ;;  %v3706_v36 = vrot.slane %v3705_v29, 4  ;;  %v3715_v51 = vor.u32 %v3714_v37, %v3710_v25  ;;  %v1670_v46 = vshrl.u32 %v12735_v61, 16 }
  0xcd   : > { %v2691_v47 = vsel %vm12235_vm1, %v2686_v26, %v12696_v15  ;;  %v12758_v48 = vsel %vm12164_vm8, %v10413_v42, %v3188_v13  ;;  %3497 = vrot.lane.b32.xlu0 %v11660_v31, %s12036_s22  ;;  %1249 = vst.msk [vmem:[#allocation2 + $0x58] sm:$0xf] %vm16617_vm14, %v12247_v23  ;;  %v4227_v15 = vrot.slane %v4225_v44, 4  ;;  %v12772_v32 = vsel %vm12164_vm8, %v10476_v14, %v4225_v44 }
  0xce   : > { %v2527_v8 = vld [vmem:[#allocation2 + $0x50] sm:$0x1]  ;;  %v1246_v10 = vld [vmem:[#allocation2 + $0x54] sm:$0xf]  ;;  %v3716_v20 = vrot.slane %v3715_v51, 4  ;;  %v1659_v58 = vrot.slane %v1657_v38, 4  ;;  %v3711_v12 = vsel %vm12235_vm1, %v3706_v36, %v3710_v25 }
  0xcf   : > { %v3072_v35 = vld [vmem:[#allocation2 + $0x50] sm:$0x1]  ;;  %v2698_v4 = vshll.u32 %v2527_v8, 16  ;;  %v1247_v43 = vsel %vm12273_vm9, %v12247_v23, %v1246_v10  ;;  %v1662_v40 = vrot.slane %v1660_v27, 5  ;;  %v1668_v22 = vrot.slane %v1666_v30, 5  ;;  %v12792_v0 = vpop.permute.xlu1 %2447 }
  0xd0   : > { %v3568_v45 = vld [vmem:[#allocation2 + $0x50] sm:$0x1]  ;;  %v3191_v50 = vrot.slane %v3072_v35, 5  ;;  %1248 = vst [vmem:[#allocation2 + $0x54] sm:$0xf] %v1247_v43  ;;  %v1672_v34 = vrot.slane %v1670_v46, 4 }
  0xd1   : > { %v3718_v13 = vshll.u32 %v3568_v45, 16  ;;  %v4113_v42 = vld [vmem:[#allocation2 + $0x50] sm:$0x1]  ;;  %v2700_v59 = vrot.slane %v2698_v4, 5  ;;  %v1119_v19 = vld [vmem:[#allocation2 + $0x5c] sm:$0x1]  ;;  %v1663_v3 = vor.u32 %v1662_v40, %v1659_v58 }
  0xd2   : > { %v1481_v57 = vld [vmem:[#allocation2 + $0x50] sm:$0x1]  ;;  %v4228_v17 = vrot.slane %v4113_v42, 5  ;;  %v3192_v21 = vsel %vm12164_vm8, %v12721_v56, %v3191_v50  ;;  %v1120_v62 = vsel %vm12263_vm7, %v865_v55, %v1119_v19  ;;  %v2027_v8 = vld [vmem:[#allocation2 + $0x48] sm:$0xe]  ;;  %vm16620_vm11 = vcmask 31744  }
  0xd3   : > { %v3720_v18 = vrot.slane %v3718_v13, 5  ;;  %v2701_v61 = vsel %vm12235_vm1, %v2696_v6, %v2700_v59  ;;  %1121 = vst [vmem:[#allocation2 + $0x5c] sm:$0x1] %v1120_v62  ;;  %v1676_v5 = vshll.u32 %v1481_v57, 16  ;;  %v12787_v56 = vpop.permute.xlu0 %2445  ;;  %v10429_v7 = vcombine.low %v12758_v48, %v3192_v21  ;;  %v631_v30 = vld [vmem:[%s12172_s28 + $0x70] sm:$0xff] }
  0xd4   : > { %v4229_v39 = vsel %vm12164_vm8, %v4227_v15, %v4228_v17  ;;  %v10397_v63 = vcombine.low %v2691_v47, %v2701_v61  ;;  %v3570_v26 = vld [vmem:[#allocation2 + $0x58] sm:$0xf]  ;;  %v1673_v6 = vor.u32 %v1672_v34, %v1668_v22  ;;  %v1664_v29 = vrot.slane %v1663_v3, 4  ;;  %v2028_v10 = vld [vmem:[#allocation2 + $0x4c] sm:$0xf] }
  0xd5   : > { %v3721_v28 = vsel %vm12235_vm1, %v3716_v20, %v3720_v18  ;;  %v12790_v31 = vld [vmem:[#allocation2 + $0x58] sm:$0xf]  ;;  %v3732_v25 = vshll.u32 %v3570_v26, 16  ;;  %v3736_v14 = vshrl.u32 %v3570_v26, 16  ;;  %v10492_v55 = vcombine.low %v12772_v32, %v4229_v39  ;;  %v2029_v20 = vld [vmem:[#allocation2 + $0x50] sm:$0x1] }
  0xd6   : > { %v10460_v24 = vcombine.low %v3711_v12, %v3721_v28  ;;  %3000 = vrot.lane.b32.xlu1 %v10397_v63, %s12039_s27  ;;  %v1483_v37 = vld [vmem:[#allocation2 + $0x58] sm:$0xf]  ;;  %v4232_v44 = vrot.slane %v12790_v31, 5  ;;  %v1674_v52 = vrot.slane %v1673_v6, 4  ;;  %v1678_v38 = vrot.slane %v1676_v5, 5 }
  0xd7   : > { %v1690_v27 = vshll.u32 %v1483_v37, 16  ;;  %v3569_v36 = vld [vmem:[#allocation2 + $0x54] sm:$0xf]  ;;  %v12799_v51 = vrot.slane %v3732_v25, 5  ;;  %v1694_v46 = vshrl.u32 %v1483_v37, 16  ;;  %v12801_v47 = vpop.permute.xlu0 %3489  ;;  %v3738_v45 = vrot.slane %v3736_v14, 4 }
  0xd8   : > { %4042 = vrot.lane.b32.xlu0 %v10460_v24, %s12040_s29  ;;  %v3723_v35 = vshrl.u32 %v3569_v36, 16  ;;  %v3726_v48 = vshll.u32 %v3569_v36, 16  ;;  %v12803_v4 = vld [vmem:[#allocation2 + $0x54] sm:$0xe]  ;;  %v1669_v50 = vsel %vm12235_vm1, %v1664_v29, %v1668_v22  ;;  %v1679_v13 = vsel %vm12235_vm1, %v1674_v52, %v1678_v38  ;;  %v12819_v17 = vld [vmem:[#allocation2 + $0x58] sm:$0xf] }
  0xd9   : > { %v11661_v15 = vld [vmem:[#allocation2 + $0x54] sm:$0xff]   ;;  %v12810_v32 = vrot.slane %v1690_v27, 5  ;;  %v12812_v57 = vpack.c.bf16 %v631_v30, %v631_v30  ;;  %v3739_v19 = vor.u32 %v3738_v45, %v12799_v51  ;;  %v12825_v21 = vrot.slane %v4232_v44, 4  ;;  %v413_v5 = vld [vmem:[#allocation2 + $0x60] sm:$0x1] }
  0xda   : > { %3321 = vrot.lane.b32.xlu1 %v10429_v7, %s12037_s24  ;;  %v1250_v43 = vld [vmem:[#allocation2 + $0x5c] sm:$0x1]  ;;  %v1482_v42 = vld [vmem:[#allocation2 + $0x54] sm:$0xf]  ;;  %v3725_v59 = vrot.slane %v3723_v35, 4  ;;  %v3728_v12 = vrot.slane %v3726_v48, 5  ;;  %v12821_v40 = vpop.permute.xlu1 %3491  ;;  %v10334_v18 = vcombine.low %v1669_v50, %v1679_v13 }
  0xdb   : > { %v1251_v58 = vsel %vm12323_vm10, %v12247_v23, %v1250_v43  ;;  %v1681_v62 = vshrl.u32 %v1482_v42, 16  ;;  %v1684_v22 = vshll.u32 %v1482_v42, 16  ;;  %v632_v61 = vld [vmem:[%s12172_s28 + $0x78] sm:$0xff]  ;;  %v12828_v39 = vpop.permute.xlu0 %2449  ;;  %v10477_v34 = vrot.slane %v12803_v4, 9  ;;  %v633_v7 = vld [vmem:[%s12172_s28 + $0x80] sm:$0xff] }
  0xdc   : > { %4363 = vrot.lane.b32.xlu0 %v10492_v55, %s12038_s26  ;;  %1252 = vst [vmem:[#allocation2 + $0x5c] sm:$0x1] %v1251_v58  ;;  %v3729_v3 = vor.u32 %v3728_v12, %v3725_v59  ;;  %v1696_v63 = vrot.slane %v1694_v46, 4  ;;  %v10350_v28 = vrot.slane %v2027_v8, 9  ;;  %v2152_v6 = vrot.slane %v2028_v10, 5  ;;  %v634_v8 = vld [vmem:[%s12172_s28 + $0x88] sm:$0xff] }
  0xdd   : > { %v1683_v24 = vrot.slane %v1681_v62, 4  ;;  %v1686_v26 = vrot.slane %v1684_v22, 5  ;;  %v2155_v25 = vrot.slane %v2029_v20, 5  ;;  %v2030_v14 = vld [vmem:[#allocation2 + $0x54] sm:$0xe]  ;;  %v12835_v29 = vrot.slane %v3739_v19, 4 }
  0xde   : > { %3499 = vrot.lane.b32.xlu1 %v11661_v15, %s12036_s22  ;;  %v12833_v55 = vrot.slane %v3729_v3, 4  ;;  %v1697_v37 = vor.u32 %v1696_v63, %v12810_v32  ;;  %v2159_v52 = vrot.slane %v12819_v17, 5  ;;  %v12840_v38 = vpop.permute.xlu1 %2451  ;;  %v2153_v30 = vsel %vm12164_vm8, %v10350_v28, %v2152_v6  ;;  %v12851_v50 = vld [vmem:[#allocation2 + $0x54] sm:$0xf] }
  0xdf   : > { %v1687_v27 = vor.u32 %v1686_v26, %v1683_v24  ;;  %v2154_v36 = vrot.slane %v2152_v6, 4  ;;  %v414_v46 = vsel %vm12140_vm4, 0, %v413_v5  ;;  %v12847_v35 = vpop.permute.xlu0 %3311  ;;  %v10351_v45 = vrot.slane %v2030_v14, 9  ;;  %v469_v14 = vld [vmem:[#allocation2 + $0x68] sm:$0x1] }
  0xe0   : > { %1956 = vrot.lane.b32.xlu0 %v10334_v18, %s12034_s20  ;;  %v12849_v48 = vrot.slane %v1697_v37, 4  ;;  %415 = vst [vmem:[#allocation2 + $0x60] sm:$0x1] %v414_v46  ;;  %v10969_v4 = vpack.c.bf16 %v632_v61, %v632_v61  ;;  %v12853_v10 = vpack.c.bf16 %v633_v7, %v633_v7  ;;  %v867_v43 = vshrl.u32 %v12812_v57, 16  ;;  %v11662_v18 = vld [vmem:[#allocation2 + $0x54] sm:$0xff]  }
  0xe1   : > { %v12855_v20 = vrot.slane %v1687_v27, 4  ;;  %v2156_v15 = vsel %vm12164_vm8, %v2154_v36, %v2155_v25  ;;  %v870_v13 = vshll.u32 %v12812_v57, 16  ;;  %v3735_v58 = vsel %vm12235_vm1, %v12833_v55, %v12799_v51  ;;  %v2529_v7 = vld [vmem:[#allocation2 + $0x58] sm:$0xf]  ;;  %v3073_v55 = vld [vmem:[#allocation2 + $0x54] sm:$0xe] }
  0xe2   : > { %v12869_v12 = vsel %vm12164_vm8, %v10477_v34, %v4232_v44  ;;  %v10366_v17 = vcombine.low %v2153_v30, %v2156_v15  ;;  %v12871_v62 = vpack.c.bf16 %v634_v8, %v634_v8  ;;  %v12873_v22 = vpop.permute.xlu1 %2270  ;;  %v2161_v28 = vrot.slane %v2159_v52, 4  ;;  %v3074_v8 = vld [vmem:[#allocation2 + $0x58] sm:$0xf] }
  0xe3   : > { %v3571_v42 = vld [vmem:[#allocation2 + $0x5c] sm:$0x1]  ;;  %v12875_v51 = vpop.permute.xlu0 %4355  ;;  %v869_v5 = vrot.slane %v867_v43, 7  ;;  %v875_v44 = vshrl.u32 %v10969_v4, 16  ;;  %v878_v34 = vshll.u32 %v10969_v4, 16  ;;  %v2703_v25 = vshrl.u32 %v12851_v50, 16 }
  0xe4   : > { %v4116_v59 = vld [vmem:[#allocation2 + $0x5c] sm:$0x1]  ;;  %v3742_v57 = vshll.u32 %v3571_v42, 16  ;;  %2280 = vrot.lane.b32.xlu0 %v10366_v17, %s12033_s19  ;;  %v1693_v27 = vsel %vm12235_vm1, %v12855_v20, %v12810_v32  ;;  %v12889_v30 = vsel %vm12164_vm8, %v10351_v45, %v2159_v52  ;;  %v11664_v52 = vld [vmem:[#allocation2] sm:$0xff]   ;;  %vm16618_vm13 = vcmask 64544  }
  0xe5   : > { %v1484_v19 = vld [vmem:[#allocation2 + $0x5c] sm:$0x1]  ;;  %v4235_v61 = vrot.slane %v4116_v59, 5  ;;  %v872_v36 = vor.u32 %v870_v13, %v869_v5  ;;  %v873_v43 = vrot.slane %v869_v5, 4  ;;  %v12900_v42 = vrot.slane %v875_v44, 7  ;;  %v11669_v13 = vld [vmem:[#allocation2 + $0xc] sm:$0xff]  }
  0xe6   : > { %v1700_v3 = vshll.u32 %v1484_v19, 16  ;;  %v2032_v63 = vld [vmem:[#allocation2 + $0x5c] sm:$0x1]  ;;  %v3744_v24 = vrot.slane %v3742_v57, 5  ;;  %v2705_v19 = vrot.slane %v2703_v25, 4  ;;  %v11674_v17 = vld [vmem:[#allocation2 + $0x24] sm:$0xff]  }
  0xe7   : > { %v2162_v31 = vrot.slane %v2032_v63, 5  ;;  %v4236_v26 = vsel %vm12164_vm8, %v12825_v21, %v4235_v61  ;;  %v2530_v46 = vld [vmem:[#allocation2 + $0x5c] sm:$0x1]  ;;  %v12891_v21 = vpop.permute.xlu1 %3313  ;;  %v1122_v32 = vld [vmem:[#allocation2 + $0x60] sm:$0xf]  ;;  %v12902_v45 = vpop.permute.xlu0 %2272  ;;  %v880_v57 = vor.u32 %v878_v34, %v12900_v42  ;;  %v882_v61 = vrot.slane %v12900_v42, 4 }
  0xe8   : > { %v1702_v6 = vrot.slane %v1700_v3, 5  ;;  %v10493_v37 = vcombine.low %v12869_v12, %v4236_v26  ;;  %v3745_v4 = vsel %vm12235_vm1, %v12835_v29, %v3744_v24  ;;  %v3075_v20 = vld [vmem:[#allocation2 + $0x5c] sm:$0x1]  ;;  %2457 = vrot.lane.b32.xlu0 %v11662_v18, %s12035_s21  ;;  %v1123_v29 = vsel %vm12210_vm15, %v872_v36, %v1122_v32  ;;  %v416_v26 = vld [vmem:[#allocation2 + $0x6c] sm:$0x1]  ;;  %1445 = vst.msk [vmem:[#allocation3] sm:$0xff] %vm16620_vm11, %v11664_v52 }
  0xe9   : > { %v12898_v15 = vsel %vm12164_vm8, %v2161_v28, %v2162_v31  ;;  %v10461_v59 = vcombine.low %v3735_v58, %v3745_v4  ;;  %1124 = vst [vmem:[#allocation2 + $0x60] sm:$0xf] %v1123_v29  ;;  %v2706_v3 = vshll.u32 %v12851_v50, 16  ;;  %v2712_v63 = vshll.u32 %v2529_v7, 16  ;;  %v11675_v58 = vld [vmem:[#allocation2 + $0x18] sm:$0xff]   ;;  %1446 = vst.msk [vmem:[#allocation3 + $0x8] sm:$0xff] %vm16620_vm11, %v11669_v13 }
  0xea   : > { %v1703_v12 = vsel %vm12235_vm1, %v12849_v48, %v1702_v6  ;;  %v2716_v28 = vshrl.u32 %v2529_v7, 16  ;;  %v2722_v48 = vshll.u32 %v2530_v46, 16  ;;  %v470_v18 = vsel %vm12150_vm6, 0, %v469_v14  ;;  %1448 = vst.msk [vmem:[#allocation3 + $0x18] sm:$0xff] %vm16620_vm11, %v11674_v17  ;;  %1447 = vst.msk [vmem:[#allocation3 + $0x10] sm:$0xff] %vm16620_vm11, %v11675_v58 }
  0xeb   : > { %4044 = vrot.lane.b32.xlu1 %v10461_v59, %s12040_s29  ;;  %v10414_v31 = vrot.slane %v3073_v55, 9  ;;  %v881_v5 = vsel %vm12221_vm0, %v873_v43, %v880_v57  ;;  %v2708_v44 = vrot.slane %v2706_v3, 5  ;;  %v2714_v34 = vrot.slane %v2712_v63, 5  ;;  %471 = vst [vmem:[#allocation2 + $0x68] sm:$0x1] %v470_v18  ;;  %v1947_v6 = vpop.permute.xlu0 %1946  ;;  %1993 = vst.msk [vmem:[#allocation3] sm:$0xff] %vm16618_vm13, %v12763_v49 }
  0xec   : > { %v3195_v24 = vrot.slane %v3074_v8, 5  ;;  %1125 = vst.msk [vmem:[#allocation2 + $0x64] sm:$0xf] %vm1068_vm12, %v881_v5  ;;  %v2718_v50 = vrot.slane %v2716_v28, 4  ;;  %v2724_v25 = vrot.slane %v2722_v48, 5  ;;  %v3198_v36 = vrot.slane %v3075_v20, 5 }
  0xed   : > { %v12919_v7 = vpop.permute.xlu1 %4357  ;;  %v10335_v46 = vcombine.low %v1693_v27, %v1703_v12  ;;  %1256 = vst.msk [vmem:[#allocation2 + $0x64] sm:$0xf] %vm16617_vm14, %v12247_v23  ;;  %v2709_v14 = vor.u32 %v2708_v44, %v2705_v19  ;;  %v417_v4 = vsel %vm12140_vm4, 0, %v416_v26  ;;  %v884_v43 = vshrl.u32 %v12853_v10, 16  ;;  %v472_v32 = vld [vmem:[#allocation2 + $0x74] sm:$0x1] }
  0xee   : > { %v3197_v55 = vrot.slane %v3195_v24, 4  ;;  %v2719_v8 = vor.u32 %v2718_v50, %v2714_v34  ;;  %v12930_v27 = vsel %vm12164_vm8, %v10414_v31, %v3195_v24  ;;  %1994 = vst.msk [vmem:[#allocation3 + $0x8] sm:$0xff] %vm16618_vm13, %v1947_v6  ;;  %418 = vst [vmem:[#allocation2 + $0x6c] sm:$0x1] %v417_v4  ;;  %v892_v52 = vshrl.u32 %v12871_v62, 16  ;;  %v11679_v44 = vld [vmem:[#allocation2 + $0x30] sm:$0xff]  }
  0xef   : > { %4365 = vrot.lane.b32.xlu1 %v10493_v37, %s12038_s26  ;;  %v2710_v20 = vrot.slane %v2709_v14, 4  ;;  %v887_v37 = vshll.u32 %v12853_v10, 16  ;;  %v895_v13 = vshll.u32 %v12871_v62, 16  ;;  %v886_v29 = vrot.slane %v884_v43, 7  ;;  %1449 = vst.msk [vmem:[#allocation3 + $0x20] sm:$0xff] %vm16620_vm11, %v11679_v44 }
  0xf0   : > { %v1253_v59 = vld [vmem:[#allocation2 + $0x60] sm:$0xf]  ;;  %v2720_v12 = vrot.slane %v2719_v8, 4  ;;  %v3199_v49 = vsel %vm12164_vm8, %v3197_v55, %v3198_v36  ;;  %vm16615_vm5 = vcmask 97344   ;;  %v12950_v57 = vrot.slane %v892_v52, 7 }
  0xf1   : > { %v12943_v19 = vpop.permute.xlu1 %2274  ;;  %v1254_v17 = vsel %vm12273_vm9, %v12247_v23, %v1253_v59  ;;  %v2715_v10 = vsel %vm12235_vm1, %v2710_v20, %v2714_v34  ;;  %2317 = vst.msk [vmem:[#allocation3] sm:$0xff] %vm16615_vm5, %v12765_v54  ;;  %vm16614_vm2 = vcmask 130144   ;;  %2318 = vst.msk [vmem:[#allocation3 + $0x8] sm:$0xff] %vm16615_vm5, %v12873_v22  ;;  %v10367_v62 = vcombine.low %v12889_v30, %v12898_v15  ;;  %v11680_v55 = vld [vmem:[#allocation2 + $0x3c] sm:$0xff]  }
  0xf2   : > { %1255 = vst [vmem:[#allocation2 + $0x60] sm:$0xf] %v1254_v17  ;;  %v2725_v3 = vsel %vm12235_vm1, %v2720_v12, %v2724_v25  ;;  %v1126_v63 = vld [vmem:[#allocation2 + $0x68] sm:$0x1]  ;;  %v890_v58 = vrot.slane %v886_v29, 4  ;;  %2494 = vst.msk [vmem:[#allocation3] sm:$0xff] %vm16614_vm2, %v12787_v56  ;;  %v889_v15 = vor.u32 %v887_v37, %v886_v29  ;;  %v897_v28 = vor.u32 %v895_v13, %v12950_v57  ;;  %v12985_v6 = vpop.permute.xlu0 %2990 }
  0xf3   : > { %1958 = vrot.lane.b32.xlu1 %v10335_v46, %s12034_s20  ;;  %v473_v54 = vsel %vm12150_vm6, 0, %v472_v32  ;;  %2495 = vst.msk [vmem:[#allocation3 + $0x8] sm:$0xff] %vm16614_vm2, %v12792_v0  ;;  %v10398_v22 = vcombine.low %v2715_v10, %v2725_v3  ;;  %v1127_v30 = vsel %vm12263_vm7, %v882_v61, %v1126_v63  ;;  %v10430_v56 = vcombine.low %v12930_v27, %v3199_v49  ;;  %v635_v32 = vld [vmem:[%s12172_s28 + $0x90] sm:$0xff] }
  0xf4   : > { %474 = vst [vmem:[#allocation2 + $0x74] sm:$0x1] %v473_v54  ;;  %1128 = vst [vmem:[#allocation2 + $0x68] sm:$0x1] %v1127_v30  ;;  %v2532_v48 = vld [vmem:[#allocation2 + $0x64] sm:$0xf]  ;;  %v898_v61 = vsel %vm12221_vm0, %v890_v58, %v897_v28 }
  0xf5   : > { %v12973_v18 = vld [vmem:[#allocation2 + $0x64] sm:$0xf]  ;;  %v12975_v31 = vpop.permute.xlu1 %2992  ;;  %3002 = vrot.lane.b32.xlu0 %v10398_v22, %s12039_s27  ;;  %v2736_v0 = vshll.u32 %v2532_v48, 16  ;;  %v2740_v5 = vshrl.u32 %v2532_v48, 16  ;;  %v1129_v34 = vld [vmem:[#allocation2 + $0x6c] sm:$0xf] }
  0xf6   : > { %v3202_v42 = vrot.slane %v12973_v18, 5  ;;  %1132 = vst.msk [vmem:[#allocation2 + $0x70] sm:$0xf] %vm1068_vm12, %v898_v61  ;;  %v3573_v24 = vld [vmem:[#allocation2 + $0x64] sm:$0xf]  ;;  %v899_v36 = vrot.slane %v12950_v57, 4  ;;  %v1130_v46 = vsel %vm12210_vm15, %v889_v15, %v1129_v34  ;;  %v13024_v61 = vpack.c.bf16 %v635_v32, %v635_v32 }
  0xf7   : > { %2282 = vrot.lane.b32.xlu1 %v10367_v62, %s12033_s19  ;;  %v12983_v26 = vld [vmem:[#allocation2 + $0x64] sm:$0xf]  ;;  %v12987_v50 = vrot.slane %v2736_v0, 5  ;;  %v2742_v25 = vrot.slane %v2740_v5, 4  ;;  %1263 = vst.msk [vmem:[#allocation2 + $0x70] sm:$0xf] %vm16617_vm14, %v12247_v23 }
  0xf8   : > { %v12994_v14 = vld [vmem:[#allocation2 + $0x64] sm:$0xf]  ;;  %v12999_v8 = vrot.slane %v3202_v42, 4  ;;  %1131 = vst [vmem:[#allocation2 + $0x6c] sm:$0xf] %v1130_v46  ;;  %v3756_v27 = vshll.u32 %v3573_v24, 16 }
  0xf9   : > { %v3760_v4 = vshrl.u32 %v3573_v24, 16  ;;  %v4239_v43 = vrot.slane %v12983_v26, 5  ;;  %v13003_v20 = vpop.permute.xlu1 %4036  ;;  %v11663_v37 = vld [vmem:[#allocation2 + $0x60] sm:$0xff]   ;;  %v2743_v13 = vor.u32 %v2742_v25, %v12987_v50  ;;  %3323 = vrot.lane.b32.xlu0 %v10430_v56, %s12037_s24  ;;  %v1714_v59 = vshll.u32 %v12994_v14, 16  ;;  %1450 = vst.msk [vmem:[#allocation3 + $0x28] sm:$0xff] %vm16620_vm11, %v11680_v55  ;;  %v636_v15 = vld [vmem:[%s12172_s28 + $0x98] sm:$0xff] }
  0xfa   : > { %v2531_v52 = vld [vmem:[#allocation2 + $0x60] sm:$0xf]  ;;  %v13014_v62 = vrot.slane %v3756_v27, 5  ;;  %v1718_v3 = vshrl.u32 %v12994_v14, 16  ;;  %v13021_v28 = vpop.permute.xlu0 %4034  ;;  %vm16616_vm3 = vcmask 162944  }
  0xfb   : > { %v2727_v12 = vshrl.u32 %v2531_v52, 16  ;;  %v2730_v49 = vshll.u32 %v2531_v52, 16  ;;  %v13009_v29 = vld [vmem:[#allocation2 + $0x60] sm:$0xe]  ;;  %2459 = vrot.lane.b32.xlu1 %v11663_v37, %s12035_s21  ;;  %v1257_v17 = vld [vmem:[#allocation2 + $0x68] sm:$0x1] }
  0xfc   : > { %v13012_v10 = vrot.slane %v2743_v13, 4  ;;  %v11665_v57 = vld [vmem:[#allocation2 + $0x60] sm:$0xff]   ;;  %v1258_v63 = vsel %vm12323_vm10, %v12247_v23, %v1257_v17  ;;  %v3762_v30 = vrot.slane %v3760_v4, 4  ;;  %v1133_v0 = vld [vmem:[#allocation2 + $0x74] sm:$0x1]  ;;  %v10415_v34 = vrot.slane %v13009_v29, 9 }
  0xfd   : > { %v2729_v58 = vrot.slane %v2727_v12, 4  ;;  %v2732_v54 = vrot.slane %v2730_v49, 5  ;;  %v3572_v22 = vld [vmem:[#allocation2 + $0x60] sm:$0xf]  ;;  %1259 = vst [vmem:[#allocation2 + $0x68] sm:$0x1] %v1258_v63  ;;  %3501 = vrot.lane.b32.xlu0 %v11665_v57, %s12036_s22  ;;  %v1134_v25 = vsel %vm12263_vm7, %v899_v36, %v1133_v0  ;;  %v13036_v29 = vpack.c.bf16 %v636_v15, %v636_v15 }
  0xfe   : > { %v3747_v48 = vshrl.u32 %v3572_v22, 16  ;;  %v3750_v56 = vshll.u32 %v3572_v22, 16  ;;  %v4117_v5 = vld [vmem:[#allocation2 + $0x60] sm:$0xe]  ;;  %v3763_v24 = vor.u32 %v3762_v30, %v13014_v62  ;;  %v3576_v46 = vld [vmem:[#allocation2 + $0x70] sm:$0xf]  ;;  %v1951_v14 = vpop.permute.xlu1 %1950 }
  0xff   : > { %v2733_v44 = vor.u32 %v2732_v54, %v2729_v58  ;;  %v1260_v55 = vld [vmem:[#allocation2 + $0x6c] sm:$0xf]  ;;  %1135 = vst [vmem:[#allocation2 + $0x74] sm:$0x1] %v1134_v25  ;;  %v3780_v37 = vshll.u32 %v3576_v46, 16  ;;  %v3784_v52 = vshrl.u32 %v3576_v46, 16 }
 0x100   : > { %v3749_v27 = vrot.slane %v3747_v48, 4  ;;  %v3752_v4 = vrot.slane %v3750_v56, 5  ;;  %1996 = vst.msk [vmem:[#allocation3 + $0x18] sm:$0xff] %vm16618_vm13, %v1951_v14  ;;  %v1261_v13 = vsel %vm12273_vm9, %v12247_v23, %v1260_v55  ;;  %v10478_v12 = vrot.slane %v4117_v5, 9  ;;  %v13034_v49 = vld [vmem:[#allocation2 + $0x70] sm:$0xf] }
 0x101   : > { %v2734_v32 = vrot.slane %v2733_v44, 4  ;;  %v1485_v36 = vld [vmem:[#allocation2 + $0x60] sm:$0xf]  ;;  %2320 = vst.msk [vmem:[#allocation3 + $0x18] sm:$0xff] %vm16615_vm5, %v12943_v19  ;;  %1262 = vst [vmem:[#allocation2 + $0x6c] sm:$0xf] %v1261_v13 }
 0x102   : > { %v3753_v17 = vor.u32 %v3752_v4, %v3749_v27  ;;  %v3764_v57 = vrot.slane %v3763_v24, 4  ;;  %v13040_v63 = vrot.slane %v3780_v37, 5  ;;  %v3786_v58 = vrot.slane %v3784_v52, 4  ;;  %v637_v54 = vld [vmem:[%s12172_s28 + $0xa0] sm:$0xff]  ;;  %v638_v22 = vld [vmem:[%s12172_s28 + $0xa8] sm:$0xff]  ;;  %2497 = vst.msk [vmem:[#allocation3 + $0x18] sm:$0xff] %vm16614_vm2, %v12840_v38  ;;  %v1949_v0 = vpop.permute.xlu0 %1948 }
 0x103   : > { %v4241_v30 = vrot.slane %v4239_v43, 4  ;;  %v4246_v15 = vrot.slane %v13034_v49, 5  ;;  %v1705_v48 = vshrl.u32 %v1485_v36, 16  ;;  %v1708_v56 = vshll.u32 %v1485_v36, 16  ;;  %1995 = vst.msk [vmem:[#allocation3 + $0x10] sm:$0xff] %vm16618_vm13, %v1949_v0 }
 0x104   : > { %v3754_v19 = vrot.slane %v3753_v17, 4  ;;  %v3787_v5 = vor.u32 %v3786_v58, %v13040_v63  ;;  %v13050_v44 = vrot.slane %v1714_v59, 5  ;;  %v1720_v24 = vrot.slane %v1718_v3, 4  ;;  %v2533_v25 = vld [vmem:[#allocation2 + $0x68] sm:$0x1]  ;;  %2319 = vst.msk [vmem:[#allocation3 + $0x10] sm:$0xff] %vm16615_vm5, %v12902_v45 }
 0x105   : > { %v3078_v46 = vld [vmem:[#allocation2 + $0x68] sm:$0x1]  ;;  %v13057_v38 = vsel %vm12164_vm8, %v10415_v34, %v3202_v42  ;;  %v13063_v55 = vsel %vm12164_vm8, %v10478_v12, %v4239_v43  ;;  %v13065_v59 = vpack.c.bf16 %v637_v54, %v637_v54  ;;  %v13067_v3 = vpack.c.bf16 %v638_v22, %v638_v22  ;;  %2496 = vst.msk [vmem:[#allocation3 + $0x10] sm:$0xff] %vm16614_vm2, %v12828_v39 }
 0x106   : > { %v3574_v14 = vld [vmem:[#allocation2 + $0x68] sm:$0x1]  ;;  %v2739_v18 = vsel %vm12235_vm1, %v2734_v32, %v12987_v50  ;;  %v2746_v42 = vshll.u32 %v2533_v25, 16  ;;  %v3205_v34 = vrot.slane %v3078_v46, 5  ;;  %v3759_v26 = vsel %vm12235_vm1, %v3754_v19, %v13014_v62  ;;  %v1264_v43 = vld [vmem:[#allocation2 + $0x74] sm:$0x1] }
 0x107   : > { %v3766_v27 = vshll.u32 %v3574_v14, 16  ;;  %v4119_v4 = vld [vmem:[#allocation2 + $0x68] sm:$0x1]  ;;  %v13079_v37 = vrot.slane %v3787_v5, 4  ;;  %v1707_v45 = vrot.slane %v1705_v48, 4  ;;  %v1265_v12 = vsel %vm12323_vm10, %v12247_v23, %v1264_v43  ;;  %3040 = vst.msk [vmem:[#allocation3 + $0x8] sm:$0xff] %vm16616_vm3, %v12975_v31 }
 0x108   : > { %v4242_v52 = vrot.slane %v4119_v4, 5  ;;  %v2748_v13 = vrot.slane %v2746_v42, 5  ;;  %v3206_v50 = vsel %vm12164_vm8, %v12999_v8, %v3205_v34  ;;  %v1487_v39 = vld [vmem:[#allocation2 + $0x68] sm:$0x1]  ;;  %1266 = vst [vmem:[#allocation2 + $0x74] sm:$0x1] %v1265_v12  ;;  %v1721_v54 = vor.u32 %v1720_v24, %v13050_v44 }
 0x109   : > { %v3768_v32 = vrot.slane %v3766_v27, 5  ;;  %v3575_v36 = vld [vmem:[#allocation2 + $0x6c] sm:$0xf]  ;;  %v4248_v17 = vrot.slane %v4246_v15, 4  ;;  %v1710_v58 = vrot.slane %v1708_v56, 5  ;;  %vm3359_vm2 = vcmask 195744  }
 0x10a   : > { %v4243_v62 = vsel %vm12164_vm8, %v4241_v30, %v4242_v52  ;;  %v2749_v8 = vsel %vm12235_vm1, %v13012_v10, %v2748_v13  ;;  %v3771_v48 = vshrl.u32 %v3575_v36, 16  ;;  %v3774_v0 = vshll.u32 %v3575_v36, 16  ;;  %v4120_v19 = vld [vmem:[#allocation2 + $0x6c] sm:$0xe]  ;;  %v1489_v56 = vld [vmem:[#allocation2 + $0x70] sm:$0xf] }
 0x10b   : > { %v3769_v22 = vsel %vm12235_vm1, %v3764_v57, %v3768_v32  ;;  %v1488_v5 = vld [vmem:[#allocation2 + $0x6c] sm:$0xf]  ;;  %v10399_v25 = vcombine.low %v2739_v18, %v2749_v8  ;;  %v10431_v30 = vcombine.low %v13057_v38, %v3206_v50  ;;  %v10494_v14 = vcombine.low %v13063_v55, %v4243_v62  ;;  %v2033_v42 = vld [vmem:[#allocation2 + $0x60] sm:$0xe]  ;;  %v2034_v50 = vld [vmem:[#allocation2 + $0x64] sm:$0xf]  ;;  %v13101_v8 = vpop.permute.xlu0 %2994 }
 0x10c   : > { %v10462_v46 = vcombine.low %v3759_v26, %v3769_v22  ;;  %v3773_v24 = vrot.slane %v3771_v48, 4  ;;  %v3776_v34 = vrot.slane %v3774_v0, 5  ;;  %v10479_v27 = vrot.slane %v4120_v19, 9  ;;  %v2035_v36 = vld [vmem:[#allocation2 + $0x68] sm:$0x1]  ;;  %v11666_v0 = vld [vmem:[#allocation2 + $0x6c] sm:$0xff]  }
 0x10d   : > { %v1711_v4 = vor.u32 %v1710_v58, %v1707_v45  ;;  %3004 = vrot.lane.b32.xlu1 %v10399_v25, %s12039_s27  ;;  %v1722_v10 = vrot.slane %v1721_v54, 4  ;;  %v1724_v57 = vshll.u32 %v1487_v39, 16  ;;  %v1729_v43 = vshrl.u32 %v1488_v5, 16  ;;  %3039 = vst.msk [vmem:[#allocation3] sm:$0xff] %vm16616_vm3, %v12985_v6  ;;  %3041 = vst.msk [vmem:[#allocation3 + $0x10] sm:$0xff] %vm16616_vm3, %v13101_v8 }
 0x10e   : > { %4046 = vrot.lane.b32.xlu0 %v10462_v46, %s12040_s29  ;;  %v1732_v52 = vshll.u32 %v1488_v5, 16  ;;  %v3777_v18 = vor.u32 %v3776_v34, %v3773_v24  ;;  %v1738_v38 = vshll.u32 %v1489_v56, 16  ;;  %v1742_v26 = vshrl.u32 %v1489_v56, 16  ;;  %v2037_v24 = vld [vmem:[#allocation2 + $0x70] sm:$0xf]  ;;  %3361 = vst.msk [vmem:[#allocation3 + $0x8] sm:$0xff] %vm3359_vm2, %v12891_v21 }
 0x10f   : > { %v1712_v13 = vrot.slane %v1711_v4, 4  ;;  %v1726_v55 = vrot.slane %v1724_v57, 5  ;;  %v1731_v32 = vrot.slane %v1729_v43, 4  ;;  %v10352_v62 = vrot.slane %v2033_v42, 9  ;;  %v3577_v45 = vld [vmem:[#allocation2 + $0x74] sm:$0x1] }
 0x110   : > { %v1734_v12 = vrot.slane %v1732_v52, 5  ;;  %v3778_v58 = vrot.slane %v3777_v18, 4  ;;  %v4122_v22 = vld [vmem:[#allocation2 + $0x74] sm:$0x1]  ;;  %v13107_v39 = vsel %vm12164_vm8, %v10479_v27, %v4246_v15  ;;  %v1740_v48 = vrot.slane %v1738_v38, 5  ;;  %3360 = vst.msk [vmem:[#allocation3] sm:$0xff] %vm3359_vm2, %v12847_v35 }
 0x111   : > { %v1717_v54 = vsel %vm12235_vm1, %v1712_v13, %v13050_v44  ;;  %3325 = vrot.lane.b32.xlu1 %v10431_v30, %s12037_s24  ;;  %v3790_v19 = vshll.u32 %v3577_v45, 16  ;;  %v4249_v5 = vrot.slane %v4122_v22, 5  ;;  %v1727_v25 = vsel %vm12235_vm1, %v1722_v10, %v1726_v55  ;;  %v1490_v49 = vld [vmem:[#allocation2 + $0x74] sm:$0x1]  ;;  %v2036_v4 = vld [vmem:[#allocation2 + $0x6c] sm:$0xe]  ;;  %v13131_v55 = vpop.permute.xlu0 %3315 }
 0x112   : > { %4367 = vrot.lane.b32.xlu0 %v10494_v14, %s12038_s26  ;;  %v1735_v46 = vor.u32 %v1734_v12, %v1731_v32  ;;  %v3783_v15 = vsel %vm12235_vm1, %v3778_v58, %v13040_v63  ;;  %v10336_v56 = vcombine.low %v1717_v54, %v1727_v25  ;;  %v1744_v42 = vrot.slane %v1742_v26, 4  ;;  %v2038_v18 = vld [vmem:[#allocation2 + $0x74] sm:$0x1]  ;;  %v419_v13 = vld [vmem:[#allocation2 + $0x78] sm:$0x1]  ;;  %3362 = vst.msk [vmem:[#allocation3 + $0x10] sm:$0xff] %vm3359_vm2, %v13131_v55 }
 0x113   : > { %v1748_v44 = vshll.u32 %v1490_v49, 16  ;;  %v3792_v34 = vrot.slane %v3790_v19, 5  ;;  %v4250_v30 = vsel %vm12164_vm8, %v4248_v17, %v4249_v5  ;;  %v2166_v14 = vrot.slane %v2034_v50, 5  ;;  %v2534_v50 = vld [vmem:[#allocation2 + $0x6c] sm:$0xf] }
 0x114   : > { %v1736_v27 = vrot.slane %v1735_v46, 4  ;;  %v10495_v57 = vcombine.low %v13107_v39, %v4250_v30  ;;  %v1745_v10 = vor.u32 %v1744_v42, %v1740_v48  ;;  %v2169_v52 = vrot.slane %v2035_v36, 5  ;;  %v2535_v54 = vld [vmem:[#allocation2 + $0x70] sm:$0xf]  ;;  %v2536_v5 = vld [vmem:[#allocation2 + $0x74] sm:$0x1] }
 0x115   : > { %v1750_v43 = vrot.slane %v1748_v44, 5  ;;  %3503 = vrot.lane.b32.xlu1 %v11666_v0, %s12036_s22  ;;  %v3793_v63 = vsel %vm12235_vm1, %v13079_v37, %v3792_v34  ;;  %v2167_v38 = vsel %vm12164_vm8, %v10352_v62, %v2166_v14  ;;  %v2168_v26 = vrot.slane %v2166_v14, 4  ;;  %v475_v25 = vld [vmem:[#allocation2 + $0x80] sm:$0x1]  ;;  %v3079_v42 = vld [vmem:[#allocation2 + $0x6c] sm:$0xe] }
 0x116   : > { %1960 = vrot.lane.b32.xlu0 %v10336_v56, %s12034_s20  ;;  %v1741_v17 = vsel %vm12235_vm1, %v1736_v27, %v1740_v48  ;;  %v10463_v32 = vcombine.low %v3783_v15, %v3793_v63  ;;  %v1746_v12 = vrot.slane %v1745_v10, 4  ;;  %v10353_v36 = vrot.slane %v2036_v4, 9  ;;  %v3080_v14 = vld [vmem:[#allocation2 + $0x70] sm:$0xf] }
 0x117   : > { %v2173_v45 = vrot.slane %v2037_v24, 5  ;;  %v2170_v58 = vsel %vm12164_vm8, %v2168_v26, %v2169_v52  ;;  %v2176_v37 = vrot.slane %v2038_v18, 5  ;;  %v420_v22 = vsel %vm12140_vm4, 0, %v419_v13  ;;  %v11667_v24 = vld [vmem:[#allocation2 + $0x6c] sm:$0xff]   ;;  %v3494_v52 = vpop.permute.xlu0 %3493  ;;  %v422_v26 = vld [vmem:[#allocation2 + $0x84] sm:$0x1] }
 0x118   : > { %v901_v39 = vshrl.u32 %v13024_v61, 16  ;;  %v1751_v62 = vsel %vm12235_vm1, %v1746_v12, %v1750_v43  ;;  %v10368_v48 = vcombine.low %v2167_v38, %v2170_v58  ;;  %421 = vst [vmem:[#allocation2 + $0x78] sm:$0x1] %v420_v22  ;;  %v904_v15 = vshll.u32 %v13024_v61, 16  ;;  %v3081_v38 = vld [vmem:[#allocation2 + $0x74] sm:$0x1] }
 0x119   : > { %v13142_v0 = vsel %vm12164_vm8, %v10353_v36, %v2173_v45  ;;  %v2175_v19 = vrot.slane %v2173_v45, 4  ;;  %4048 = vrot.lane.b32.xlu1 %v10463_v32, %s12040_s29  ;;  %v10337_v49 = vcombine.low %v1741_v17, %v1751_v62  ;;  %v909_v56 = vshrl.u32 %v13036_v29, 16 }
 0x11a   : > { %v903_v46 = vrot.slane %v901_v39, 7  ;;  %2284 = vrot.lane.b32.xlu0 %v10368_v48, %s12033_s19  ;;  %v912_v34 = vshll.u32 %v13036_v29, 16  ;;  %v2751_v30 = vshrl.u32 %v2534_v50, 16  ;;  %v2754_v27 = vshll.u32 %v2534_v50, 16 }
 0x11b   : > { %v13150_v44 = vsel %vm12164_vm8, %v2175_v19, %v2176_v37  ;;  %v13155_v43 = vrot.slane %v909_v56, 7  ;;  %v2760_v63 = vshll.u32 %v2535_v54, 16  ;;  %v2764_v17 = vshrl.u32 %v2535_v54, 16 }
 0x11c   : > { %v10369_v4 = vcombine.low %v13142_v0, %v13150_v44  ;;  %v906_v10 = vor.u32 %v904_v15, %v903_v46  ;;  %v907_v61 = vrot.slane %v903_v46, 4  ;;  %v2753_v18 = vrot.slane %v2751_v30, 4 }
 0x11d   : > { %v2756_v13 = vrot.slane %v2754_v27, 5  ;;  %4369 = vrot.lane.b32.xlu1 %v10495_v57, %s12038_s26  ;;  %v914_v29 = vor.u32 %v912_v34, %v13155_v43  ;;  %v916_v50 = vrot.slane %v13155_v43, 4  ;;  %v2770_v32 = vshll.u32 %v2536_v5, 16 }
 0x11e   : > { %v476_v12 = vsel %vm12150_vm6, 0, %v475_v25  ;;  %2461 = vrot.lane.b32.xlu0 %v11667_v24, %s12035_s21  ;;  %v2762_v45 = vrot.slane %v2760_v63, 5  ;;  %v2766_v58 = vrot.slane %v2764_v17, 4  ;;  %v10416_v37 = vrot.slane %v3079_v42, 9  ;;  %v478_v25 = vld [vmem:[#allocation2 + $0x8c] sm:$0x1] }
 0x11f   : > { %v2757_v36 = vor.u32 %v2756_v13, %v2753_v18  ;;  %477 = vst [vmem:[#allocation2 + $0x80] sm:$0x1] %v476_v12  ;;  %v915_v22 = vsel %vm12221_vm0, %v907_v61, %v914_v29  ;;  %v1136_v39 = vld [vmem:[#allocation2 + $0x78] sm:$0xf]  ;;  %v2772_v57 = vrot.slane %v2770_v32, 5  ;;  %v3209_v54 = vrot.slane %v3080_v14, 5 }
 0x120   : > { %v3212_v62 = vrot.slane %v3081_v38, 5  ;;  %v1137_v48 = vsel %vm12210_vm15, %v906_v10, %v1136_v39  ;;  %1139 = vst.msk [vmem:[#allocation2 + $0x7c] sm:$0xf] %vm1068_vm12, %v915_v22  ;;  %v2767_v5 = vor.u32 %v2766_v58, %v2762_v45  ;;  %v423_v56 = vsel %vm12140_vm4, 0, %v422_v26  ;;  %v2997_v42 = vpop.permute.xlu1 %2996  ;;  %v425_v61 = vld [vmem:[#allocation2 + $0x90] sm:$0x1] }
 0x121   : > { %v2758_v19 = vrot.slane %v2757_v36, 4  ;;  %1962 = vrot.lane.b32.xlu1 %v10337_v49, %s12034_s20  ;;  %1138 = vst [vmem:[#allocation2 + $0x78] sm:$0xf] %v1137_v48  ;;  %1270 = vst.msk [vmem:[#allocation2 + $0x7c] sm:$0xf] %vm16617_vm14, %v12247_v23  ;;  %v13173_v46 = vsel %vm12164_vm8, %v10416_v37, %v3209_v54  ;;  %v3211_v15 = vrot.slane %v3209_v54, 4 }
 0x122   : > { %v11676_v49 = vld [vmem:[%s16601_s1 + $0x10] ss:$0 sps:$4 sm:$0x33]   ;;  %v4039_v24 = vpop.permute.xlu0 %4038  ;;  %v2768_v30 = vrot.slane %v2767_v5, 4  ;;  %424 = vst [vmem:[#allocation2 + $0x84] sm:$0x1] %v423_v56 }
 0x123   : > { %v2763_v34 = vsel %vm12235_vm1, %v2758_v19, %v2762_v45  ;;  %v918_v31 = vshrl.u32 %v13065_v59, 16  ;;  %v921_v6 = vshll.u32 %v13065_v59, 16  ;;  %3042 = vst.msk [vmem:[#allocation3 + $0x18] sm:$0xff] %vm16616_vm3, %v2997_v42  ;;  %v13199_v8 = vsel %vm12164_vm8, %v3211_v15, %v3212_v62 }
 0x124   : > { %v926_v27 = vshrl.u32 %v13067_v3, 16  ;;  %v929_v21 = vshll.u32 %v13067_v3, 16  ;;  %vm16621_vm5 = vcmask 228544   ;;  %v2773_v35 = vsel %vm12235_vm1, %v2768_v30, %v2772_v57 }
 0x125   : > { %v10432_v59 = vcombine.low %v13173_v46, %v13199_v8  ;;  %v920_v14 = vrot.slane %v918_v31, 7  ;;  %vm16619_vm3 = vcmask 261344   ;;  %3539 = vst.msk [vmem:[#allocation3 + $0x8] sm:$0xff] %vm16621_vm5, %v12821_v40  ;;  %3538 = vst.msk [vmem:[#allocation3] sm:$0xff] %vm16621_vm5, %v12801_v47  ;;  %2286 = vrot.lane.b32.xlu1 %v10369_v4, %s12033_s19  ;;  %v10400_v3 = vcombine.low %v2763_v34, %v2773_v35  ;;  %v3318_v40 = vpop.permute.xlu1 %3317 }
 0x126   : > { %3540 = vst.msk [vmem:[#allocation3 + $0x10] sm:$0xff] %vm16621_vm5, %v3494_v52  ;;  %v1140_v55 = vld [vmem:[#allocation2 + $0x80] sm:$0x1]  ;;  %v13216_v10 = vrot.slane %v926_v27, 7  ;;  %vm4403_vm14 = vcmask 294144   ;;  %v479_v47 = vsel %vm12150_vm6, 0, %v478_v25  ;;  %v4360_v0 = vpop.permute.xlu0 %4359 }
 0x127   : > { %4084 = vst.msk [vmem:[#allocation3 + $0x8] sm:$0xff] %vm16619_vm3, %v13003_v20  ;;  %4083 = vst.msk [vmem:[#allocation3] sm:$0xff] %vm16619_vm3, %v13021_v28  ;;  %v639_v52 = vld [vmem:[%s12172_s28 + $0xb0] sm:$0xff]  ;;  %v1141_v44 = vsel %vm12263_vm7, %v916_v50, %v1140_v55  ;;  %v923_v4 = vor.u32 %v921_v6, %v920_v14  ;;  %v924_v18 = vrot.slane %v920_v14, 4  ;;  %vm4512_vm13 = vcmask 1041408   ;;  %v11685_v20 = vld [vmem:[#allocation2 + $0x48] sm:$0xff]   ;;  %3006 = vrot.lane.b32.xlu0 %v10400_v3, %s12039_s27 }
 0x128   : > { %4085 = vst.msk [vmem:[#allocation3 + $0x10] sm:$0xff] %vm16619_vm3, %v4039_v24  ;;  %480 = vst [vmem:[#allocation2 + $0x8c] sm:$0x1] %v479_v47  ;;  %v931_v28 = vor.u32 %v929_v21, %v13216_v10  ;;  %v933_v43 = vrot.slane %v13216_v10, 4  ;;  %11611 = vmatprep.subr.msk.bf16.mxu0 %vm4512_vm13, %v11676_v49  ;;  %v4514_v13 = vsel %vm4512_vm13, %v11676_v49, 0  ;;  %vm4463_vm3 = vcmask 293888  }
 0x129   : > { %4405 = vst.msk [vmem:[#allocation3 + $0x8] sm:$0xff] %vm4403_vm14, %v12919_v7  ;;  %4404 = vst.msk [vmem:[#allocation3] sm:$0xff] %vm4403_vm14, %v12875_v51  ;;  %v11686_v7 = vld [vmem:[#allocation2 + $0x54] sm:$0xff]   ;;  %v2538_v51 = vld [vmem:[#allocation2 + $0x7c] sm:$0xf]  ;;  %11514 = vmatpush3.bf16.msra.mxu0 %v4514_v13  ;;  %v13239_v17 = vpack.c.bf16 %v639_v52, %v639_v52  ;;  %v3496_v12 = vpop.permute.xlu1 %3495  ;;  %v426_v22 = vsel %vm12140_vm4, 0, %v425_v61 }
 0x12a   : > { %3363 = vst.msk [vmem:[#allocation3 + $0x18] sm:$0xff] %vm3359_vm2, %v3318_v40  ;;  %1142 = vst [vmem:[#allocation2 + $0x80] sm:$0x1] %v1141_v44  ;;  %v1267_v63 = vld [vmem:[#allocation2 + $0x78] sm:$0xf]  ;;  %v2784_v26 = vshll.u32 %v2538_v51, 16  ;;  %v932_v32 = vsel %vm12221_vm0, %v924_v18, %v931_v28  ;;  %v1953_v36 = vpop.permute.xlu0 %1952 }
 0x12b   : > { %4406 = vst.msk [vmem:[#allocation3 + $0x10] sm:$0xff] %vm4403_vm14, %v4360_v0  ;;  %v1268_v38 = vsel %vm12273_vm9, %v12247_v23, %v1267_v63  ;;  %v2788_v29 = vshrl.u32 %v2538_v51, 16  ;;  %v13245_v50 = vld [vmem:[#allocation2 + $0x7c] sm:$0xf]  ;;  %v1143_v58 = vld [vmem:[#allocation2 + $0x84] sm:$0xf]  ;;  %3327 = vrot.lane.b32.xlu0 %v10432_v59, %s12037_s24 }
 0x12c   : > { %1451 = vst.msk [vmem:[#allocation3 + $0x30] sm:$0xff] %vm16620_vm11, %v11685_v20  ;;  %1452 = vst.msk [vmem:[#allocation3 + $0x38] sm:$0xff] %vm16620_vm11, %v11686_v7  ;;  %v3216_v45 = vrot.slane %v13245_v50, 5  ;;  %v3579_v37 = vld [vmem:[#allocation2 + $0x7c] sm:$0xf]  ;;  %vm16673_vm13 = vcmask 64544   ;;  %v1144_v54 = vsel %vm12210_vm15, %v923_v4, %v1143_v58 }
 0x12d   : > { %1269 = vst [vmem:[#allocation2 + $0x78] sm:$0xf] %v1268_v38  ;;  %1146 = vst.msk [vmem:[#allocation2 + $0x88] sm:$0xf] %vm1068_vm12, %v932_v32  ;;  %v13256_v39 = vrot.slane %v2784_v26, 5  ;;  %v2790_v57 = vrot.slane %v2788_v29, 4  ;;  %v4041_v30 = vpop.permute.xlu1 %4040 }
 0x12e   : > { %3541 = vst.msk [vmem:[#allocation3 + $0x18] sm:$0xff] %vm16621_vm5, %v3496_v12  ;;  %vm16674_vm11 = vcmask 27672   ;;  %v3804_v62 = vshll.u32 %v3579_v37, 16  ;;  %v13263_v48 = vld [vmem:[#allocation2 + $0x7c] sm:$0xf]  ;;  %v3808_v19 = vshrl.u32 %v3579_v37, 16  ;;  %v2277_v31 = vpop.permute.xlu0 %2276 }
 0x12f   : > { %1997 = vst.msk [vmem:[#allocation3 + $0x20] sm:$0xff] %vm16673_vm13, %v1953_v36  ;;  %427 = vst [vmem:[#allocation2 + $0x90] sm:$0x1] %v426_v22  ;;  %v4253_v5 = vrot.slane %v13263_v48, 5  ;;  %v1492_v25 = vld [vmem:[#allocation2 + $0x7c] sm:$0xf]  ;;  %v2791_v15 = vor.u32 %v2790_v57, %v13256_v39 }
 0x130   : > { %1277 = vst.msk [vmem:[#allocation2 + $0x88] sm:$0xf] %vm16674_vm11, %v12247_v23  ;;  %1145 = vst [vmem:[#allocation2 + $0x84] sm:$0xf] %v1144_v54  ;;  %v935_v46 = vshrl.u32 %v13239_v17, 16  ;;  %v13268_v56 = vrot.slane %v3804_v62, 5 }
 0x131   : > { %v1147_v49 = vld [vmem:[#allocation2 + $0x8c] sm:$0x1]  ;;  %v1762_v42 = vshll.u32 %v1492_v25, 16  ;;  %v1766_v24 = vshrl.u32 %v1492_v25, 16  ;;  %v4420_v34 = vld [vmem:[#allocation3] sm:$0xff]  ;;  %v13272_v8 = vrot.slane %v3216_v45, 4 }
 0x132   : > { %v1271_v6 = vld [vmem:[#allocation2 + $0x80] sm:$0x1]  ;;  %v3810_v27 = vrot.slane %v3808_v19, 4  ;;  %v1148_v21 = vsel %vm12263_vm7, %v933_v43, %v1147_v49  ;;  %v13278_v35 = vrot.slane %v4253_v5, 4  ;;  %11515 = vmatprep.mubr.msk.bf16.mxu0 %vm4463_vm3, %v4420_v34  ;;  %vm16675_vm11 = vcmask 261344   ;;  %v4422_v40 = vld [vmem:[#allocation3 + $0x10] sm:$0xff]  ;;  %v4362_v43 = vpop.permute.xlu1 %4361  ;;  %v2454_v13 = vpop.permute.xlu0 %2453 }
 0x133   : > { %v4421_v59 = vld [vmem:[#allocation3 + $0x8] sm:$0xff]  ;;  %4086 = vst.msk [vmem:[#allocation3 + $0x18] sm:$0xff] %vm16675_vm11, %v4041_v30  ;;  %vm16676_vm13 = vcmask 97344   ;;  %v1272_v14 = vsel %vm12323_vm10, %v12247_v23, %v1271_v6  ;;  %v13286_v3 = vrot.slane %v2791_v15, 4  ;;  %1149 = vst [vmem:[#allocation2 + $0x8c] sm:$0x1] %v1148_v21 }
 0x134   : > { %2321 = vst.msk [vmem:[#allocation3 + $0x20] sm:$0xff] %vm16676_vm13, %v2277_v31  ;;  %v13288_v55 = vrot.slane %v1762_v42, 5  ;;  %11516 = vmatmul.mubr.msk.bf16.vlgmr.msra.gmra.mrb[0].mxu0 %vm4463_vm3, %v4421_v59  ;;  %v13291_v10 = vld [vmem:[#allocation2 + $0x7c] sm:$0xf]  ;;  %v13293_v47 = vrot.slane %v935_v46, 7  ;;  %v3811_v61 = vor.u32 %v3810_v27, %v13268_v56  ;;  %v13296_v52 = vrot.slane %v1766_v24, 4 }
 0x135   : > { %1273 = vst [vmem:[#allocation2 + $0x80] sm:$0x1] %v1272_v14  ;;  %v2180_v0 = vrot.slane %v13291_v10, 5  ;;  %v640_v44 = vld [vmem:[%s12172_s28 + $0xb8] sm:$0xff]  ;;  %v938_v4 = vshll.u32 %v13239_v17, 16  ;;  %11519 = vmatprep.mubr.msk.bf16.mxu0 %vm4463_vm3, %v4422_v40  ;;  %4407 = vst.msk [vmem:[#allocation3 + $0x18] sm:$0xff] %vm4403_vm14, %v4362_v43 }
 0x136   : > { %v11668_v18 = vld [vmem:[#allocation2 + $0x78] sm:$0xff]   ;;  %v941_v28 = vrot.slane %v13293_v47, 4  ;;  %vm16677_vm11 = vcmask 130144   ;;  %v13309_v37 = vrot.slane %v3811_v61, 4  ;;  %v641_v22 = vld [vmem:[%s12172_s28 + $0xc0] sm:$0xff]  ;;  %v13313_v25 = vpack.c.bf16 %v640_v44, %v640_v44  ;;  %v1955_v46 = vpop.permute.xlu1 %1954 }
 0x137   : > { %v2537_v20 = vld [vmem:[#allocation2 + $0x78] sm:$0xf]  ;;  %2498 = vst.msk [vmem:[#allocation3 + $0x20] sm:$0xff] %vm16677_vm11, %v2454_v13  ;;  %2463 = vrot.lane.b32.xlu1 %v11668_v18, %s12035_s21  ;;  %v1274_v29 = vld [vmem:[#allocation2 + $0x84] sm:$0xf]  ;;  %vm16678_vm13 = vcmask 64544   ;;  %v1769_v59 = vor.u32 %v13296_v52, %v13288_v55  ;;  %v13327_v14 = vpack.c.bf16 %v641_v22, %v641_v22  ;;  %v2999_v50 = vpop.permute.xlu0 %2998 }
 0x138   : > { %v2775_v7 = vshrl.u32 %v2537_v20, 16  ;;  %v2778_v63 = vshll.u32 %v2537_v20, 16  ;;  %v3082_v51 = vld [vmem:[#allocation2 + $0x78] sm:$0xe]  ;;  %v1275_v36 = vsel %vm12273_vm9, %v12247_v23, %v1274_v29  ;;  %v3582_v62 = vld [vmem:[#allocation2 + $0x88] sm:$0xf] }
 0x139   : > { %v10417_v38 = vrot.slane %v3082_v51, 9  ;;  %v11670_v26 = vld [vmem:[#allocation2 + $0x78] sm:$0xff]   ;;  %1276 = vst [vmem:[#allocation2 + $0x84] sm:$0xf] %v1275_v36  ;;  %v3828_v42 = vshll.u32 %v3582_v62, 16  ;;  %v3832_v24 = vshrl.u32 %v3582_v62, 16 }
 0x13a   : > { %v2777_v32 = vrot.slane %v2775_v7, 4  ;;  %v2780_v12 = vrot.slane %v2778_v63, 5  ;;  %v3578_v58 = vld [vmem:[#allocation2 + $0x78] sm:$0xf]  ;;  %3505 = vrot.lane.b32.xlu0 %v11670_v26, %s12036_s22  ;;  %v1278_v49 = vld [vmem:[#allocation2 + $0x8c] sm:$0x1]  ;;  %v2279_v63 = vpop.permute.xlu1 %2278 }
 0x13b   : > { %v3795_v57 = vshrl.u32 %v3578_v58, 16  ;;  %v3798_v54 = vshll.u32 %v3578_v58, 16  ;;  %v4123_v19 = vld [vmem:[#allocation2 + $0x78] sm:$0xe]  ;;  %1998 = vst.msk [vmem:[#allocation3 + $0x28] sm:$0xff] %vm16678_vm13, %v1955_v46  ;;  %v13320_v6 = vsel %vm12164_vm8, %v10417_v38, %v3216_v45  ;;  %v1279_v21 = vsel %vm12323_vm10, %v12247_v23, %v1278_v49  ;;  %v3320_v46 = vpop.permute.xlu0 %3319 }
 0x13c   : > { %v2781_v15 = vor.u32 %v2780_v12, %v2777_v32  ;;  %v10480_v34 = vrot.slane %v4123_v19, 9  ;;  %v2539_v30 = vld [vmem:[#allocation2 + $0x80] sm:$0x1]  ;;  %1280 = vst [vmem:[#allocation2 + $0x8c] sm:$0x1] %v1279_v21  ;;  %v13329_v45 = vrot.slane %v3828_v42, 5 }
 0x13d   : > { %v3084_v31 = vld [vmem:[#allocation2 + $0x80] sm:$0x1]  ;;  %v2794_v61 = vshll.u32 %v2539_v30, 16  ;;  %v3797_v18 = vrot.slane %v3795_v57, 4  ;;  %v3800_v20 = vrot.slane %v3798_v54, 5  ;;  %v3834_v13 = vrot.slane %v3832_v24, 4 }
 0x13e   : > { %v3580_v27 = vld [vmem:[#allocation2 + $0x80] sm:$0x1]  ;;  %v2782_v40 = vrot.slane %v2781_v15, 4  ;;  %v3219_v44 = vrot.slane %v3084_v31, 5  ;;  %vm16679_vm11 = vcmask 162944   ;;  %v943_v29 = vshrl.u32 %v13313_v25, 16 }
 0x13f   : > { %v3814_v43 = vshll.u32 %v3580_v27, 16  ;;  %v4125_v7 = vld [vmem:[#allocation2 + $0x80] sm:$0x1]  ;;  %3043 = vst.msk [vmem:[#allocation3 + $0x20] sm:$0xff] %vm16679_vm11, %v2999_v50  ;;  %v2796_v38 = vrot.slane %v2794_v61, 5  ;;  %vm16680_vm13 = vcmask 97344   ;;  %v3801_v12 = vor.u32 %v3800_v20, %v3797_v18 }
 0x140   : > { %v2787_v51 = vsel %vm12235_vm1, %v2782_v40, %v13256_v39  ;;  %v3220_v26 = vsel %vm12164_vm8, %v13272_v8, %v3219_v44  ;;  %2322 = vst.msk [vmem:[#allocation3 + $0x28] sm:$0xff] %vm16680_vm13, %v2279_v63  ;;  %v4423_v32 = vld [vmem:[#allocation3 + $0x18] sm:$0xff]  ;;  %v3835_v58 = vor.u32 %v3834_v13, %v13329_v45  ;;  %v4127_v22 = vld [vmem:[#allocation2 + $0x88] sm:$0xf]  ;;  %v13344_v57 = vor.u32 %v938_v4, %v13293_v47  ;;  %v3581_v54 = vld [vmem:[#allocation2 + $0x84] sm:$0xf] }
 0x141   : > { %v3816_v36 = vrot.slane %v3814_v43, 5  ;;  %11520 = vmatmul.mubr.msk.bf16.gmra.mrb[4].mxu0 %vm4463_vm3, %v4423_v32  ;;  %v2797_v39 = vsel %vm12235_vm1, %v13286_v3, %v2796_v38  ;;  %v10433_v8 = vcombine.low %v13320_v6, %v3220_v26  ;;  %v4254_v62 = vsel %vm12164_vm8, %v10480_v34, %v4253_v5  ;;  %v4126_v42 = vld [vmem:[#allocation2 + $0x84] sm:$0xe]  ;;  %v1491_v24 = vld [vmem:[#allocation2 + $0x78] sm:$0xf]  ;;  %v2456_v3 = vpop.permute.xlu1 %2455  ;;  %3364 = vst.msk [vmem:[#allocation3 + $0x20] sm:$0xff] %vm3359_vm2, %v3320_v46  ;;  %v3498_v43 = vpop.permute.xlu0 %3497 }
 0x142   : > { %v4256_v19 = vrot.slane %v4125_v7, 5  ;;  %v10401_v15 = vcombine.low %v2787_v51, %v2797_v39  ;;  %v3802_v17 = vrot.slane %v3801_v12, 4  ;;  %v3819_v49 = vshrl.u32 %v3581_v54, 16  ;;  %v1493_v34 = vld [vmem:[#allocation2 + $0x80] sm:$0x1]  ;;  %3542 = vst.msk [vmem:[#allocation3 + $0x20] sm:$0xff] %vm16621_vm5, %v3498_v43 }
 0x143   : > { %v3817_v4 = vsel %vm12235_vm1, %v13309_v37, %v3816_v36  ;;  %v3822_v30 = vshll.u32 %v3581_v54, 16  ;;  %v3836_v31 = vrot.slane %v3835_v58, 4  ;;  %v10481_v5 = vrot.slane %v4126_v42, 9  ;;  %v3583_v6 = vld [vmem:[#allocation2 + $0x8c] sm:$0x1]  ;;  %v11672_v36 = vld [vmem:[#allocation2 + $0x84] sm:$0xff]  }
 0x144   : > { %v4257_v48 = vsel %vm12164_vm8, %v13278_v35, %v4256_v19  ;;  %vm16681_vm11 = vcmask 130144   ;;  %3008 = vrot.lane.b32.xlu1 %v10401_v15, %s12039_s27  ;;  %v3807_v37 = vsel %vm12235_vm1, %v3802_v17, %v13268_v56  ;;  %v3821_v27 = vrot.slane %v3819_v49, 4  ;;  %v4128_v40 = vld [vmem:[#allocation2 + $0x8c] sm:$0x1]  ;;  %v1494_v35 = vld [vmem:[#allocation2 + $0x84] sm:$0xf] }
 0x145   : > { %2499 = vst.msk [vmem:[#allocation3 + $0x28] sm:$0xff] %vm16681_vm11, %v2456_v3  ;;  %v10496_v21 = vcombine.low %v4254_v62, %v4257_v48  ;;  %v4260_v61 = vrot.slane %v4127_v22, 5  ;;  %v10464_v44 = vcombine.low %v3807_v37, %v3817_v4  ;;  %v3824_v18 = vrot.slane %v3822_v30, 5  ;;  %v1495_v12 = vld [vmem:[#allocation2 + $0x88] sm:$0xf] }
 0x146   : > { %v3838_v50 = vshll.u32 %v3583_v6, 16  ;;  %v4263_v20 = vrot.slane %v4128_v40, 5  ;;  %v1753_v63 = vshrl.u32 %v1491_v24, 16  ;;  %v1756_v51 = vshll.u32 %v1491_v24, 16  ;;  %v1496_v54 = vld [vmem:[#allocation2 + $0x8c] sm:$0x1] }
 0x147   : > { %v13369_v13 = vsel %vm12164_vm8, %v10481_v5, %v4260_v61  ;;  %v4262_v7 = vrot.slane %v4260_v61, 4  ;;  %4050 = vrot.lane.b32.xlu0 %v10464_v44, %s12040_s29  ;;  %v3825_v56 = vor.u32 %v3824_v18, %v3821_v27  ;;  %v1770_v26 = vrot.slane %v1769_v59, 4  ;;  %v2039_v49 = vld [vmem:[#allocation2 + $0x78] sm:$0xe]  ;;  %v2042_v48 = vld [vmem:[#allocation2 + $0x84] sm:$0xe] }
 0x148   : > { %v3840_v38 = vrot.slane %v3838_v50, 5  ;;  %v1772_v32 = vshll.u32 %v1493_v34, 16  ;;  %3329 = vrot.lane.b32.xlu1 %v10433_v8, %s12037_s24  ;;  %v1755_v22 = vrot.slane %v1753_v63, 4  ;;  %v1758_v39 = vrot.slane %v1756_v51, 5  ;;  %v2043_v27 = vld [vmem:[#allocation2 + $0x88] sm:$0xf]  ;;  %v3001_v50 = vpop.permute.xlu1 %3000 }
 0x149   : > { %v13379_v58 = vsel %vm12164_vm8, %v4262_v7, %v4263_v20  ;;  %v1777_v62 = vshrl.u32 %v1494_v35, 16  ;;  %v3826_v19 = vrot.slane %v3825_v56, 4  ;;  %v1780_v8 = vshll.u32 %v1494_v35, 16  ;;  %v642_v40 = vld [vmem:[%s12172_s28 + $0xc8] sm:$0xff]  ;;  %v1150_v63 = vld [vmem:[#allocation2 + $0x90] sm:$0xf] }
 0x14a   : > { %v3841_v46 = vsel %vm12235_vm1, %v3836_v31, %v3840_v38  ;;  %v10497_v52 = vcombine.low %v13369_v13, %v13379_v58  ;;  %v1774_v59 = vrot.slane %v1772_v32, 5  ;;  %v1759_v15 = vor.u32 %v1758_v39, %v1755_v22  ;;  %v2041_v31 = vld [vmem:[#allocation2 + $0x80] sm:$0x1]  ;;  %v2044_v18 = vld [vmem:[#allocation2 + $0x8c] sm:$0x1]  ;;  %v4043_v56 = vpop.permute.xlu0 %4042 }
 0x14b   : > { %v1779_v17 = vrot.slane %v1777_v62, 4  ;;  %v1786_v4 = vshll.u32 %v1495_v12, 16  ;;  %v3831_v42 = vsel %vm12235_vm1, %v3826_v19, %v13329_v45  ;;  %4371 = vrot.lane.b32.xlu0 %v10496_v21, %s12038_s26  ;;  %v1790_v3 = vshrl.u32 %v1495_v12, 16  ;;  %v2540_v51 = vld [vmem:[#allocation2 + $0x84] sm:$0xf] }
 0x14c   : > { %v1775_v24 = vsel %vm12235_vm1, %v1770_v26, %v1774_v59  ;;  %v1796_v30 = vshll.u32 %v1496_v54, 16  ;;  %3507 = vrot.lane.b32.xlu1 %v11672_v36, %s12036_s22  ;;  %v10465_v5 = vcombine.low %v3831_v42, %v3841_v46  ;;  %v1760_v34 = vrot.slane %v1759_v15, 4  ;;  %v2541_v36 = vld [vmem:[#allocation2 + $0x88] sm:$0xf]  ;;  %v2542_v62 = vld [vmem:[#allocation2 + $0x8c] sm:$0x1]  ;;  %v3322_v15 = vpop.permute.xlu1 %3321 }
 0x14d   : > { %v1782_v37 = vrot.slane %v1780_v8, 5  ;;  %v1788_v6 = vrot.slane %v1786_v4, 5  ;;  %v1792_v61 = vrot.slane %v1790_v3, 4  ;;  %v10354_v45 = vrot.slane %v2039_v49, 9  ;;  %v481_v46 = vld [vmem:[#allocation2 + $0x98] sm:$0x1] }
 0x14e   : > { %v1798_v44 = vrot.slane %v1796_v30, 5  ;;  %v2182_v21 = vrot.slane %v2180_v0, 4  ;;  %v1765_v20 = vsel %vm12235_vm1, %v1760_v34, %v13288_v55  ;;  %v2183_v43 = vrot.slane %v2041_v31, 5  ;;  %v13424_v49 = vld [vmem:[#allocation2 + $0x84] sm:$0xe] }
 0x14f   : > { %v1783_v35 = vor.u32 %v1782_v37, %v1779_v17  ;;  %v10355_v7 = vrot.slane %v2042_v48, 9  ;;  %vm16682_vm13 = vcmask 162944   ;;  %v10338_v38 = vcombine.low %v1765_v20, %v1775_v24  ;;  %v13426_v42 = vld [vmem:[#allocation2 + $0x88] sm:$0xf]  ;;  %v4364_v24 = vpop.permute.xlu0 %4363 }
 0x150   : > { %3044 = vst.msk [vmem:[#allocation3 + $0x28] sm:$0xff] %vm16682_vm13, %v3001_v50  ;;  %v1793_v26 = vor.u32 %v1792_v61, %v1788_v6  ;;  %v2181_v32 = vsel %vm12164_vm8, %v10354_v45, %v2180_v0  ;;  %v2187_v12 = vrot.slane %v2043_v27, 5  ;;  %vm16683_vm11 = vcmask 261344   ;;  %4052 = vrot.lane.b32.xlu1 %v10465_v5, %s12040_s29  ;;  %v11677_v31 = vld [vmem:[#allocation2 + $0x84] sm:$0xff]   ;;  %v428_v5 = vld [vmem:[#allocation2 + $0x9c] sm:$0x1] }
 0x151   : > { %4087 = vst.msk [vmem:[#allocation3 + $0x20] sm:$0xff] %vm16683_vm11, %v4043_v56  ;;  %v1784_v55 = vrot.slane %v1783_v35, 4  ;;  %v2184_v22 = vsel %vm12164_vm8, %v2182_v21, %v2183_v43  ;;  %v2190_v39 = vrot.slane %v2044_v18, 5  ;;  %v13409_v54 = vrot.slane %v943_v29, 7  ;;  %1964 = vrot.lane.b32.xlu0 %v10338_v38, %s12034_s20  ;;  %v3087_v27 = vld [vmem:[#allocation2 + $0x8c] sm:$0x1]  ;;  %v3500_v21 = vpop.permute.xlu1 %3499 }
 0x152   : > { %v1794_v10 = vrot.slane %v1793_v26, 4  ;;  %v10370_v0 = vcombine.low %v2181_v32, %v2184_v22  ;;  %v2189_v19 = vrot.slane %v2187_v12, 4  ;;  %v13412_v59 = vpack.c.bf16 %v642_v40, %v642_v40  ;;  %3365 = vst.msk [vmem:[#allocation3 + $0x28] sm:$0xff] %vm3359_vm2, %v3322_v15  ;;  %v484_v50 = vld [vmem:[#allocation2 + $0xa4] sm:$0x1] }
 0x153   : > { %v1789_v17 = vsel %vm12235_vm1, %v1784_v55, %v1788_v6  ;;  %v13418_v8 = vsel %vm12164_vm8, %v10355_v7, %v2187_v12  ;;  %v946_v29 = vshll.u32 %v13313_v25, 16  ;;  %v1151_v4 = vsel %vm12210_vm15, %v13344_v57, %v1150_v63  ;;  %4408 = vst.msk [vmem:[#allocation3 + $0x20] sm:$0xff] %vm4403_vm14, %v4364_v24  ;;  %v1957_v20 = vpop.permute.xlu0 %1956  ;;  %v431_v38 = vld [vmem:[#allocation2 + $0xa8] sm:$0x1]  ;;  %v11692_v24 = vld [vmem:[#allocation2 + $0x6c] sm:$0xff]  }
 0x154   : > { %v1799_v3 = vsel %vm12235_vm1, %v1794_v10, %v1798_v44  ;;  %v2191_v30 = vsel %vm12164_vm8, %v2189_v19, %v2190_v39  ;;  %1152 = vst [vmem:[#allocation2 + $0x90] sm:$0xf] %v1151_v4  ;;  %v2799_v25 = vshrl.u32 %v2540_v51, 16  ;;  %v2802_v48 = vshll.u32 %v2540_v51, 16  ;;  %4373 = vrot.lane.b32.xlu1 %v10497_v52, %s12038_s26  ;;  %3543 = vst.msk [vmem:[#allocation3 + $0x28] sm:$0xff] %vm16621_vm5, %v3500_v21 }
 0x155   : > { %v10339_v57 = vcombine.low %v1789_v17, %v1799_v3  ;;  %v948_v34 = vor.u32 %v946_v29, %v13409_v54  ;;  %v950_v37 = vrot.slane %v13409_v54, 4  ;;  %v2808_v6 = vshll.u32 %v2541_v36, 16  ;;  %2288 = vrot.lane.b32.xlu0 %v10370_v0, %s12033_s19 }
 0x156   : > { %v2801_v40 = vrot.slane %v2799_v25, 4  ;;  %v2804_v61 = vrot.slane %v2802_v48, 5  ;;  %v2812_v44 = vshrl.u32 %v2541_v36, 16  ;;  %v2818_v45 = vshll.u32 %v2542_v62, 16 }
 0x157   : > { %v10371_v18 = vcombine.low %v13418_v8, %v2191_v30  ;;  %v949_v13 = vsel %vm12221_vm0, %v941_v28, %v948_v34  ;;  %v2810_v58 = vrot.slane %v2808_v6, 5  ;;  %v482_v52 = vsel %vm12150_vm6, 0, %v481_v46  ;;  %v11691_v8 = vld [vmem:[#allocation2 + $0x60] sm:$0xff]  }
 0x158   : > { %1153 = vst.msk [vmem:[#allocation2 + $0x94] sm:$0xf] %vm1068_vm12, %v949_v13  ;;  %v2805_v35 = vor.u32 %v2804_v61, %v2801_v40  ;;  %v2814_v43 = vrot.slane %v2812_v44, 4  ;;  %483 = vst [vmem:[#allocation2 + $0x98] sm:$0x1] %v482_v52  ;;  %v10418_v7 = vrot.slane %v13424_v49, 9  ;;  %1966 = vrot.lane.b32.xlu1 %v10339_v57, %s12034_s20 }
 0x159   : > { %v3223_v47 = vrot.slane %v13426_v42, 5  ;;  %vm16684_vm13 = vcmask 64544   ;;  %vm16685_vm11 = vcmask 27672   ;;  %v2820_v28 = vrot.slane %v2818_v45, 5  ;;  %2465 = vrot.lane.b32.xlu0 %v11677_v31, %s12035_s21 }
 0x15a   : > { %1999 = vst.msk [vmem:[#allocation3 + $0x30] sm:$0xff] %vm16684_vm13, %v1957_v20  ;;  %v3226_v63 = vrot.slane %v3087_v27, 5  ;;  %v429_v51 = vsel %vm12140_vm4, 0, %v428_v5  ;;  %v952_v56 = vshrl.u32 %v13327_v14, 16  ;;  %v2806_v26 = vrot.slane %v2805_v35, 4  ;;  %v4424_v15 = vld [vmem:[#allocation3 + $0x20] sm:$0xff] }
 0x15b   : > { %1284 = vst.msk [vmem:[#allocation2 + $0x94] sm:$0xf] %vm16685_vm11, %v12247_v23  ;;  %v2815_v32 = vor.u32 %v2814_v43, %v2810_v58  ;;  %v3225_v12 = vrot.slane %v3223_v47, 4  ;;  %430 = vst [vmem:[#allocation2 + $0x9c] sm:$0x1] %v429_v51  ;;  %v955_v36 = vshll.u32 %v13327_v14, 16  ;;  %11523 = vmatprep.mubr.msk.bf16.mxu0 %vm4463_vm3, %v4424_v15  ;;  %v3224_v4 = vsel %vm12164_vm8, %v10418_v7, %v3223_v47 }
 0x15c   : > { %v1281_v55 = vld [vmem:[#allocation2 + $0x90] sm:$0xf]  ;;  %v954_v22 = vrot.slane %v952_v56, 7  ;;  %v960_v39 = vshrl.u32 %v13412_v59, 16  ;;  %v963_v62 = vshll.u32 %v13412_v59, 16  ;;  %v485_v10 = vsel %vm12150_vm6, 0, %v484_v50  ;;  %2290 = vrot.lane.b32.xlu1 %v10371_v18, %s12033_s19  ;;  %v2281_v59 = vpop.permute.xlu0 %2280 }
 0x15d   : > { %v1282_v0 = vsel %vm12273_vm9, %v12247_v23, %v1281_v55  ;;  %v2811_v19 = vsel %vm12235_vm1, %v2806_v26, %v2810_v58  ;;  %v2816_v46 = vrot.slane %v2815_v32, 4  ;;  %486 = vst [vmem:[#allocation2 + $0xa4] sm:$0x1] %v485_v10  ;;  %v3227_v49 = vsel %vm12164_vm8, %v3225_v12, %v3226_v63  ;;  %v643_v5 = vld [vmem:[%s12172_s28 + $0xd0] sm:$0xff]  ;;  %v644_v20 = vld [vmem:[%s12172_s28 + $0xd8] sm:$0xff]  ;;  %v4045_v35 = vpop.permute.xlu1 %4044  ;;  %v645_v26 = vld [vmem:[%s12172_s28 + $0xe0] sm:$0xff] }
 0x15e   : > { %1283 = vst [vmem:[#allocation2 + $0x90] sm:$0xf] %v1282_v0  ;;  %v958_v14 = vrot.slane %v954_v22, 4  ;;  %v962_v17 = vrot.slane %v960_v39, 7  ;;  %v432_v42 = vsel %vm12140_vm4, 0, %v431_v38  ;;  %vm16686_vm13 = vcmask 97344  }
 0x15f   : > { %v2821_v29 = vsel %vm12235_vm1, %v2816_v46, %v2820_v28  ;;  %2323 = vst.msk [vmem:[#allocation3 + $0x30] sm:$0xff] %vm16686_vm13, %v2281_v59  ;;  %v1154_v30 = vld [vmem:[#allocation2 + $0x98] sm:$0x1]  ;;  %v957_v31 = vor.u32 %v955_v36, %v954_v22  ;;  %433 = vst [vmem:[#allocation2 + $0xa8] sm:$0x1] %v432_v42  ;;  %vm16687_vm11 = vcmask 31744   ;;  %v10434_v61 = vcombine.low %v3224_v4, %v3227_v49 }
 0x160   : > { %v10402_v3 = vcombine.low %v2811_v19, %v2821_v29  ;;  %v965_v25 = vor.u32 %v963_v62, %v962_v17  ;;  %v967_v48 = vrot.slane %v962_v17, 4  ;;  %1453 = vst.msk [vmem:[#allocation3 + $0x40] sm:$0xff] %vm16687_vm11, %v11691_v8  ;;  %v1155_v57 = vsel %vm12263_vm7, %v950_v37, %v1154_v30  ;;  %vm16688_vm5 = vmmov %vm16687_vm11  ;;  %v2458_v45 = vpop.permute.xlu0 %2457  ;;  %v646_v62 = vld [vmem:[%s12172_s28 + $0xe8] sm:$0xff] }
 0x161   : > { %1454 = vst.msk [vmem:[#allocation3 + $0x48] sm:$0xff] %vm16688_vm5, %v11692_v24  ;;  %1156 = vst [vmem:[#allocation2 + $0x98] sm:$0x1] %v1155_v57  ;;  %v13494_v21 = vpack.c.bf16 %v643_v5, %v643_v5  ;;  %vm16689_vm13 = vcmask 130144   ;;  %vm16690_vm5 = vcmask 27672   ;;  %vm16691_vm11 = vcmask 261344  }
 0x162   : > { %v2544_v34 = vld [vmem:[#allocation2 + $0x94] sm:$0xf]  ;;  %3010 = vrot.lane.b32.xlu0 %v10402_v3, %s12039_s27  ;;  %v966_v44 = vsel %vm12221_vm0, %v958_v14, %v965_v25  ;;  %v1157_v54 = vld [vmem:[#allocation2 + $0x9c] sm:$0xf]  ;;  %2500 = vst.msk [vmem:[#allocation3 + $0x30] sm:$0xff] %vm16689_vm13, %v2458_v45  ;;  %v13516_v22 = vpack.c.bf16 %v644_v20, %v644_v20  ;;  %v4366_v14 = vpop.permute.xlu1 %4365  ;;  %vm16692_vm13 = vcmask 64544  }
 0x163   : > { %v13487_v6 = vld [vmem:[#allocation2 + $0x94] sm:$0xf]  ;;  %v2832_v27 = vshll.u32 %v2544_v34, 16  ;;  %v2836_v40 = vshrl.u32 %v2544_v34, 16  ;;  %1160 = vst.msk [vmem:[#allocation2 + $0xa0] sm:$0xf] %vm1068_vm12, %v966_v44  ;;  %v1158_v52 = vsel %vm12210_vm15, %v957_v31, %v1157_v54 }
 0x164   : > { %v3585_v37 = vld [vmem:[#allocation2 + $0x94] sm:$0xf]  ;;  %v3230_v58 = vrot.slane %v13487_v6, 5  ;;  %1291 = vst.msk [vmem:[#allocation2 + $0xa0] sm:$0xf] %vm16690_vm5, %v12247_v23  ;;  %v969_v39 = vshrl.u32 %v13494_v21, 16 }
 0x165   : > { %v13497_v18 = vrot.slane %v2832_v27, 5  ;;  %v2838_v13 = vrot.slane %v2836_v40, 4  ;;  %v1161_v50 = vld [vmem:[#allocation2 + $0xa4] sm:$0x1]  ;;  %v11678_v43 = vld [vmem:[#allocation2 + $0x90] sm:$0xff]   ;;  %v3852_v47 = vshll.u32 %v3585_v37, 16  ;;  %v13537_v27 = vpack.c.bf16 %v645_v26, %v645_v26 }
 0x166   : > { %v2543_v7 = vld [vmem:[#allocation2 + $0x90] sm:$0xf]  ;;  %1159 = vst [vmem:[#allocation2 + $0x9c] sm:$0xf] %v1158_v52  ;;  %v1162_v28 = vsel %vm12263_vm7, %v967_v48, %v1161_v50  ;;  %4088 = vst.msk [vmem:[#allocation3 + $0x28] sm:$0xff] %vm16691_vm11, %v4045_v35  ;;  %3331 = vrot.lane.b32.xlu0 %v10434_v61, %s12037_s24  ;;  %2467 = vrot.lane.b32.xlu1 %v11678_v43, %s12035_s21  ;;  %v3856_v55 = vshrl.u32 %v3585_v37, 16  ;;  %v1959_v54 = vpop.permute.xlu1 %1958  ;;  %v13539_v37 = vpack.c.bf16 %v646_v62, %v646_v62 }
 0x167   : > { %v2823_v63 = vshrl.u32 %v2543_v7, 16  ;;  %v2826_v51 = vshll.u32 %v2543_v7, 16  ;;  %v2839_v56 = vor.u32 %v2838_v13, %v13497_v18  ;;  %v13510_v38 = vld [vmem:[#allocation2 + $0x90] sm:$0xe]  ;;  %1163 = vst [vmem:[#allocation2 + $0xa4] sm:$0x1] %v1162_v28 }
 0x168   : > { %v11681_v32 = vld [vmem:[#allocation2 + $0x90] sm:$0xff]   ;;  %v13514_v36 = vrot.slane %v3852_v47, 5  ;;  %v972_v15 = vshll.u32 %v13494_v21, 16  ;;  %v1285_v17 = vld [vmem:[#allocation2 + $0x98] sm:$0x1]  ;;  %v10419_v59 = vrot.slane %v13510_v38, 9 }
 0x169   : > { %v3584_v12 = vld [vmem:[#allocation2 + $0x90] sm:$0xf]  ;;  %v2825_v10 = vrot.slane %v2823_v63, 4  ;;  %v2828_v0 = vrot.slane %v2826_v51, 5  ;;  %v13520_v46 = vld [vmem:[#allocation2 + $0x94] sm:$0xf]  ;;  %v1286_v49 = vsel %vm12323_vm10, %v12247_v23, %v1285_v17 }
 0x16a   : > { %v3843_v19 = vshrl.u32 %v3584_v12, 16  ;;  %v13526_v8 = vrot.slane %v3230_v58, 4  ;;  %v3846_v29 = vshll.u32 %v3584_v12, 16  ;;  %v3858_v4 = vrot.slane %v3856_v55, 4  ;;  %4409 = vst.msk [vmem:[#allocation3 + $0x28] sm:$0xff] %vm4403_vm14, %v4366_v14  ;;  %3509 = vrot.lane.b32.xlu0 %v11681_v32, %s12036_s22  ;;  %v11695_v13 = vld [vmem:[#allocation2 + $0x78] sm:$0xff]   ;;  %v2283_v17 = vpop.permute.xlu1 %2282 }
 0x16b   : > { %v2829_v42 = vor.u32 %v2828_v0, %v2825_v10  ;;  %v13532_v24 = vrot.slane %v2839_v56, 4  ;;  %v4129_v30 = vld [vmem:[#allocation2 + $0x90] sm:$0xe]  ;;  %1287 = vst [vmem:[#allocation2 + $0x98] sm:$0x1] %v1286_v49  ;;  %v4267_v57 = vrot.slane %v13520_v46, 5  ;;  %v3003_v10 = vpop.permute.xlu0 %3002 }
 0x16c   : > { %v3845_v3 = vrot.slane %v3843_v19, 4  ;;  %v1497_v31 = vld [vmem:[#allocation2 + $0x90] sm:$0xf]  ;;  %v3848_v25 = vrot.slane %v3846_v29, 5  ;;  %v3859_v48 = vor.u32 %v3858_v4, %v13514_v36  ;;  %v3588_v5 = vld [vmem:[#allocation2 + $0xa0] sm:$0xf] }
 0x16d   : > { %v1498_v34 = vld [vmem:[#allocation2 + $0x94] sm:$0xf]  ;;  %v1288_v40 = vld [vmem:[#allocation2 + $0x9c] sm:$0xf]  ;;  %v3876_v61 = vshll.u32 %v3588_v5, 16  ;;  %v3880_v44 = vshrl.u32 %v3588_v5, 16  ;;  %v13584_v5 = vsel %vm12164_vm8, %v10419_v59, %v3230_v58 }
 0x16e   : > { %v1801_v45 = vshrl.u32 %v1497_v31, 16  ;;  %v13541_v52 = vrot.slane %v2829_v42, 4  ;;  %v1289_v50 = vsel %vm12273_vm9, %v12247_v23, %v1288_v40  ;;  %v3849_v20 = vor.u32 %v3848_v25, %v3845_v3  ;;  %v1292_v35 = vld [vmem:[#allocation2 + $0xa4] sm:$0x1]  ;;  %v13546_v7 = vld [vmem:[#allocation2 + $0xa0] sm:$0xf] }
 0x16f   : > { %v10482_v43 = vrot.slane %v4129_v30, 9  ;;  %2000 = vst.msk [vmem:[#allocation3 + $0x38] sm:$0xff] %vm16692_vm13, %v1959_v54  ;;  %1290 = vst [vmem:[#allocation2 + $0x9c] sm:$0xf] %v1289_v50  ;;  %v13549_v47 = vrot.slane %v3859_v48, 4  ;;  %v1293_v28 = vsel %vm12323_vm10, %v12247_v23, %v1292_v35  ;;  %v13554_v63 = vrot.slane %v3876_v61, 5  ;;  %v3324_v38 = vpop.permute.xlu0 %3323 }
 0x170   : > { %v3882_v51 = vrot.slane %v3880_v44, 4  ;;  %v13556_v56 = vld [vmem:[#allocation2 + $0xa0] sm:$0xf]  ;;  %v647_v26 = vld [vmem:[%s12172_s28 + $0xf0] sm:$0xff]  ;;  %vm16693_vm5 = vcmask 31744   ;;  %v3850_v32 = vrot.slane %v3849_v20, 4  ;;  %v2835_v25 = vsel %vm12235_vm1, %v13541_v52, %v13497_v18 }
 0x171   : > { %1455 = vst.msk [vmem:[#allocation3 + $0x50] sm:$0xff] %vm16693_vm5, %v11695_v13  ;;  %1294 = vst [vmem:[#allocation2 + $0xa4] sm:$0x1] %v1293_v28  ;;  %v4269_v12 = vrot.slane %v4267_v57, 4  ;;  %v4274_v55 = vrot.slane %v13546_v7, 5  ;;  %v1804_v62 = vshll.u32 %v1497_v31, 16  ;;  %v13572_v3 = vpack.c.bf16 %v647_v26, %v647_v26 }
 0x172   : > { %v3883_v0 = vor.u32 %v3882_v51, %v13554_v63  ;;  %v13562_v19 = vrot.slane %v1801_v45, 4  ;;  %v1810_v46 = vshll.u32 %v1498_v34, 16  ;;  %v1814_v14 = vshrl.u32 %v1498_v34, 16  ;;  %v4425_v29 = vld [vmem:[#allocation3 + $0x28] sm:$0xff]  ;;  %v2545_v31 = vld [vmem:[#allocation2 + $0x98] sm:$0x1] }
 0x173   : > { %vm16694_vm11 = vcmask 162944   ;;  %v13567_v4 = vrot.slane %v4274_v55, 4  ;;  %v1806_v49 = vrot.slane %v1804_v62, 5  ;;  %v1834_v42 = vshll.u32 %v13556_v56, 16  ;;  %11524 = vmatmul.mubr.msk.bf16.gmra.mrb[8].mxu0 %vm4463_vm3, %v4425_v29  ;;  %v11696_v30 = vld [vmem:[#allocation2 + $0x84] sm:$0xff]  }
 0x174   : > { %3045 = vst.msk [vmem:[#allocation3 + $0x30] sm:$0xff] %vm16694_vm11, %v3003_v10  ;;  %vm16695_vm13 = vcmask 97344   ;;  %v3090_v48 = vld [vmem:[#allocation2 + $0x98] sm:$0x1]  ;;  %v3855_v40 = vsel %vm12235_vm1, %v3850_v32, %v13514_v36  ;;  %v13591_v61 = vsel %vm12164_vm8, %v10482_v43, %v4267_v57  ;;  %v2842_v44 = vshll.u32 %v2545_v31, 16  ;;  %v2460_v43 = vpop.permute.xlu1 %2459 }
 0x175   : > { %2324 = vst.msk [vmem:[#allocation3 + $0x38] sm:$0xff] %vm16695_vm13, %v2283_v17  ;;  %v3586_v34 = vld [vmem:[#allocation2 + $0x98] sm:$0x1]  ;;  %v3233_v18 = vrot.slane %v3090_v48, 5  ;;  %v1838_v6 = vshrl.u32 %v13556_v56, 16  ;;  %v13595_v58 = vrot.slane %v3883_v0, 4  ;;  %v1807_v10 = vor.u32 %v1806_v49, %v13562_v19 }
 0x176   : > { %v3862_v45 = vshll.u32 %v3586_v34, 16  ;;  %v4131_v54 = vld [vmem:[#allocation2 + $0x98] sm:$0x1]  ;;  %1456 = vst.msk [vmem:[#allocation3 + $0x58] sm:$0xff] %vm16693_vm5, %v11696_v30  ;;  %v1812_v52 = vrot.slane %v1810_v46, 5  ;;  %v1816_v50 = vrot.slane %v1814_v14, 4  ;;  %v3502_v30 = vpop.permute.xlu0 %3501 }
 0x177   : > { %v4270_v59 = vrot.slane %v4131_v54, 5  ;;  %v1499_v13 = vld [vmem:[#allocation2 + $0x98] sm:$0x1]  ;;  %3366 = vst.msk [vmem:[#allocation3 + $0x30] sm:$0xff] %vm3359_vm2, %v3324_v38  ;;  %v2844_v36 = vrot.slane %v2842_v44, 5  ;;  %v3234_v57 = vsel %vm12164_vm8, %v13526_v8, %v3233_v18  ;;  %vm16696_vm11 = vcmask 130144  }
 0x178   : > { %v3864_v20 = vrot.slane %v3862_v45, 5  ;;  %v1820_v35 = vshll.u32 %v1499_v13, 16  ;;  %v10435_v28 = vcombine.low %v13584_v5, %v3234_v57  ;;  %v3587_v51 = vld [vmem:[#allocation2 + $0x9c] sm:$0xf]  ;;  %v3589_v26 = vld [vmem:[#allocation2 + $0xa4] sm:$0x1]  ;;  %v1817_v0 = vor.u32 %v1816_v50, %v1812_v52 }
 0x179   : > { %v4271_v32 = vsel %vm12164_vm8, %v4269_v12, %v4270_v59  ;;  %v4132_v62 = vld [vmem:[#allocation2 + $0x9c] sm:$0xe]  ;;  %2501 = vst.msk [vmem:[#allocation3 + $0x38] sm:$0xff] %vm16696_vm11, %v2460_v43  ;;  %v2845_v8 = vsel %vm12235_vm1, %v13532_v24, %v2844_v36  ;;  %v3867_v14 = vshrl.u32 %v3587_v51, 16  ;;  %v3870_v17 = vshll.u32 %v3587_v51, 16  ;;  %vm16698_vm11 = vmmov %vm16693_vm5 }
 0x17a   : > { %v3865_v46 = vsel %vm12235_vm1, %v13549_v47, %v3864_v20  ;;  %v4134_v29 = vld [vmem:[#allocation2 + $0xa4] sm:$0x1]  ;;  %v10403_v31 = vcombine.low %v2835_v25, %v2845_v8  ;;  %v3886_v48 = vshll.u32 %v3589_v26, 16  ;;  %v10498_v19 = vcombine.low %v13591_v61, %v4271_v32  ;;  %v1500_v49 = vld [vmem:[#allocation2 + $0x9c] sm:$0xf] }
 0x17b   : > { %v10466_v12 = vcombine.low %v3855_v40, %v3865_v46  ;;  %vm16697_vm13 = vcmask 228544   ;;  %v3869_v5 = vrot.slane %v3867_v14, 4  ;;  %v3872_v34 = vrot.slane %v3870_v17, 5  ;;  %v2045_v25 = vld [vmem:[#allocation2 + $0x90] sm:$0xe] }
 0x17c   : > { %3544 = vst.msk [vmem:[#allocation3 + $0x30] sm:$0xff] %vm16697_vm13, %v3502_v30  ;;  %v10483_v44 = vrot.slane %v4132_v62, 9  ;;  %v4277_v24 = vrot.slane %v4134_v29, 5  ;;  %3012 = vrot.lane.b32.xlu1 %v10403_v31, %s12039_s27  ;;  %v3888_v47 = vrot.slane %v3886_v48, 5  ;;  %v1808_v18 = vrot.slane %v1807_v10, 4  ;;  %v11682_v10 = vld [vmem:[#allocation2 + $0x9c] sm:$0xff]  }
 0x17d   : > { %4054 = vrot.lane.b32.xlu0 %v10466_v12, %s12040_s29  ;;  %v1818_v45 = vrot.slane %v1817_v0, 4  ;;  %v1822_v54 = vrot.slane %v1820_v35, 5  ;;  %v3873_v40 = vor.u32 %v3872_v34, %v3869_v5  ;;  %v1502_v38 = vld [vmem:[#allocation2 + $0xa4] sm:$0x1]  ;;  %v1825_v59 = vshrl.u32 %v1500_v49, 16 }
 0x17e   : > { %v13620_v61 = vsel %vm12164_vm8, %v10483_v44, %v4274_v55  ;;  %v977_v13 = vshrl.u32 %v13516_v22, 16  ;;  %v3889_v50 = vsel %vm12235_vm1, %v13595_v58, %v3888_v47  ;;  %v13629_v36 = vsel %vm12164_vm8, %v13567_v4, %v4277_v24  ;;  %v2046_v57 = vld [vmem:[#allocation2 + $0x94] sm:$0xf]  ;;  %v2047_v20 = vld [vmem:[#allocation2 + $0x98] sm:$0x1] }
 0x17f   : > { %v1813_v7 = vsel %vm12235_vm1, %v1808_v18, %v1812_v52  ;;  %v1823_v55 = vsel %vm12235_vm1, %v1818_v45, %v1822_v54  ;;  %v2049_v35 = vld [vmem:[#allocation2 + $0xa0] sm:$0xf]  ;;  %v3874_v43 = vrot.slane %v3873_v40, 4  ;;  %v1827_v26 = vrot.slane %v1825_v59, 4  ;;  %v2048_v62 = vld [vmem:[#allocation2 + $0x9c] sm:$0xe] }
 0x180   : > { %v10340_v51 = vcombine.low %v1813_v7, %v1823_v55  ;;  %v1828_v32 = vshll.u32 %v1500_v49, 16  ;;  %v11697_v58 = vld [vmem:[#allocation2 + $0x90] sm:$0xff]   ;;  %3333 = vrot.lane.b32.xlu1 %v10435_v28, %s12037_s24  ;;  %v1836_v4 = vrot.slane %v1834_v42, 5  ;;  %v1840_v52 = vrot.slane %v1838_v6, 4  ;;  %v2050_v30 = vld [vmem:[#allocation2 + $0xa4] sm:$0x1] }
 0x181   : > { %4375 = vrot.lane.b32.xlu0 %v10498_v19, %s12038_s26  ;;  %v1844_v0 = vshll.u32 %v1502_v38, 16  ;;  %v10356_v8 = vrot.slane %v2045_v25, 9  ;;  %v3879_v46 = vsel %vm12235_vm1, %v3874_v43, %v13554_v63  ;;  %v2194_v17 = vrot.slane %v2046_v57, 5  ;;  %1457 = vst.msk [vmem:[#allocation3 + $0x60] sm:$0xff] %vm16693_vm5, %v11697_v58  ;;  %v11698_v28 = vld [vmem:[#allocation2 + $0x9c] sm:$0xff]   ;;  %v3005_v58 = vpop.permute.xlu1 %3004 }
 0x182   : > { %v1830_v14 = vrot.slane %v1828_v32, 5  ;;  %v2197_v29 = vrot.slane %v2047_v20, 5  ;;  %v10467_v31 = vcombine.low %v3879_v46, %v3889_v50  ;;  %v1841_v12 = vor.u32 %v1840_v52, %v1836_v4  ;;  %v1164_v5 = vld [vmem:[#allocation2 + $0xa8] sm:$0xf]  ;;  %v2546_v34 = vld [vmem:[#allocation2 + $0x9c] sm:$0xf] }
 0x183   : > { %v1846_v48 = vrot.slane %v1844_v0, 5  ;;  %v10357_v42 = vrot.slane %v2048_v62, 9  ;;  %v2195_v56 = vsel %vm12164_vm8, %v10356_v8, %v2194_v17  ;;  %v2196_v6 = vrot.slane %v2194_v17, 4  ;;  %1458 = vst.msk [vmem:[#allocation3 + $0x68] sm:$0xff] %vm16698_vm11, %v11698_v28  ;;  %v2547_v18 = vld [vmem:[#allocation2 + $0xa0] sm:$0xf] }
 0x184   : > { %v1831_v19 = vor.u32 %v1830_v14, %v1827_v26  ;;  %v2201_v49 = vrot.slane %v2049_v35, 5  ;;  %3511 = vrot.lane.b32.xlu1 %v11682_v10, %s12036_s22  ;;  %v1842_v63 = vrot.slane %v1841_v12, 4  ;;  %v2204_v44 = vrot.slane %v2050_v30, 5  ;;  %v487_v38 = vld [vmem:[#allocation2 + $0xb0] sm:$0x1]  ;;  %v4047_v10 = vpop.permute.xlu0 %4046 }
 0x185   : > { %1968 = vrot.lane.b32.xlu0 %v10340_v51, %s12034_s20  ;;  %v971_v24 = vrot.slane %v969_v39, 7  ;;  %v13652_v47 = vrot.slane %v977_v13, 7  ;;  %v10499_v45 = vcombine.low %v13620_v61, %v13629_v36  ;;  %v2198_v25 = vsel %vm12164_vm8, %v2196_v6, %v2197_v29  ;;  %v11683_v39 = vld [vmem:[#allocation2 + $0x9c] sm:$0xff]   ;;  %v2548_v55 = vld [vmem:[#allocation2 + $0xa4] sm:$0x1] }
 0x186   : > { %v1832_v54 = vrot.slane %v1831_v19, 4  ;;  %v2203_v40 = vrot.slane %v2201_v49, 4  ;;  %v1847_v59 = vsel %vm12235_vm1, %v1842_v63, %v1846_v48  ;;  %v10372_v50 = vcombine.low %v2195_v56, %v2198_v25  ;;  %v3091_v35 = vld [vmem:[#allocation2 + $0x9c] sm:$0xe]  ;;  %v3092_v43 = vld [vmem:[#allocation2 + $0xa0] sm:$0xf] }
 0x187   : > { %v13662_v7 = vsel %vm12164_vm8, %v10357_v42, %v2201_v49  ;;  %v974_v13 = vor.u32 %v972_v15, %v971_v24  ;;  %v975_v57 = vrot.slane %v971_v24, 4  ;;  %v980_v20 = vshll.u32 %v13516_v22, 16  ;;  %v434_v51 = vld [vmem:[#allocation2 + $0xb4] sm:$0x1]  ;;  %v3093_v62 = vld [vmem:[#allocation2 + $0xa4] sm:$0x1]  ;;  %v3326_v49 = vpop.permute.xlu1 %3325 }
 0x188   : > { %v1837_v61 = vsel %vm12235_vm1, %v1832_v54, %v1836_v4  ;;  %v13670_v36 = vsel %vm12164_vm8, %v2203_v40, %v2204_v44  ;;  %4056 = vrot.lane.b32.xlu1 %v10467_v31, %s12040_s29  ;;  %v984_v21 = vrot.slane %v13652_v47, 4  ;;  %v2847_v32 = vshrl.u32 %v2546_v34, 16  ;;  %v490_v29 = vld [vmem:[#allocation2 + $0xbc] sm:$0x1]  ;;  %v437_v48 = vld [vmem:[#allocation2 + $0xc0] sm:$0x1] }
 0x189   : > { %v10341_v26 = vcombine.low %v1837_v61, %v1847_v59  ;;  %2292 = vrot.lane.b32.xlu0 %v10372_v50, %s12033_s19  ;;  %v1165_v15 = vsel %vm12210_vm15, %v974_v13, %v1164_v5  ;;  %v982_v4 = vor.u32 %v980_v20, %v13652_v47  ;;  %v2850_v22 = vshll.u32 %v2546_v34, 16  ;;  %v4368_v5 = vpop.permute.xlu0 %4367 }
 0x18a   : > { %1166 = vst [vmem:[#allocation2 + $0xa8] sm:$0xf] %v1165_v15  ;;  %v2856_v52 = vshll.u32 %v2547_v18, 16  ;;  %v2860_v0 = vshrl.u32 %v2547_v18, 16  ;;  %vm16699_vm13 = vcmask 162944   ;;  %vm16700_vm5 = vcmask 261344  }
 0x18b   : > { %3046 = vst.msk [vmem:[#allocation3 + $0x38] sm:$0xff] %vm16699_vm13, %v3005_v58  ;;  %v10373_v8 = vcombine.low %v13662_v7, %v13670_v36  ;;  %v2849_v46 = vrot.slane %v2847_v32, 4  ;;  %v2866_v14 = vshll.u32 %v2548_v55, 16  ;;  %v488_v17 = vsel %vm12150_vm6, 0, %v487_v38  ;;  %v3504_v55 = vpop.permute.xlu1 %3503 }
 0x18c   : > { %4089 = vst.msk [vmem:[#allocation3 + $0x30] sm:$0xff] %vm16700_vm5, %v4047_v10  ;;  %v983_v30 = vsel %vm12221_vm0, %v975_v57, %v982_v4  ;;  %v2852_v28 = vrot.slane %v2850_v22, 5  ;;  %v2858_v31 = vrot.slane %v2856_v52, 5  ;;  %v2862_v12 = vrot.slane %v2860_v0, 4  ;;  %489 = vst [vmem:[#allocation2 + $0xb0] sm:$0x1] %v488_v17  ;;  %4377 = vrot.lane.b32.xlu1 %v10499_v45, %s12038_s26 }
 0x18d   : > { %2469 = vrot.lane.b32.xlu0 %v11683_v39, %s12035_s21  ;;  %1167 = vst.msk [vmem:[#allocation2 + $0xac] sm:$0xf] %vm1068_vm12, %v983_v30  ;;  %v2868_v42 = vrot.slane %v2866_v14, 5  ;;  %v10420_v19 = vrot.slane %v3091_v35, 9  ;;  %v3237_v56 = vrot.slane %v3092_v43, 5  ;;  %v435_v6 = vsel %vm12140_vm4, 0, %v434_v51  ;;  %v1961_v61 = vpop.permute.xlu0 %1960 }
 0x18e   : > { %vm16701_vm11 = vcmask 27672   ;;  %v2853_v34 = vor.u32 %v2852_v28, %v2849_v46  ;;  %v2863_v63 = vor.u32 %v2862_v12, %v2858_v31  ;;  %v3240_v44 = vrot.slane %v3093_v62, 5  ;;  %436 = vst [vmem:[#allocation2 + $0xb4] sm:$0x1] %v435_v6  ;;  %3367 = vst.msk [vmem:[#allocation3 + $0x38] sm:$0xff] %vm3359_vm2, %v3326_v49 }
 0x18f   : > { %1298 = vst.msk [vmem:[#allocation2 + $0xac] sm:$0xf] %vm16701_vm11, %v12247_v23  ;;  %v986_v24 = vshrl.u32 %v13537_v27, 16  ;;  %v3239_v18 = vrot.slane %v3237_v56, 4  ;;  %v989_v45 = vshll.u32 %v13537_v27, 16  ;;  %v994_v54 = vshrl.u32 %v13539_v37, 16  ;;  %v4049_v0 = vpop.permute.xlu1 %4048 }
 0x190   : > { %4410 = vst.msk [vmem:[#allocation3 + $0x30] sm:$0xff] %vm4403_vm14, %v4368_v5  ;;  %v997_v25 = vshll.u32 %v13539_v37, 16  ;;  %v2854_v40 = vrot.slane %v2853_v34, 4  ;;  %v2864_v38 = vrot.slane %v2863_v63, 4  ;;  %v491_v50 = vsel %vm12150_vm6, 0, %v490_v29  ;;  %1970 = vrot.lane.b32.xlu1 %v10341_v26, %s12034_s20 }
 0x191   : > { %v988_v59 = vrot.slane %v986_v24, 7  ;;  %v1295_v7 = vld [vmem:[#allocation2 + $0xa8] sm:$0xf]  ;;  %v3238_v39 = vsel %vm12164_vm8, %v10420_v19, %v3237_v56  ;;  %v996_v13 = vrot.slane %v994_v54, 7  ;;  %492 = vst [vmem:[#allocation2 + $0xbc] sm:$0x1] %v491_v50  ;;  %v3241_v35 = vsel %vm12164_vm8, %v3239_v18, %v3240_v44 }
 0x192   : > { %v438_v27 = vsel %vm12140_vm4, 0, %v437_v48  ;;  %v1003_v37 = vshrl.u32 %v13572_v3, 16  ;;  %v1296_v36 = vsel %vm12273_vm9, %v12247_v23, %v1295_v7  ;;  %v2859_v57 = vsel %vm12235_vm1, %v2854_v40, %v2858_v31 }
 0x193   : > { %v2869_v20 = vsel %vm12235_vm1, %v2864_v38, %v2868_v42  ;;  %vm16702_vm13 = vcmask 228544   ;;  %439 = vst [vmem:[#allocation2 + $0xc0] sm:$0x1] %v438_v27  ;;  %vm16703_vm5 = vcmask 64544   ;;  %1297 = vst [vmem:[#allocation2 + $0xa8] sm:$0xf] %v1296_v36  ;;  %v999_v15 = vor.u32 %v997_v25, %v996_v13  ;;  %v4370_v5 = vpop.permute.xlu1 %4369 }
 0x194   : > { %3545 = vst.msk [vmem:[#allocation3 + $0x38] sm:$0xff] %vm16702_vm13, %v3504_v55  ;;  %v10404_v43 = vcombine.low %v2859_v57, %v2869_v20  ;;  %v1168_v51 = vld [vmem:[#allocation2 + $0xb0] sm:$0x1]  ;;  %v992_v26 = vrot.slane %v988_v59, 4  ;;  %v991_v62 = vor.u32 %v989_v45, %v988_v59  ;;  %v1001_v58 = vrot.slane %v996_v13, 4  ;;  %2294 = vrot.lane.b32.xlu1 %v10373_v8, %s12033_s19  ;;  %v2285_v8 = vpop.permute.xlu0 %2284 }
 0x195   : > { %2001 = vst.msk [vmem:[#allocation3 + $0x40] sm:$0xff] %vm16703_vm5, %v1961_v61  ;;  %v1169_v32 = vsel %vm12263_vm7, %v984_v21, %v1168_v51  ;;  %v10436_v4 = vcombine.low %v3238_v39, %v3241_v35  ;;  %v13730_v21 = vrot.slane %v1003_v37, 7  ;;  %vm16704_vm11 = vcmask 261344   ;;  %v1171_v17 = vld [vmem:[#allocation2 + $0xb4] sm:$0xf] }
 0x196   : > { %3014 = vrot.lane.b32.xlu0 %v10404_v43, %s12039_s27  ;;  %1170 = vst [vmem:[#allocation2 + $0xb0] sm:$0x1] %v1169_v32  ;;  %v2550_v10 = vld [vmem:[#allocation2 + $0xac] sm:$0xf]  ;;  %v1000_v52 = vsel %vm12221_vm0, %v992_v26, %v999_v15  ;;  %4090 = vst.msk [vmem:[#allocation3 + $0x38] sm:$0xff] %vm16704_vm11, %v4049_v0  ;;  %vm16705_vm13 = vcmask 27672   ;;  %v1172_v12 = vsel %vm12210_vm15, %v991_v62, %v1171_v17 }
 0x197   : > { %v13725_v22 = vld [vmem:[#allocation2 + $0xac] sm:$0xf]  ;;  %v2880_v46 = vshll.u32 %v2550_v10, 16  ;;  %v2884_v47 = vshrl.u32 %v2550_v10, 16  ;;  %1174 = vst.msk [vmem:[#allocation2 + $0xb8] sm:$0xf] %vm1068_vm12, %v1000_v52  ;;  %v1963_v27 = vpop.permute.xlu1 %1962 }
 0x198   : > { %v4426_v14 = vld [vmem:[#allocation3 + $0x30] sm:$0xff]  ;;  %1305 = vst.msk [vmem:[#allocation2 + $0xb8] sm:$0xf] %vm16705_vm13, %v12247_v23  ;;  %vm16706_vm5 = vcmask 97344   ;;  %v3244_v31 = vrot.slane %v13725_v22, 5  ;;  %v1006_v42 = vshll.u32 %v13572_v3, 16  ;;  %v2462_v24 = vpop.permute.xlu0 %2461 }
 0x199   : > { %v3591_v29 = vld [vmem:[#allocation2 + $0xac] sm:$0xf]  ;;  %2325 = vst.msk [vmem:[#allocation3 + $0x40] sm:$0xff] %vm16706_vm5, %v2285_v8  ;;  %11527 = vmatprep.mubr.msk.bf16.mxu0 %vm4463_vm3, %v4426_v14  ;;  %v13739_v28 = vrot.slane %v2880_v46, 5  ;;  %v1175_v48 = vld [vmem:[#allocation2 + $0xbc] sm:$0x1] }
 0x19a   : > { %v13735_v30 = vld [vmem:[#allocation2 + $0xac] sm:$0xf]  ;;  %v2886_v19 = vrot.slane %v2884_v47, 4  ;;  %3335 = vrot.lane.b32.xlu0 %v10436_v4, %s12037_s24  ;;  %1173 = vst [vmem:[#allocation2 + $0xb4] sm:$0xf] %v1172_v12  ;;  %v3900_v56 = vshll.u32 %v3591_v29, 16  ;;  %v1176_v49 = vsel %vm12263_vm7, %v1001_v58, %v1175_v48 }
 0x19b   : > { %v3904_v6 = vshrl.u32 %v3591_v29, 16  ;;  %v11684_v34 = vld [vmem:[#allocation2 + $0xa8] sm:$0xff]   ;;  %1177 = vst [vmem:[#allocation2 + $0xbc] sm:$0x1] %v1176_v49  ;;  %v4281_v44 = vrot.slane %v13735_v30, 5  ;;  %4411 = vst.msk [vmem:[#allocation3 + $0x38] sm:$0xff] %vm4403_vm14, %v4370_v5  ;;  %v2287_v8 = vpop.permute.xlu1 %2286 }
 0x19c   : > { %v2549_v63 = vld [vmem:[#allocation2 + $0xa8] sm:$0xf]  ;;  %v13750_v54 = vld [vmem:[#allocation2 + $0xac] sm:$0xf]  ;;  %vm16707_vm11 = vcmask 130144   ;;  %2471 = vrot.lane.b32.xlu1 %v11684_v34, %s12035_s21  ;;  %v13754_v59 = vrot.slane %v3900_v56, 5  ;;  %v2887_v37 = vor.u32 %v2886_v19, %v13739_v28 }
 0x19d   : > { %v2871_v18 = vshrl.u32 %v2549_v63, 16  ;;  %v2874_v45 = vshll.u32 %v2549_v63, 16  ;;  %2502 = vst.msk [vmem:[#allocation3 + $0x40] sm:$0xff] %vm16707_vm11, %v2462_v24  ;;  %v1299_v25 = vld [vmem:[#allocation2 + $0xb0] sm:$0x1]  ;;  %v11687_v38 = vld [vmem:[#allocation2 + $0xa8] sm:$0xff]   ;;  %v3007_v63 = vpop.permute.xlu0 %3006 }
 0x19e   : > { %v3094_v40 = vld [vmem:[#allocation2 + $0xa8] sm:$0xe]  ;;  %v1300_v50 = vsel %vm12323_vm10, %v12247_v23, %v1299_v25  ;;  %v3906_v55 = vrot.slane %v3904_v6, 4  ;;  %3513 = vrot.lane.b32.xlu0 %v11687_v38, %s12036_s22  ;;  %vm16708_vm13 = vcmask 64544   ;;  %v3246_v15 = vrot.slane %v3244_v31, 4  ;;  %v648_v56 = vld [vmem:[%s12172_s28 + $0xf8] sm:$0xff] }
 0x19f   : > { %v2873_v7 = vrot.slane %v2871_v18, 4  ;;  %v2876_v39 = vrot.slane %v2874_v45, 5  ;;  %v3590_v13 = vld [vmem:[#allocation2 + $0xa8] sm:$0xf]  ;;  %1301 = vst [vmem:[#allocation2 + $0xb0] sm:$0x1] %v1300_v50 }
 0x1a0   : > { %v3891_v61 = vshrl.u32 %v3590_v13, 16  ;;  %v3894_v36 = vshll.u32 %v3590_v13, 16  ;;  %v3594_v57 = vld [vmem:[#allocation2 + $0xb8] sm:$0xf]  ;;  %2002 = vst.msk [vmem:[#allocation3 + $0x48] sm:$0xff] %vm16708_vm13, %v1963_v27  ;;  %v3907_v35 = vor.u32 %v3906_v55, %v13754_v59  ;;  %v1858_v10 = vshll.u32 %v13750_v54, 16 }
 0x1a1   : > { %v2877_v20 = vor.u32 %v2876_v39, %v2873_v7  ;;  %v3924_v43 = vshll.u32 %v3594_v57, 16  ;;  %v3928_v51 = vshrl.u32 %v3594_v57, 16  ;;  %v4135_v26 = vld [vmem:[#allocation2 + $0xa8] sm:$0xe]  ;;  %v1302_v32 = vld [vmem:[#allocation2 + $0xb4] sm:$0xf]  ;;  %v13796_v55 = vpack.c.bf16 %v648_v56, %v648_v56 }
 0x1a2   : > { %v3893_v62 = vrot.slane %v3891_v61, 4  ;;  %v3896_v58 = vrot.slane %v3894_v36, 5  ;;  %v10421_v4 = vrot.slane %v3094_v40, 9  ;;  %v1303_v52 = vsel %vm12273_vm9, %v12247_v23, %v1302_v32  ;;  %v1306_v0 = vld [vmem:[#allocation2 + $0xbc] sm:$0x1]  ;;  %v4427_v14 = vld [vmem:[#allocation3 + $0x38] sm:$0xff] }
 0x1a3   : > { %v13769_v46 = vrot.slane %v3924_v43, 5  ;;  %v10484_v47 = vrot.slane %v4135_v26, 9  ;;  %v2878_v17 = vrot.slane %v2877_v20, 4  ;;  %1304 = vst [vmem:[#allocation2 + $0xb4] sm:$0xf] %v1303_v52  ;;  %v1307_v12 = vsel %vm12323_vm10, %v12247_v23, %v1306_v0  ;;  %2326 = vst.msk [vmem:[#allocation3 + $0x48] sm:$0xff] %vm16706_vm5, %v2287_v8  ;;  %11528 = vmatmul.mubr.msk.bf16.gmra.mrb[12].mxu0 %vm4463_vm3, %v4427_v14 }
 0x1a4   : > { %v3897_v29 = vor.u32 %v3896_v58, %v3893_v62  ;;  %v3930_v48 = vrot.slane %v3928_v51, 4  ;;  %v1503_v19 = vld [vmem:[#allocation2 + $0xa8] sm:$0xf]  ;;  %v2888_v6 = vrot.slane %v2887_v37, 4  ;;  %v3908_v49 = vrot.slane %v3907_v35, 4 }
 0x1a5   : > { %1308 = vst [vmem:[#allocation2 + $0xbc] sm:$0x1] %v1307_v12  ;;  %v4283_v5 = vrot.slane %v4281_v44, 4  ;;  %v1849_v34 = vshrl.u32 %v1503_v19, 16  ;;  %v13780_v45 = vld [vmem:[#allocation2 + $0xb8] sm:$0xf]  ;;  %v13788_v7 = vsel %vm12164_vm8, %v10421_v4, %v3244_v31  ;;  %v13794_v13 = vsel %vm12164_vm8, %v10484_v47, %v4281_v44  ;;  %v3328_v44 = vpop.permute.xlu0 %3327 }
 0x1a6   : > { %v3898_v24 = vrot.slane %v3897_v29, 4  ;;  %v3931_v18 = vor.u32 %v3930_v48, %v13769_v46  ;;  %v1852_v25 = vshll.u32 %v1503_v19, 16  ;;  %v1862_v40 = vshrl.u32 %v13750_v54, 16  ;;  %v2551_v38 = vld [vmem:[#allocation2 + $0xb0] sm:$0x1] }
 0x1a7   : > { %vm16709_vm11 = vcmask 162944   ;;  %v3096_v50 = vld [vmem:[#allocation2 + $0xb0] sm:$0x1]  ;;  %v2883_v54 = vsel %vm12235_vm1, %v2878_v17, %v13739_v28  ;;  %v2890_v27 = vshll.u32 %v2551_v38, 16  ;;  %v4288_v30 = vrot.slane %v13780_v45, 5 }
 0x1a8   : > { %3047 = vst.msk [vmem:[#allocation3 + $0x40] sm:$0xff] %vm16709_vm11, %v3007_v63  ;;  %v3592_v39 = vld [vmem:[#allocation2 + $0xb0] sm:$0x1]  ;;  %v3247_v37 = vrot.slane %v3096_v50, 5  ;;  %v3903_v31 = vsel %vm12235_vm1, %v3898_v24, %v13754_v59  ;;  %v13805_v57 = vrot.slane %v1858_v10, 5  ;;  %v13807_v43 = vrot.slane %v3931_v18, 4 }
 0x1a9   : > { %v3910_v22 = vshll.u32 %v3592_v39, 16  ;;  %v4137_v61 = vld [vmem:[#allocation2 + $0xb0] sm:$0x1]  ;;  %v2892_v20 = vrot.slane %v2890_v27, 5  ;;  %v1851_v51 = vrot.slane %v1849_v34, 4  ;;  %3368 = vst.msk [vmem:[#allocation3 + $0x40] sm:$0xff] %vm3359_vm2, %v3328_v44  ;;  %v13828_v39 = vor.u32 %v1006_v42, %v13730_v21 }
 0x1aa   : > { %v4284_v36 = vrot.slane %v4137_v61, 5  ;;  %v3248_v28 = vsel %vm12164_vm8, %v3246_v15, %v3247_v37  ;;  %v3593_v26 = vld [vmem:[#allocation2 + $0xb4] sm:$0xf]  ;;  %v1854_v32 = vrot.slane %v1852_v25, 5  ;;  %v1864_v62 = vrot.slane %v1862_v40, 4  ;;  %v2464_v61 = vpop.permute.xlu1 %2463 }
 0x1ab   : > { %v3912_v35 = vrot.slane %v3910_v22, 5  ;;  %v2893_v58 = vsel %vm12235_vm1, %v2888_v6, %v2892_v20  ;;  %v3915_v52 = vshrl.u32 %v3593_v26, 16  ;;  %v3918_v0 = vshll.u32 %v3593_v26, 16  ;;  %v1505_v47 = vld [vmem:[#allocation2 + $0xb0] sm:$0x1]  ;;  %v11688_v3 = vld [vmem:[#allocation2 + $0xb4] sm:$0xff]  }
 0x1ac   : > { %v4285_v59 = vsel %vm12164_vm8, %v4283_v5, %v4284_v36  ;;  %v3595_v4 = vld [vmem:[#allocation2 + $0xbc] sm:$0x1]  ;;  %v10405_v8 = vcombine.low %v2883_v54, %v2893_v58  ;;  %v4138_v15 = vld [vmem:[#allocation2 + $0xb4] sm:$0xe]  ;;  %v4290_v29 = vrot.slane %v4288_v30, 4  ;;  %v10437_v48 = vcombine.low %v13788_v7, %v3248_v28  ;;  %v3506_v26 = vpop.permute.xlu0 %3505 }
 0x1ad   : > { %v3913_v10 = vsel %vm12235_vm1, %v3908_v49, %v3912_v35  ;;  %v3934_v17 = vshll.u32 %v3595_v4, 16  ;;  %v1506_v12 = vld [vmem:[#allocation2 + $0xb4] sm:$0xf]  ;;  %v3917_v19 = vrot.slane %v3915_v52, 4  ;;  %v3920_v56 = vrot.slane %v3918_v0, 5 }
 0x1ae   : > { %v10468_v14 = vcombine.low %v3903_v31, %v3913_v10  ;;  %v10500_v6 = vcombine.low %v13794_v13, %v4285_v59  ;;  %v4140_v5 = vld [vmem:[#allocation2 + $0xbc] sm:$0x1]  ;;  %3016 = vrot.lane.b32.xlu1 %v10405_v8, %s12039_s27  ;;  %v1855_v34 = vor.u32 %v1854_v32, %v1851_v51  ;;  %v1865_v63 = vor.u32 %v1864_v62, %v13805_v57  ;;  %v1507_v18 = vld [vmem:[#allocation2 + $0xb8] sm:$0xf]  ;;  %v2051_v25 = vld [vmem:[#allocation2 + $0xa8] sm:$0xe] }
 0x1af   : > { %v3936_v49 = vrot.slane %v3934_v17, 5  ;;  %v1868_v24 = vshll.u32 %v1505_v47, 16  ;;  %v3921_v40 = vor.u32 %v3920_v56, %v3917_v19  ;;  %v10485_v38 = vrot.slane %v4138_v15, 9  ;;  %v1508_v50 = vld [vmem:[#allocation2 + $0xbc] sm:$0x1]  ;;  %v11699_v59 = vld [vmem:[#allocation2 + $0xa8] sm:$0xff]  }
 0x1b0   : > { %4058 = vrot.lane.b32.xlu0 %v10468_v14, %s12040_s29  ;;  %v1873_v7 = vshrl.u32 %v1506_v12, 16  ;;  %v4291_v54 = vrot.slane %v4140_v5, 5  ;;  %v1856_v27 = vrot.slane %v1855_v34, 4  ;;  %v1866_v37 = vrot.slane %v1865_v63, 4  ;;  %v2052_v22 = vld [vmem:[#allocation2 + $0xac] sm:$0xf] }
 0x1b1   : > { %v3937_v13 = vsel %vm12235_vm1, %v13807_v43, %v3936_v49  ;;  %v3922_v31 = vrot.slane %v3921_v40, 4  ;;  %v1870_v36 = vrot.slane %v1868_v24, 5  ;;  %v1876_v20 = vshll.u32 %v1506_v12, 16  ;;  %v2053_v35 = vld [vmem:[#allocation2 + $0xb0] sm:$0x1]  ;;  %v11700_v19 = vld [vmem:[#allocation2 + $0xb4] sm:$0xff]  }
 0x1b2   : > { %v1875_v44 = vrot.slane %v1873_v7, 4  ;;  %vm16710_vm13 = vcmask 130144   ;;  %3337 = vrot.lane.b32.xlu1 %v10437_v48, %s12037_s24  ;;  %v1861_v42 = vsel %vm12235_vm1, %v1856_v27, %v13805_v57  ;;  %v1882_v43 = vshll.u32 %v1507_v18, 16  ;;  %v2054_v4 = vld [vmem:[#allocation2 + $0xb4] sm:$0xe] }
 0x1b3   : > { %2503 = vst.msk [vmem:[#allocation3 + $0x48] sm:$0xff] %vm16710_vm13, %v2464_v61  ;;  %v1886_v51 = vshrl.u32 %v1507_v18, 16  ;;  %v1892_v28 = vshll.u32 %v1508_v50, 16  ;;  %v3927_v32 = vsel %vm12235_vm1, %v3922_v31, %v13769_v46  ;;  %v1871_v62 = vsel %vm12235_vm1, %v1866_v37, %v1870_v36  ;;  %v2055_v52 = vld [vmem:[#allocation2 + $0xb8] sm:$0xf] }
 0x1b4   : > { %4379 = vrot.lane.b32.xlu0 %v10500_v6, %s12038_s26  ;;  %v1878_v58 = vrot.slane %v1876_v20, 5  ;;  %v10358_v10 = vrot.slane %v2051_v25, 9  ;;  %vm16711_vm5 = vcmask 228544   ;;  %v4289_v57 = vsel %vm12164_vm8, %v10485_v38, %v4288_v30  ;;  %v2056_v14 = vld [vmem:[#allocation2 + $0xbc] sm:$0x1]  ;;  %v11689_v31 = vld [vmem:[#allocation2 + $0xb4] sm:$0xff]  }
 0x1b5   : > { %3546 = vst.msk [vmem:[#allocation3 + $0x40] sm:$0xff] %vm16711_vm5, %v3506_v26  ;;  %v10342_v0 = vcombine.low %v1861_v42, %v1871_v62  ;;  %v1884_v47 = vrot.slane %v1882_v43, 5  ;;  %v1888_v8 = vrot.slane %v1886_v51, 4  ;;  %v1178_v17 = vld [vmem:[#allocation2 + $0xc0] sm:$0xf]  ;;  %vm16712_vm11 = vcmask 31744  }
 0x1b6   : > { %1459 = vst.msk [vmem:[#allocation3 + $0x70] sm:$0xff] %vm16712_vm11, %v11699_v59  ;;  %v4292_v46 = vsel %vm12164_vm8, %v4290_v29, %v4291_v54  ;;  %v1879_v15 = vor.u32 %v1878_v58, %v1875_v44  ;;  %v2208_v12 = vrot.slane %v2052_v22, 5  ;;  %v2211_v48 = vrot.slane %v2053_v35, 5  ;;  %3515 = vrot.lane.b32.xlu1 %v11688_v3, %s12036_s22  ;;  %v2552_v5 = vld [vmem:[#allocation2 + $0xb4] sm:$0xf]  ;;  %vm16713_vm13 = vmmov %vm16712_vm11 }
 0x1b7   : > { %v10469_v45 = vcombine.low %v3927_v32, %v3937_v13  ;;  %v1889_v30 = vor.u32 %v1888_v8, %v1884_v47  ;;  %v10359_v56 = vrot.slane %v2054_v4, 9  ;;  %v2215_v6 = vrot.slane %v2055_v52, 5  ;;  %v2553_v29 = vld [vmem:[#allocation2 + $0xb8] sm:$0xf]  ;;  %1460 = vst.msk [vmem:[#allocation3 + $0x78] sm:$0xff] %vm16713_vm13, %v11700_v19  ;;  %v3009_v32 = vpop.permute.xlu1 %3008 }
 0x1b8   : > { %1972 = vrot.lane.b32.xlu0 %v10342_v0, %s12034_s20  ;;  %v1880_v49 = vrot.slane %v1879_v15, 4  ;;  %v1894_v34 = vrot.slane %v1892_v28, 5  ;;  %v2209_v63 = vsel %vm12164_vm8, %v10358_v10, %v2208_v12  ;;  %v2210_v24 = vrot.slane %v2208_v12, 4  ;;  %v2554_v50 = vld [vmem:[#allocation2 + $0xbc] sm:$0x1] }
 0x1b9   : > { %v1890_v18 = vrot.slane %v1889_v30, 4  ;;  %v2217_v25 = vrot.slane %v2215_v6, 4  ;;  %v2218_v40 = vrot.slane %v2056_v14, 5  ;;  %v1011_v38 = vshrl.u32 %v13796_v55, 16  ;;  %v493_v7 = vld [vmem:[#allocation2 + $0xc8] sm:$0x1]  ;;  %v4051_v15 = vpop.permute.xlu0 %4050 }
 0x1ba   : > { %v10501_v13 = vcombine.low %v4289_v57, %v4292_v46  ;;  %v2212_v54 = vsel %vm12164_vm8, %v2210_v24, %v2211_v48  ;;  %v1014_v27 = vshll.u32 %v13796_v55, 16  ;;  %v1179_v37 = vsel %vm12210_vm15, %v13828_v39, %v1178_v17  ;;  %4060 = vrot.lane.b32.xlu1 %v10469_v45, %s12040_s29  ;;  %v3097_v20 = vld [vmem:[#allocation2 + $0xb4] sm:$0xe]  ;;  %v3098_v35 = vld [vmem:[#allocation2 + $0xb8] sm:$0xf] }
 0x1bb   : > { %v10374_v22 = vcombine.low %v2209_v63, %v2212_v54  ;;  %v13867_v61 = vsel %vm12164_vm8, %v10359_v56, %v2215_v6  ;;  %v1009_v36 = vrot.slane %v13730_v21, 4  ;;  %v13870_v44 = vrot.slane %v1011_v38, 7  ;;  %1180 = vst [vmem:[#allocation2 + $0xc0] sm:$0xf] %v1179_v37  ;;  %v440_v42 = vld [vmem:[#allocation2 + $0xcc] sm:$0x1]  ;;  %v3330_v30 = vpop.permute.xlu1 %3329 }
 0x1bc   : > { %v1885_v55 = vsel %vm12235_vm1, %v1880_v49, %v1884_v47  ;;  %v1895_v53 = vsel %vm12235_vm1, %v1890_v18, %v1894_v34  ;;  %v2895_v39 = vshrl.u32 %v2552_v5, 16  ;;  %v2898_v3 = vshll.u32 %v2552_v5, 16  ;;  %v496_v43 = vld [vmem:[#allocation2 + $0xd4] sm:$0x1]  ;;  %v3099_v59 = vld [vmem:[#allocation2 + $0xbc] sm:$0x1] }
 0x1bd   : > { %2296 = vrot.lane.b32.xlu0 %v10374_v22, %s12033_s19  ;;  %v2219_v21 = vsel %vm12164_vm8, %v2217_v25, %v2218_v40  ;;  %v1016_v51 = vor.u32 %v1014_v27, %v13870_v44  ;;  %v2904_v28 = vshll.u32 %v2553_v29, 16  ;;  %v2908_v26 = vshrl.u32 %v2553_v29, 16  ;;  %v4372_v24 = vpop.permute.xlu0 %4371 }
 0x1be   : > { %v2897_v62 = vrot.slane %v2895_v39, 4  ;;  %v2900_v58 = vrot.slane %v2898_v3, 5  ;;  %v2914_v10 = vshll.u32 %v2554_v50, 16  ;;  %v494_v4 = vsel %vm12150_vm6, 0, %v493_v7  ;;  %4381 = vrot.lane.b32.xlu1 %v10501_v13, %s12038_s26  ;;  %v3600_v50 = vld [vmem:[#allocation2 + $0xd0] sm:$0xf] }
 0x1bf   : > { %vm16714_vm15 = vcmask 162944   ;;  %v10343_v52 = vcombine.low %v1885_v55, %v1895_v53  ;;  %v1017_v57 = vsel %vm12221_vm0, %v1009_v36, %v1016_v51  ;;  %v2906_v0 = vrot.slane %v2904_v28, 5  ;;  %495 = vst [vmem:[#allocation2 + $0xc8] sm:$0x1] %v494_v4  ;;  %v3508_v40 = vpop.permute.xlu1 %3507 }
 0x1c0   : > { %3048 = vst.msk [vmem:[#allocation3 + $0x48] sm:$0xff] %vm16714_vm15, %v3009_v32  ;;  %v2910_v47 = vrot.slane %v2908_v26, 4  ;;  %v2901_v8 = vor.u32 %v2900_v58, %v2897_v62  ;;  %v2916_v14 = vrot.slane %v2914_v10, 5  ;;  %v10422_v17 = vrot.slane %v3097_v20, 9 }
 0x1c1   : > { %1181 = vst.msk [vmem:[#allocation2 + $0xc4] sm:$0xf] %vm1068_vm12, %v1017_v57  ;;  %v3251_v46 = vrot.slane %v3098_v35, 5  ;;  %2473 = vrot.lane.b32.xlu0 %v11689_v31, %s12035_s21  ;;  %vm16715_vm5 = vcmask 27672   ;;  %v3254_v48 = vrot.slane %v3099_v59, 5  ;;  %v441_v19 = vsel %vm12140_vm4, 0, %v440_v42 }
 0x1c2   : > { %1312 = vst.msk [vmem:[#allocation2 + $0xc4] sm:$0xf] %vm16715_vm5, %v12247_v23  ;;  %v2911_v12 = vor.u32 %v2910_v47, %v2906_v0  ;;  %v497_v45 = vsel %vm12150_vm6, 0, %v496_v43  ;;  %vm16716_vm12 = vcmask 261344   ;;  %v1309_v56 = vld [vmem:[#allocation2 + $0xc0] sm:$0xf]  ;;  %1974 = vrot.lane.b32.xlu1 %v10343_v52, %s12034_s20  ;;  %v10375_v49 = vcombine.low %v13867_v61, %v2219_v21 }
 0x1c3   : > { %4091 = vst.msk [vmem:[#allocation3 + $0x40] sm:$0xff] %vm16716_vm12, %v4051_v15  ;;  %v2902_v6 = vrot.slane %v2901_v8, 4  ;;  %v3253_v5 = vrot.slane %v3251_v46, 4  ;;  %442 = vst [vmem:[#allocation2 + $0xcc] sm:$0x1] %v441_v19  ;;  %v1018_v1 = vrot.slane %v13870_v44, 4  ;;  %v1310_v2 = vsel %vm12273_vm9, %v12247_v23, %v1309_v56  ;;  %v4053_v61 = vpop.permute.xlu1 %4052  ;;  %v1965_v36 = vpop.permute.xlu0 %1964 }
 0x1c4   : > { %498 = vst [vmem:[#allocation2 + $0xd4] sm:$0x1] %v497_v45  ;;  %3369 = vst.msk [vmem:[#allocation3 + $0x48] sm:$0xff] %vm3359_vm2, %v3330_v30  ;;  %v2912_v34 = vrot.slane %v2911_v12, 4  ;;  %v3252_v18 = vsel %vm12164_vm8, %v10422_v17, %v3251_v46  ;;  %vm16717_vm4 = vcmask 228544   ;;  %v3972_v22 = vshll.u32 %v3600_v50, 16 }
 0x1c5   : > { %1311 = vst [vmem:[#allocation2 + $0xc0] sm:$0xf] %v1310_v2  ;;  %v2907_v63 = vsel %vm12235_vm1, %v2902_v6, %v2906_v0  ;;  %v3255_v25 = vsel %vm12164_vm8, %v3253_v5, %v3254_v48  ;;  %4412 = vst.msk [vmem:[#allocation3 + $0x40] sm:$0xff] %vm4403_vm14, %v4372_v24  ;;  %v3976_v35 = vshrl.u32 %v3600_v50, 16  ;;  %vm16719_vm9 = vcmask 64544  }
 0x1c6   : > { %v2917_v29 = vsel %vm12235_vm1, %v2912_v34, %v2916_v14  ;;  %v1182_v38 = vld [vmem:[#allocation2 + $0xc8] sm:$0x1]  ;;  %3547 = vst.msk [vmem:[#allocation3 + $0x48] sm:$0xff] %vm16717_vm4, %v3508_v40  ;;  %2298 = vrot.lane.b32.xlu1 %v10375_v49, %s12033_s19  ;;  %v10438_v54 = vcombine.low %v3252_v18, %v3255_v25  ;;  %vm16718_vm6 = vmmov %vm16716_vm12  ;;  %v13924_v21 = vrot.slane %v3972_v22, 5  ;;  %v13935_v15 = vld [vmem:[#allocation2 + $0xd0] sm:$0xf] }
 0x1c7   : > { %v10406_v41 = vcombine.low %v2907_v63, %v2917_v29  ;;  %v1183_v7 = vsel %vm12263_vm7, %v1018_v1, %v1182_v38  ;;  %4092 = vst.msk [vmem:[#allocation3 + $0x48] sm:$0xff] %vm16718_vm6, %v4053_v61  ;;  %v4374_v51 = vpop.permute.xlu1 %4373  ;;  %v2289_v62 = vpop.permute.xlu0 %2288  ;;  %vm16720_vm7 = vcmask 97344   ;;  %v3978_v5 = vrot.slane %v3976_v35, 4 }
 0x1c8   : > { %1184 = vst [vmem:[#allocation2 + $0xc8] sm:$0x1] %v1183_v7  ;;  %2003 = vst.msk [vmem:[#allocation3 + $0x50] sm:$0xff] %vm16719_vm9, %v1965_v36  ;;  %v4302_v34 = vrot.slane %v13935_v15, 5  ;;  %vm16722_vm11 = vcmask 130144   ;;  %vm506_vm12 = vcmask 1040384  }
 0x1c9   : > { %3018 = vrot.lane.b32.xlu0 %v10406_v41, %s12039_s27  ;;  %v2556_v13 = vld [vmem:[#allocation2 + $0xc4] sm:$0xf]  ;;  %4413 = vst.msk [vmem:[#allocation3 + $0x48] sm:$0xff] %vm4403_vm14, %v4374_v51  ;;  %vm16723_vm13 = vmmov %vm16720_vm7  ;;  %vm16725_vm4 = vsmask.f32 7938 }
 0x1ca   : > { %v2928_v27 = vshll.u32 %v2556_v13, 16  ;;  %v2932_v37 = vshrl.u32 %v2556_v13, 16  ;;  %v13916_v31 = vld [vmem:[#allocation2 + $0xc4] sm:$0xf]  ;;  %v3599_v32 = vld [vmem:[#allocation2 + $0xcc] sm:$0xf]  ;;  %vm16724_vm5 = vmmov %vm16722_vm11 }
 0x1cb   : > { %v3597_v3 = vld [vmem:[#allocation2 + $0xc4] sm:$0xf]  ;;  %v3258_v4 = vrot.slane %v13916_v31, 5  ;;  %2327 = vst.msk [vmem:[#allocation3 + $0x50] sm:$0xff] %vm16720_vm7, %v2289_v62  ;;  %v3963_v45 = vshrl.u32 %v3599_v32, 16  ;;  %v1967_v56 = vpop.permute.xlu1 %1966  ;;  %v3966_v6 = vshll.u32 %v3599_v32, 16  ;;  %vm13966_vm6 = vmand %vm506_vm12, %vm16725_vm4 }
 0x1cc   : > { %v11690_v44 = vld [vmem:[#allocation2 + $0xc0] sm:$0xff]   ;;  %v13920_v53 = vrot.slane %v2928_v27, 5  ;;  %v2934_v39 = vrot.slane %v2932_v37, 4  ;;  %v4428_v58 = vld [vmem:[#allocation3 + $0x40] sm:$0xff]  ;;  %v3948_v57 = vshll.u32 %v3597_v3, 16  ;;  %v3952_v0 = vshrl.u32 %v3597_v3, 16 }
 0x1cd   : > { %v2555_v20 = vld [vmem:[#allocation2 + $0xc0] sm:$0xf]  ;;  %3339 = vrot.lane.b32.xlu0 %v10438_v54, %s12037_s24  ;;  %2475 = vrot.lane.b32.xlu1 %v11690_v44, %s12035_s21  ;;  %v4142_v16 = vld [vmem:[#allocation2 + $0xc4] sm:$0xf]  ;;  %v3260_v49 = vrot.slane %v3258_v4, 4  ;;  %v3965_v18 = vrot.slane %v3963_v45, 4 }
 0x1ce   : > { %v2919_v33 = vshrl.u32 %v2555_v20, 16  ;;  %v2922_v55 = vshll.u32 %v2555_v20, 16  ;;  %v11693_v42 = vld [vmem:[#allocation2 + $0xc0] sm:$0xff]   ;;  %11531 = vmatprep.mubr.msk.bf16.mxu0 %vm4463_vm3, %v4428_v58  ;;  %v2935_v14 = vor.u32 %v2934_v39, %v13920_v53  ;;  %v3950_v48 = vrot.slane %v3948_v57, 5  ;;  %v3601_v25 = vld [vmem:[#allocation2 + $0xd4] sm:$0x1] }
 0x1cf   : > { %v3596_v43 = vld [vmem:[#allocation2 + $0xc0] sm:$0xf]  ;;  %v1313_v10 = vld [vmem:[#allocation2 + $0xc8] sm:$0x1]  ;;  %v3954_v19 = vrot.slane %v3952_v0, 4  ;;  %v3968_v40 = vrot.slane %v3966_v6, 5  ;;  %v2291_v50 = vpop.permute.xlu1 %2290 }
 0x1d0   : > { %v2921_v28 = vrot.slane %v2919_v33, 4  ;;  %v2924_v26 = vrot.slane %v2922_v55, 5  ;;  %v3939_v59 = vshrl.u32 %v3596_v43, 16  ;;  %v3942_v52 = vshll.u32 %v3596_v43, 16  ;;  %v3100_v17 = vld [vmem:[#allocation2 + $0xc0] sm:$0xe] }
 0x1d1   : > { %v1314_v47 = vsel %vm12323_vm10, %v12247_v23, %v1313_v10  ;;  %3517 = vrot.lane.b32.xlu0 %v11693_v42, %s12036_s22  ;;  %v4141_v30 = vld [vmem:[#allocation2 + $0xc0] sm:$0xe]  ;;  %vm16721_vm10 = vmmov %vm16719_vm9  ;;  %v2466_v23 = vpop.permute.xlu0 %2465  ;;  %v3955_v2 = vor.u32 %v3954_v19, %v3950_v48  ;;  %v2936_v24 = vrot.slane %v2935_v14, 4  ;;  %v10423_v29 = vrot.slane %v3100_v17, 9  ;;  %v4144_v57 = vld [vmem:[#allocation2 + $0xcc] sm:$0xe] }
 0x1d2   : > { %v2925_v8 = vor.u32 %v2924_v26, %v2921_v28  ;;  %v3941_v46 = vrot.slane %v3939_v59, 4  ;;  %1315 = vst [vmem:[#allocation2 + $0xc8] sm:$0x1] %v1314_v47  ;;  %v3944_v12 = vrot.slane %v3942_v52, 5  ;;  %2004 = vst.msk [vmem:[#allocation3 + $0x58] sm:$0xff] %vm16721_vm10, %v1967_v56  ;;  %v10486_v41 = vrot.slane %v4141_v30, 9 }
 0x1d3   : > { %2504 = vst.msk [vmem:[#allocation3 + $0x50] sm:$0xff] %vm16722_vm11, %v2466_v23  ;;  %v4295_v38 = vrot.slane %v4142_v16, 5  ;;  %v4429_v7 = vld [vmem:[#allocation3 + $0x48] sm:$0xff]  ;;  %v3956_v54 = vrot.slane %v3955_v2, 4  ;;  %v3982_v33 = vshll.u32 %v3601_v25, 16  ;;  %v3259_v51 = vsel %vm12164_vm8, %v10423_v29, %v3258_v4  ;;  %v11694_v45 = vld [vmem:[#allocation2 + $0xcc] sm:$0xff]   ;;  %vm16734_vm11 = vmmov %vm16714_vm15 }
 0x1d4   : > { %v3945_v1 = vor.u32 %v3944_v12, %v3941_v46  ;;  %v2926_v63 = vrot.slane %v2925_v8, 4  ;;  %2328 = vst.msk [vmem:[#allocation3 + $0x58] sm:$0xff] %vm16723_vm13, %v2291_v50  ;;  %11532 = vmatmul.mubr.msk.bf16.gmra.mrb[16].mxu0 %vm4463_vm3, %v4429_v7  ;;  %v3969_v28 = vor.u32 %v3968_v40, %v3965_v18  ;;  %v3979_v26 = vor.u32 %v3978_v5, %v13924_v21  ;;  %v4146_v47 = vld [vmem:[#allocation2 + $0xd4] sm:$0x1]  ;;  %v514_v5 = vld [vmem:[#allocation4 + $0x18] sm:$0x1] }
 0x1d5   : > { %v4297_v20 = vrot.slane %v4295_v38, 4  ;;  %v3011_v35 = vpop.permute.xlu0 %3010  ;;  %v4296_v59 = vsel %vm12164_vm8, %v10486_v41, %v4295_v38  ;;  %v3984_v12 = vrot.slane %v3982_v33, 5  ;;  %v16726_v19 = vmov 0  ;;  %v566_v18 = vld [vmem:[#allocation4 + $0x14] sm:$0x1]  ;;  %v11701_v38 = vld [vmem:[%s16603_s3 + $0xc0] sm:$0xff]  }
 0x1d6   : > { %v3946_v13 = vrot.slane %v3945_v1, 4  ;;  %3049 = vst.msk [vmem:[#allocation3 + $0x50] sm:$0xff] %vm16714_vm15, %v3011_v35  ;;  %v2931_v39 = vsel %vm12235_vm1, %v2926_v63, %v13920_v53  ;;  %v3980_v14 = vrot.slane %v3979_v26, 4  ;;  %v3970_v46 = vrot.slane %v3969_v28, 4  ;;  %v569_v1 = vld [vmem:[#allocation4 + $0x20] sm:$0x1]  ;;  %11149 = vmatprep.subr.bf16.mxu0 %v11701_v38 }
 0x1d7   : > { %v16727_v19 = vsel %vm13966_vm6, 4294967295, %v16726_v19  ;;  %vm16729_vm9 = vcmask 228544   ;;  %v10487_v30 = vrot.slane %v4144_v57, 9  ;;  %v4304_v56 = vrot.slane %v4302_v34, 4  ;;  %v520_v50 = vld [vmem:[#allocation4 + $0x30] sm:$0x1] }
 0x1d8   : > { %v3951_v42 = vsel %vm12235_vm1, %v3946_v13, %v3950_v48  ;;  %v2468_v0 = vpop.permute.xlu1 %2467  ;;  %16728 = vst [vmem:[#allocation13_spill] sm:$0xff] %v16727_v19  ;;  %vm16730_vm7 = vsmask.f32 256  ;;  %v16731_v6 = vmov 0  ;;  %v4305_v16 = vrot.slane %v4146_v47, 5  ;;  %v11702_v7 = vld [vmem:[%s16603_s3 + $0x40] sm:$0xff]   ;;  %vm16736_vm15 = vmmov %vm16729_vm9 }
 0x1d9   : > { %v2557_v27 = vld [vmem:[#allocation2 + $0xc8] sm:$0x1]  ;;  %v3332_v10 = vpop.permute.xlu0 %3331  ;;  %2505 = vst.msk [vmem:[#allocation3 + $0x58] sm:$0xff] %vm16724_vm5, %v2468_v0  ;;  %vm13974_vm10 = vmand %vm506_vm12, %vm16730_vm7  ;;  %v3975_v2 = vsel %vm12235_vm1, %v3970_v46, %v13924_v21  ;;  %v3985_v63 = vsel %vm12235_vm1, %v3980_v14, %v3984_v12  ;;  %v570_v29 = vsel %vm13966_vm6, 0, %v569_v1  ;;  %v567_v25 = vsel %vm13966_vm6, 0, %v566_v18  ;;  %11037 = vmatprep.subr.bf16.mxu1 %v11702_v7  ;;  %v11713_v28 = vld [vmem:[%s16603_s3 + $0xd8] sm:$0xff]  }
 0x1da   : > { %v3102_v37 = vld [vmem:[#allocation2 + $0xc8] sm:$0x1]  ;;  %v2938_v61 = vshll.u32 %v2557_v27, 16  ;;  %3370 = vst.msk [vmem:[#allocation3 + $0x50] sm:$0xff] %vm3359_vm2, %v3332_v10  ;;  %v16732_v6 = vsel %vm13974_vm10, 4294967295, %v16731_v6  ;;  %v515_v23 = vsel %vm13974_vm10, 0, %v514_v5  ;;  %v10471_v21 = vcombine.low %v3975_v2, %v3985_v63 }
 0x1db   : > { %v3598_v22 = vld [vmem:[#allocation2 + $0xc8] sm:$0x1]  ;;  %v3261_v31 = vrot.slane %v3102_v37, 5  ;;  %16733 = vst [vmem:[#allocation14_spill] sm:$0xff] %v16732_v6  ;;  %516 = vst [vmem:[#allocation4 + $0x18] sm:$0x1] %v515_v23  ;;  %v4303_v40 = vsel %vm12164_vm8, %v10487_v30, %v4302_v34  ;;  %v4306_v41 = vsel %vm12164_vm8, %v4304_v56, %v4305_v16 }
 0x1dc   : > { %v3958_v36 = vshll.u32 %v3598_v22, 16  ;;  %v4143_v44 = vld [vmem:[#allocation2 + $0xc8] sm:$0x1]  ;;  %v2940_v3 = vrot.slane %v2938_v61, 5  ;;  %571 = vst [vmem:[#allocation4 + $0x20] sm:$0x1] %v570_v29  ;;  %v10503_v13 = vcombine.low %v4303_v40, %v4306_v41 }
 0x1dd   : > { %v4298_v55 = vrot.slane %v4143_v44, 5  ;;  %v3262_v53 = vsel %vm12164_vm8, %v3260_v49, %v3261_v31  ;;  %v3510_v48 = vpop.permute.xlu0 %3509  ;;  %v511_v49 = vld [vmem:[#allocation4 + $0xc] sm:$0x1]  ;;  %568 = vst [vmem:[#allocation4 + $0x14] sm:$0x1] %v567_v25  ;;  %v521_v15 = vsel %vm13974_vm10, 0, %v520_v50 }
 0x1de   : > { %v3960_v43 = vrot.slane %v3958_v36, 5  ;;  %v2941_v32 = vsel %vm12235_vm1, %v2936_v24, %v2940_v3  ;;  %v10439_v8 = vcombine.low %v3259_v51, %v3262_v53  ;;  %3548 = vst.msk [vmem:[#allocation3 + $0x50] sm:$0xff] %vm16729_vm9, %v3510_v48  ;;  %v512_v24 = vsel %vm13974_vm10, 0, %v511_v49  ;;  %v11703_v34 = vld [vmem:[%s16603_s3 + $0x80] sm:$0xff]   ;;  %522 = vst [vmem:[#allocation4 + $0x30] sm:$0x1] %v521_v15 }
 0x1df   : > { %v4299_v58 = vsel %vm12164_vm8, %v4297_v20, %v4298_v55  ;;  %v10407_v4 = vcombine.low %v2931_v39, %v2941_v32  ;;  %513 = vst [vmem:[#allocation4 + $0xc] sm:$0x1] %v512_v24  ;;  %v11704_v37 = vld [vmem:[%s16603_s3] sm:$0xff]   ;;  %11150 = vmatpush3.bf16.msra.mxu0 %v11703_v34  ;;  %v575_v22 = vld [vmem:[#allocation4 + $0x38] sm:$0x1]  ;;  %v11705_v44 = vld [vmem:[%s16603_s3 + $0xc8] sm:$0xff]  }
 0x1e0   : > { %v3961_v62 = vsel %vm12235_vm1, %v3956_v54, %v3960_v43  ;;  %v10502_v17 = vcombine.low %v4296_v59, %v4299_v58  ;;  %v517_v54 = vld [vmem:[#allocation4 + $0x24] sm:$0x1]  ;;  %v572_v61 = vld [vmem:[#allocation4 + $0x2c] sm:$0x1]  ;;  %11038 = vmatpush3.bf16.msra.mxu1 %v11704_v37  ;;  %v576_v31 = vsel %vm13966_vm6, 0, %v575_v22  ;;  %v11706_v20 = vld [vmem:[%s16603_s3 + $0x48] sm:$0xff]   ;;  %11151 = vmatprep.subr.bf16.mxu0 %v11705_v44 }
 0x1e1   : > { %v10470_v52 = vcombine.low %v3951_v42, %v3961_v62  ;;  %3020 = vrot.lane.b32.xlu1 %v10407_v4, %s12039_s27  ;;  %v518_v27 = vsel %vm13974_vm10, 0, %v517_v54  ;;  %v573_v36 = vsel %vm13966_vm6, 0, %v572_v61  ;;  %v11707_v35 = vld [vmem:[%s16603_s3 + $0x88] sm:$0xff]   ;;  %577 = vst [vmem:[#allocation4 + $0x38] sm:$0x1] %v576_v31  ;;  %v11709_v55 = vld [vmem:[%s16603_s3 + $0xd0] sm:$0xff]   ;;  %11039 = vmatprep.subr.bf16.mxu1 %v11706_v20 }
 0x1e2   : > { %519 = vst [vmem:[#allocation4 + $0x24] sm:$0x1] %v518_v27  ;;  %574 = vst [vmem:[#allocation4 + $0x2c] sm:$0x1] %v573_v36  ;;  %v11708_v33 = vld [vmem:[%s16603_s3 + $0x8] sm:$0xff]   ;;  %v11710_v39 = vld [vmem:[%s16603_s3 + $0x50] sm:$0xff]  }
 0x1e3   : > { %4062 = vrot.lane.b32.xlu0 %v10470_v52, %s12040_s29  ;;  %vm16735_vm13 = vcmask 261344   ;;  %11152 = vmatpush3.bf16.msra.mxu0 %v11707_v35  ;;  %v11711_v43 = vld [vmem:[%s16603_s3 + $0x90] sm:$0xff]   ;;  %v11714_v26 = vld [vmem:[%s16603_s3 + $0x58] sm:$0xff]   ;;  %v11717_v58 = vld [vmem:[%s16603_s3 + $0xe0] sm:$0xff]   ;;  %vm16737_vm5 = vcmask 64544   ;;  %vm16739_vm4 = vcmask 97344  }
 0x1e4   : > { %11040 = vmatpush3.bf16.msra.mxu1 %v11708_v33  ;;  %11153 = vmatprep.subr.bf16.mxu0 %v11709_v55  ;;  %v11712_v51 = vld [vmem:[%s16603_s3 + $0x10] sm:$0xff]   ;;  %v11715_v53 = vld [vmem:[%s16603_s3 + $0x98] sm:$0xff]   ;;  %v11718_v10 = vld [vmem:[%s16603_s3 + $0x60] sm:$0xff]   ;;  %vm16740_vm9 = vcmask 130144  }
 0x1e5   : > { %3341 = vrot.lane.b32.xlu1 %v10439_v8, %s12037_s24  ;;  %11041 = vmatprep.subr.bf16.mxu1 %v11710_v39  ;;  %v11716_v62 = vld [vmem:[%s16603_s3 + $0x18] sm:$0xff]   ;;  %v11719_v0 = vld [vmem:[%s16603_s3 + $0xa0] sm:$0xff]   ;;  %v11721_v46 = vld [vmem:[%s16603_s3 + $0xe8] sm:$0xff]  }
 0x1e6   : > { %v508_v57 = vld [vmem:[#allocation4] sm:$0x1]  ;;  %v563_v8 = vld [vmem:[#allocation4 + $0x8] sm:$0x1]  ;;  %v14075_v14 = vld [vmem:[#allocation4 + $0x4] sm:$0xf] }
 0x1e7   : > { %4383 = vrot.lane.b32.xlu0 %v10502_v17, %s12038_s26  ;;  %11154 = vmatpush3.bf16.msra.mxu0 %v11711_v43  ;;  %v509_v47 = vsel %vm13974_vm10, 0, %v508_v57  ;;  %v11720_v17 = vld [vmem:[%s16603_s3 + $0x20] sm:$0xff]   ;;  %v564_v12 = vsel %vm13966_vm6, 0, %v563_v8  ;;  %v5522_v48 = vshll.u32 %v14075_v14, 16  ;;  %v11722_v30 = vld [vmem:[%s16603_s3 + $0x68] sm:$0xff]   ;;  %vm16738_vm12 = vmmov %vm16735_vm13 }
 0x1e8   : > { %11042 = vmatpush3.bf16.msra.mxu1 %v11712_v51  ;;  %11155 = vmatprep.subr.bf16.mxu0 %v11713_v28  ;;  %510 = vst [vmem:[#allocation4] sm:$0x1] %v509_v47  ;;  %565 = vst [vmem:[#allocation4 + $0x8] sm:$0x1] %v564_v12  ;;  %v526_v56 = vld [vmem:[#allocation4 + $0x48] sm:$0x1] }
 0x1e9   : > { %3519 = vrot.lane.b32.xlu1 %v11694_v45, %s12036_s22  ;;  %11043 = vmatprep.subr.bf16.mxu1 %v11714_v26  ;;  %v5526_v45 = vshrl.u32 %v14075_v14, 16  ;;  %v11723_v49 = vld [vmem:[%s16603_s3 + $0xa8] sm:$0xff]   ;;  %v14093_v1 = vrot.slane %v5522_v48, 5  ;;  %v527_v63 = vsel %vm13974_vm10, 0, %v526_v56  ;;  %v523_v24 = vld [vmem:[#allocation4 + $0x3c] sm:$0x1]  ;;  %vm16741_vm7 = vmmov %vm16737_vm5 }
 0x1ea   : > { %528 = vst [vmem:[#allocation4 + $0x48] sm:$0x1] %v527_v63  ;;  %v581_v29 = vld [vmem:[#allocation4 + $0x50] sm:$0x1]  ;;  %v578_v18 = vld [vmem:[#allocation4 + $0x44] sm:$0x1] }
 0x1eb   : > { %11156 = vmatpush3.bf16.msra.mxu0 %v11715_v53  ;;  %v5528_v2 = vrot.slane %v5526_v45, 4  ;;  %v11724_v25 = vld [vmem:[%s16603_s3 + $0x28] sm:$0xff]   ;;  %v524_v40 = vsel %vm13974_vm10, 0, %v523_v24  ;;  %v11726_v41 = vld [vmem:[%s16603_s3 + $0x70] sm:$0xff]   ;;  %v582_v38 = vsel %vm13966_vm6, 0, %v581_v29  ;;  %v579_v50 = vsel %vm13966_vm6, 0, %v578_v18 }
 0x1ec   : > { %11044 = vmatpush3.bf16.msra.mxu1 %v11716_v62  ;;  %11157 = vmatprep.subr.bf16.mxu0 %v11717_v58  ;;  %525 = vst [vmem:[#allocation4 + $0x3c] sm:$0x1] %v524_v40  ;;  %583 = vst [vmem:[#allocation4 + $0x50] sm:$0x1] %v582_v38  ;;  %v11727_v34 = vld [vmem:[%s16603_s3 + $0xb0] sm:$0xff]   ;;  %v11729_v37 = vld [vmem:[%s16603_s3 + $0xf8] sm:$0xff]  }
 0x1ed   : > { %4064 = vrot.lane.b32.xlu1 %v10471_v21, %s12040_s29  ;;  %11045 = vmatprep.subr.bf16.mxu1 %v11718_v10  ;;  %v11725_v21 = vld [vmem:[%s16603_s3 + $0xf0] sm:$0xff]   ;;  %v5529_v15 = vor.u32 %v5528_v2, %v14093_v1  ;;  %580 = vst [vmem:[#allocation4 + $0x44] sm:$0x1] %v579_v50  ;;  %v11730_v36 = vld [vmem:[%s16603_s3 + $0x78] sm:$0xff]   ;;  %v14149_v10 = vld [vmem:[%s16602_s2] ss:$0 sm:$0xff] }
 0x1ee   : > { %v3013_v3 = vpop.permute.xlu1 %3012  ;;  %v11728_v27 = vld [vmem:[%s16603_s3 + $0x30] sm:$0xff]   ;;  %v532_v58 = vld [vmem:[#allocation4 + $0x60] sm:$0x1]  ;;  %s375_s29 = sld [smem:[#allocation8 + %s12097_s10]]  ;;  %s16295_s10 = scalar_lea.vmem %s16608_s8, %s12159_s25 }
 0x1ef   : > { %v4055_v42 = vpop.permute.xlu0 %4054  ;;  %3050 = vst.msk [vmem:[#allocation3 + $0x58] sm:$0xff] %vm16734_vm11, %v3013_v3  ;;  %11158 = vmatpush3.bf16.msra.mxu0 %v11719_v0  ;;  %v5464_v54 = vld [vmem:[#allocation4] sm:$0xf]  ;;  %v5496_v22 = vld [vmem:[#allocation4 + $0x8] sm:$0x1]  ;;  %v5530_v55 = vrot.slane %v5529_v15, 4  ;;  %vm16742_vm11 = vmmov %vm16739_vm4 }
 0x1f0   : > { %4093 = vst.msk [vmem:[#allocation3 + $0x50] sm:$0xff] %vm16735_vm13, %v4055_v42  ;;  %11046 = vmatpush3.bf16.msra.mxu1 %v11720_v17  ;;  %11159 = vmatprep.subr.bf16.mxu0 %v11721_v46  ;;  %v5513_v61 = vshrl.u32 %v5464_v54, 16  ;;  %v5516_v31 = vshll.u32 %v5464_v54, 16  ;;  %v5532_v44 = vshll.u32 %v5496_v22, 16  ;;  %v11731_v3 = vld [vmem:[%s16603_s3 + $0xb8] sm:$0xff]   ;;  %vm16743_vm13 = vcmask 162944  }
 0x1f1   : > { %4385 = vrot.lane.b32.xlu1 %v10503_v13, %s12038_s26  ;;  %11047 = vmatprep.subr.bf16.mxu1 %v11722_v30  ;;  %v11732_v42 = vld [vmem:[%s16603_s3 + $0x38] sm:$0xff]   ;;  %v10588_v62 = vcombine.low %v5464_v54, %v14075_v14 }
 0x1f2   : > { %v3334_v59 = vpop.permute.xlu1 %3333  ;;  %v5515_v35 = vrot.slane %v5513_v61, 4  ;;  %v5518_v33 = vrot.slane %v5516_v31, 5  ;;  %v5534_v39 = vrot.slane %v5532_v44, 5 }
 0x1f3   : > { %v4376_v32 = vpop.permute.xlu0 %4375  ;;  %3371 = vst.msk [vmem:[#allocation3 + $0x58] sm:$0xff] %vm3359_vm2, %v3334_v59  ;;  %11160 = vmatpush3.bf16.msra.mxu0 %v11723_v49 }
 0x1f4   : > { %4414 = vst.msk [vmem:[#allocation3 + $0x50] sm:$0xff] %vm4403_vm14, %v4376_v32  ;;  %11048 = vmatpush3.bf16.msra.mxu1 %v11724_v25  ;;  %11161 = vmatprep.subr.bf16.mxu0 %v11725_v21  ;;  %v5519_v43 = vor.u32 %v5518_v33, %v5515_v35  ;;  %v5535_v32 = vsel %vm12235_vm1, %v5530_v55, %v5534_v39  ;;  %v538_v55 = vld [vmem:[#allocation4 + $0x78] sm:$0x1] }
 0x1f5   : > { %11049 = vmatprep.subr.bf16.mxu1 %v11726_v41  ;;  %v539_v39 = vsel %vm13974_vm10, 0, %v538_v55  ;;  %v5324_v55 = vld [vmem:[#allocation4 + $0x14] sm:$0x1] }
 0x1f6   : > { %v3512_v4 = vpop.permute.xlu1 %3511  ;;  %v5520_v59 = vrot.slane %v5519_v43, 4  ;;  %540 = vst [vmem:[#allocation4 + $0x78] sm:$0x1] %v539_v39 }
 0x1f7   : > { %v1969_v52 = vpop.permute.xlu0 %1968  ;;  %3549 = vst.msk [vmem:[#allocation3 + $0x58] sm:$0xff] %vm16736_vm15, %v3512_v4  ;;  %11162 = vmatpush3.bf16.msra.mxu0 %v11727_v34  ;;  %vm16744_vm15 = vmmov %vm16740_vm9 }
 0x1f8   : > { %2005 = vst.msk [vmem:[#allocation3 + $0x60] sm:$0xff] %vm16737_vm5, %v1969_v52  ;;  %11050 = vmatpush3.bf16.msra.mxu1 %v11728_v27  ;;  %11163 = vmatprep.subr.bf16.mxu0 %v11729_v37  ;;  %v5525_v53 = vsel %vm12235_vm1, %v5520_v59, %v14093_v1  ;;  %v533_v52 = vsel %vm13974_vm10, 0, %v532_v58  ;;  %vm16745_vm5 = vcmask 228544   ;;  %v587_v37 = vld [vmem:[#allocation4 + $0x68] sm:$0x1] }
 0x1f9   : > { %11051 = vmatprep.subr.bf16.mxu1 %v11730_v36  ;;  %v10604_v4 = vcombine.low %v5525_v53, %v5535_v32  ;;  %534 = vst [vmem:[#allocation4 + $0x60] sm:$0x1] %v533_v52  ;;  %v588_v44 = vsel %vm13966_vm6, 0, %v587_v37 }
 0x1fa   : > { %v4057_v5 = vpop.permute.xlu1 %4056  ;;  %589 = vst [vmem:[#allocation4 + $0x68] sm:$0x1] %v588_v44 }
 0x1fb   : > { %v2293_v16 = vpop.permute.xlu0 %2292  ;;  %v4430_v23 = vld [vmem:[#allocation3 + $0x50] sm:$0xff]  ;;  %4094 = vst.msk [vmem:[#allocation3 + $0x58] sm:$0xff] %vm16738_vm12, %v4057_v5  ;;  %11164 = vmatpush3.bf16.msra.mxu0 %v11731_v3  ;;  %6248 = vmatprep.mubr.bf16.mxu1 %v10604_v4  ;;  %vm16746_vm12 = vmmov %vm16743_vm13 }
 0x1fc   : > { %2329 = vst.msk [vmem:[#allocation3 + $0x60] sm:$0xff] %vm16739_vm4, %v2293_v16  ;;  %11535 = vmatprep.mubr.msk.bf16.mxu0 %vm4463_vm3, %v4430_v23  ;;  %11052 = vmatpush3.bf16.msra.mxu1 %v11732_v42  ;;  %vm16747_vm4 = vcmask 261344  }
 0x1fe   : > { %v4378_v7 = vpop.permute.xlu1 %4377 }
 0x1ff   : > { %v2470_v13 = vpop.permute.xlu0 %2469  ;;  %4415 = vst.msk [vmem:[#allocation3 + $0x58] sm:$0xff] %vm4403_vm14, %v4378_v7  ;;  %6249 = vmatmul.mubr.bf16.vlgmr.msra.gmra.mrb[0].mxu1 %v10588_v62 }
 0x200   : > { %2506 = vst.msk [vmem:[#allocation3 + $0x60] sm:$0xff] %vm16740_vm9, %v2470_v13  ;;  %v529_v13 = vld [vmem:[#allocation4 + $0x54] sm:$0x1]  ;;  %vm16748_vm9 = vmmov %vm16745_vm5 }
 0x201   : > { %v530_v27 = vsel %vm13974_vm10, 0, %v529_v13 }
 0x202   : > { %v1971_v20 = vpop.permute.xlu1 %1970  ;;  %531 = vst [vmem:[#allocation4 + $0x54] sm:$0x1] %v530_v27 }
 0x203   : > { %2006 = vst.msk [vmem:[#allocation3 + $0x68] sm:$0xff] %vm16741_vm7, %v1971_v20  ;;  %v584_v20 = vld [vmem:[#allocation4 + $0x5c] sm:$0x1] }
 0x204   : > { %v585_v33 = vsel %vm13966_vm6, 0, %v584_v20 }
 0x205   : > { %586 = vst [vmem:[#allocation4 + $0x5c] sm:$0x1] %v585_v33 }
 0x206   : > { %v2295_v51 = vpop.permute.xlu1 %2294  ;;  %v4431_v28 = vld [vmem:[#allocation3 + $0x58] sm:$0xff] }
 0x207   : > { %2330 = vst.msk [vmem:[#allocation3 + $0x68] sm:$0xff] %vm16742_vm11, %v2295_v51  ;;  %11536 = vmatmul.mubr.msk.bf16.gmra.mrb[20].mxu0 %vm4463_vm3, %v4431_v28  ;;  %v11517_v0 = vpop.f32.mrb[0].mxu0  ;;  %vm16749_vm11 = vmmov %vm16747_vm4 }
 0x208   : > { %v3015_v26 = vpop.permute.xlu0 %3014  ;;  %v14155_v47 = vadd.f32 %v11517_v0, %v14149_v10  ;;  %v4550_v8 = vpop.f32.mrb[1].mxu0 }
 0x209   : > { %3051 = vst.msk [vmem:[#allocation3 + $0x60] sm:$0xff] %vm16743_vm13, %v3015_v26  ;;  %v14158_v17 = vadd.f32 %v14149_v10, %v4550_v8  ;;  %v11518_v46 = vpop.f32.mrb[2].mxu0  ;;  %vm5318_vm13 = vcmask 1043456  }
 0x20a   : > { %v10526_v12 = vmul.f32 -1.442695, %v14155_v47  ;;  %v14163_v48 = vadd.f32 %v11518_v46, %v14149_v10  ;;  %v4553_v45 = vpop.f32.mrb[3].mxu0 }
 0x20b   : > { %v10524_v56 = vmul.f32 -1.442695, %v14158_v17  ;;  %v14167_v5 = vadd.f32 %v14149_v10, %v4553_v45 }
 0x20c   : > { %v3336_v57 = vpop.permute.xlu0 %3335  ;;  %11821 = vpow2.f32 %v10526_v12  ;;  %v10527_v16 = vmul.f32 -1.442695, %v14163_v48 }
 0x20d   : > { %3372 = vst.msk [vmem:[#allocation3 + $0x60] sm:$0xff] %vm3359_vm2, %v3336_v57  ;;  %11823 = vpow2.f32 %v10524_v56  ;;  %v10525_v23 = vmul.f32 -1.442695, %v14167_v5 }
 0x20e   : > { %v2472_v14 = vpop.permute.xlu1 %2471  ;;  %11825 = vpow2.f32 %v10527_v16 }
 0x20f   : > { %2507 = vst.msk [vmem:[#allocation3 + $0x68] sm:$0xff] %vm16744_vm15, %v2472_v14  ;;  %11827 = vpow2.f32 %v10525_v23  ;;  %vm16750_vm15 = vcmask 97344  }
 0x210   : > { %v3514_v30 = vpop.permute.xlu0 %3513 }
 0x211   : > { %3550 = vst.msk [vmem:[#allocation3 + $0x60] sm:$0xff] %vm16745_vm5, %v3514_v30  ;;  %vm16751_vm5 = vsmask.f32 7938 }
 0x214   : > { %v11521_v49 = vpop.f32.mrb[4].mxu0 }
 0x215   : > { %v14173_v1 = vadd.f32 %v11521_v49, %v14149_v10  ;;  %v4566_v2 = vpop.f32.mrb[5].mxu0 }
 0x216   : > { %v14176_v63 = vadd.f32 %v14149_v10, %v4566_v2  ;;  %v11522_v24 = vpop.f32.mrb[6].mxu0  ;;  %v11822_v29 = vpop.eup %11821 }
 0x217   : > { %v10530_v18 = vmul.f32 -1.442695, %v14173_v1  ;;  %v14180_v25 = vadd.f32 %v11522_v24, %v14149_v10  ;;  %v4569_v21 = vpop.f32.mrb[7].mxu0  ;;  %v11824_v40 = vpop.eup %11823  ;;  %v4775_v41 = vadd.f32 1.0, %v11822_v29 }
 0x218   : > { %v14183_v38 = vadd.f32 %v14149_v10, %v4569_v21  ;;  %v11826_v50 = vpop.eup %11825  ;;  %v4773_v7 = vadd.f32 1.0, %v11824_v40  ;;  %v10528_v54 = vmul.f32 -1.442695, %v14176_v63  ;;  %v5327_v21 = vld [vmem:[#allocation4 + $0x18] sm:$0xf] }
 0x219   : > { %11829 = vpow2.f32 %v10530_v18  ;;  %v11828_v15 = vpop.eup %11827  ;;  %v4776_v34 = vadd.f32 1.0, %v11826_v50  ;;  %v10531_v36 = vmul.f32 -1.442695, %v14180_v25 }
 0x21a   : > { %11831 = vrcp.f32 %v4775_v41  ;;  %v4774_v31 = vadd.f32 1.0, %v11828_v15  ;;  %v10529_v35 = vmul.f32 -1.442695, %v14183_v38  ;;  %v5320_v15 = vld [vmem:[#allocation4 + $0xc] sm:$0xf] }
 0x21b   : > { %11833 = vrcp.f32 %v4773_v7 }
 0x21c   : > { %11835 = vrcp.f32 %v4776_v34 }
 0x21d   : > { %11837 = vrcp.f32 %v4774_v31 }
 0x21e   : > { %11839 = vpow2.f32 %v10528_v54 }
 0x21f   : > { %11841 = vpow2.f32 %v10531_v36 }
 0x220   : > { %v3017_v22 = vpop.permute.xlu1 %3016  ;;  %11843 = vpow2.f32 %v10529_v35 }
 0x221   : > { %3052 = vst.msk [vmem:[#allocation3 + $0x68] sm:$0xff] %vm16746_vm12, %v3017_v22  ;;  %vm14211_vm12 = vmand %vm5318_vm13, %vm16751_vm5 }
 0x222   : > { %v4059_v61 = vpop.permute.xlu0 %4058 }
 0x223   : > { %4095 = vst.msk [vmem:[#allocation3 + $0x60] sm:$0xff] %vm16747_vm4, %v4059_v61  ;;  %v11830_v43 = vpop.eup %11829  ;;  %vm16755_vm4 = vcmask 130144   ;;  %v5331_v61 = vld [vmem:[#allocation4 + $0x20] sm:$0x1] }
 0x224   : > { %v3338_v3 = vpop.permute.xlu1 %3337  ;;  %v11832_v26 = vpop.eup %11831  ;;  %v4779_v59 = vadd.f32 1.0, %v11830_v43  ;;  %vm16759_vm13 = vmmov %vm16755_vm4 }
 0x225   : > { %3373 = vst.msk [vmem:[#allocation3 + $0x68] sm:$0xff] %vm3359_vm2, %v3338_v3  ;;  %v11834_v32 = vpop.eup %11833  ;;  %v4871_v53 = vmul.f32 %v11832_v26, %v14155_v47 }
 0x226   : > { %v4380_v42 = vpop.permute.xlu0 %4379  ;;  %v11836_v62 = vpop.eup %11835  ;;  %v4869_v58 = vmul.f32 %v11834_v32, %v14158_v17  ;;  %11845 = vrcp.f32 %v4779_v59 }
 0x227   : > { %4416 = vst.msk [vmem:[#allocation3 + $0x60] sm:$0xff] %vm4403_vm14, %v4380_v42  ;;  %v11838_v4 = vpop.eup %11837  ;;  %v10988_v0 = vpack.c.bf16 %v4871_v53, %v4871_v53  ;;  %v4872_v8 = vmul.f32 %v11836_v62, %v14163_v48 }
 0x228   : > { %v3516_v51 = vpop.permute.xlu1 %3515  ;;  %v11840_v14 = vpop.eup %11839  ;;  %v10986_v46 = vpack.c.bf16 %v4869_v58, %v4869_v58  ;;  %v4870_v12 = vmul.f32 %v11838_v4, %v14167_v5  ;;  %v16752_v5 = vmov 0 }
 0x229   : > { %3551 = vst.msk [vmem:[#allocation3 + $0x68] sm:$0xff] %vm16748_vm9, %v3516_v51  ;;  %v11842_v45 = vpop.eup %11841  ;;  %v5015_v30 = vshrl.u32 %v10988_v0, 16  ;;  %v10989_v17 = vpack.c.bf16 %v4872_v8, %v4872_v8  ;;  %v4777_v56 = vadd.f32 1.0, %v11840_v14  ;;  %v5018_v29 = vshll.u32 %v10988_v0, 16  ;;  %vm16756_vm9 = vmmov %vm16741_vm7 }
 0x22a   : > { %v1973_v28 = vpop.permute.xlu0 %1972  ;;  %v11844_v16 = vpop.eup %11843  ;;  %v4998_v23 = vshrl.u32 %v10986_v46, 16  ;;  %v10987_v49 = vpack.c.bf16 %v4870_v12, %v4870_v12  ;;  %v4780_v48 = vadd.f32 1.0, %v11842_v45  ;;  %v16753_v5 = vsel %vm14211_vm12, 4294967295, %v16752_v5 }
 0x22b   : > { %2007 = vst.msk [vmem:[#allocation3 + $0x70] sm:$0xff] %vm16741_vm7, %v1973_v28  ;;  %v5017_v24 = vrot.slane %v5015_v30, 7  ;;  %v5023_v18 = vshrl.u32 %v10989_v17, 16  ;;  %11847 = vrcp.f32 %v4777_v56  ;;  %16754 = vst [vmem:[#allocation15_spill] sm:$0xff] %v16753_v5  ;;  %v5001_v41 = vshll.u32 %v10986_v46, 16 }
 0x22c   : > { %v4061_v52 = vpop.permute.xlu1 %4060  ;;  %v5000_v40 = vrot.slane %v4998_v23, 7  ;;  %v5006_v50 = vshrl.u32 %v10987_v49, 16  ;;  %11849 = vrcp.f32 %v4780_v48  ;;  %v5026_v54 = vshll.u32 %v10989_v17, 16  ;;  %vm16757_vm7 = vmmov %vm16750_vm15 }
 0x22d   : > { %4096 = vst.msk [vmem:[#allocation3 + $0x68] sm:$0xff] %vm16749_vm11, %v4061_v52  ;;  %v5020_v13 = vor.u32 %v5018_v29, %v5017_v24  ;;  %v5025_v34 = vrot.slane %v5023_v18, 7  ;;  %v4778_v27 = vadd.f32 1.0, %v11844_v16  ;;  %v5021_v37 = vrot.slane %v5017_v24, 4 }
 0x22e   : > { %v4432_v57 = vld [vmem:[#allocation3 + $0x60] sm:$0xff]  ;;  %v5003_v22 = vor.u32 %v5001_v41, %v5000_v40  ;;  %v5008_v31 = vrot.slane %v5006_v50, 7  ;;  %v5009_v36 = vshll.u32 %v10987_v49, 16  ;;  %v5004_v3 = vrot.slane %v5000_v40, 4 }
 0x22f   : > { %11539 = vmatprep.mubr.msk.bf16.mxu0 %vm4463_vm3, %v4432_v57  ;;  %v2297_v47 = vpop.permute.xlu0 %2296  ;;  %v5328_v20 = vsel %vm14211_vm12, %v5020_v13, %v5327_v21  ;;  %v5028_v35 = vor.u32 %v5026_v54, %v5025_v34  ;;  %v5030_v33 = vrot.slane %v5025_v34, 4  ;;  %11851 = vrcp.f32 %v4778_v27  ;;  %v5334_v34 = vld [vmem:[#allocation4 + $0x24] sm:$0xf] }
 0x230   : > { %2331 = vst.msk [vmem:[#allocation3 + $0x70] sm:$0xff] %vm16750_vm15, %v2297_v47  ;;  %v4382_v2 = vpop.permute.xlu1 %4381  ;;  %v11846_v39 = vpop.eup %11845  ;;  %5329 = vst [vmem:[#allocation4 + $0x18] sm:$0xf] %v5328_v20  ;;  %v5321_v42 = vsel %vm14211_vm12, %v5003_v22, %v5320_v15  ;;  %v5011_v43 = vor.u32 %v5009_v36, %v5008_v31  ;;  %v5013_v51 = vrot.slane %v5008_v31, 4  ;;  %vm16758_vm11 = vcmask 162944  }
 0x231   : > { %4417 = vst.msk [vmem:[#allocation3 + $0x68] sm:$0xff] %vm4403_vm14, %v4382_v2  ;;  %5322 = vst [vmem:[#allocation4 + $0xc] sm:$0xf] %v5321_v42  ;;  %v5029_v28 = vsel %vm12221_vm0, %v5021_v37, %v5028_v35  ;;  %v5332_v26 = vsel %vm13974_vm10, %v5030_v33, %v5331_v61  ;;  %v4875_v59 = vmul.f32 %v11846_v39, %v14173_v1  ;;  %v5341_v47 = vld [vmem:[#allocation4 + $0x30] sm:$0xf]  ;;  %vm16760_vm15 = vcmask 228544  }
 0x232   : > { %5330 = vst [vmem:[#allocation4 + $0x1c] sm:$0xf] %v5029_v28  ;;  %5333 = vst [vmem:[#allocation4 + $0x20] sm:$0x1] %v5332_v26  ;;  %v5012_v32 = vsel %vm12221_vm0, %v5004_v3, %v5011_v43  ;;  %v5325_v53 = vsel %vm13974_vm10, %v5013_v51, %v5324_v55  ;;  %v5345_v31 = vld [vmem:[#allocation4 + $0x38] sm:$0x1] }
 0x233   : > { %v2474_v7 = vpop.permute.xlu0 %2473  ;;  %5323 = vst [vmem:[#allocation4 + $0x10] sm:$0xf] %v5012_v32  ;;  %5326 = vst [vmem:[#allocation4 + $0x14] sm:$0x1] %v5325_v53  ;;  %v10992_v4 = vpack.c.bf16 %v4875_v59, %v4875_v59  ;;  %v5338_v59 = vld [vmem:[#allocation4 + $0x2c] sm:$0x1] }
 0x234   : > { %2508 = vst.msk [vmem:[#allocation3 + $0x70] sm:$0xff] %vm16755_vm4, %v2474_v7  ;;  %v1975_v44 = vpop.permute.xlu1 %1974  ;;  %vm16761_vm5 = vmmov %vm16758_vm11  ;;  %vm16762_vm4 = vcmask 261344  }
 0x235   : > { %2008 = vst.msk [vmem:[#allocation3 + $0x78] sm:$0xff] %vm16756_vm9, %v1975_v44  ;;  %v11848_v57 = vpop.eup %11847  ;;  %v5049_v1 = vshrl.u32 %v10992_v4, 16  ;;  %v5052_v46 = vshll.u32 %v10992_v4, 16  ;;  %vm16764_vm9 = vmmov %vm16762_vm4 }
 0x236   : > { %v11850_v0 = vpop.eup %11849  ;;  %v4873_v8 = vmul.f32 %v11848_v57, %v14176_v63 }
 0x237   : > { %v5051_v14 = vrot.slane %v5049_v1, 7  ;;  %v4876_v12 = vmul.f32 %v11850_v0, %v14180_v25  ;;  %v14252_v51 = vld [vmem:[#allocation4 + $0x18] sm:$0xf] }
 0x238   : > { %v2299_v62 = vpop.permute.xlu1 %2298  ;;  %v4433_v58 = vld [vmem:[#allocation3 + $0x68] sm:$0xff]  ;;  %v10990_v30 = vpack.c.bf16 %v4873_v8, %v4873_v8  ;;  %v5561_v1 = vshrl.u32 %v14252_v51, 16 }
 0x239   : > { %2332 = vst.msk [vmem:[#allocation3 + $0x78] sm:$0xff] %vm16757_vm7, %v2299_v62  ;;  %11540 = vmatmul.mubr.msk.bf16.gmra.mrb[24].mxu0 %vm4463_vm3, %v4433_v58  ;;  %v14236_v17 = vld [vmem:[#allocation4 + $0xc] sm:$0xf]  ;;  %v11852_v56 = vpop.eup %11851  ;;  %v5054_v23 = vor.u32 %v5052_v46, %v5051_v14  ;;  %v10993_v49 = vpack.c.bf16 %v4876_v12, %v4876_v12  ;;  %v5055_v22 = vrot.slane %v5051_v14, 4 }
 0x23a   : > { %v5537_v48 = vshrl.u32 %v14236_v17, 16  ;;  %v5032_v63 = vshrl.u32 %v10990_v30, 16  ;;  %v4874_v2 = vmul.f32 %v11852_v56, %v14183_v38  ;;  %v5540_v25 = vshll.u32 %v14236_v17, 16  ;;  %v14245_v21 = vld [vmem:[#allocation4 + $0x10] sm:$0xf] }
 0x23b   : > { %v3019_v52 = vpop.permute.xlu0 %3018  ;;  %v5342_v24 = vsel %vm14211_vm12, %v5054_v23, %v5341_v47  ;;  %v5035_v29 = vshll.u32 %v10990_v30, 16  ;;  %v5057_v18 = vshrl.u32 %v10993_v49, 16  ;;  %v5497_v40 = vld [vmem:[#allocation4 + $0x14] sm:$0x1]  ;;  %v5060_v54 = vshll.u32 %v10993_v49, 16 }
 0x23c   : > { %3053 = vst.msk [vmem:[#allocation3 + $0x70] sm:$0xff] %vm16758_vm11, %v3019_v52  ;;  %5343 = vst [vmem:[#allocation4 + $0x30] sm:$0xf] %v5342_v24  ;;  %v5034_v50 = vrot.slane %v5032_v63, 7  ;;  %v10991_v7 = vpack.c.bf16 %v4874_v2, %v4874_v2  ;;  %v5539_v13 = vrot.slane %v5537_v48, 4  ;;  %v5542_v15 = vrot.slane %v5540_v25, 5 }
 0x23d   : > { %v5059_v38 = vrot.slane %v5057_v18, 7  ;;  %v5546_v27 = vshll.u32 %v14245_v21, 16  ;;  %v5550_v37 = vshrl.u32 %v14245_v21, 16  ;;  %v5556_v44 = vshll.u32 %v5497_v40, 16  ;;  %v14277_v63 = vld [vmem:[#allocation4 + $0x1c] sm:$0xf] }
 0x23e   : > { %v5037_v61 = vor.u32 %v5035_v29, %v5034_v50  ;;  %v5040_v36 = vshrl.u32 %v10991_v7, 16  ;;  %v5543_v33 = vor.u32 %v5542_v15, %v5539_v13  ;;  %v5043_v42 = vshll.u32 %v10991_v7, 16  ;;  %v5498_v18 = vld [vmem:[#allocation4 + $0x20] sm:$0x1] }
 0x23f   : > { %v3340_v45 = vpop.permute.xlu0 %3339  ;;  %v2476_v16 = vpop.permute.xlu1 %2475  ;;  %v5062_v20 = vor.u32 %v5060_v54, %v5059_v38  ;;  %v5064_v35 = vrot.slane %v5059_v38, 4  ;;  %v5548_v55 = vrot.slane %v5546_v27, 5  ;;  %v5552_v43 = vrot.slane %v5550_v37, 4 }
 0x240   : > { %3374 = vst.msk [vmem:[#allocation3 + $0x70] sm:$0xff] %vm3359_vm2, %v3340_v45  ;;  %v5335_v39 = vsel %vm14211_vm12, %v5037_v61, %v5334_v34  ;;  %v5042_v3 = vrot.slane %v5040_v36, 7  ;;  %v5544_v32 = vrot.slane %v5543_v33, 4  ;;  %v5038_v53 = vrot.slane %v5034_v50, 4 }
 0x241   : > { %2509 = vst.msk [vmem:[#allocation3 + $0x78] sm:$0xff] %vm16759_vm13, %v2476_v16  ;;  %5336 = vst [vmem:[#allocation4 + $0x24] sm:$0xf] %v5335_v39  ;;  %v5063_v28 = vsel %vm12221_vm0, %v5055_v22, %v5062_v20  ;;  %v5346_v26 = vsel %vm13974_vm10, %v5064_v35, %v5345_v31  ;;  %v5553_v4 = vor.u32 %v5552_v43, %v5548_v55  ;;  %v5558_v57 = vrot.slane %v5556_v44, 5 }
 0x242   : > { %5344 = vst [vmem:[#allocation4 + $0x34] sm:$0xf] %v5063_v28  ;;  %5347 = vst [vmem:[#allocation4 + $0x38] sm:$0x1] %v5346_v26  ;;  %v5045_v62 = vor.u32 %v5043_v42, %v5042_v3  ;;  %v5047_v58 = vrot.slane %v5042_v3, 4  ;;  %v5549_v30 = vsel %vm12235_vm1, %v5544_v32, %v5548_v55  ;;  %v5563_v56 = vrot.slane %v5561_v1, 4 }
 0x243   : > { %v3518_v41 = vpop.permute.xlu0 %3517  ;;  %v5554_v12 = vrot.slane %v5553_v4, 4  ;;  %v5564_v2 = vshll.u32 %v14252_v51, 16  ;;  %v5570_v13 = vshll.u32 %v14277_v63, 16  ;;  %v5574_v15 = vshrl.u32 %v14277_v63, 16 }
 0x244   : > { %3552 = vst.msk [vmem:[#allocation3 + $0x70] sm:$0xff] %vm16760_vm15, %v3518_v41  ;;  %v5046_v0 = vsel %vm12221_vm0, %v5038_v53, %v5045_v62  ;;  %v5339_v8 = vsel %vm13974_vm10, %v5047_v58, %v5338_v59  ;;  %v10589_v41 = vcombine.low %v14236_v17, %v14245_v21  ;;  %v5580_v38 = vshll.u32 %v5498_v18, 16 }
 0x245   : > { %5337 = vst [vmem:[#allocation4 + $0x28] sm:$0xf] %v5046_v0  ;;  %5340 = vst [vmem:[#allocation4 + $0x2c] sm:$0x1] %v5339_v8  ;;  %v5559_v48 = vsel %vm12235_vm1, %v5554_v12, %v5558_v57  ;;  %v5566_v50 = vrot.slane %v5564_v2, 5  ;;  %v5572_v27 = vrot.slane %v5570_v13, 5  ;;  %v10590_v8 = vcombine.low %v14252_v51, %v14277_v63 }
 0x246   : > { %v11525_v52 = vpop.f32.mrb[8].mxu0  ;;  %v10605_v29 = vcombine.low %v5549_v30, %v5559_v48  ;;  %v5576_v37 = vrot.slane %v5574_v15, 4  ;;  %v5582_v20 = vrot.slane %v5580_v38, 5  ;;  %v14306_v57 = vld [vmem:[#allocation4 + $0x30] sm:$0xf] }
 0x247   : > { %v14264_v14 = vadd.f32 %v11525_v52, %v14149_v10  ;;  %v4582_v46 = vpop.f32.mrb[9].mxu0  ;;  %v5567_v34 = vor.u32 %v5566_v50, %v5563_v56  ;;  %v535_v50 = vld [vmem:[#allocation4 + $0x6c] sm:$0x1] }
 0x248   : > { %v14267_v45 = vadd.f32 %v14149_v10, %v4582_v46  ;;  %v11526_v47 = vpop.f32.mrb[10].mxu0  ;;  %6256 = vmatprep.mubr.bf16.mxu1 %v10605_v29  ;;  %v14290_v54 = vld [vmem:[#allocation4 + $0x24] sm:$0xf]  ;;  %v5577_v61 = vor.u32 %v5576_v37, %v5572_v27  ;;  %v5609_v29 = vshrl.u32 %v14306_v57, 16 }
 0x249   : > { %v10534_v16 = vmul.f32 -1.442695, %v14264_v14  ;;  %v14273_v23 = vadd.f32 %v11526_v47, %v14149_v10  ;;  %v4585_v49 = vpop.f32.mrb[11].mxu0  ;;  %6257 = vmatmul.mubr.bf16.gmra.mrb[4].mxu1 %v10589_v41  ;;  %v5568_v21 = vrot.slane %v5567_v34, 4  ;;  %v5585_v44 = vshrl.u32 %v14290_v54, 16 }
 0x24a   : > { %v10532_v25 = vmul.f32 -1.442695, %v14267_v45  ;;  %v14282_v24 = vadd.f32 %v14149_v10, %v4585_v49  ;;  %v5588_v35 = vshll.u32 %v14290_v54, 16  ;;  %v5578_v33 = vrot.slane %v5577_v61, 4 }
 0x24b   : > { %11853 = vpow2.f32 %v10534_v16  ;;  %v10535_v40 = vmul.f32 -1.442695, %v14273_v23  ;;  %v5587_v55 = vrot.slane %v5585_v44, 4  ;;  %v5573_v59 = vsel %vm12235_vm1, %v5568_v21, %v5572_v27  ;;  %v593_v27 = vld [vmem:[#allocation4 + $0x80] sm:$0x1] }
 0x24c   : > { %11855 = vpow2.f32 %v10532_v25  ;;  %v10533_v7 = vmul.f32 -1.442695, %v14282_v24  ;;  %v14294_v31 = vld [vmem:[#allocation4 + $0x28] sm:$0xf]  ;;  %v5499_v36 = vld [vmem:[#allocation4 + $0x2c] sm:$0x1]  ;;  %v5583_v32 = vsel %vm12235_vm1, %v5578_v33, %v5582_v20 }
 0x24d   : > { %11857 = vpow2.f32 %v10535_v40  ;;  %v5594_v39 = vshll.u32 %v14294_v31, 16  ;;  %v5598_v3 = vshrl.u32 %v14294_v31, 16  ;;  %v5590_v28 = vrot.slane %v5588_v35, 5  ;;  %v14311_v25 = vld [vmem:[#allocation4 + $0x34] sm:$0xf] }
 0x24e   : > { %11859 = vpow2.f32 %v10533_v7  ;;  %v5604_v26 = vshll.u32 %v5499_v36, 16  ;;  %v10606_v4 = vcombine.low %v5573_v59, %v5583_v32  ;;  %v5500_v40 = vld [vmem:[#allocation4 + $0x38] sm:$0x1]  ;;  %v5611_v41 = vrot.slane %v5609_v29, 4  ;;  %v6442_v21 = vld [vmem:[#allocation4 + $0x4] sm:$0xf] }
 0x24f   : > { %v5596_v53 = vrot.slane %v5594_v39, 5  ;;  %v5600_v62 = vrot.slane %v5598_v3, 4  ;;  %v5591_v52 = vor.u32 %v5590_v28, %v5587_v55  ;;  %v5612_v34 = vshll.u32 %v14306_v57, 16  ;;  %v6441_v28 = vld [vmem:[#allocation4] sm:$0xe] }
 0x250   : > { %6264 = vmatprep.mubr.bf16.mxu1 %v10606_v4  ;;  %v5606_v16 = vrot.slane %v5604_v26, 5  ;;  %v5618_v38 = vshll.u32 %v14311_v25, 16  ;;  %v5622_v37 = vshrl.u32 %v14311_v25, 16  ;;  %v536_v44 = vsel %vm13974_vm10, 0, %v535_v50  ;;  %v6443_v32 = vld [vmem:[#allocation4 + $0x8] sm:$0x1] }
 0x251   : > { %v5601_v46 = vor.u32 %v5600_v62, %v5596_v53  ;;  %v5592_v56 = vrot.slane %v5591_v52, 4  ;;  %6265 = vmatmul.mubr.bf16.gmra.mrb[8].mxu1 %v10590_v8  ;;  %v5614_v61 = vrot.slane %v5612_v34, 5  ;;  %v10591_v20 = vcombine.low %v14290_v54, %v14294_v31  ;;  %537 = vst [vmem:[#allocation4 + $0x6c] sm:$0x1] %v536_v44  ;;  %v6445_v50 = vld [vmem:[#allocation4 + $0x10] sm:$0xf] }
 0x252   : > { %v5620_v36 = vrot.slane %v5618_v38, 5  ;;  %v5624_v35 = vrot.slane %v5622_v37, 4  ;;  %v5628_v33 = vshll.u32 %v5500_v40, 16  ;;  %v594_v3 = vsel %vm13966_vm6, 0, %v593_v27  ;;  %v5348_v27 = vld [vmem:[#allocation4 + $0x3c] sm:$0xf] }
 0x253   : > { %v3021_v22 = vpop.permute.xlu1 %3020  ;;  %v5602_v2 = vrot.slane %v5601_v46, 4  ;;  %v5597_v63 = vsel %vm12235_vm1, %v5592_v56, %v5596_v53  ;;  %v5615_v39 = vor.u32 %v5614_v61, %v5611_v41  ;;  %v6539_v26 = vrot.slane %v6442_v21, 5  ;;  %595 = vst [vmem:[#allocation4 + $0x80] sm:$0x1] %v594_v3  ;;  %v5352_v3 = vld [vmem:[#allocation4 + $0x44] sm:$0x1] }
 0x254   : > { %3054 = vst.msk [vmem:[#allocation3 + $0x78] sm:$0xff] %vm16761_vm5, %v3021_v22  ;;  %v590_v22 = vld [vmem:[#allocation4 + $0x74] sm:$0x1]  ;;  %v5625_v54 = vor.u32 %v5624_v35, %v5620_v36  ;;  %v5630_v62 = vrot.slane %v5628_v33, 5  ;;  %v10636_v4 = vrot.slane %v6441_v28, 9  ;;  %v6542_v56 = vrot.slane %v6443_v32, 5 }
 0x255   : > { %v4063_v17 = vpop.permute.xlu0 %4062  ;;  %v11854_v58 = vpop.eup %11853  ;;  %v5607_v18 = vsel %vm12235_vm1, %v5602_v2, %v5606_v16  ;;  %v5616_v31 = vrot.slane %v5615_v39, 4  ;;  %v10592_v29 = vcombine.low %v14306_v57, %v14311_v25  ;;  %v5355_v25 = vld [vmem:[#allocation4 + $0x48] sm:$0xf] }
 0x256   : > { %4097 = vst.msk [vmem:[#allocation3 + $0x70] sm:$0xff] %vm16762_vm4, %v4063_v17  ;;  %v11856_v1 = vpop.eup %11855  ;;  %v4783_v0 = vadd.f32 1.0, %v11854_v58  ;;  %v10607_v15 = vcombine.low %v5597_v63, %v5607_v18  ;;  %v544_v17 = vld [vmem:[#allocation4 + $0x90] sm:$0x1]  ;;  %v5626_v53 = vrot.slane %v5625_v54, 4  ;;  %v6540_v18 = vsel %vm12164_vm8, %v10636_v4, %v6539_v26 }
 0x257   : > { %v3342_v42 = vpop.permute.xlu1 %3341  ;;  %v11858_v12 = vpop.eup %11857  ;;  %v4781_v30 = vadd.f32 1.0, %v11856_v1  ;;  %v5621_v46 = vsel %vm12235_vm1, %v5616_v31, %v5620_v36  ;;  %v5359_v36 = vld [vmem:[#allocation4 + $0x50] sm:$0x1]  ;;  %v6446_v54 = vld [vmem:[#allocation4 + $0x14] sm:$0x1] }
 0x258   : > { %3375 = vst.msk [vmem:[#allocation3 + $0x78] sm:$0xff] %vm3359_vm2, %v3342_v42  ;;  %v11860_v49 = vpop.eup %11859  ;;  %vm16763_vm2 = vmmov %vm16760_vm15  ;;  %11861 = vrcp.f32 %v4783_v0  ;;  %v4784_v48 = vadd.f32 1.0, %v11858_v12  ;;  %6272 = vmatprep.mubr.bf16.mxu1 %v10607_v15  ;;  %v591_v42 = vsel %vm13966_vm6, 0, %v590_v22  ;;  %v6541_v0 = vrot.slane %v6539_v26, 4  ;;  %v14353_v31 = vld [vmem:[#allocation4 + $0x1c] sm:$0xf] }
 0x259   : > { %v4384_v43 = vpop.permute.xlu0 %4383  ;;  %11863 = vrcp.f32 %v4781_v30  ;;  %v4782_v51 = vadd.f32 1.0, %v11860_v49  ;;  %6273 = vmatmul.mubr.bf16.gmra.mrb[12].mxu1 %v10591_v20  ;;  %592 = vst [vmem:[#allocation4 + $0x74] sm:$0x1] %v591_v42  ;;  %v5631_v12 = vsel %vm12235_vm1, %v5626_v53, %v5630_v62  ;;  %v11733_v30 = vld [vmem:[#allocation4 + $0xc] sm:$0xff]  }
 0x25a   : > { %4418 = vst.msk [vmem:[#allocation3 + $0x70] sm:$0xff] %vm4403_vm14, %v4384_v43  ;;  %11865 = vrcp.f32 %v4784_v48  ;;  %v545_v43 = vsel %vm13974_vm10, 0, %v544_v17  ;;  %v10608_v48 = vcombine.low %v5621_v46, %v5631_v12  ;;  %v6546_v17 = vrot.slane %v6445_v50, 5  ;;  %v6447_v12 = vld [vmem:[#allocation4 + $0x18] sm:$0xe] }
 0x25b   : > { %v3520_v47 = vpop.permute.xlu1 %3519  ;;  %11867 = vrcp.f32 %v4782_v51  ;;  %546 = vst [vmem:[#allocation4 + $0x90] sm:$0x1] %v545_v43 }
 0x25c   : > { %3553 = vst.msk [vmem:[#allocation3 + $0x78] sm:$0xff] %vm16763_vm2, %v3520_v47  ;;  %6280 = vmatprep.mubr.bf16.mxu1 %v10608_v48  ;;  %v6548_v62 = vrot.slane %v6546_v17, 4  ;;  %v14368_v48 = vld [vmem:[#allocation4 + $0x28] sm:$0xf] }
 0x25f   : > { %v4065_v7 = vpop.permute.xlu1 %4064 }
 0x260   : > { %4098 = vst.msk [vmem:[#allocation3 + $0x78] sm:$0xff] %vm16764_vm9, %v4065_v7 }
 0x261   : > { %v4434_v13 = vld [vmem:[#allocation3 + $0x70] sm:$0xff]  ;;  %6281 = vmatmul.mubr.bf16.gmra.mrb[16].mxu1 %v10592_v29 }
 0x262   : > { %11543 = vmatprep.mubr.msk.bf16.mxu0 %vm4463_vm3, %v4434_v13  ;;  %v11862_v59 = vpop.eup %11861 }
 0x263   : > { %v4386_v55 = vpop.permute.xlu1 %4385  ;;  %v11864_v58 = vpop.eup %11863  ;;  %v4879_v52 = vmul.f32 %v11862_v59, %v14264_v14  ;;  %v11735_v59 = vld [vmem:[#allocation4 + $0x18] sm:$0xff]  }
 0x264   : > { %4419 = vst.msk [vmem:[#allocation3 + $0x78] sm:$0xff] %vm4403_vm14, %v4386_v55  ;;  %v11866_v1 = vpop.eup %11865  ;;  %v4877_v8 = vmul.f32 %v11864_v58, %v14267_v45 }
 0x265   : > { %v11868_v47 = vpop.eup %11867  ;;  %v10996_v16 = vpack.c.bf16 %v4879_v52, %v4879_v52  ;;  %v4880_v49 = vmul.f32 %v11866_v1, %v14273_v23  ;;  %v6543_v23 = vsel %vm12164_vm8, %v6541_v0, %v6542_v56  ;;  %v6444_v52 = vld [vmem:[#allocation4 + $0xc] sm:$0xe]  ;;  %v6549_v1 = vrot.slane %v6446_v54, 5 }
 0x266   : > { %v10994_v2 = vpack.c.bf16 %v4877_v8, %v4877_v8  ;;  %v4878_v14 = vmul.f32 %v11868_v47, %v14282_v24  ;;  %v10652_v21 = vcombine.low %v6540_v18, %v6543_v23  ;;  %v6553_v0 = vrot.slane %v14353_v31, 5  ;;  %v11738_v47 = vld [vmem:[#allocation4 + $0x24] sm:$0xff]  }
 0x267   : > { %v5083_v51 = vshrl.u32 %v10996_v16, 16  ;;  %v10997_v63 = vpack.c.bf16 %v4880_v49, %v4880_v49  ;;  %v5086_v7 = vshll.u32 %v10996_v16, 16  ;;  %v10637_v8 = vrot.slane %v6444_v52, 9  ;;  %v14408_v52 = vld [vmem:[#allocation4 + $0x34] sm:$0xf] }
 0x268   : > { %v5066_v40 = vshrl.u32 %v10994_v2, 16  ;;  %v10995_v41 = vpack.c.bf16 %v4878_v14, %v4878_v14  ;;  %v5069_v15 = vshll.u32 %v10994_v2, 16  ;;  %v6550_v46 = vsel %vm12164_vm8, %v6548_v62, %v6549_v1 }
 0x269   : > { %v5085_v24 = vrot.slane %v5083_v51, 7  ;;  %v5091_v57 = vshrl.u32 %v10997_v63, 16  ;;  %v5094_v22 = vshll.u32 %v10997_v63, 16  ;;  %v6547_v16 = vsel %vm12164_vm8, %v10637_v8, %v6546_v17 }
 0x26a   : > { %v5068_v13 = vrot.slane %v5066_v40, 7  ;;  %v5074_v34 = vshrl.u32 %v10995_v41, 16  ;;  %v5077_v20 = vshll.u32 %v10995_v41, 16  ;;  %v6555_v49 = vrot.slane %v6553_v0, 4 }
 0x26b   : > { %v4435_v45 = vld [vmem:[#allocation3 + $0x78] sm:$0xff]  ;;  %v5088_v38 = vor.u32 %v5086_v7, %v5085_v24  ;;  %v5093_v37 = vrot.slane %v5091_v57, 7  ;;  %v5089_v35 = vrot.slane %v5085_v24, 4  ;;  %v10653_v29 = vcombine.low %v6547_v16, %v6550_v46 }
 0x26c   : > { %11544 = vmatmul.mubr.msk.bf16.gmra.mrb[28].mxu0 %vm4463_vm3, %v4435_v45  ;;  %v5071_v61 = vor.u32 %v5069_v15, %v5068_v13  ;;  %v5076_v44 = vrot.slane %v5074_v34, 7  ;;  %v5072_v42 = vrot.slane %v5068_v13, 4  ;;  %v10638_v45 = vrot.slane %v6447_v12, 9 }
 0x26d   : > { %7034 = vmatprep.mubr.bf16.mxu0 %v11733_v30  ;;  %v5356_v33 = vsel %vm14211_vm12, %v5088_v38, %v5355_v25  ;;  %v5096_v55 = vor.u32 %v5094_v22, %v5093_v37  ;;  %v5098_v39 = vrot.slane %v5093_v37, 4  ;;  %v6449_v30 = vld [vmem:[#allocation4 + $0x20] sm:$0x1]  ;;  %v6560_v7 = vrot.slane %v14368_v48, 5  ;;  %v6450_v37 = vld [vmem:[#allocation4 + $0x24] sm:$0xe] }
 0x26e   : > { %5357 = vst [vmem:[#allocation4 + $0x48] sm:$0xf] %v5356_v33  ;;  %v5349_v43 = vsel %vm14211_vm12, %v5071_v61, %v5348_v27  ;;  %v5079_v28 = vor.u32 %v5077_v20, %v5076_v44  ;;  %v5081_v26 = vrot.slane %v5076_v44, 4  ;;  %v6556_v41 = vrot.slane %v6449_v30, 5  ;;  %v6455_v48 = vld [vmem:[#allocation4 + $0x38] sm:$0x1] }
 0x26f   : > { %5350 = vst [vmem:[#allocation4 + $0x3c] sm:$0xf] %v5349_v43  ;;  %v5097_v32 = vsel %vm12221_vm0, %v5089_v35, %v5096_v55  ;;  %v5360_v53 = vsel %vm13974_vm10, %v5098_v39, %v5359_v36  ;;  %v6562_v20 = vrot.slane %v6560_v7, 4  ;;  %v6554_v55 = vsel %vm12164_vm8, %v10638_v45, %v6553_v0 }
 0x270   : > { %5358 = vst [vmem:[#allocation4 + $0x4c] sm:$0xf] %v5097_v32  ;;  %5361 = vst [vmem:[#allocation4 + $0x50] sm:$0x1] %v5360_v53  ;;  %v5080_v58 = vsel %vm12221_vm0, %v5072_v42, %v5079_v28  ;;  %v5353_v4 = vsel %vm13974_vm10, %v5081_v26, %v5352_v3  ;;  %v6557_v15 = vsel %vm12164_vm8, %v6555_v49, %v6556_v41  ;;  %v10639_v28 = vrot.slane %v6450_v37, 9 }
 0x271   : > { %5351 = vst [vmem:[#allocation4 + $0x40] sm:$0xf] %v5080_v58  ;;  %5354 = vst [vmem:[#allocation4 + $0x44] sm:$0x1] %v5353_v4  ;;  %v10654_v43 = vcombine.low %v6554_v55, %v6557_v15  ;;  %v541_v41 = vld [vmem:[#allocation4 + $0x84] sm:$0x1] }
 0x272   : > { %vm9992_vm3 = vcmask 23552  }
 0x274   : > { %7035 = vmatmul.mubr.bf16.vlgmr.msra.gmra.mrb[32].mxu0 %v10652_v21  ;;  %v6452_v21 = vld [vmem:[#allocation4 + $0x2c] sm:$0x1] }
 0x275   : > { %7042 = vmatprep.mubr.bf16.mxu0 %v11735_v59  ;;  %v14378_v40 = vld [vmem:[#allocation4 + $0x48] sm:$0xf]  ;;  %v6563_v26 = vrot.slane %v6452_v21, 5  ;;  %v11739_v59 = vld [vmem:[#allocation4 + $0x30] sm:$0xff]  }
 0x276   : > { %v11529_v56 = vpop.f32.mrb[12].mxu0  ;;  %v14376_v18 = vld [vmem:[#allocation4 + $0x3c] sm:$0xf]  ;;  %v5657_v44 = vshrl.u32 %v14378_v40, 16  ;;  %v5660_v62 = vshll.u32 %v14378_v40, 16 }
 0x277   : > { %v14371_v2 = vadd.f32 %v11529_v56, %v14149_v10  ;;  %v4598_v14 = vpop.f32.mrb[13].mxu0  ;;  %v5633_v13 = vshrl.u32 %v14376_v18, 16  ;;  %v14402_v42 = vld [vmem:[#allocation4 + $0x4c] sm:$0xf]  ;;  %v5502_v31 = vld [vmem:[#allocation4 + $0x50] sm:$0x1]  ;;  %v6564_v4 = vsel %vm12164_vm8, %v6562_v20, %v6563_v26  ;;  %v6561_v56 = vsel %vm12164_vm8, %v10639_v28, %v6560_v7 }
 0x278   : > { %v14374_v51 = vadd.f32 %v14149_v10, %v4598_v14  ;;  %v11530_v63 = vpop.f32.mrb[14].mxu0  ;;  %v14393_v38 = vld [vmem:[#allocation4 + $0x40] sm:$0xf]  ;;  %v5501_v27 = vld [vmem:[#allocation4 + $0x44] sm:$0x1]  ;;  %v5659_v53 = vrot.slane %v5657_v44, 4 }
 0x279   : > { %v10538_v50 = vmul.f32 -1.442695, %v14371_v2  ;;  %v14382_v23 = vadd.f32 %v11530_v63, %v14149_v10  ;;  %v4601_v24 = vpop.f32.mrb[15].mxu0  ;;  %v5635_v17 = vrot.slane %v5633_v13, 4  ;;  %v5642_v61 = vshll.u32 %v14393_v38, 16  ;;  %v11742_v13 = vld [vmem:[#allocation4 + $0x3c] sm:$0xff]  }
 0x27a   : > { %v10536_v57 = vmul.f32 -1.442695, %v14374_v51  ;;  %v14387_v25 = vadd.f32 %v14149_v10, %v4601_v24  ;;  %v5636_v10 = vshll.u32 %v14376_v18, 16  ;;  %v5646_v36 = vshrl.u32 %v14393_v38, 16  ;;  %v599_v7 = vld [vmem:[#allocation4 + $0x98] sm:$0x1] }
 0x27b   : > { %11869 = vpow2.f32 %v10538_v50  ;;  %v10539_v34 = vmul.f32 -1.442695, %v14382_v23  ;;  %v5652_v33 = vshll.u32 %v5501_v27, 16  ;;  %v5644_v39 = vrot.slane %v5642_v61, 5  ;;  %v596_v27 = vld [vmem:[#allocation4 + $0x8c] sm:$0x1] }
 0x27c   : > { %7043 = vmatmul.mubr.bf16.gmra.mrb[36].mxu0 %v10653_v29  ;;  %11871 = vpow2.f32 %v10536_v57  ;;  %v10537_v22 = vmul.f32 -1.442695, %v14387_v25  ;;  %v5638_v35 = vrot.slane %v5636_v10, 5  ;;  %v5648_v3 = vrot.slane %v5646_v36, 4  ;;  %v11749_v61 = vld [vmem:[%s16603_s3 + $0x140] sm:$0xff]   ;;  %v11753_v44 = vld [vmem:[%s16603_s3 + $0x148] sm:$0xff]  }
 0x27d   : > { %7050 = vmatprep.mubr.bf16.mxu0 %v11738_v47  ;;  %11873 = vpow2.f32 %v10539_v34  ;;  %v5666_v58 = vshll.u32 %v14402_v42, 16  ;;  %v5654_v0 = vrot.slane %v5652_v33, 5  ;;  %v5670_v8 = vshrl.u32 %v14402_v42, 16  ;;  %v11751_v36 = vld [vmem:[%s16603_s3 + $0x100] sm:$0xff]   ;;  %11261 = vmatprep.subr.bf16.mxu1 %v11749_v61  ;;  %v6457_v28 = vld [vmem:[#allocation4 + $0x40] sm:$0xf] }
 0x27e   : > { %11875 = vpow2.f32 %v10537_v22  ;;  %v5639_v54 = vor.u32 %v5638_v35, %v5635_v17  ;;  %v5649_v32 = vor.u32 %v5648_v3, %v5644_v39  ;;  %v5662_v12 = vrot.slane %v5660_v62, 5  ;;  %11262 = vmatpush3.bf16.msra.mxu1 %v11751_v36  ;;  %v5362_v36 = vld [vmem:[#allocation4 + $0x54] sm:$0xf] }
 0x27f   : > { %v5668_v47 = vrot.slane %v5666_v58, 5  ;;  %v5676_v30 = vshll.u32 %v5502_v31, 16  ;;  %v5672_v16 = vrot.slane %v5670_v8, 4  ;;  %v6567_v14 = vrot.slane %v14408_v52, 5  ;;  %11263 = vmatprep.subr.bf16.mxu1 %v11753_v44 }
 0x280   : > { %v5640_v1 = vrot.slane %v5639_v54, 4  ;;  %v5650_v46 = vrot.slane %v5649_v32, 4  ;;  %v5663_v63 = vor.u32 %v5662_v12, %v5659_v53  ;;  %v10655_v24 = vcombine.low %v6561_v56, %v6564_v4  ;;  %v11743_v12 = vld [vmem:[#allocation4 + $0x48] sm:$0xff]   ;;  %v6456_v56 = vld [vmem:[#allocation4 + $0x3c] sm:$0xe] }
 0x281   : > { %v5673_v34 = vor.u32 %v5672_v16, %v5668_v47  ;;  %v10593_v17 = vcombine.low %v14376_v18, %v14393_v38  ;;  %v5678_v21 = vrot.slane %v5676_v30, 5  ;;  %v542_v18 = vsel %vm13974_vm10, 0, %v541_v41  ;;  %v550_v38 = vld [vmem:[#allocation4 + $0xa8] sm:$0x1] }
 0x282   : > { %v5645_v29 = vsel %vm12235_vm1, %v5640_v1, %v5644_v39  ;;  %v5655_v45 = vsel %vm12235_vm1, %v5650_v46, %v5654_v0  ;;  %v5664_v10 = vrot.slane %v5663_v63, 4  ;;  %v6569_v39 = vrot.slane %v6567_v14, 4  ;;  %543 = vst [vmem:[#allocation4 + $0x84] sm:$0x1] %v542_v18  ;;  %v6458_v46 = vld [vmem:[#allocation4 + $0x44] sm:$0x1] }
 0x283   : > { %v10609_v15 = vcombine.low %v5645_v29, %v5655_v45  ;;  %v5674_v33 = vrot.slane %v5673_v34, 4  ;;  %v6570_v3 = vrot.slane %v6455_v48, 5  ;;  %v600_v31 = vsel %vm13966_vm6, 0, %v599_v7 }
 0x284   : > { %7051 = vmatmul.mubr.bf16.gmra.mrb[40].mxu0 %v10654_v43  ;;  %v6453_v43 = vld [vmem:[#allocation4 + $0x30] sm:$0xe]  ;;  %v5669_v26 = vsel %vm12235_vm1, %v5664_v10, %v5668_v47  ;;  %601 = vst [vmem:[#allocation4 + $0x98] sm:$0x1] %v600_v31  ;;  %v597_v53 = vsel %vm13966_vm6, 0, %v596_v27  ;;  %v551_v62 = vsel %vm13974_vm10, 0, %v550_v38  ;;  %v10594_v0 = vcombine.low %v14378_v40, %v14402_v42 }
 0x285   : > { %7058 = vmatprep.mubr.bf16.mxu0 %v11739_v59  ;;  %v11870_v49 = vpop.eup %11869  ;;  %6288 = vmatprep.mubr.bf16.mxu1 %v10609_v15  ;;  %v5679_v54 = vsel %vm12235_vm1, %v5674_v33, %v5678_v21  ;;  %v11755_v59 = vld [vmem:[%s16603_s3 + $0x108] sm:$0xff]   ;;  %598 = vst [vmem:[#allocation4 + $0x8c] sm:$0x1] %v597_v53  ;;  %552 = vst [vmem:[#allocation4 + $0xa8] sm:$0x1] %v551_v62  ;;  %v10640_v58 = vrot.slane %v6453_v43, 9  ;;  %v6571_v4 = vsel %vm12164_vm8, %v6569_v39, %v6570_v3 }
 0x286   : > { %v11872_v50 = vpop.eup %11871  ;;  %v4787_v57 = vadd.f32 1.0, %v11870_v49  ;;  %6289 = vmatmul.mubr.bf16.gmra.mrb[20].mxu1 %v10593_v17  ;;  %v10610_v32 = vcombine.low %v5669_v26, %v5679_v54  ;;  %v6574_v52 = vrot.slane %v6457_v28, 5  ;;  %v6577_v48 = vrot.slane %v6458_v46, 5  ;;  %v5366_v28 = vld [vmem:[#allocation4 + $0x5c] sm:$0x1] }
 0x287   : > { %v11874_v37 = vpop.eup %11873  ;;  %v4785_v22 = vadd.f32 1.0, %v11872_v50  ;;  %11264 = vmatpush3.bf16.msra.mxu1 %v11755_v59  ;;  %v6568_v1 = vsel %vm12164_vm8, %v10640_v58, %v6567_v14  ;;  %v10641_v42 = vrot.slane %v6456_v56, 9 }
 0x288   : > { %v11876_v20 = vpop.eup %11875  ;;  %11877 = vrcp.f32 %v4787_v57  ;;  %v4788_v35 = vadd.f32 1.0, %v11874_v37  ;;  %6296 = vmatprep.mubr.bf16.mxu1 %v10610_v32  ;;  %v10656_v8 = vcombine.low %v6568_v1, %v6571_v4  ;;  %v6576_v47 = vrot.slane %v6574_v52, 4  ;;  %v6461_v4 = vld [vmem:[#allocation4 + $0x50] sm:$0x1]  ;;  %v6459_v1 = vld [vmem:[#allocation4 + $0x48] sm:$0xe] }
 0x289   : > { %11879 = vrcp.f32 %v4785_v22  ;;  %v4786_v55 = vadd.f32 1.0, %v11876_v20  ;;  %v6460_v22 = vld [vmem:[#allocation4 + $0x4c] sm:$0xf] }
 0x28a   : > { %11881 = vrcp.f32 %v4788_v35  ;;  %v6578_v41 = vsel %vm12164_vm8, %v6576_v47, %v6577_v48  ;;  %v5373_v35 = vld [vmem:[#allocation4 + $0x68] sm:$0x1]  ;;  %v6581_v38 = vrot.slane %v6460_v22, 5 }
 0x28b   : > { %11883 = vrcp.f32 %v4786_v55 }
 0x28c   : > { %7059 = vmatmul.mubr.bf16.gmra.mrb[44].mxu0 %v10655_v24 }
 0x28d   : > { %7066 = vmatprep.mubr.bf16.mxu0 %v11742_v13 }
 0x28e   : > { %6297 = vmatmul.mubr.bf16.gmra.mrb[24].mxu1 %v10594_v0  ;;  %v6584_v0 = vrot.slane %v6461_v4, 5 }
 0x292   : > { %v11878_v30 = vpop.eup %11877 }
 0x293   : > { %v11880_v16 = vpop.eup %11879  ;;  %v4883_v49 = vmul.f32 %v11878_v30, %v14371_v2  ;;  %v6575_v2 = vsel %vm12164_vm8, %v10641_v42, %v6574_v52  ;;  %v6583_v52 = vrot.slane %v6581_v38, 4 }
 0x294   : > { %7067 = vmatmul.mubr.bf16.gmra.mrb[48].mxu0 %v10656_v8  ;;  %v11882_v29 = vpop.eup %11881  ;;  %v4881_v45 = vmul.f32 %v11880_v16, %v14374_v51  ;;  %v10657_v7 = vcombine.low %v6575_v2, %v6578_v41  ;;  %v10642_v8 = vrot.slane %v6459_v1, 9 }
 0x295   : > { %7074 = vmatprep.mubr.bf16.mxu0 %v11743_v12  ;;  %v11884_v14 = vpop.eup %11883  ;;  %v11000_v63 = vpack.c.bf16 %v4883_v49, %v4883_v49  ;;  %v4884_v40 = vmul.f32 %v11882_v29, %v14382_v23  ;;  %v5369_v23 = vld [vmem:[#allocation4 + $0x60] sm:$0xf]  ;;  %v6585_v46 = vsel %vm12164_vm8, %v6583_v52, %v6584_v0 }
 0x296   : > { %v10998_v50 = vpack.c.bf16 %v4881_v45, %v4881_v45  ;;  %v4882_v24 = vmul.f32 %v11884_v14, %v14387_v25  ;;  %v6582_v47 = vsel %vm12164_vm8, %v10642_v8, %v6581_v38  ;;  %v14483_v14 = vld [vmem:[%s16602_s2] ss:$0 sm:$0xff] }
 0x297   : > { %v5117_v57 = vshrl.u32 %v11000_v63, 16  ;;  %v11001_v13 = vpack.c.bf16 %v4884_v40, %v4884_v40  ;;  %v5120_v27 = vshll.u32 %v11000_v63, 16  ;;  %v10658_v29 = vcombine.low %v6582_v47, %v6585_v46 }
 0x298   : > { %v5100_v15 = vshrl.u32 %v10998_v50, 16  ;;  %v10999_v34 = vpack.c.bf16 %v4882_v24, %v4882_v24  ;;  %v5103_v10 = vshll.u32 %v10998_v50, 16 }
 0x299   : > { %v5119_v51 = vrot.slane %v5117_v57, 7  ;;  %v5125_v37 = vshrl.u32 %v11001_v13, 16  ;;  %v5128_v44 = vshll.u32 %v11001_v13, 16 }
 0x29a   : > { %v5102_v17 = vrot.slane %v5100_v15, 7  ;;  %v5108_v21 = vshrl.u32 %v10999_v34, 16  ;;  %v5111_v18 = vshll.u32 %v10999_v34, 16 }
 0x29b   : > { %v5122_v61 = vor.u32 %v5120_v27, %v5119_v51  ;;  %v5127_v25 = vrot.slane %v5125_v37, 7  ;;  %v5123_v55 = vrot.slane %v5119_v51, 4 }
 0x29c   : > { %7075 = vmatmul.mubr.bf16.gmra.mrb[52].mxu0 %v10657_v7  ;;  %v5105_v20 = vor.u32 %v5103_v10, %v5102_v17  ;;  %v5110_v33 = vrot.slane %v5108_v21, 7  ;;  %v5106_v26 = vrot.slane %v5102_v17, 4 }
 0x29d   : > { %v5370_v39 = vsel %vm14211_vm12, %v5122_v61, %v5369_v23  ;;  %v5130_v3 = vor.u32 %v5128_v44, %v5127_v25  ;;  %v5132_v43 = vrot.slane %v5127_v25, 4 }
 0x29e   : > { %5371 = vst [vmem:[#allocation4 + $0x60] sm:$0xf] %v5370_v39  ;;  %v5363_v54 = vsel %vm14211_vm12, %v5105_v20, %v5362_v36  ;;  %v5113_v31 = vor.u32 %v5111_v18, %v5110_v33  ;;  %v5115_v59 = vrot.slane %v5110_v33, 4 }
 0x29f   : > { %5364 = vst [vmem:[#allocation4 + $0x54] sm:$0xf] %v5363_v54  ;;  %v5131_v32 = vsel %vm12221_vm0, %v5123_v55, %v5130_v3  ;;  %v5374_v53 = vsel %vm13974_vm10, %v5132_v43, %v5373_v35 }
 0x2a0   : > { %5372 = vst [vmem:[#allocation4 + $0x64] sm:$0xf] %v5131_v32  ;;  %5375 = vst [vmem:[#allocation4 + $0x68] sm:$0x1] %v5374_v53  ;;  %v5114_v62 = vsel %vm12221_vm0, %v5106_v26, %v5113_v31  ;;  %v5367_v58 = vsel %vm13974_vm10, %v5115_v59, %v5366_v28 }
 0x2a1   : > { %5365 = vst [vmem:[#allocation4 + $0x58] sm:$0xf] %v5114_v62  ;;  %5368 = vst [vmem:[#allocation4 + $0x5c] sm:$0x1] %v5367_v58 }
 0x2a5   : > { %v14502_v35 = vld [vmem:[#allocation4 + $0x60] sm:$0xf] }
 0x2a6   : > { %v14472_v12 = vld [vmem:[#allocation4 + $0x54] sm:$0xf]  ;;  %v5705_v54 = vshrl.u32 %v14502_v35, 16  ;;  %v5708_v31 = vshll.u32 %v14502_v35, 16 }
 0x2a7   : > { %v5681_v30 = vshrl.u32 %v14472_v12, 16  ;;  %v5684_v56 = vshll.u32 %v14472_v12, 16  ;;  %v6462_v16 = vld [vmem:[#allocation4 + $0x54] sm:$0xe]  ;;  %v11533_v49 = vpop.f32.mrb[16].mxu0  ;;  %v11747_v2 = vld [vmem:[#allocation4 + $0x60] sm:$0xff]  }
 0x2a8   : > { %v11746_v48 = vld [vmem:[#allocation4 + $0x54] sm:$0xff]   ;;  %v14486_v63 = vadd.f32 %v14483_v14, %v11533_v49  ;;  %v4614_v40 = vpop.f32.mrb[17].mxu0  ;;  %v5503_v42 = vld [vmem:[#allocation4 + $0x5c] sm:$0x1]  ;;  %v10643_v36 = vrot.slane %v6462_v16, 9  ;;  %v5707_v52 = vrot.slane %v5705_v54, 4 }
 0x2a9   : > { %v14478_v45 = vld [vmem:[#allocation4 + $0x58] sm:$0xf]  ;;  %v5683_v41 = vrot.slane %v5681_v30, 4  ;;  %v5686_v50 = vrot.slane %v5684_v56, 5  ;;  %v14490_v57 = vadd.f32 %v14483_v14, %v4614_v40  ;;  %v11534_v13 = vpop.f32.mrb[18].mxu0  ;;  %7082 = vmatprep.mubr.bf16.mxu0 %v11746_v48  ;;  %v5700_v34 = vshll.u32 %v5503_v42, 16 }
 0x2aa   : > { %v5690_v24 = vshll.u32 %v14478_v45, 16  ;;  %v5694_v15 = vshrl.u32 %v14478_v45, 16  ;;  %v6463_v7 = vld [vmem:[#allocation4 + $0x58] sm:$0xf]  ;;  %v10542_v51 = vmul.f32 -1.442695, %v14486_v63  ;;  %v14495_v27 = vadd.f32 %v14483_v14, %v11534_v13  ;;  %7083 = vmatmul.mubr.bf16.gmra.mrb[56].mxu0 %v10658_v29 }
 0x2ab   : > { %v4617_v37 = vpop.f32.mrb[19].mxu0  ;;  %v5687_v22 = vor.u32 %v5686_v50, %v5683_v41  ;;  %v10540_v17 = vmul.f32 -1.442695, %v14490_v57  ;;  %7090 = vmatprep.mubr.bf16.mxu0 %v11747_v2  ;;  %v6464_v61 = vld [vmem:[#allocation4 + $0x5c] sm:$0x1]  ;;  %v6588_v20 = vrot.slane %v6463_v7, 5  ;;  %v10595_v30 = vcombine.low %v14472_v12, %v14478_v45 }
 0x2ac   : > { %v5692_v23 = vrot.slane %v5690_v24, 5  ;;  %v14499_v10 = vadd.f32 %v14483_v14, %v4617_v37  ;;  %v5696_v21 = vrot.slane %v5694_v15, 4  ;;  %11885 = vpow2.f32 %v10542_v51  ;;  %v14505_v55 = vld [vmem:[#allocation4 + $0x64] sm:$0xf]  ;;  %v5504_v26 = vld [vmem:[#allocation4 + $0x68] sm:$0x1] }
 0x2ad   : > { %v10543_v25 = vmul.f32 -1.442695, %v14495_v27  ;;  %v5688_v44 = vrot.slane %v5687_v22, 4  ;;  %11887 = vpow2.f32 %v10540_v17  ;;  %v5702_v38 = vrot.slane %v5700_v34, 5  ;;  %v547_v16 = vld [vmem:[#allocation4 + $0x9c] sm:$0x1] }
 0x2ae   : > { %v10541_v33 = vmul.f32 -1.442695, %v14499_v10  ;;  %v5697_v18 = vor.u32 %v5696_v21, %v5692_v23  ;;  %v6590_v3 = vrot.slane %v6588_v20, 4  ;;  %v6591_v43 = vrot.slane %v6464_v61, 5  ;;  %v605_v29 = vld [vmem:[#allocation4 + $0xb0] sm:$0x1] }
 0x2af   : > { %11889 = vpow2.f32 %v10543_v25  ;;  %v5693_v39 = vsel %vm12235_vm1, %v5688_v44, %v5692_v23  ;;  %v6589_v59 = vsel %vm12164_vm8, %v10643_v36, %v6588_v20  ;;  %v5714_v53 = vshll.u32 %v14505_v55, 16  ;;  %v602_v41 = vld [vmem:[#allocation4 + $0xa4] sm:$0x1]  ;;  %v11757_v45 = vld [vmem:[%s16603_s3 + $0x150] sm:$0xff]   ;;  %v11762_v51 = vld [vmem:[%s16603_s3 + $0x1c0] sm:$0xff]  }
 0x2b0   : > { %11891 = vpow2.f32 %v10541_v33  ;;  %v5698_v28 = vrot.slane %v5697_v18, 4  ;;  %v6592_v32 = vsel %vm12164_vm8, %v6590_v3, %v6591_v43  ;;  %v5718_v62 = vshrl.u32 %v14505_v55, 16  ;;  %v11759_v2 = vld [vmem:[%s16603_s3 + $0x110] sm:$0xff]   ;;  %v11761_v15 = vld [vmem:[%s16603_s3 + $0x158] sm:$0xff]   ;;  %v11765_v37 = vld [vmem:[%s16603_s3 + $0x180] sm:$0xff]   ;;  %11265 = vmatprep.subr.bf16.mxu1 %v11757_v45  ;;  %11373 = vmatprep.subr.bf16.mxu0 %v11762_v51 }
 0x2b1   : > { %v10659_v4 = vcombine.low %v6589_v59, %v6592_v32  ;;  %v5710_v1 = vrot.slane %v5708_v31, 5  ;;  %v5716_v8 = vrot.slane %v5714_v53, 5  ;;  %v5724_v47 = vshll.u32 %v5504_v26, 16  ;;  %v556_v61 = vld [vmem:[#allocation4 + $0xc0] sm:$0x1]  ;;  %11266 = vmatpush3.bf16.msra.mxu1 %v11759_v2  ;;  %11374 = vmatpush3.bf16.msra.mxu0 %v11765_v37 }
 0x2b2   : > { %v5703_v58 = vsel %vm12235_vm1, %v5698_v28, %v5702_v38  ;;  %v5720_v46 = vrot.slane %v5718_v62, 4  ;;  %v548_v48 = vsel %vm13974_vm10, 0, %v547_v16  ;;  %v606_v42 = vsel %vm13966_vm6, 0, %v605_v29  ;;  %11267 = vmatprep.subr.bf16.mxu1 %v11761_v15  ;;  %v11764_v18 = vld [vmem:[%s16603_s3 + $0x118] sm:$0xff]   ;;  %v6467_v37 = vld [vmem:[#allocation4 + $0x68] sm:$0x1] }
 0x2b3   : > { %v10611_v0 = vcombine.low %v5693_v39, %v5703_v58  ;;  %7091 = vmatmul.mubr.bf16.gmra.mrb[60].mxu0 %v10659_v4  ;;  %v5711_v56 = vor.u32 %v5710_v1, %v5707_v52  ;;  %549 = vst [vmem:[#allocation4 + $0x9c] sm:$0x1] %v548_v48  ;;  %v5726_v13 = vrot.slane %v5724_v47, 5  ;;  %607 = vst [vmem:[#allocation4 + $0xb0] sm:$0x1] %v606_v42  ;;  %v603_v12 = vsel %vm13966_vm6, 0, %v602_v41 }
 0x2b4   : > { %v5721_v49 = vor.u32 %v5720_v46, %v5716_v8  ;;  %604 = vst [vmem:[#allocation4 + $0xa4] sm:$0x1] %v603_v12  ;;  %v557_v20 = vsel %vm13974_vm10, 0, %v556_v61  ;;  %v10596_v38 = vcombine.low %v14502_v35, %v14505_v55 }
 0x2b5   : > { %6304 = vmatprep.mubr.bf16.mxu1 %v10611_v0  ;;  %v5712_v40 = vrot.slane %v5711_v56, 4  ;;  %558 = vst [vmem:[#allocation4 + $0xc0] sm:$0x1] %v557_v20  ;;  %11268 = vmatpush3.bf16.msra.mxu1 %v11764_v18  ;;  %v6466_v0 = vld [vmem:[#allocation4 + $0x64] sm:$0xf] }
 0x2b6   : > { %6305 = vmatmul.mubr.bf16.gmra.mrb[28].mxu1 %v10595_v30  ;;  %v11886_v50 = vpop.eup %11885  ;;  %v5722_v24 = vrot.slane %v5721_v49, 4  ;;  %v5376_v30 = vld [vmem:[#allocation4 + $0x6c] sm:$0xf]  ;;  %v5387_v49 = vld [vmem:[#allocation4 + $0x80] sm:$0x1]  ;;  %v6595_v29 = vrot.slane %v6466_v0, 5 }
 0x2b7   : > { %v11888_v34 = vpop.eup %11887  ;;  %v4791_v7 = vadd.f32 1.0, %v11886_v50  ;;  %v5717_v17 = vsel %vm12235_vm1, %v5712_v40, %v5716_v8  ;;  %v5383_v8 = vld [vmem:[#allocation4 + $0x78] sm:$0xf] }
 0x2b8   : > { %v4789_v23 = vadd.f32 1.0, %v11888_v34  ;;  %v5727_v21 = vsel %vm12235_vm1, %v5722_v24, %v5726_v13  ;;  %v5380_v24 = vld [vmem:[#allocation4 + $0x74] sm:$0x1] }
 0x2b9   : > { %v11890_v22 = vpop.eup %11889  ;;  %11893 = vrcp.f32 %v4791_v7  ;;  %v10612_v44 = vcombine.low %v5717_v17, %v5727_v21  ;;  %v6598_v17 = vrot.slane %v6467_v37, 5  ;;  %v553_v37 = vld [vmem:[#allocation4 + $0xb4] sm:$0x1] }
 0x2ba   : > { %v11892_v36 = vpop.eup %11891  ;;  %v4792_v25 = vadd.f32 1.0, %v11890_v22  ;;  %11895 = vrcp.f32 %v4789_v23  ;;  %v6597_v22 = vrot.slane %v6595_v29, 4  ;;  %v6465_v23 = vld [vmem:[#allocation4 + $0x60] sm:$0xe] }
 0x2bb   : > { %v4790_v33 = vadd.f32 1.0, %v11892_v36  ;;  %6312 = vmatprep.mubr.bf16.mxu1 %v10612_v44  ;;  %v10644_v21 = vrot.slane %v6465_v23, 9 }
 0x2bc   : > { %11897 = vrcp.f32 %v4792_v25  ;;  %v6599_v61 = vsel %vm12164_vm8, %v6597_v22, %v6598_v17 }
 0x2bd   : > { %11899 = vrcp.f32 %v4790_v33  ;;  %v6596_v20 = vsel %vm12164_vm8, %v10644_v21, %v6595_v29  ;;  %v611_v21 = vld [vmem:[#allocation4 + $0xc8] sm:$0x1] }
 0x2be   : > { %6313 = vmatmul.mubr.bf16.gmra.mrb[32].mxu1 %v10596_v38 }
 0x2c3   : > { %v11894_v39 = vpop.eup %11893 }
 0x2c4   : > { %v11896_v3 = vpop.eup %11895  ;;  %v4887_v43 = vmul.f32 %v11894_v39, %v14486_v63 }
 0x2c5   : > { %v4885_v26 = vmul.f32 %v11896_v3, %v14490_v57  ;;  %v10660_v3 = vcombine.low %v6596_v20, %v6599_v61  ;;  %v11768_v61 = vld [vmem:[%s16603_s3 + $0x1c8] sm:$0xff]  }
 0x2c6   : > { %v11898_v28 = vpop.eup %11897  ;;  %v11004_v31 = vpack.c.bf16 %v4887_v43, %v4887_v43  ;;  %11375 = vmatprep.subr.bf16.mxu0 %v11768_v61 }
 0x2c7   : > { %v11900_v54 = vpop.eup %11899  ;;  %v4888_v59 = vmul.f32 %v11898_v28, %v14495_v27  ;;  %v11002_v32 = vpack.c.bf16 %v4885_v26, %v4885_v26 }
 0x2c8   : > { %v4886_v53 = vmul.f32 %v11900_v54, %v14499_v10  ;;  %v5151_v62 = vshrl.u32 %v11004_v31, 16  ;;  %v5154_v52 = vshll.u32 %v11004_v31, 16 }
 0x2c9   : > { %v11005_v58 = vpack.c.bf16 %v4888_v59, %v4888_v59  ;;  %v5134_v35 = vshrl.u32 %v11002_v32, 16  ;;  %v5137_v46 = vshll.u32 %v11002_v32, 16 }
 0x2ca   : > { %v11003_v55 = vpack.c.bf16 %v4886_v53, %v4886_v53  ;;  %v5153_v4 = vrot.slane %v5151_v62, 7 }
 0x2cb   : > { %v5159_v1 = vshrl.u32 %v11005_v58, 16  ;;  %v5136_v63 = vrot.slane %v5134_v35, 7  ;;  %v5162_v16 = vshll.u32 %v11005_v58, 16 }
 0x2cc   : > { %v5142_v47 = vshrl.u32 %v11003_v55, 16  ;;  %v5156_v57 = vor.u32 %v5154_v52, %v5153_v4  ;;  %v5145_v10 = vshll.u32 %v11003_v55, 16  ;;  %v5157_v40 = vrot.slane %v5153_v4, 4 }
 0x2cd   : > { %v5161_v56 = vrot.slane %v5159_v1, 7  ;;  %v5139_v27 = vor.u32 %v5137_v46, %v5136_v63  ;;  %v5140_v13 = vrot.slane %v5136_v63, 4 }
 0x2ce   : > { %v5144_v48 = vrot.slane %v5142_v47, 7  ;;  %v5384_v42 = vsel %vm14211_vm12, %v5156_v57, %v5383_v8 }
 0x2cf   : > { %v5164_v41 = vor.u32 %v5162_v16, %v5161_v56  ;;  %v5166_v50 = vrot.slane %v5161_v56, 4  ;;  %5385 = vst [vmem:[#allocation4 + $0x78] sm:$0xf] %v5384_v42  ;;  %v5377_v12 = vsel %vm14211_vm12, %v5139_v27, %v5376_v30 }
 0x2d0   : > { %v5147_v45 = vor.u32 %v5145_v10, %v5144_v48  ;;  %v5149_v2 = vrot.slane %v5144_v48, 4  ;;  %5378 = vst [vmem:[#allocation4 + $0x6c] sm:$0xf] %v5377_v12 }
 0x2d1   : > { %v5165_v15 = vsel %vm12221_vm0, %v5157_v40, %v5164_v41  ;;  %v5388_v34 = vsel %vm13974_vm10, %v5166_v50, %v5387_v49 }
 0x2d2   : > { %5386 = vst [vmem:[#allocation4 + $0x7c] sm:$0xf] %v5165_v15  ;;  %5389 = vst [vmem:[#allocation4 + $0x80] sm:$0x1] %v5388_v34  ;;  %v5148_v7 = vsel %vm12221_vm0, %v5140_v13, %v5147_v45  ;;  %v5381_v51 = vsel %vm13974_vm10, %v5149_v2, %v5380_v24 }
 0x2d3   : > { %5379 = vst [vmem:[#allocation4 + $0x70] sm:$0xf] %v5148_v7  ;;  %5382 = vst [vmem:[#allocation4 + $0x74] sm:$0x1] %v5381_v51 }
 0x2d6   : > { %v14571_v36 = vld [vmem:[#allocation4 + $0x78] sm:$0xf] }
 0x2d7   : > { %v14573_v25 = vld [vmem:[#allocation4 + $0x6c] sm:$0xf]  ;;  %v5753_v26 = vshrl.u32 %v14571_v36, 16  ;;  %v5756_v51 = vshll.u32 %v14571_v36, 16 }
 0x2d8   : > { %v6468_v44 = vld [vmem:[#allocation4 + $0x6c] sm:$0xe]  ;;  %v5729_v33 = vshrl.u32 %v14573_v25, 16  ;;  %v5732_v18 = vshll.u32 %v14573_v25, 16 }
 0x2d9   : > { %v10645_v38 = vrot.slane %v6468_v44, 9  ;;  %v11754_v43 = vld [vmem:[#allocation4 + $0x78] sm:$0xff]   ;;  %v5755_v2 = vrot.slane %v5753_v26, 4  ;;  %v5506_v7 = vld [vmem:[#allocation4 + $0x80] sm:$0x1]  ;;  %v5758_v20 = vrot.slane %v5756_v51, 5 }
 0x2da   : > { %v11752_v39 = vld [vmem:[#allocation4 + $0x6c] sm:$0xff]   ;;  %v5505_v54 = vld [vmem:[#allocation4 + $0x74] sm:$0x1]  ;;  %v5731_v31 = vrot.slane %v5729_v33, 4  ;;  %v5734_v59 = vrot.slane %v5732_v18, 5  ;;  %v11537_v62 = vpop.f32.mrb[20].mxu0 }
 0x2db   : > { %v14579_v28 = vld [vmem:[#allocation4 + $0x70] sm:$0xf]  ;;  %7098 = vmatprep.mubr.bf16.mxu0 %v11752_v39  ;;  %v5748_v58 = vshll.u32 %v5505_v54, 16  ;;  %v6470_v55 = vld [vmem:[#allocation4 + $0x74] sm:$0x1]  ;;  %v14585_v4 = vadd.f32 %v14483_v14, %v11537_v62  ;;  %v4630_v52 = vpop.f32.mrb[21].mxu0 }
 0x2dc   : > { %v5738_v32 = vshll.u32 %v14579_v28, 16  ;;  %v5742_v53 = vshrl.u32 %v14579_v28, 16  ;;  %v6469_v35 = vld [vmem:[#allocation4 + $0x70] sm:$0xf]  ;;  %7099 = vmatmul.mubr.bf16.gmra.mrb[64].mxu0 %v10660_v3  ;;  %v5735_v1 = vor.u32 %v5734_v59, %v5731_v31  ;;  %v14588_v63 = vadd.f32 %v14483_v14, %v4630_v52  ;;  %v11538_v46 = vpop.f32.mrb[22].mxu0  ;;  %v11767_v31 = vld [vmem:[%s16603_s3 + $0x160] sm:$0xff]  }
 0x2dd   : > { %7106 = vmatprep.mubr.bf16.mxu0 %v11754_v43  ;;  %v5750_v47 = vrot.slane %v5748_v58, 5  ;;  %v6602_v57 = vrot.slane %v6469_v35, 5  ;;  %v6605_v30 = vrot.slane %v6470_v55, 5  ;;  %v10546_v56 = vmul.f32 -1.442695, %v14585_v4  ;;  %v4633_v27 = vpop.f32.mrb[23].mxu0  ;;  %11269 = vmatprep.subr.bf16.mxu1 %v11767_v31 }
 0x2de   : > { %v5740_v0 = vrot.slane %v5738_v32, 5  ;;  %v5744_v8 = vrot.slane %v5742_v53, 4  ;;  %v14592_v16 = vadd.f32 %v14483_v14, %v11538_v46  ;;  %v5736_v49 = vrot.slane %v5735_v1, 4  ;;  %v14603_v13 = vld [vmem:[#allocation4 + $0x7c] sm:$0xf]  ;;  %v11771_v18 = vld [vmem:[%s16603_s3 + $0x188] sm:$0xff]  }
 0x2df   : > { %v10544_v10 = vmul.f32 -1.442695, %v14588_v63  ;;  %v14596_v29 = vadd.f32 %v14483_v14, %v4633_v27  ;;  %v6603_v40 = vsel %vm12164_vm8, %v10645_v38, %v6602_v57  ;;  %v6604_v42 = vrot.slane %v6602_v57, 4  ;;  %v608_v33 = vld [vmem:[#allocation4 + $0xbc] sm:$0x1]  ;;  %11376 = vmatpush3.bf16.msra.mxu0 %v11771_v18  ;;  %v11770_v59 = vld [vmem:[%s16603_s3 + $0x120] sm:$0xff]  }
 0x2e0   : > { %v5745_v48 = vor.u32 %v5744_v8, %v5740_v0  ;;  %11901 = vpow2.f32 %v10546_v56  ;;  %v10547_v41 = vmul.f32 -1.442695, %v14592_v16  ;;  %v5741_v50 = vsel %vm12235_vm1, %v5736_v49, %v5740_v0  ;;  %v11773_v32 = vld [vmem:[%s16603_s3 + $0x168] sm:$0xff]   ;;  %v11774_v62 = vld [vmem:[%s16603_s3 + $0x1d0] sm:$0xff]   ;;  %v11780_v52 = vld [vmem:[%s16603_s3 + $0x1d8] sm:$0xff]   ;;  %11270 = vmatpush3.bf16.msra.mxu1 %v11770_v59 }
 0x2e1   : > { %11903 = vpow2.f32 %v10544_v10  ;;  %v10545_v12 = vmul.f32 -1.442695, %v14596_v29  ;;  %v6606_v45 = vsel %vm12164_vm8, %v6604_v42, %v6605_v30  ;;  %v5762_v23 = vshll.u32 %v14603_v13, 16  ;;  %v11777_v58 = vld [vmem:[%s16603_s3 + $0x190] sm:$0xff]   ;;  %11377 = vmatprep.subr.bf16.mxu0 %v11774_v62  ;;  %v11776_v8 = vld [vmem:[%s16603_s3 + $0x128] sm:$0xff]   ;;  %11271 = vmatprep.subr.bf16.mxu1 %v11773_v32  ;;  %v11785_v51 = vld [vmem:[%s16603_s3 + $0x178] sm:$0xff]  }
 0x2e2   : > { %v5746_v24 = vrot.slane %v5745_v48, 4  ;;  %11905 = vpow2.f32 %v10547_v41  ;;  %v10661_v34 = vcombine.low %v6603_v40, %v6606_v45  ;;  %v5766_v17 = vshrl.u32 %v14603_v13, 16  ;;  %v14645_v1 = vld [vmem:[#allocation4 + $0x18] sm:$0xf]  ;;  %v14657_v27 = vld [vmem:[#allocation4 + $0x1c] sm:$0xf] }
 0x2e3   : > { %11907 = vpow2.f32 %v10545_v12  ;;  %v10597_v44 = vcombine.low %v14573_v25, %v14579_v28  ;;  %v5764_v38 = vrot.slane %v5762_v23, 5  ;;  %v5772_v3 = vshll.u32 %v5506_v7, 16  ;;  %16765 = vst [vmem:[#allocation16_spill] sm:$0xff] %v14645_v1  ;;  %11378 = vmatpush3.bf16.msra.mxu0 %v11777_v58  ;;  %v11779_v56 = vld [vmem:[%s16603_s3 + $0x170] sm:$0xff]   ;;  %16766 = vst [vmem:[#allocation17_spill] sm:$0xff] %v14657_v27  ;;  %v11783_v40 = vld [vmem:[%s16603_s3 + $0x198] sm:$0xff]  }
 0x2e4   : > { %v5751_v15 = vsel %vm12235_vm1, %v5746_v24, %v5750_v47  ;;  %7107 = vmatmul.mubr.bf16.gmra.mrb[68].mxu0 %v10661_v34  ;;  %v5768_v39 = vrot.slane %v5766_v17, 4  ;;  %v5759_v43 = vor.u32 %v5758_v20, %v5755_v2  ;;  %v554_v26 = vsel %vm13974_vm10, 0, %v553_v37  ;;  %11379 = vmatprep.subr.bf16.mxu0 %v11780_v52  ;;  %v11782_v2 = vld [vmem:[%s16603_s3 + $0x130] sm:$0xff]   ;;  %v14677_v7 = vld [vmem:[#allocation4 + $0x10] sm:$0xf]  ;;  %v11053_v37 = vpop.f32.mrb[0].mxu1 }
 0x2e5   : > { %v10613_v22 = vcombine.low %v5741_v50, %v5751_v15  ;;  %v612_v54 = vsel %vm13966_vm6, 0, %v611_v21  ;;  %555 = vst [vmem:[#allocation4 + $0xb4] sm:$0x1] %v554_v26  ;;  %v609_v28 = vsel %vm13966_vm6, 0, %v608_v33  ;;  %v5774_v55 = vrot.slane %v5772_v3, 5  ;;  %11272 = vmatpush3.bf16.msra.mxu1 %v11776_v8  ;;  %v11788_v21 = vld [vmem:[%s16603_s3 + $0x138] sm:$0xff]  }
 0x2e6   : > { %v5769_v25 = vor.u32 %v5768_v39, %v5764_v38  ;;  %613 = vst [vmem:[#allocation4 + $0xc8] sm:$0x1] %v612_v54  ;;  %v5760_v53 = vrot.slane %v5759_v43, 4  ;;  %610 = vst [vmem:[#allocation4 + $0xbc] sm:$0x1] %v609_v28  ;;  %v8399_v42 = vshrl.u32 %v14645_v1, 16  ;;  %v10598_v24 = vcombine.low %v14571_v36, %v14603_v13  ;;  %11273 = vmatprep.subr.bf16.mxu1 %v11779_v56 }
 0x2e7   : > { %6320 = vmatprep.mubr.bf16.mxu1 %v10613_v22  ;;  %v8402_v12 = vshll.u32 %v14645_v1, 16  ;;  %v8408_v15 = vshll.u32 %v14657_v27, 16  ;;  %v8412_v34 = vshrl.u32 %v14657_v27, 16  ;;  %v11786_v36 = vld [vmem:[%s16603_s3 + $0x1e0] sm:$0xff]   ;;  %11380 = vmatpush3.bf16.msra.mxu0 %v11783_v40  ;;  %v8382_v22 = vld [vmem:[#allocation4 + $0x20] sm:$0x1] }
 0x2e8   : > { %6321 = vmatmul.mubr.bf16.gmra.mrb[36].mxu1 %v10597_v44  ;;  %v5770_v35 = vrot.slane %v5769_v25, 4  ;;  %v5765_v57 = vsel %vm12235_vm1, %v5760_v53, %v5764_v38  ;;  %v11789_v13 = vld [vmem:[%s16603_s3 + $0x1a0] sm:$0xff]   ;;  %11381 = vmatprep.subr.bf16.mxu0 %v11786_v36  ;;  %v8401_v23 = vrot.slane %v8399_v42, 4  ;;  %v11054_v61 = vpop.f32.mrb[1].mxu1  ;;  %v11790_v44 = vld [vmem:[%s16603_s3 + $0x1e8] sm:$0xff]   ;;  %v7285_v39 = vshll.u32 %v14677_v7, 16 }
 0x2e9   : > { %v8404_v17 = vrot.slane %v8402_v12, 5  ;;  %11274 = vmatpush3.bf16.msra.mxu1 %v11782_v2  ;;  %v14688_v20 = vrot.slane %v8408_v15, 5  ;;  %v8414_v33 = vrot.slane %v8412_v34, 4  ;;  %v14690_v18 = vadd.f32 %v11054_v61, %v11053_v37  ;;  %v11056_v38 = vpop.f32.mrb[2].mxu1  ;;  %v11791_v26 = vld [vmem:[%s16603_s3 + $0x1a8] sm:$0xff]   ;;  %v11796_v37 = vld [vmem:[%s16603_s3 + $0x1b8] sm:$0xff]  }
 0x2ea   : > { %v11902_v0 = vpop.eup %11901  ;;  %v5775_v30 = vsel %vm12235_vm1, %v5770_v35, %v5774_v55  ;;  %11275 = vmatprep.subr.bf16.mxu1 %v11785_v51  ;;  %v7289_v3 = vshrl.u32 %v14677_v7, 16  ;;  %v11057_v43 = vpop.f32.mrb[3].mxu1  ;;  %v8418_v54 = vshll.u32 %v8382_v22, 16  ;;  %v7227_v31 = vld [vmem:[#allocation4 + $0xc] sm:$0xf]  ;;  %v14704_v58 = vrot.slane %v7285_v39, 5 }
 0x2eb   : > { %v11904_v46 = vpop.eup %11903  ;;  %v4795_v47 = vadd.f32 1.0, %v11902_v0  ;;  %v10614_v10 = vcombine.low %v5765_v57, %v5775_v30  ;;  %11382 = vmatpush3.bf16.msra.mxu0 %v11789_v13  ;;  %v14697_v25 = vadd.f32 %v11057_v43, %v11056_v38  ;;  %v8405_v28 = vor.u32 %v8404_v17, %v8401_v23  ;;  %v14700_v32 = vld [vmem:[#allocation4 + $0x24] sm:$0xf]  ;;  %v14702_v62 = vld [vmem:[#allocation4 + $0x14] sm:$0x1] }
 0x2ec   : > { %v11906_v49 = vpop.eup %11905  ;;  %v4793_v48 = vadd.f32 1.0, %v11904_v46  ;;  %11383 = vmatprep.subr.bf16.mxu0 %v11790_v44  ;;  %v8415_v59 = vor.u32 %v8414_v33, %v14688_v20  ;;  %16767 = vst [vmem:[#allocation18_spill] sm:$0xff] %v14700_v32  ;;  %v14706_v35 = vrot.slane %v7289_v3, 4  ;;  %v14709_v0 = vrot.slane %v8418_v54, 5  ;;  %v14748_v44 = vld [vmem:[#allocation4 + $0x7c] sm:$0xf] }
 0x2ed   : > { %v11908_v41 = vpop.eup %11907  ;;  %11909 = vrcp.f32 %v4795_v47  ;;  %v4796_v50 = vadd.f32 1.0, %v11906_v49  ;;  %6328 = vmatprep.mubr.bf16.mxu1 %v10614_v10  ;;  %11276 = vmatpush3.bf16.msra.mxu1 %v11788_v21  ;;  %v7725_v8 = vrot.slane %v14677_v7, 5  ;;  %v7276_v46 = vshrl.u32 %v7227_v31, 16  ;;  %v5397_v38 = vld [vmem:[#allocation4 + $0x90] sm:$0xf] }
 0x2ee   : > { %11911 = vrcp.f32 %v4793_v48  ;;  %v4794_v45 = vadd.f32 1.0, %v11908_v41  ;;  %v14713_v30 = vrot.slane %v8405_v28, 4  ;;  %v7279_v56 = vshll.u32 %v7227_v31, 16  ;;  %v5390_v28 = vld [vmem:[#allocation4 + $0x84] sm:$0xf] }
 0x2ef   : > { %11913 = vrcp.f32 %v4796_v50  ;;  %11384 = vmatpush3.bf16.msra.mxu0 %v11791_v26  ;;  %v8423_v49 = vshrl.u32 %v14700_v32, 16  ;;  %v14720_v42 = vrot.slane %v8415_v59, 4  ;;  %v7295_v41 = vshll.u32 %v14702_v62, 16 }
 0x2f0   : > { %6329 = vmatmul.mubr.bf16.gmra.mrb[40].mxu1 %v10598_v24  ;;  %11915 = vrcp.f32 %v4794_v45  ;;  %v11794_v24 = vld [vmem:[%s16603_s3 + $0x1b0] sm:$0xff]   ;;  %v7292_v12 = vor.u32 %v14706_v35, %v14704_v58  ;;  %v14729_v45 = vld [vmem:[#allocation4 + $0x28] sm:$0xf]  ;;  %v14734_v34 = vrot.slane %v7725_v8, 4  ;;  %v14739_v36 = vrot.slane %v7276_v46, 4 }
 0x2f1   : > { %16768 = vst [vmem:[#allocation19_spill] sm:$0xff] %v14729_v45  ;;  %v14744_v22 = vrot.slane %v7279_v56, 5  ;;  %v14746_v23 = vrot.slane %v8423_v49, 4  ;;  %v8432_v33 = vshll.u32 %v14729_v45, 16  ;;  %v11798_v56 = vld [vmem:[%s16604_s4] sm:$0xff]  }
 0x2f2   : > { %11595 = vmatprep.subr.bf16.mxu1 %v11798_v56 }
 0x2f7   : > { %v11910_v53 = vpop.eup %11909 }
 0x2f8   : > { %v11912_v55 = vpop.eup %11911  ;;  %v4891_v52 = vmul.f32 %v11910_v53, %v14585_v4  ;;  %v11792_v4 = vld [vmem:[%s16603_s3 + $0x1f0] sm:$0xff]   ;;  %v8436_v53 = vshrl.u32 %v14729_v45, 16 }
 0x2f9   : > { %v11914_v47 = vpop.eup %11913  ;;  %v4889_v57 = vmul.f32 %v11912_v55, %v14588_v63  ;;  %11385 = vmatprep.subr.bf16.mxu0 %v11792_v4  ;;  %v5394_v4 = vld [vmem:[#allocation4 + $0x8c] sm:$0x1] }
 0x2fa   : > { %v11916_v48 = vpop.eup %11915  ;;  %v11008_v10 = vpack.c.bf16 %v4891_v52, %v4891_v52  ;;  %v4892_v40 = vmul.f32 %v11914_v47, %v14592_v16  ;;  %v8426_v16 = vshll.u32 %v14700_v32, 16  ;;  %11386 = vmatpush3.bf16.msra.mxu0 %v11794_v24  ;;  %v5401_v52 = vld [vmem:[#allocation4 + $0x98] sm:$0x1] }
 0x2fb   : > { %v11006_v50 = vpack.c.bf16 %v4889_v57, %v4889_v57  ;;  %v4890_v63 = vmul.f32 %v11916_v48, %v14596_v29  ;;  %v11795_v29 = vld [vmem:[%s16603_s3 + $0x1f8] sm:$0xff]   ;;  %v6609_v57 = vrot.slane %v14748_v44, 5 }
 0x2fc   : > { %v5185_v2 = vshrl.u32 %v11008_v10, 16  ;;  %v11009_v15 = vpack.c.bf16 %v4892_v40, %v4892_v40  ;;  %v5188_v21 = vshll.u32 %v11008_v10, 16  ;;  %11387 = vmatprep.subr.bf16.mxu0 %v11795_v29  ;;  %v8428_v26 = vrot.slane %v8426_v16, 5 }
 0x2fd   : > { %v5168_v13 = vshrl.u32 %v11006_v50, 16  ;;  %v11007_v51 = vpack.c.bf16 %v4890_v63, %v4890_v63  ;;  %v5171_v3 = vshll.u32 %v11006_v50, 16 }
 0x2fe   : > { %v5187_v17 = vrot.slane %v5185_v2, 7  ;;  %v5193_v61 = vshrl.u32 %v11009_v15, 16  ;;  %v5196_v59 = vshll.u32 %v11009_v15, 16  ;;  %11388 = vmatpush3.bf16.msra.mxu0 %v11796_v37  ;;  %v7659_v2 = vld [vmem:[#allocation4 + $0xc] sm:$0xe] }
 0x2ff   : > { %v5170_v39 = vrot.slane %v5168_v13, 7  ;;  %v5176_v43 = vshrl.u32 %v11007_v51, 16  ;;  %v5179_v47 = vshll.u32 %v11007_v51, 16  ;;  %11547 = vmatprep.subr.bf16.mxu0 %v11798_v56  ;;  %v7282_v13 = vor.u32 %v14744_v22, %v14739_v36  ;;  %v6473_v36 = vld [vmem:[#allocation4 + $0x80] sm:$0x1] }
 0x300   : > { %v5190_v54 = vor.u32 %v5188_v21, %v5187_v17  ;;  %v5195_v31 = vrot.slane %v5193_v61, 7  ;;  %v5191_v49 = vrot.slane %v5187_v17, 4  ;;  %v8429_v51 = vor.u32 %v8428_v26, %v14746_v23  ;;  %v14790_v26 = vld [vmem:[#allocation4 + $0x18] sm:$0xf] }
 0x301   : > { %v5173_v55 = vor.u32 %v5171_v3, %v5170_v39  ;;  %v5178_v46 = vrot.slane %v5176_v43, 7  ;;  %v5174_v50 = vrot.slane %v5170_v39, 4  ;;  %v7728_v21 = vrot.slane %v14702_v62, 5  ;;  %v14776_v39 = vld [vmem:[#allocation4 + $0x1c] sm:$0xf] }
 0x302   : > { %v5398_v48 = vsel %vm14211_vm12, %v5190_v54, %v5397_v38  ;;  %v5198_v10 = vor.u32 %v5196_v59, %v5195_v31  ;;  %v5200_v40 = vrot.slane %v5195_v31, 4  ;;  %v14774_v38 = vld [vmem:[#allocation4 + $0x2c] sm:$0x1]  ;;  %v8411_v22 = vsel %vm12235_vm1, %v14713_v30, %v14688_v20  ;;  %v14806_v62 = vld [vmem:[#allocation4 + $0x30] sm:$0xf] }
 0x303   : > { %5399 = vst [vmem:[#allocation4 + $0x90] sm:$0xf] %v5398_v48  ;;  %v5391_v63 = vsel %vm14211_vm12, %v5173_v55, %v5390_v28  ;;  %v5181_v24 = vor.u32 %v5179_v47, %v5178_v46  ;;  %v5183_v16 = vrot.slane %v5178_v46, 4  ;;  %v8421_v23 = vsel %vm12235_vm1, %v14720_v42, %v14709_v0  ;;  %16770 = vst [vmem:[#allocation21_spill] sm:$0xff] %v14806_v62  ;;  %v6471_v30 = vld [vmem:[#allocation4 + $0x78] sm:$0xe] }
 0x304   : > { %5392 = vst [vmem:[#allocation4 + $0x84] sm:$0xf] %v5391_v63  ;;  %v5199_v15 = vsel %vm12221_vm0, %v5191_v49, %v5198_v10  ;;  %v5402_v29 = vsel %vm13974_vm10, %v5200_v40, %v5401_v52  ;;  %v14788_v3 = vrot.slane %v7295_v41, 5  ;;  %v10732_v43 = vrot.slane %v7659_v2, 9 }
 0x305   : > { %5400 = vst [vmem:[#allocation4 + $0x94] sm:$0xf] %v5199_v15  ;;  %5403 = vst [vmem:[#allocation4 + $0x98] sm:$0x1] %v5402_v29  ;;  %v5182_v37 = vsel %vm12221_vm0, %v5174_v50, %v5181_v24  ;;  %v5395_v17 = vsel %vm13974_vm10, %v5183_v16, %v5394_v4  ;;  %v6611_v54 = vrot.slane %v6609_v57, 4  ;;  %v14797_v28 = vrot.slane %v7292_v12, 4 }
 0x306   : > { %5393 = vst [vmem:[#allocation4 + $0x88] sm:$0xf] %v5182_v37  ;;  %5396 = vst [vmem:[#allocation4 + $0x8c] sm:$0x1] %v5395_v17  ;;  %v14802_v20 = vsel %vm12164_vm8, %v14734_v34, %v7728_v21  ;;  %v14804_v0 = vrot.slane %v8432_v33, 5  ;;  %v14808_v42 = vrot.slane %v7282_v13, 4  ;;  %v14828_v40 = vcombine.low %v8411_v22, %v8421_v23 }
 0x307   : > { %16769 = vst [vmem:[#allocation20_spill] sm:$0xff] %v14802_v20  ;;  %v14810_v41 = vrot.slane %v8429_v51, 4  ;;  %v14812_v31 = vrot.slane %v8436_v53, 4  ;;  %v7309_v35 = vshll.u32 %v14776_v39, 16  ;;  %v6612_v12 = vrot.slane %v6473_v36, 5 }
 0x308   : > { %v7300_v34 = vshrl.u32 %v14790_v26, 16  ;;  %v7303_v33 = vshll.u32 %v14790_v26, 16  ;;  %v7313_v52 = vshrl.u32 %v14776_v39, 16  ;;  %v8447_v46 = vshrl.u32 %v14806_v62, 16  ;;  %16771 = vst [vmem:[#allocation22_spill] sm:$0xff] %v14828_v40 }
 0x309   : > { %v10646_v53 = vrot.slane %v6471_v30, 9  ;;  %v6613_v49 = vsel %vm12164_vm8, %v6611_v54, %v6612_v12  ;;  %v14834_v4 = vsel %vm12164_vm8, %v10732_v43, %v7725_v8  ;;  %v14841_v2 = vrot.slane %v7309_v35, 5 }
 0x30a   : > { %v14826_v10 = vld [vmem:[#allocation4 + $0x90] sm:$0xf]  ;;  %16772 = vst [vmem:[#allocation23_spill] sm:$0xff] %v14834_v4  ;;  %v14875_v51 = vrot.slane %v7313_v52, 4 }
 0x30b   : > { %v14824_v48 = vld [vmem:[#allocation4 + $0x84] sm:$0xf]  ;;  %v6610_v7 = vsel %vm12164_vm8, %v10646_v53, %v6609_v57 }
 0x30c   : > { %v11541_v56 = vpop.f32.mrb[24].mxu0  ;;  %v5777_v24 = vshrl.u32 %v14824_v48, 16  ;;  %v5780_v16 = vshll.u32 %v14824_v48, 16  ;;  %v10662_v44 = vcombine.low %v6610_v7, %v6613_v49  ;;  %v11763_v22 = vld [vmem:[#allocation4 + $0x90] sm:$0xff]   ;;  %v5801_v49 = vshrl.u32 %v14826_v10, 16 }
 0x30d   : > { %v14837_v50 = vadd.f32 %v14483_v14, %v11541_v56  ;;  %v4646_v63 = vpop.f32.mrb[25].mxu0  ;;  %v11760_v13 = vld [vmem:[#allocation4 + $0x84] sm:$0xff]   ;;  %v5507_v54 = vld [vmem:[#allocation4 + $0x8c] sm:$0x1]  ;;  %v5508_v37 = vld [vmem:[#allocation4 + $0x98] sm:$0x1]  ;;  %v7316_v26 = vor.u32 %v14875_v51, %v14841_v2 }
 0x30e   : > { %v14844_v15 = vadd.f32 %v14483_v14, %v4646_v63  ;;  %v11542_v29 = vpop.f32.mrb[26].mxu0  ;;  %v14850_v8 = vld [vmem:[#allocation4 + $0x88] sm:$0xf]  ;;  %v5779_v23 = vrot.slane %v5777_v24, 4  ;;  %7114 = vmatprep.mubr.bf16.mxu0 %v11760_v13  ;;  %v5782_v30 = vrot.slane %v5780_v16, 5  ;;  %v5796_v13 = vshll.u32 %v5507_v54, 16 }
 0x30f   : > { %v10550_v17 = vmul.f32 -1.442695, %v14837_v50  ;;  %v14860_v21 = vadd.f32 %v14483_v14, %v11542_v29  ;;  %v4649_v36 = vpop.f32.mrb[27].mxu0  ;;  %v5786_v35 = vshll.u32 %v14850_v8, 16  ;;  %7115 = vmatmul.mubr.bf16.gmra.mrb[72].mxu0 %v10662_v44  ;;  %v5790_v56 = vshrl.u32 %v14850_v8, 16 }
 0x310   : > { %v10548_v57 = vmul.f32 -1.442695, %v14844_v15  ;;  %v14864_v43 = vadd.f32 %v14483_v14, %v4649_v36  ;;  %v6475_v53 = vld [vmem:[#allocation4 + $0x88] sm:$0xf]  ;;  %7122 = vmatprep.mubr.bf16.mxu0 %v11763_v22  ;;  %v5783_v14 = vor.u32 %v5782_v30, %v5779_v23  ;;  %v6474_v29 = vld [vmem:[#allocation4 + $0x84] sm:$0xe] }
 0x311   : > { %11917 = vpow2.f32 %v10550_v17  ;;  %v10551_v12 = vmul.f32 -1.442695, %v14860_v21  ;;  %v5788_v24 = vrot.slane %v5786_v35, 5  ;;  %v5792_v16 = vrot.slane %v5790_v56, 4  ;;  %v6476_v7 = vld [vmem:[#allocation4 + $0x8c] sm:$0x1] }
 0x312   : > { %11919 = vpow2.f32 %v10548_v57  ;;  %v10549_v63 = vmul.f32 -1.442695, %v14864_v43  ;;  %v14871_v17 = vld [vmem:[#allocation4 + $0x94] sm:$0xf]  ;;  %v5784_v44 = vrot.slane %v5783_v14, 4  ;;  %v6616_v61 = vrot.slane %v6475_v53, 5 }
 0x313   : > { %11921 = vpow2.f32 %v10551_v12  ;;  %v5793_v57 = vor.u32 %v5792_v16, %v5788_v24  ;;  %v5803_v22 = vrot.slane %v5801_v49, 4  ;;  %v5804_v23 = vshll.u32 %v14826_v10, 16 }
 0x314   : > { %11923 = vpow2.f32 %v10549_v63  ;;  %v5810_v30 = vshll.u32 %v14871_v17, 16  ;;  %v10647_v35 = vrot.slane %v6474_v29, 9  ;;  %v6618_v54 = vrot.slane %v6616_v61, 4 }
 0x315   : > { %v6619_v12 = vrot.slane %v6476_v7, 5  ;;  %v5814_v56 = vshrl.u32 %v14871_v17, 16  ;;  %v5794_v59 = vrot.slane %v5793_v57, 4  ;;  %v5798_v55 = vrot.slane %v5796_v13, 5 }
 0x316   : > { %v5806_v36 = vrot.slane %v5804_v23, 5  ;;  %v5812_v63 = vrot.slane %v5810_v30, 5  ;;  %v6617_v52 = vsel %vm12164_vm8, %v10647_v35, %v6616_v61  ;;  %v5820_v14 = vshll.u32 %v5508_v37, 16  ;;  %v7232_v30 = vld [vmem:[#allocation4 + $0x20] sm:$0x1] }
 0x317   : > { %v6620_v53 = vsel %vm12164_vm8, %v6618_v54, %v6619_v12  ;;  %v5816_v49 = vrot.slane %v5814_v56, 4  ;;  %v5789_v16 = vsel %vm12235_vm1, %v5784_v44, %v5788_v24  ;;  %v5799_v29 = vsel %vm12235_vm1, %v5794_v59, %v5798_v55 }
 0x318   : > { %v10663_v7 = vcombine.low %v6617_v52, %v6620_v53  ;;  %v5807_v47 = vor.u32 %v5806_v36, %v5803_v22  ;;  %v10615_v57 = vcombine.low %v5789_v16, %v5799_v29  ;;  %v8439_v23 = vor.u32 %v14812_v31, %v14804_v0  ;;  %v7660_v29 = vld [vmem:[#allocation4 + $0x18] sm:$0xe] }
 0x319   : > { %v5817_v13 = vor.u32 %v5816_v49, %v5812_v63  ;;  %v7302_v61 = vrot.slane %v7300_v34, 4  ;;  %v10599_v37 = vcombine.low %v14824_v48, %v14850_v8  ;;  %v7305_v59 = vrot.slane %v7303_v33, 5  ;;  %v14904_v8 = vld [vmem:[#allocation4 + $0x34] sm:$0xf] }
 0x31a   : > { %7123 = vmatmul.mubr.bf16.gmra.mrb[76].mxu0 %v10663_v7  ;;  %v5808_v24 = vrot.slane %v5807_v47, 4  ;;  %v8449_v55 = vrot.slane %v8447_v46, 4  ;;  %6336 = vmatprep.mubr.bf16.mxu1 %v10615_v57  ;;  %v5822_v22 = vrot.slane %v5820_v14, 5  ;;  %v16773_v54 = vshll.u32 %v14806_v62, 16  ;;  %16775 = vst [vmem:[#allocation24_spill] sm:$0xff] %v14904_v8 }
 0x31b   : > { %v11918_v35 = vpop.eup %11917  ;;  %v5818_v31 = vrot.slane %v5817_v13, 4  ;;  %6337 = vmatmul.mubr.bf16.gmra.mrb[44].mxu1 %v10599_v37  ;;  %v16774_v48 = vrot.slane %v14776_v39, 5  ;;  %v7319_v33 = vshll.u32 %v7232_v30, 16  ;;  %v7306_v7 = vor.u32 %v7305_v59, %v7302_v61 }
 0x31c   : > { %v11920_v36 = vpop.eup %11919  ;;  %v4799_v44 = vadd.f32 1.0, %v11918_v35  ;;  %v8452_v34 = vrot.slane %v16773_v54, 5  ;;  %v5813_v53 = vsel %vm12235_vm1, %v5808_v24, %v5812_v63  ;;  %v8456_v51 = vshll.u32 %v14904_v8, 16  ;;  %v11059_v63 = vpop.f32.mrb[4].mxu1 }
 0x31d   : > { %v11922_v12 = vpop.eup %11921  ;;  %v4797_v56 = vadd.f32 1.0, %v11920_v36  ;;  %v7734_v47 = vrot.slane %v16774_v48, 4  ;;  %v5823_v49 = vsel %vm12235_vm1, %v5818_v31, %v5822_v22  ;;  %v8460_v13 = vshrl.u32 %v14904_v8, 16  ;;  %v5404_v31 = vld [vmem:[#allocation4 + $0x9c] sm:$0xf] }
 0x31e   : > { %v11924_v46 = vpop.eup %11923  ;;  %11925 = vrcp.f32 %v4799_v44  ;;  %v4800_v52 = vadd.f32 1.0, %v11922_v12  ;;  %v10616_v16 = vcombine.low %v5813_v53, %v5823_v49  ;;  %v8453_v57 = vor.u32 %v8452_v34, %v8449_v55  ;;  %v8384_v55 = vld [vmem:[#allocation4 + $0x38] sm:$0x1]  ;;  %v7233_v12 = vld [vmem:[#allocation4 + $0x24] sm:$0xf] }
 0x31f   : > { %11927 = vrcp.f32 %v4797_v56  ;;  %v4798_v14 = vadd.f32 1.0, %v11924_v46  ;;  %v8440_v35 = vrot.slane %v8439_v23, 4  ;;  %v7735_v37 = vrot.slane %v7232_v30, 5  ;;  %v11060_v23 = vpop.f32.mrb[5].mxu1 }
 0x320   : > { %11929 = vrcp.f32 %v4800_v52  ;;  %6344 = vmatprep.mubr.bf16.mxu1 %v10616_v16  ;;  %v7317_v36 = vrot.slane %v7316_v26, 4  ;;  %v7288_v24 = vsel %vm12235_vm1, %v14808_v42, %v14704_v58  ;;  %v16776_v44 = vshll.u32 %v14774_v38, 16  ;;  %v11062_v38 = vpop.f32.mrb[6].mxu1  ;;  %v14932_v26 = vld [vmem:[#allocation4 + $0x28] sm:$0xf] }
 0x321   : > { %11931 = vrcp.f32 %v4798_v14  ;;  %v10733_v59 = vrot.slane %v7660_v29, 9  ;;  %v10600_v22 = vcombine.low %v14826_v10, %v14871_v17  ;;  %v14924_v30 = vsel %vm12164_vm8, %v7734_v47, %v7735_v37  ;;  %v11063_v10 = vpop.f32.mrb[7].mxu1  ;;  %v7661_v14 = vld [vmem:[#allocation4 + $0x24] sm:$0xe] }
 0x322   : > { %v8444_v61 = vrot.slane %v16776_v44, 5  ;;  %16777 = vst [vmem:[#allocation25_spill] sm:$0xff] %v14924_v30  ;;  %v7307_v54 = vrot.slane %v7306_v7, 4  ;;  %v7321_v34 = vrot.slane %v7319_v33, 5  ;;  %v14926_v58 = vadd.f32 %v11060_v23, %v11059_v63 }
 0x323   : > { %v14928_v42 = vrot.slane %v8453_v57, 4  ;;  %v14930_v56 = vrot.slane %v8456_v51, 5  ;;  %v8462_v48 = vrot.slane %v8460_v13, 4  ;;  %6345 = vmatmul.mubr.bf16.gmra.mrb[48].mxu1 %v10600_v22  ;;  %v8435_v17 = vsel %vm12235_vm1, %v14810_v41, %v14804_v0  ;;  %v14962_v57 = vld [vmem:[#allocation4 + $0x2c] sm:$0x1] }
 0x324   : > { %v8445_v47 = vsel %vm12235_vm1, %v8440_v35, %v8444_v61  ;;  %v7322_v33 = vsel %vm12235_vm1, %v7317_v36, %v7321_v34  ;;  %v8466_v46 = vshll.u32 %v8384_v55, 16  ;;  %v14942_v52 = vadd.f32 %v11063_v10, %v11062_v38  ;;  %v5408_v55 = vld [vmem:[#allocation4 + $0xa4] sm:$0x1] }
 0x325   : > { %v16778_v53 = vrot.slane %v14776_v39, 5  ;;  %v7324_v16 = vshrl.u32 %v7233_v12, 16  ;;  %v7327_v29 = vshll.u32 %v7233_v12, 16  ;;  %v16780_v0 = vsel %vm12235_vm1, %v14797_v28, %v14788_v3 }
 0x326   : > { %v14955_v41 = vcombine.low %v7288_v24, %v16780_v0  ;;  %v7312_v39 = vsel %vm12235_vm1, %v7307_v54, %v14841_v2  ;;  %v7739_v51 = vrot.slane %v14932_v26, 5  ;;  %v14965_v35 = vcombine.low %v8435_v17, %v8445_v47 }
 0x327   : > { %v14948_v49 = vsel %vm12164_vm8, %v10733_v59, %v16778_v53  ;;  %v14967_v37 = vcombine.low %v7312_v39, %v7322_v33  ;;  %v8463_v28 = vor.u32 %v8462_v48, %v14930_v56  ;;  %v14975_v2 = vrot.slane %v8466_v46, 5  ;;  %v14991_v48 = vld [vmem:[#allocation4 + $0x3c] sm:$0xf]  ;;  %v11065_v53 = vpop.f32.mrb[8].mxu1 }
 0x328   : > { %16779 = vst [vmem:[#allocation26_spill] sm:$0xff] %v14948_v49  ;;  %16781 = vst [vmem:[#allocation27_spill] sm:$0xff] %v14955_v41  ;;  %v11926_v13 = vpop.eup %11925  ;;  %v10734_v24 = vrot.slane %v7661_v14, 9  ;;  %v7333_v44 = vshll.u32 %v14932_v26, 16  ;;  %v14980_v22 = vrot.slane %v7324_v16, 4  ;;  %v14982_v23 = vrot.slane %v7327_v29, 5 }
 0x329   : > { %16782 = vst [vmem:[#allocation28_spill] sm:$0xff] %v14965_v35  ;;  %16783 = vst [vmem:[#allocation29_spill] sm:$0xff] %v14967_v37  ;;  %v11928_v36 = vpop.eup %11927  ;;  %v4895_v63 = vmul.f32 %v11926_v13, %v14837_v50  ;;  %v14989_v38 = vrot.slane %v7739_v51, 4  ;;  %v14994_v17 = vrot.slane %v8463_v28, 4  ;;  %v7337_v47 = vshrl.u32 %v14932_v26, 16  ;;  %v11066_v39 = vpop.f32.mrb[9].mxu1 }
 0x32a   : > { %v11930_v61 = vpop.eup %11929  ;;  %v4893_v59 = vmul.f32 %v11928_v36, %v14844_v15  ;;  %v14987_v50 = vsel %vm12164_vm8, %v10734_v24, %v7739_v51  ;;  %16785 = vst [vmem:[#allocation31_spill] sm:$0xff] %v14991_v48  ;;  %v14997_v14 = vrot.slane %v7333_v44, 5  ;;  %v5411_v16 = vld [vmem:[#allocation4 + $0xa8] sm:$0xf]  ;;  %v7330_v51 = vor.u32 %v14982_v23, %v14980_v22  ;;  %v15003_v26 = vld [vmem:[#allocation4 + $0x94] sm:$0xf] }
 0x32b   : > { %v11932_v54 = vpop.eup %11931  ;;  %v11012_v34 = vpack.c.bf16 %v4895_v63, %v4895_v63  ;;  %v4896_v12 = vmul.f32 %v11930_v61, %v14860_v21  ;;  %16784 = vst [vmem:[#allocation30_spill] sm:$0xff] %v14987_v50  ;;  %v15005_v63 = vadd.f32 %v11066_v39, %v11065_v53  ;;  %v11068_v24 = vpop.f32.mrb[10].mxu1  ;;  %v16622_v21 = vrot.slane %v15003_v26, 5 }
 0x32c   : > { %v11010_v10 = vpack.c.bf16 %v4893_v59, %v4893_v59  ;;  %v4894_v15 = vmul.f32 %v11932_v54, %v14864_v43  ;;  %v11069_v54 = vpop.f32.mrb[11].mxu1 }
 0x32d   : > { %v5219_v33 = vshrl.u32 %v11012_v34, 16  ;;  %v11013_v46 = vpack.c.bf16 %v4896_v12, %v4896_v12  ;;  %v5222_v28 = vshll.u32 %v11012_v34, 16  ;;  %v7339_v12 = vrot.slane %v7337_v47, 4  ;;  %v15012_v47 = vld [vmem:[#allocation4 + $0x40] sm:$0xf] }
 0x32e   : > { %v5202_v29 = vshrl.u32 %v11010_v10, 16  ;;  %v11011_v0 = vpack.c.bf16 %v4894_v15, %v4894_v15  ;;  %v5205_v61 = vshll.u32 %v11010_v10, 16  ;;  %v15007_v22 = vadd.f32 %v11069_v54, %v11068_v24  ;;  %16786 = vst [vmem:[#allocation32_spill] sm:$0xff] %v15012_v47 }
 0x32f   : > { %v5221_v13 = vrot.slane %v5219_v33, 7  ;;  %v5227_v36 = vshrl.u32 %v11013_v46, 16  ;;  %v5230_v3 = vshll.u32 %v11013_v46, 16  ;;  %v5415_v33 = vld [vmem:[#allocation4 + $0xb0] sm:$0x1] }
 0x330   : > { %v5204_v44 = vrot.slane %v5202_v29, 7  ;;  %v5210_v59 = vshrl.u32 %v11011_v0, 16  ;;  %v5213_v43 = vshll.u32 %v11011_v0, 16 }
 0x331   : > { %v5224_v15 = vor.u32 %v5222_v28, %v5221_v13  ;;  %v5229_v7 = vrot.slane %v5227_v36, 7  ;;  %v5225_v53 = vrot.slane %v5221_v13, 4 }
 0x332   : > { %v5207_v23 = vor.u32 %v5205_v61, %v5204_v44  ;;  %v5212_v34 = vrot.slane %v5210_v59, 7  ;;  %v5208_v28 = vrot.slane %v5204_v44, 4  ;;  %v15022_v61 = vld [vmem:[#allocation4 + $0x34] sm:$0xf]  ;;  %v15024_v44 = vld [vmem:[#allocation4 + $0x30] sm:$0xf] }
 0x333   : > { %v5412_v29 = vsel %vm14211_vm12, %v5224_v15, %v5411_v16  ;;  %v5232_v10 = vor.u32 %v5230_v3, %v5229_v7  ;;  %v5234_v39 = vrot.slane %v5229_v7, 4  ;;  %v11071_v16 = vpop.f32.mrb[12].mxu1  ;;  %v7340_v7 = vor.u32 %v7339_v12, %v14997_v14  ;;  %v6479_v59 = vld [vmem:[#allocation4 + $0x98] sm:$0x1] }
 0x334   : > { %5413 = vst [vmem:[#allocation4 + $0xa8] sm:$0xf] %v5412_v29  ;;  %v5405_v46 = vsel %vm14211_vm12, %v5207_v23, %v5404_v31  ;;  %v5215_v36 = vor.u32 %v5213_v43, %v5212_v34  ;;  %v5217_v24 = vrot.slane %v5212_v34, 4  ;;  %v8474_v3 = vshll.u32 %v14991_v48, 16  ;;  %v11072_v54 = vpop.f32.mrb[13].mxu1 }
 0x335   : > { %5406 = vst [vmem:[#allocation4 + $0x9c] sm:$0xf] %v5405_v46  ;;  %v5233_v0 = vsel %vm12221_vm0, %v5225_v53, %v5232_v10  ;;  %v5416_v13 = vsel %vm13974_vm10, %v5234_v39, %v5415_v33  ;;  %v8480_v15 = vshll.u32 %v15012_v47, 16  ;;  %v8484_v12 = vshrl.u32 %v15012_v47, 16  ;;  %v15045_v10 = vld [vmem:[#allocation4 + $0x44] sm:$0x1] }
 0x336   : > { %5414 = vst [vmem:[#allocation4 + $0xac] sm:$0xf] %v5233_v0  ;;  %5417 = vst [vmem:[#allocation4 + $0xb0] sm:$0x1] %v5416_v13  ;;  %v5216_v31 = vsel %vm12221_vm0, %v5208_v28, %v5215_v36  ;;  %v5409_v43 = vsel %vm13974_vm10, %v5217_v24, %v5408_v55  ;;  %v6625_v23 = vrot.slane %v16622_v21, 4  ;;  %v16787_v33 = vrot.slane %v14962_v57, 5 }
 0x337   : > { %5407 = vst [vmem:[#allocation4 + $0xa0] sm:$0xf] %v5216_v31  ;;  %5410 = vst [vmem:[#allocation4 + $0xa4] sm:$0x1] %v5409_v43  ;;  %v15041_v53 = vadd.f32 %v11072_v54, %v11071_v16  ;;  %v11074_v55 = vpop.f32.mrb[14].mxu1  ;;  %v15043_v29 = vrot.slane %v7330_v51, 4 }
 0x338   : > { %v15039_v34 = vsel %vm12164_vm8, %v14989_v38, %v16787_v33  ;;  %v6477_v39 = vld [vmem:[#allocation4 + $0x90] sm:$0xe]  ;;  %v11075_v46 = vpop.f32.mrb[15].mxu1  ;;  %v16790_v36 = vshll.u32 %v14962_v57, 16  ;;  %v16623_v38 = vrot.slane %v15022_v61, 5  ;;  %v7348_v0 = vshrl.u32 %v15024_v44, 16 }
 0x339   : > { %16788 = vst [vmem:[#allocation33_spill] sm:$0xff] %v15039_v34  ;;  %16789 = vst [vmem:[#allocation34_spill] sm:$0xff] %v15041_v53  ;;  %v6626_v13 = vrot.slane %v6479_v59, 5  ;;  %v15057_v51 = vadd.f32 %v11075_v46, %v11074_v55  ;;  %v15059_v16 = vrot.slane %v7340_v7, 4  ;;  %v16792_v31 = vshrl.u32 %v14991_v48, 16 }
 0x33a   : > { %v15053_v24 = vrot.slane %v16790_v36, 5  ;;  %v15065_v54 = vrot.slane %v8474_v3, 5  ;;  %v15067_v33 = vrot.slane %v8480_v15, 5  ;;  %v8486_v57 = vrot.slane %v8484_v12, 4  ;;  %v15070_v28 = vld [vmem:[#allocation4 + $0x4c] sm:$0xf] }
 0x33b   : > { %16791 = vst [vmem:[#allocation35_spill] sm:$0xff] %v15057_v51  ;;  %v15063_v43 = vrot.slane %v16792_v31, 4  ;;  %v10648_v21 = vrot.slane %v6477_v39, 9  ;;  %v6627_v59 = vsel %vm12164_vm8, %v6625_v23, %v6626_v13  ;;  %v15076_v46 = vld [vmem:[#allocation4 + $0x48] sm:$0xf]  ;;  %v15084_v15 = vrot.slane %v16623_v38, 4 }
 0x33c   : > { %v15078_v31 = vld [vmem:[#allocation4 + $0x9c] sm:$0xf]  ;;  %v15088_v39 = vrot.slane %v7348_v0, 4  ;;  %v16793_v13 = vrot.slane %v15003_v26, 5  ;;  %v11950_v38 = vld [vmem:[%s16602_s2] ss:$0 sm:$0xff] }
 0x33d   : > { %v5825_v55 = vshrl.u32 %v15078_v31, 16  ;;  %v5828_v7 = vshll.u32 %v15078_v31, 16  ;;  %v11775_v48 = vld [vmem:[#allocation4 + $0xa8] sm:$0xff]   ;;  %v6480_v37 = vld [vmem:[#allocation4 + $0x9c] sm:$0xe] }
 0x33e   : > { %v6624_v36 = vsel %vm12164_vm8, %v10648_v21, %v16793_v13  ;;  %v11772_v12 = vld [vmem:[#allocation4 + $0x9c] sm:$0xff]   ;;  %v8487_v21 = vor.u32 %v8486_v57, %v15067_v33  ;;  %v5509_v62 = vld [vmem:[#allocation4 + $0xa4] sm:$0x1]  ;;  %v15114_v30 = vld [vmem:[#allocation4 + $0xa8] sm:$0xf] }
 0x33f   : > { %v11545_v23 = vpop.f32.mrb[28].mxu0  ;;  %v10664_v47 = vcombine.low %v6624_v36, %v6627_v59  ;;  %v15102_v26 = vld [vmem:[#allocation4 + $0xa0] sm:$0xf]  ;;  %v5827_v34 = vrot.slane %v5825_v55, 4  ;;  %v5830_v50 = vrot.slane %v5828_v7, 5  ;;  %7130 = vmatprep.mubr.bf16.mxu0 %v11772_v12  ;;  %v5844_v32 = vshll.u32 %v5509_v62, 16 }
 0x340   : > { %v15100_v19 = vadd.f32 %v11950_v38, %v11545_v23  ;;  %v4662_v0 = vpop.f32.mrb[29].mxu0  ;;  %v5834_v23 = vshll.u32 %v15102_v26, 16  ;;  %v5838_v57 = vshrl.u32 %v15102_v26, 16  ;;  %v6481_v41 = vld [vmem:[#allocation4 + $0xa0] sm:$0xf]  ;;  %v15122_v62 = vrot.slane %v8487_v21, 4 }
 0x341   : > { %v15107_v8 = vadd.f32 %v11950_v38, %v4662_v0  ;;  %v11546_v3 = vpop.f32.mrb[30].mxu0  ;;  %v15116_v0 = vpop.f32.mrb[16].mxu1  ;;  %7131 = vmatmul.mubr.bf16.gmra.mrb[80].mxu0 %v10664_v47  ;;  %v5831_v7 = vor.u32 %v5830_v50, %v5827_v34  ;;  %v6482_v27 = vld [vmem:[#allocation4 + $0xa4] sm:$0x1]  ;;  %v5846_v4 = vrot.slane %v5844_v32, 5  ;;  %v10649_v47 = vrot.slane %v6480_v37, 9 }
 0x342   : > { %v10554_v45 = vmul.f32 -1.442695, %v15100_v19  ;;  %v15111_v36 = vadd.f32 %v11950_v38, %v11546_v3  ;;  %v4665_v59 = vpop.f32.mrb[31].mxu0  ;;  %v5836_v49 = vrot.slane %v5834_v23, 5  ;;  %v11078_v35 = vpop.f32.mrb[17].mxu1  ;;  %7138 = vmatprep.mubr.bf16.mxu0 %v11775_v48  ;;  %v5840_v12 = vrot.slane %v5838_v57, 4 }
 0x343   : > { %v10552_v13 = vmul.f32 -1.442695, %v15107_v8  ;;  %v15119_v55 = vadd.f32 %v11950_v38, %v4665_v59  ;;  %v5832_v20 = vrot.slane %v5831_v7, 4  ;;  %v6630_v50 = vrot.slane %v6481_v41, 5  ;;  %v15125_v34 = vld [vmem:[#allocation4 + $0xac] sm:$0xf] }
 0x344   : > { %16794 = vst [vmem:[#allocation36_spill] sm:$0xff] %v15111_v36  ;;  %11933 = vpow2.f32 %v10554_v45  ;;  %v10555_v3 = vmul.f32 -1.442695, %v15111_v36  ;;  %v5841_v38 = vor.u32 %v5840_v12, %v5836_v49  ;;  %v6633_v45 = vrot.slane %v6482_v27, 5  ;;  %v5510_v23 = vld [vmem:[#allocation4 + $0xb0] sm:$0x1] }
 0x345   : > { %16795 = vst [vmem:[#allocation37_spill] sm:$0xff] %v15119_v55  ;;  %11935 = vpow2.f32 %v10552_v13  ;;  %v10553_v1 = vmul.f32 -1.442695, %v15119_v55  ;;  %v5849_v48 = vshrl.u32 %v15114_v30, 16  ;;  %v11080_v13 = vpop.f32.mrb[18].mxu1  ;;  %v5837_v57 = vsel %vm12235_vm1, %v5832_v20, %v5836_v49 }
 0x346   : > { %11937 = vpow2.f32 %v10555_v3  ;;  %v5842_v32 = vrot.slane %v5841_v38, 4  ;;  %v6632_v7 = vrot.slane %v6630_v50, 4  ;;  %v5852_v37 = vshll.u32 %v15114_v30, 16  ;;  %v11081_v3 = vpop.f32.mrb[19].mxu1 }
 0x347   : > { %11939 = vpow2.f32 %v10553_v1  ;;  %v11165_v59 = vpop.f32.mrb[32].mxu0  ;;  %v6631_v1 = vsel %vm12164_vm8, %v10649_v47, %v6630_v50  ;;  %v5851_v27 = vrot.slane %v5849_v48, 4  ;;  %v5858_v12 = vshll.u32 %v15125_v34, 16 }
 0x348   : > { %v11166_v41 = vpop.f32.mrb[33].mxu0  ;;  %v5862_v40 = vshrl.u32 %v15125_v34, 16  ;;  %v5847_v21 = vsel %vm12235_vm1, %v5842_v32, %v5846_v4  ;;  %v6634_v20 = vsel %vm12164_vm8, %v6632_v7, %v6633_v45  ;;  %v5854_v49 = vrot.slane %v5852_v37, 5 }
 0x349   : > { %v11168_v6 = vpop.f32.mrb[34].mxu0  ;;  %v5868_v38 = vshll.u32 %v5510_v23, 16  ;;  %v10617_v51 = vcombine.low %v5837_v57, %v5847_v21  ;;  %v10665_v5 = vcombine.low %v6631_v1, %v6634_v20  ;;  %v5860_v53 = vrot.slane %v5858_v12, 5 }
 0x34a   : > { %v11169_v60 = vpop.f32.mrb[35].mxu0  ;;  %v5864_v55 = vrot.slane %v5862_v40, 4  ;;  %v10601_v47 = vcombine.low %v15078_v31, %v15102_v26  ;;  %v5855_v50 = vor.u32 %v5854_v49, %v5851_v27  ;;  %v16796_v48 = vshll.u32 %v15024_v44, 16 }
 0x34b   : > { %v16797_v4 = vshll.u32 %v15022_v61, 16  ;;  %6352 = vmatprep.mubr.bf16.mxu1 %v10617_v51  ;;  %7139 = vmatmul.mubr.bf16.gmra.mrb[84].mxu0 %v10665_v5  ;;  %v11167_v23 = vadd.f32 %v11166_v41, %v11165_v59  ;;  %v11170_v21 = vadd.f32 %v11169_v60, %v11168_v6  ;;  %v16798_v57 = vshrl.u32 %v15022_v61, 16 }
 0x34c   : > { %v15145_v36 = vrot.slane %v16796_v48, 5  ;;  %v5865_v45 = vor.u32 %v5864_v55, %v5860_v53  ;;  %6353 = vmatmul.mubr.bf16.gmra.mrb[52].mxu1 %v10601_v47  ;;  %v5856_v31 = vrot.slane %v5855_v50, 4  ;;  %v5870_v26 = vrot.slane %v5868_v38, 5  ;;  %v7238_v48 = vld [vmem:[#allocation4 + $0x38] sm:$0x1] }
 0x34d   : > { %v15149_v32 = vrot.slane %v16797_v4, 5  ;;  %v7363_v40 = vrot.slane %v16798_v57, 4  ;;  %v15154_v44 = vadd.f32 %v11078_v35, %v15116_v0  ;;  %v8495_v37 = vshrl.u32 %v15076_v46, 16 }
 0x34e   : > { %v11934_v7 = vpop.eup %11933  ;;  %v5866_v12 = vrot.slane %v5865_v45, 4  ;;  %v15158_v5 = vadd.f32 %v11167_v23, %v14690_v18  ;;  %v15161_v60 = vadd.f32 %v11170_v21, %v14697_v25  ;;  %v15163_v41 = vadd.f32 %v11081_v3, %v11080_v13  ;;  %v7662_v23 = vld [vmem:[#allocation4 + $0x30] sm:$0xe] }
 0x34f   : > { %v11936_v1 = vpop.eup %11935  ;;  %v4803_v27 = vadd.f32 1.0, %v11934_v7  ;;  %v11171_v6 = vpop.f32.mrb[36].mxu0  ;;  %v7354_v35 = vor.u32 %v15145_v36, %v15088_v39  ;;  %v8498_v0 = vshll.u32 %v15076_v46, 16  ;;  %v5861_v18 = vsel %vm12235_vm1, %v5856_v31, %v5860_v53 }
 0x350   : > { %16799 = vst [vmem:[#allocation38_spill] sm:$0xff] %v15158_v5  ;;  %16800 = vst [vmem:[#allocation39_spill] sm:$0xff] %v15161_v60  ;;  %v11938_v51 = vpop.eup %11937  ;;  %v4801_v55 = vadd.f32 1.0, %v11936_v1  ;;  %v11172_v59 = vpop.f32.mrb[37].mxu0  ;;  %v5871_v25 = vsel %vm12235_vm1, %v5866_v12, %v5870_v26  ;;  %v7364_v36 = vor.u32 %v7363_v40, %v15149_v32  ;;  %v8497_v4 = vrot.slane %v8495_v37, 4 }
 0x351   : > { %v11940_v20 = vpop.eup %11939  ;;  %11941 = vrcp.f32 %v4803_v27  ;;  %v4804_v49 = vadd.f32 1.0, %v11938_v51  ;;  %v11174_v38 = vpop.f32.mrb[38].mxu0  ;;  %v10618_v50 = vcombine.low %v5861_v18, %v5871_v25  ;;  %v11173_v13 = vadd.f32 %v11172_v59, %v11171_v6  ;;  %v15237_v18 = vld [vmem:[#allocation4 + $0x3c] sm:$0xe] }
 0x352   : > { %11943 = vrcp.f32 %v4801_v55  ;;  %v4802_v47 = vadd.f32 1.0, %v11940_v20  ;;  %v11175_v3 = vpop.f32.mrb[39].mxu0  ;;  %v10602_v53 = vcombine.low %v15114_v30, %v15125_v34  ;;  %v8500_v21 = vrot.slane %v8498_v0, 5 }
 0x353   : > { %11945 = vrcp.f32 %v4804_v49  ;;  %v11176_v39 = vadd.f32 %v11175_v3, %v11174_v38  ;;  %6360 = vmatprep.mubr.bf16.mxu1 %v10618_v50  ;;  %v15176_v45 = vadd.f32 %v11173_v13, %v14926_v58  ;;  %v7749_v7 = vrot.slane %v7238_v48, 5 }
 0x354   : > { %11947 = vrcp.f32 %v4802_v47  ;;  %v8504_v31 = vshll.u32 %v15070_v28, 16  ;;  %v8508_v26 = vshrl.u32 %v15070_v28, 16  ;;  %6361 = vmatmul.mubr.bf16.gmra.mrb[56].mxu1 %v10602_v53  ;;  %v7346_v40 = vsel %vm12235_vm1, %v15059_v16, %v15053_v24 }
 0x355   : > { %16801 = vst [vmem:[#allocation40_spill] sm:$0xff] %v15176_v45  ;;  %v15179_v57 = vadd.f32 %v11176_v39, %v14942_v52  ;;  %v16803_v30 = vor.u32 %v15065_v54, %v15063_v43  ;;  %v16804_v34 = vshll.u32 %v15045_v10, 16  ;;  %v7367_v52 = vshll.u32 %v7238_v48, 16  ;;  %v8386_v54 = vld [vmem:[#allocation4 + $0x50] sm:$0x1] }
 0x356   : > { %v16805_v27 = vsel %vm12235_vm1, %v14994_v17, %v14975_v2  ;;  %v16806_v12 = vsel %vm12235_vm1, %v14928_v42, %v14930_v56  ;;  %v7336_v10 = vsel %vm12235_vm1, %v15043_v29, %v14997_v14  ;;  %v10735_v16 = vrot.slane %v7662_v23, 9 }
 0x357   : > { %16802 = vst [vmem:[#allocation41_spill] sm:$0xff] %v15179_v57  ;;  %v8478_v58 = vrot.slane %v16803_v30, 4  ;;  %v8492_v37 = vrot.slane %v16804_v34, 5  ;;  %v11177_v1 = vpop.f32.mrb[40].mxu0  ;;  %v15202_v24 = vcombine.low %v16806_v12, %v16805_v27  ;;  %v15211_v43 = vsel %vm12164_vm8, %v15084_v15, %v7749_v7 }
 0x358   : > { %v11178_v2 = vpop.f32.mrb[41].mxu0  ;;  %v15216_v42 = vrot.slane %v7354_v35, 4  ;;  %v15218_v56 = vrot.slane %v7364_v36, 4  ;;  %v8501_v6 = vor.u32 %v8500_v21, %v8497_v4  ;;  %v15220_v14 = vcombine.low %v7336_v10, %v7346_v40  ;;  %v15259_v36 = vld [vmem:[#allocation4 + $0x44] sm:$0x1]  ;;  %v16810_v40 = vld [vmem:[#allocation36_spill] sm:$0xff] }
 0x359   : > { %v8493_v17 = vsel %vm12235_vm1, %v15122_v62, %v8492_v37  ;;  %v11179_v51 = vadd.f32 %v11178_v2, %v11177_v1  ;;  %v11180_v55 = vpop.f32.mrb[42].mxu0  ;;  %v15222_v29 = vrot.slane %v8504_v31, 5  ;;  %v15224_v59 = vrot.slane %v8508_v26, 4  ;;  %v15261_v4 = vld [vmem:[#allocation4 + $0x3c] sm:$0xf]  ;;  %v16811_v1 = vld [vmem:[#allocation37_spill] sm:$0xff] }
 0x35a   : > { %v11181_v15 = vpop.f32.mrb[43].mxu0  ;;  %v8483_v0 = vsel %vm12235_vm1, %v8478_v58, %v15067_v33  ;;  %v16807_v62 = vrot.slane %v15022_v61, 5  ;;  %v15235_v20 = vrot.slane %v7367_v52, 5  ;;  %v8514_v49 = vshll.u32 %v8386_v54, 16  ;;  %v15246_v61 = vld [vmem:[#allocation4 + $0x40] sm:$0xf] }
 0x35b   : > { %v11942_v25 = vpop.eup %11941  ;;  %v15240_v38 = vadd.f32 %v11179_v51, %v15005_v63  ;;  %v11182_v47 = vadd.f32 %v11181_v15, %v11180_v55  ;;  %v15242_v50 = vcombine.low %v8483_v0, %v8493_v17  ;;  %v15257_v39 = vrot.slane %v8501_v6, 4  ;;  %v15271_v58 = vld [vmem:[#allocation4 + $0xac] sm:$0xf]  ;;  %v11083_v52 = vpop.f32.mrb[20].mxu1  ;;  %v16815_v37 = vld [vmem:[#allocation35_spill] sm:$0xff] }
 0x35c   : > { %v15233_v35 = vsel %vm12164_vm8, %v10735_v16, %v16807_v62  ;;  %v11944_v13 = vpop.eup %11943  ;;  %v4899_v3 = vmul.f32 %v11942_v25, %v15100_v19  ;;  %v8511_v21 = vor.u32 %v15224_v59, %v15222_v29  ;;  %v15273_v34 = vrot.slane %v8514_v49, 5  ;;  %v11084_v16 = vpop.f32.mrb[21].mxu1 }
 0x35d   : > { %16808 = vst [vmem:[#allocation42_spill] sm:$0xff] %v15240_v38  ;;  %v11946_v53 = vpop.eup %11945  ;;  %v4897_v23 = vmul.f32 %v11944_v13, %v15107_v8  ;;  %v15265_v19 = vadd.f32 %v11182_v47, %v15007_v22  ;;  %v15280_v51 = vadd.f32 %v11084_v16, %v11083_v52  ;;  %v11086_v55 = vpop.f32.mrb[22].mxu1  ;;  %v16812_v52 = vld [vmem:[#allocation34_spill] sm:$0xff] }
 0x35e   : > { %v11948_v31 = vpop.eup %11947  ;;  %v11016_v26 = vpack.c.bf16 %v4899_v3, %v4899_v3  ;;  %v4900_v30 = vmul.f32 %v11946_v53, %v16810_v40  ;;  %v11087_v47 = vpop.f32.mrb[23].mxu1  ;;  %v5425_v40 = vld [vmem:[#allocation4 + $0xc0] sm:$0xf] }
 0x35f   : > { %16809 = vst [vmem:[#allocation43_spill] sm:$0xff] %v15265_v19  ;;  %v11014_v8 = vpack.c.bf16 %v4897_v23, %v4897_v23  ;;  %v4898_v22 = vmul.f32 %v11948_v31, %v16811_v1  ;;  %v11183_v27 = vpop.f32.mrb[44].mxu0  ;;  %v15283_v31 = vadd.f32 %v11087_v47, %v11086_v55  ;;  %v16839_v19 = vld [vmem:[#allocation17_spill] sm:$0xff] }
 0x360   : > { %v5253_v54 = vshrl.u32 %v11016_v26, 16  ;;  %v11017_v2 = vpack.c.bf16 %v4900_v30, %v4900_v30  ;;  %v11184_v17 = vpop.f32.mrb[45].mxu0  ;;  %v5256_v3 = vshll.u32 %v11016_v26, 16 }
 0x361   : > { %v5236_v15 = vshrl.u32 %v11014_v8, 16  ;;  %v11015_v0 = vpack.c.bf16 %v4898_v22, %v4898_v22  ;;  %v11185_v49 = vadd.f32 %v11184_v17, %v11183_v27  ;;  %v11186_v25 = vpop.f32.mrb[46].mxu0  ;;  %v5239_v1 = vshll.u32 %v11014_v8, 16  ;;  %v5418_v22 = vld [vmem:[#allocation4 + $0xb4] sm:$0xf] }
 0x362   : > { %v5255_v13 = vrot.slane %v5253_v54, 7  ;;  %v5261_v53 = vshrl.u32 %v11017_v2, 16  ;;  %v11187_v23 = vpop.f32.mrb[47].mxu0  ;;  %v5264_v63 = vshll.u32 %v11017_v2, 16  ;;  %v5429_v54 = vld [vmem:[#allocation4 + $0xc8] sm:$0x1] }
 0x363   : > { %v5238_v30 = vrot.slane %v5236_v15, 7  ;;  %v5244_v33 = vshrl.u32 %v11015_v0, 16  ;;  %v15286_v16 = vadd.f32 %v11185_v49, %v16812_v52  ;;  %v11188_v27 = vadd.f32 %v11187_v23, %v11186_v25  ;;  %v5422_v8 = vld [vmem:[#allocation4 + $0xbc] sm:$0x1]  ;;  %v11089_v49 = vpop.f32.mrb[24].mxu1 }
 0x364   : > { %v5258_v7 = vor.u32 %v5256_v3, %v5255_v13  ;;  %v5263_v48 = vrot.slane %v5261_v53, 7  ;;  %v5259_v17 = vrot.slane %v5255_v13, 4  ;;  %v5247_v6 = vshll.u32 %v11015_v0, 16  ;;  %v15295_v53 = vld [vmem:[#allocation4 + $0x54] sm:$0xf]  ;;  %v11090_v0 = vpop.f32.mrb[25].mxu1 }
 0x365   : > { %16813 = vst [vmem:[#allocation36_spill] sm:$0xff] %v15286_v16  ;;  %v5241_v12 = vor.u32 %v5239_v1, %v5238_v30  ;;  %v5246_v26 = vrot.slane %v5244_v33, 7  ;;  %v15291_v62 = vadd.f32 %v11188_v27, %v16815_v37  ;;  %v5242_v3 = vrot.slane %v5238_v30, 4  ;;  %v6485_v52 = vld [vmem:[#allocation4 + $0xb0] sm:$0x1] }
 0x366   : > { %v5426_v55 = vsel %vm14211_vm12, %v5258_v7, %v5425_v40  ;;  %v5266_v47 = vor.u32 %v5264_v63, %v5263_v48  ;;  %v5268_v15 = vrot.slane %v5263_v48, 4  ;;  %v8512_v23 = vrot.slane %v8511_v21, 4  ;;  %v15304_v40 = vld [vmem:[#allocation4 + $0x58] sm:$0xf] }
 0x367   : > { %16816 = vst [vmem:[#allocation37_spill] sm:$0xff] %v15291_v62  ;;  %5427 = vst [vmem:[#allocation4 + $0xc0] sm:$0xf] %v5426_v55  ;;  %v5419_v2 = vsel %vm14211_vm12, %v5241_v12, %v5418_v22  ;;  %v5249_v25 = vor.u32 %v5247_v6, %v5246_v26  ;;  %v5251_v13 = vrot.slane %v5246_v26, 4  ;;  %v11189_v33 = vpop.f32.mrb[48].mxu0  ;;  %v15306_v10 = vadd.f32 %v11090_v0, %v11089_v49  ;;  %v11092_v6 = vpop.f32.mrb[26].mxu1 }
 0x368   : > { %5420 = vst [vmem:[#allocation4 + $0xb4] sm:$0xf] %v5419_v2  ;;  %v5267_v48 = vsel %vm12221_vm0, %v5259_v17, %v5266_v47  ;;  %v5430_v37 = vsel %vm13974_vm10, %v5268_v15, %v5429_v54  ;;  %v11190_v12 = vpop.f32.mrb[49].mxu0  ;;  %v7381_v22 = vshll.u32 %v15246_v61, 16  ;;  %v11093_v21 = vpop.f32.mrb[27].mxu1  ;;  %v16819_v17 = vrot.slane %v15271_v58, 5 }
 0x369   : > { %5428 = vst [vmem:[#allocation4 + $0xc4] sm:$0xf] %v5267_v48  ;;  %5431 = vst [vmem:[#allocation4 + $0xc8] sm:$0x1] %v5430_v37  ;;  %v5250_v30 = vsel %vm12221_vm0, %v5242_v3, %v5249_v25  ;;  %v5423_v1 = vsel %vm13974_vm10, %v5251_v13, %v5422_v8  ;;  %v11191_v27 = vadd.f32 %v11190_v12, %v11189_v33  ;;  %v11192_v59 = vpop.f32.mrb[50].mxu0  ;;  %v7385_v26 = vshrl.u32 %v15246_v61, 16 }
 0x36a   : > { %5421 = vst [vmem:[#allocation4 + $0xb8] sm:$0xf] %v5250_v30  ;;  %5424 = vst [vmem:[#allocation4 + $0xbc] sm:$0x1] %v5423_v1  ;;  %v6639_v54 = vrot.slane %v16819_v17, 4  ;;  %v8519_v55 = vshrl.u32 %v15295_v53, 16  ;;  %v15317_v15 = vadd.f32 %v11093_v21, %v11092_v6  ;;  %v8517_v6 = vsel %vm12235_vm1, %v8512_v23, %v15273_v34 }
 0x36b   : > { %v11193_v47 = vpop.f32.mrb[51].mxu0  ;;  %v6483_v49 = vld [vmem:[#allocation4 + $0xa8] sm:$0xe]  ;;  %v16820_v8 = vrot.slane %v15246_v61, 5  ;;  %v8522_v2 = vshll.u32 %v15295_v53, 16  ;;  %v15323_v25 = vadd.f32 %v11191_v27, %v15154_v44  ;;  %v6640_v33 = vrot.slane %v6485_v52, 5 }
 0x36c   : > { %v11194_v13 = vadd.f32 %v11193_v47, %v11192_v59  ;;  %v16822_v0 = vshrl.u32 %v15261_v4, 16  ;;  %v16823_v48 = vshll.u32 %v15261_v4, 16  ;;  %v8528_v12 = vshll.u32 %v15304_v40, 16 }
 0x36d   : > { %v7755_v3 = vrot.slane %v16820_v8, 4  ;;  %16821 = vst [vmem:[#allocation34_spill] sm:$0xff] %v15323_v25  ;;  %v15337_v30 = vrot.slane %v7381_v22, 5  ;;  %v10650_v52 = vrot.slane %v6483_v49, 9  ;;  %v6641_v27 = vsel %vm12164_vm8, %v6639_v54, %v6640_v33 }
 0x36e   : > { %v15327_v7 = vrot.slane %v16822_v0, 4  ;;  %v15331_v37 = vrot.slane %v16823_v48, 5  ;;  %v15341_v1 = vadd.f32 %v11194_v13, %v15163_v41  ;;  %v15345_v4 = vrot.slane %v7385_v26, 4 }
 0x36f   : > { %v15347_v59 = vrot.slane %v8519_v55, 4  ;;  %v15349_v21 = vld [vmem:[#allocation4 + $0xb4] sm:$0xf]  ;;  %v8507_v34 = vsel %vm12235_vm1, %v15257_v39, %v15222_v29  ;;  %v16825_v23 = vrot.slane %v15259_v36, 5  ;;  %v15361_v22 = vrot.slane %v8522_v2, 5 }
 0x370   : > { %16824 = vst [vmem:[#allocation15_spill] sm:$0xff] %v15341_v1  ;;  %v8532_v17 = vshrl.u32 %v15304_v40, 16  ;;  %v16826_v54 = vrot.slane %v15271_v58, 5  ;;  %v5873_v55 = vshrl.u32 %v15349_v21, 16  ;;  %v5876_v47 = vshll.u32 %v15349_v21, 16 }
 0x371   : > { %v15359_v41 = vsel %vm12164_vm8, %v7755_v3, %v16825_v23  ;;  %v15370_v29 = vrot.slane %v8528_v12, 5  ;;  %v15372_v39 = vld [vmem:[#allocation4 + $0x4c] sm:$0xf]  ;;  %v11784_v49 = vld [vmem:[#allocation4 + $0xb4] sm:$0xff]   ;;  %v11787_v3 = vld [vmem:[#allocation4 + $0xc0] sm:$0xff]   ;;  %v16827_v58 = vsel %vm12235_vm1, %v15218_v56, %v15235_v20  ;;  %v16828_v13 = vsel %vm12235_vm1, %v15216_v42, %v15149_v32 }
 0x372   : > { %v6638_v26 = vsel %vm12164_vm8, %v10650_v52, %v16826_v54  ;;  %v15374_v2 = vld [vmem:[#allocation4 + $0xb8] sm:$0xf]  ;;  %v15386_v33 = vcombine.low %v16828_v13, %v16827_v58  ;;  %v15388_v0 = vcombine.low %v8507_v34, %v8517_v6  ;;  %v16829_v48 = vrot.slane %v15246_v61, 5  ;;  %v5511_v23 = vld [vmem:[#allocation4 + $0xbc] sm:$0x1]  ;;  %7146 = vmatprep.mubr.bf16.mxu0 %v11784_v49 }
 0x373   : > { %v10666_v8 = vcombine.low %v6638_v26, %v6641_v27  ;;  %v16830_v12 = vrot.slane %v15237_v18, 9  ;;  %v11195_v27 = vpop.f32.mrb[52].mxu0  ;;  %v5875_v56 = vrot.slane %v5873_v55, 4  ;;  %v5878_v20 = vrot.slane %v5876_v47, 5  ;;  %v15400_v42 = vld [vmem:[#allocation4 + $0x48] sm:$0xf] }
 0x374   : > { %v5882_v54 = vshll.u32 %v15374_v2, 16  ;;  %v5886_v32 = vshrl.u32 %v15374_v2, 16  ;;  %v5892_v6 = vshll.u32 %v5511_v23, 16  ;;  %v6487_v34 = vld [vmem:[#allocation4 + $0xb8] sm:$0xf]  ;;  %v7378_v26 = vor.u32 %v15331_v37, %v15327_v7  ;;  %v11196_v47 = vpop.f32.mrb[53].mxu0 }
 0x375   : > { %v15396_v52 = vsel %vm12164_vm8, %v16830_v12, %v16829_v48  ;;  %v6488_v61 = vld [vmem:[#allocation4 + $0xbc] sm:$0x1]  ;;  %v7388_v55 = vor.u32 %v15345_v4, %v15337_v30  ;;  %7147 = vmatmul.mubr.bf16.gmra.mrb[88].mxu0 %v10666_v8  ;;  %v5879_v58 = vor.u32 %v5878_v20, %v5875_v56  ;;  %v6486_v12 = vld [vmem:[#allocation4 + $0xb4] sm:$0xe]  ;;  %v6644_v44 = vrot.slane %v6487_v34, 5  ;;  %v11198_v49 = vpop.f32.mrb[54].mxu0 }
 0x376   : > { %v5884_v13 = vrot.slane %v5882_v54, 5  ;;  %v5888_v48 = vrot.slane %v5886_v32, 4  ;;  %7154 = vmatprep.mubr.bf16.mxu0 %v11787_v3  ;;  %v15408_v23 = vrot.slane %v8532_v17, 4  ;;  %v7405_v1 = vshll.u32 %v15372_v39, 16  ;;  %v11199_v7 = vpop.f32.mrb[55].mxu0 }
 0x377   : > { %v7409_v18 = vshrl.u32 %v15372_v39, 16  ;;  %v11197_v25 = vadd.f32 %v11196_v47, %v11195_v27  ;;  %v5880_v37 = vrot.slane %v5879_v58, 4  ;;  %v6646_v4 = vrot.slane %v6644_v44, 4  ;;  %v15413_v20 = vld [vmem:[#allocation4 + $0x60] sm:$0xf] }
 0x378   : > { %v5889_v62 = vor.u32 %v5888_v48, %v5884_v13  ;;  %v6647_v16 = vrot.slane %v6488_v61, 5  ;;  %v10651_v8 = vrot.slane %v6486_v12, 9  ;;  %v7396_v56 = vshrl.u32 %v15400_v42, 16  ;;  %v15421_v47 = vld [vmem:[#allocation4 + $0x64] sm:$0xf] }
 0x379   : > { %v15416_v54 = vadd.f32 %v11197_v25, %v15280_v51  ;;  %v11200_v17 = vadd.f32 %v11199_v7, %v11198_v49  ;;  %v5894_v32 = vrot.slane %v5892_v6, 5  ;;  %v7399_v27 = vshll.u32 %v15400_v42, 16  ;;  %v8387_v25 = vld [vmem:[#allocation4 + $0x5c] sm:$0x1]  ;;  %v8388_v7 = vld [vmem:[#allocation4 + $0x68] sm:$0x1] }
 0x37a   : > { %v5890_v3 = vrot.slane %v5889_v62, 4  ;;  %v6648_v34 = vsel %vm12164_vm8, %v6646_v4, %v6647_v16  ;;  %v6645_v61 = vsel %vm12164_vm8, %v10651_v8, %v6644_v44  ;;  %v15425_v58 = vrot.slane %v7405_v1, 5 }
 0x37b   : > { %16831 = vst [vmem:[#allocation35_spill] sm:$0xff] %v15416_v54  ;;  %v7411_v48 = vrot.slane %v7409_v18, 4  ;;  %v15428_v12 = vadd.f32 %v11200_v17, %v15283_v31  ;;  %v5885_v51 = vsel %vm12235_vm1, %v5880_v37, %v5884_v13  ;;  %v10667_v16 = vcombine.low %v6645_v61, %v6648_v34  ;;  %v16833_v37 = vld [vmem:[#allocation22_spill] sm:$0xff]  ;;  %v16838_v54 = vld [vmem:[#allocation16_spill] sm:$0xff] }
 0x37c   : > { %v5895_v62 = vsel %vm12235_vm1, %v5890_v3, %v5894_v32  ;;  %v8543_v42 = vshrl.u32 %v15413_v20, 16  ;;  %v8546_v49 = vshll.u32 %v15413_v20, 16  ;;  %v8552_v44 = vshll.u32 %v15421_v47, 16 }
 0x37d   : > { %16832 = vst [vmem:[#allocation12_spill] sm:$0xff] %v15428_v12  ;;  %v10619_v6 = vcombine.low %v5885_v51, %v5895_v62  ;;  %v8556_v1 = vshrl.u32 %v15421_v47, 16  ;;  %7155 = vmatmul.mubr.bf16.gmra.mrb[92].mxu0 %v10667_v16  ;;  %v10603_v31 = vcombine.low %v15349_v21, %v15374_v2  ;;  %v15440_v18 = vrot.slane %v7378_v26, 4  ;;  %v15455_v26 = vld [vmem:[#allocation4 + $0x70] sm:$0xf]  ;;  %v16836_v51 = vld [vmem:[#allocation20_spill] sm:$0xff] }
 0x37e   : > { %v15442_v13 = vrot.slane %v7388_v55, 4  ;;  %9135 = vmatprep.mubr.bf16.mxu0 %v16833_v37  ;;  %v16834_v4 = vshll.u32 %v15259_v36, 16  ;;  %v8525_v17 = vor.u32 %v15361_v22, %v15347_v59  ;;  %v8535_v21 = vor.u32 %v15408_v23, %v15370_v29  ;;  %v7244_v55 = vld [vmem:[#allocation4 + $0x50] sm:$0x1] }
 0x37f   : > { %6368 = vmatprep.mubr.bf16.mxu1 %v10619_v6  ;;  %v8538_v2 = vshll.u32 %v8387_v25, 16  ;;  %v7760_v3 = vrot.slane %v15372_v39, 5  ;;  %v7398_v32 = vrot.slane %v7396_v56, 4  ;;  %v7401_v34 = vrot.slane %v7399_v27, 5  ;;  %v16835_v36 = vld [vmem:[#allocation23_spill] sm:$0xff] }
 0x380   : > { %v15449_v8 = vrot.slane %v16834_v4, 5  ;;  %6369 = vmatmul.mubr.bf16.gmra.mrb[60].mxu1 %v10603_v31  ;;  %v7412_v61 = vor.u32 %v7411_v48, %v15425_v58  ;;  %v16837_v62 = vcombine.low %v16835_v36, %v16836_v51  ;;  %v8545_v16 = vrot.slane %v8543_v42, 4  ;;  %v15464_v25 = vld [vmem:[#allocation4 + $0x6c] sm:$0xf]  ;;  %v15474_v27 = vld [vmem:[#allocation4 + $0x58] sm:$0xf] }
 0x381   : > { %v8548_v59 = vrot.slane %v8546_v49, 5  ;;  %v15462_v22 = vrot.slane %v8552_v44, 5  ;;  %v8558_v23 = vrot.slane %v8556_v1, 4  ;;  %v7384_v6 = vsel %vm12235_vm1, %v15440_v18, %v15337_v30  ;;  %v7245_v42 = vld [vmem:[#allocation4 + $0x54] sm:$0xf]  ;;  %v11201_v44 = vpop.f32.mrb[56].mxu0 }
 0x382   : > { %8156 = vmatprep.mubr.bf16.mxu1 %v16837_v62  ;;  %v7394_v56 = vsel %vm12235_vm1, %v15442_v13, %v15449_v8  ;;  %v8526_v1 = vrot.slane %v8525_v17, 4  ;;  %v8536_v31 = vrot.slane %v8535_v21, 4  ;;  %v8540_v37 = vrot.slane %v8538_v2, 5  ;;  %v11202_v30 = vpop.f32.mrb[57].mxu0  ;;  %v11801_v18 = vld [vmem:[%s16604_s4 + $0x8] sm:$0xff]  }
 0x383   : > { %v7415_v4 = vshll.u32 %v7244_v55, 16  ;;  %v7664_v13 = vld [vmem:[#allocation4 + $0x48] sm:$0xe]  ;;  %v7762_v8 = vrot.slane %v7760_v3, 4  ;;  %v7402_v36 = vor.u32 %v7401_v34, %v7398_v32  ;;  %v7413_v51 = vrot.slane %v7412_v61, 4  ;;  %v11204_v48 = vpop.f32.mrb[58].mxu0 }
 0x384   : > { %v11203_v62 = vadd.f32 %v11202_v30, %v11201_v44  ;;  %v8549_v49 = vor.u32 %v8548_v59, %v8545_v16  ;;  %v8559_v17 = vor.u32 %v8558_v23, %v15462_v22  ;;  %v7420_v21 = vshrl.u32 %v7245_v42, 16  ;;  %v11205_v12 = vpop.f32.mrb[59].mxu0  ;;  %v16842_v61 = vld [vmem:[#allocation28_spill] sm:$0xff]  ;;  %v16845_v44 = vld [vmem:[#allocation26_spill] sm:$0xff] }
 0x385   : > { %v7423_v2 = vshll.u32 %v7245_v42, 16  ;;  %v16840_v38 = vcombine.low %v16838_v54, %v16839_v19  ;;  %v7429_v57 = vshll.u32 %v15474_v27, 16  ;;  %v7433_v45 = vshrl.u32 %v15474_v27, 16  ;;  %v16843_v19 = vld [vmem:[#allocation27_spill] sm:$0xff] }
 0x386   : > { %v15492_v32 = vadd.f32 %v11203_v62, %v15306_v10  ;;  %v11206_v34 = vadd.f32 %v11205_v12, %v11204_v48  ;;  %v8531_v16 = vsel %vm12235_vm1, %v8526_v1, %v15370_v29  ;;  %v10737_v59 = vrot.slane %v7664_v13, 9  ;;  %v15505_v10 = vld [vmem:[%s16604_s4 + $0x10] sm:$0xff]   ;;  %v16846_v1 = vld [vmem:[#allocation25_spill] sm:$0xff]  ;;  %v7665_v13 = vld [vmem:[#allocation4 + $0x54] sm:$0xe] }
 0x387   : > { %9136 = vmatmul.mubr.bf16.vlgmr.msra.gmra.mrb[96].mxu0 %v16840_v38  ;;  %v7763_v23 = vrot.slane %v7244_v55, 5  ;;  %v7417_v42 = vrot.slane %v7415_v4, 5  ;;  %v11951_v38 = vld [vmem:[%s16604_s4] sm:$0xff]   ;;  %v8541_v54 = vsel %vm12235_vm1, %v8536_v31, %v8540_v37  ;;  %v7403_v12 = vrot.slane %v7402_v36, 4  ;;  %v15509_v48 = vld [vmem:[#allocation4 + $0x7c] sm:$0xf] }
 0x388   : > { %16841 = vst [vmem:[#allocation14_spill] sm:$0xff] %v15492_v32  ;;  %9143 = vmatprep.mubr.bf16.mxu0 %v16842_v61  ;;  %11548 = vmatpush3.bf16.msra.mxu0 %v11951_v38  ;;  %v8562_v29 = vshll.u32 %v8388_v7, 16  ;;  %v15512_v55 = vadd.f32 %v11206_v34, %v15317_v15  ;;  %v16847_v4 = vcombine.low %v16845_v44, %v16846_v1  ;;  %v8550_v37 = vrot.slane %v8549_v49, 4  ;;  %v15525_v61 = vld [vmem:[#allocation4 + $0x78] sm:$0xf] }
 0x389   : > { %8157 = vmatmul.mubr.bf16.vlgmr.msra.gmra.mrb[64].mxu1 %v16843_v19  ;;  %11549 = vmatprep.subr.bf16.mxu0 %v11801_v18  ;;  %v15519_v30 = vsel %vm12164_vm8, %v7762_v8, %v7763_v23  ;;  %v7418_v31 = vsel %vm12235_vm1, %v7413_v51, %v7417_v42  ;;  %v8560_v7 = vrot.slane %v8559_v17, 4  ;;  %v7422_v36 = vrot.slane %v7420_v21, 4  ;;  %v15537_v49 = vld [vmem:[#allocation4 + $0x5c] sm:$0x1]  ;;  %v16848_v42 = vld [vmem:[#allocation18_spill] sm:$0xff] }
 0x38a   : > { %16844 = vst [vmem:[#allocation22_spill] sm:$0xff] %v15512_v55  ;;  %11603 = vmatpush3.bf16.msra.mxu1 %v11951_v38  ;;  %8164 = vmatprep.mubr.bf16.mxu1 %v16847_v4  ;;  %v7425_v62 = vrot.slane %v7423_v2, 5  ;;  %v15523_v15 = vrot.slane %v7429_v57, 5  ;;  %v7435_v34 = vrot.slane %v7433_v45, 4  ;;  %v15527_v38 = vcombine.low %v7384_v6, %v7394_v56  ;;  %v11207_v57 = vpop.f32.mrb[60].mxu0 }
 0x38b   : > { %11596 = vmatprep.subr.bf16.mxu1 %v11801_v18  ;;  %v15529_v19 = vcombine.low %v8531_v16, %v8541_v54  ;;  %v15535_v8 = vsel %vm12164_vm8, %v10737_v59, %v7760_v3  ;;  %v7408_v6 = vsel %vm12235_vm1, %v7403_v12, %v15425_v58  ;;  %v8564_v56 = vrot.slane %v8562_v29, 5  ;;  %v11807_v3 = vld [vmem:[%s16604_s4 + $0x18] sm:$0xff]   ;;  %v11208_v17 = vpop.f32.mrb[61].mxu0  ;;  %v11095_v59 = vpop.f32.mrb[28].mxu1 }
 0x38c   : > { %11550 = vmatpush3.bf16.msra.mxu0 %v11801_v18  ;;  %v7767_v39 = vrot.slane %v15474_v27, 5  ;;  %v15551_v21 = vcombine.low %v7408_v6, %v7418_v31  ;;  %v8555_v2 = vsel %vm12235_vm1, %v8550_v37, %v15462_v22  ;;  %v10738_v16 = vrot.slane %v7665_v13, 9  ;;  %v11210_v23 = vpop.f32.mrb[62].mxu0  ;;  %v16849_v27 = vld [vmem:[#allocation19_spill] sm:$0xff]  ;;  %v15564_v1 = vld [vmem:[#allocation4 + $0x64] sm:$0xf] }
 0x38d   : > { %11551 = vmatprep.subr.bf16.mxu0 %v15505_v10  ;;  %v11209_v58 = vadd.f32 %v11208_v17, %v11207_v57  ;;  %v16850_v54 = vcombine.low %v16848_v42, %v16849_v27  ;;  %v8565_v12 = vsel %vm12235_vm1, %v8560_v7, %v8564_v56  ;;  %v7436_v29 = vor.u32 %v7435_v34, %v15523_v15  ;;  %v11096_v22 = vpop.f32.mrb[29].mxu1  ;;  %v11211_v4 = vpop.f32.mrb[63].mxu0  ;;  %v16851_v7 = vld [vmem:[#allocation29_spill] sm:$0xff]  ;;  %v11810_v56 = vld [vmem:[%s16604_s4 + $0x20] sm:$0xff]  }
 0x38e   : > { %11604 = vmatpush3.bf16.msra.mxu1 %v11801_v18  ;;  %v7426_v18 = vor.u32 %v7425_v62, %v7422_v36  ;;  %v7439_v44 = vshll.u32 %v15537_v49, 16  ;;  %v8567_v31 = vshrl.u32 %v15464_v25, 16  ;;  %v8570_v37 = vshll.u32 %v15464_v25, 16  ;;  %v11098_v57 = vpop.f32.mrb[30].mxu1 }
 0x38f   : > { %9144 = vmatmul.mubr.bf16.gmra.mrb[100].mxu0 %v16850_v54  ;;  %11597 = vmatprep.subr.bf16.mxu1 %v15505_v10  ;;  %v11097_v13 = vadd.f32 %v11096_v22, %v11095_v59  ;;  %v11212_v6 = vadd.f32 %v11211_v4, %v11210_v23  ;;  %v15573_v36 = vsel %vm12164_vm8, %v10738_v16, %v7767_v39  ;;  %v7770_v62 = vrot.slane %v15537_v49, 5  ;;  %v11099_v17 = vpop.f32.mrb[31].mxu1  ;;  %v16852_v59 = vld [vmem:[#allocation30_spill] sm:$0xff]  ;;  %v16853_v23 = vld [vmem:[#allocation33_spill] sm:$0xff] }
 0x390   : > { %9151 = vmatprep.mubr.bf16.mxu0 %v15202_v24  ;;  %11552 = vmatpush3.bf16.msra.mxu0 %v15505_v10  ;;  %v8576_v34 = vshll.u32 %v15455_v26, 16  ;;  %v8580_v24 = vshrl.u32 %v15455_v26, 16  ;;  %v16854_v42 = vcombine.low %v16852_v59, %v16853_v23  ;;  %v7248_v16 = vld [vmem:[#allocation4 + $0x60] sm:$0xf]  ;;  %v7453_v27 = vshll.u32 %v15564_v1, 16 }
 0x391   : > { %8165 = vmatmul.mubr.bf16.gmra.mrb[68].mxu1 %v16851_v7  ;;  %11553 = vmatprep.subr.bf16.mxu0 %v11807_v3  ;;  %v7457_v49 = vshrl.u32 %v15564_v1, 16  ;;  %v15587_v54 = vadd.f32 %v11209_v58, %v11097_v13  ;;  %v11100_v22 = vadd.f32 %v11099_v17, %v11098_v57  ;;  %v15589_v4 = vcombine.low %v8555_v2, %v8565_v12  ;;  %v11813_v2 = vld [vmem:[%s16604_s4 + $0x28] sm:$0xff]  }
 0x392   : > { %8172 = vmatprep.mubr.bf16.mxu1 %v16854_v42  ;;  %11605 = vmatpush3.bf16.msra.mxu1 %v15505_v10  ;;  %v7769_v7 = vrot.slane %v7767_v39, 4  ;;  %v7427_v51 = vrot.slane %v7426_v18, 4  ;;  %v7437_v45 = vrot.slane %v7436_v29, 4  ;;  %v7441_v55 = vrot.slane %v7439_v44, 5  ;;  %v11101_v29 = vpop.f32.mrb[32].mxu1  ;;  %v16855_v44 = vld [vmem:[#allocation21_spill] sm:$0xff] }
 0x393   : > { %11598 = vmatprep.subr.bf16.mxu1 %v11807_v3  ;;  %v8569_v32 = vrot.slane %v8567_v31, 4  ;;  %v8572_v59 = vrot.slane %v8570_v37, 5  ;;  %v15591_v23 = vadd.f32 %v11212_v6, %v11100_v22  ;;  %v15593_v10 = vrot.slane %v8576_v34, 5  ;;  %v16856_v31 = vld [vmem:[#allocation24_spill] sm:$0xff]  ;;  %v8389_v6 = vld [vmem:[#allocation4 + $0x74] sm:$0x1] }
 0x394   : > { %11554 = vmatpush3.bf16.msra.mxu0 %v11807_v3  ;;  %v8582_v42 = vrot.slane %v8580_v24, 4  ;;  %v7444_v60 = vshrl.u32 %v7248_v16, 16  ;;  %v7447_v5 = vshll.u32 %v7248_v16, 16  ;;  %v15598_v39 = vrot.slane %v7453_v27, 5  ;;  %v15614_v34 = vld [vmem:[#allocation4 + $0x68] sm:$0x1] }
 0x395   : > { %11555 = vmatprep.subr.bf16.mxu0 %v11810_v56  ;;  %v7459_v58 = vrot.slane %v7457_v49, 4  ;;  %v8591_v12 = vshrl.u32 %v15525_v61, 16  ;;  %v8594_v18 = vshll.u32 %v15525_v61, 16  ;;  %v16857_v37 = vcombine.low %v16855_v44, %v16856_v31  ;;  %v11102_v24 = vpop.f32.mrb[33].mxu1  ;;  %v7251_v27 = vld [vmem:[#allocation4 + $0x6c] sm:$0xf] }
 0x396   : > { %11606 = vmatpush3.bf16.msra.mxu1 %v11807_v3  ;;  %v15607_v13 = vsel %vm12164_vm8, %v7769_v7, %v7770_v62  ;;  %v7432_v3 = vsel %vm12235_vm1, %v7427_v51, %v15523_v15  ;;  %v7442_v57 = vsel %vm12235_vm1, %v7437_v45, %v7441_v55  ;;  %v8573_v17 = vor.u32 %v8572_v59, %v8569_v32  ;;  %v11104_v22 = vpop.f32.mrb[34].mxu1  ;;  %v7666_v59 = vld [vmem:[#allocation4 + $0x60] sm:$0xe] }
 0x397   : > { %9152 = vmatmul.mubr.bf16.gmra.mrb[104].mxu0 %v16857_v37  ;;  %11599 = vmatprep.subr.bf16.mxu1 %v11810_v56  ;;  %v8600_v16 = vshll.u32 %v15509_v48, 16  ;;  %v8604_v62 = vshrl.u32 %v15509_v48, 16  ;;  %v15619_v49 = vadd.f32 %v11102_v24, %v11101_v29  ;;  %v8583_v55 = vor.u32 %v8582_v42, %v15593_v10  ;;  %v11105_v7 = vpop.f32.mrb[35].mxu1 }
 0x398   : > { %9159 = vmatprep.mubr.bf16.mxu0 %v15242_v50  ;;  %11556 = vmatpush3.bf16.msra.mxu0 %v11810_v56  ;;  %v7774_v15 = vrot.slane %v15564_v1, 5  ;;  %v7446_v51 = vrot.slane %v7444_v60, 4  ;;  %v7449_v45 = vrot.slane %v7447_v5, 5  ;;  %v11816_v50 = vld [vmem:[%s16604_s4 + $0x30] sm:$0xff]   ;;  %v16858_v32 = vcombine.low %v15233_v35, %v15211_v43  ;;  %v15640_v35 = vld [vmem:[#allocation4 + $0x70] sm:$0xf] }
 0x399   : > { %8173 = vmatmul.mubr.bf16.gmra.mrb[72].mxu1 %v15220_v14  ;;  %11557 = vmatprep.subr.bf16.mxu0 %v11813_v2  ;;  %v7460_v29 = vor.u32 %v7459_v58, %v15598_v39  ;;  %v8593_v14 = vrot.slane %v8591_v12, 4  ;;  %v8596_v44 = vrot.slane %v8594_v18, 5  ;;  %v15631_v42 = vadd.f32 %v11105_v7, %v11104_v22 }
 0x39a   : > { %8180 = vmatprep.mubr.bf16.mxu1 %v16858_v32  ;;  %11607 = vmatpush3.bf16.msra.mxu1 %v11810_v56  ;;  %v15635_v60 = vcombine.low %v7432_v3, %v7442_v57  ;;  %v8586_v1 = vshll.u32 %v8389_v6, 16  ;;  %v7463_v31 = vshll.u32 %v15614_v34, 16  ;;  %v15638_v37 = vrot.slane %v8600_v16, 5  ;;  %v11819_v3 = vld [vmem:[%s16604_s4 + $0x38] sm:$0xff]   ;;  %v16860_v32 = vld [vmem:[#allocation32_spill] sm:$0xff] }
 0x39b   : > { %11600 = vmatprep.subr.bf16.mxu1 %v11813_v2  ;;  %v8606_v43 = vrot.slane %v8604_v62, 4  ;;  %v7468_v58 = vshrl.u32 %v7251_v27, 16  ;;  %v7471_v12 = vshll.u32 %v7251_v27, 16  ;;  %v8574_v56 = vrot.slane %v8573_v17, 4  ;;  %v16859_v62 = vld [vmem:[#allocation31_spill] sm:$0xff] }
 0x39c   : > { %11558 = vmatpush3.bf16.msra.mxu0 %v11813_v2  ;;  %v10739_v18 = vrot.slane %v7666_v59, 9  ;;  %v7776_v24 = vrot.slane %v7774_v15, 4  ;;  %v7450_v22 = vor.u32 %v7449_v45, %v7446_v51  ;;  %v8584_v57 = vrot.slane %v8583_v55, 4  ;;  %v8390_v59 = vld [vmem:[#allocation4 + $0x80] sm:$0x1] }
 0x39d   : > { %11559 = vmatprep.subr.bf16.mxu0 %v11816_v50  ;;  %v7777_v6 = vrot.slane %v15614_v34, 5  ;;  %v7461_v16 = vrot.slane %v7460_v29, 4  ;;  %v8597_v7 = vor.u32 %v8596_v44, %v8593_v14  ;;  %v16861_v5 = vcombine.low %v16859_v62, %v16860_v32  ;;  %v15654_v14 = vld [vmem:[#allocation4 + $0x88] sm:$0xf] }
 0x39e   : > { %11608 = vmatpush3.bf16.msra.mxu1 %v11813_v2  ;;  %v8588_v27 = vrot.slane %v8586_v1, 5  ;;  %v7465_v17 = vrot.slane %v7463_v31, 5  ;;  %v7781_v51 = vrot.slane %v15640_v35, 5  ;;  %v7477_v45 = vshll.u32 %v15640_v35, 16  ;;  %v15668_v31 = vld [vmem:[#allocation4 + $0x84] sm:$0xf] }
 0x39f   : > { %9160 = vmatmul.mubr.bf16.gmra.mrb[108].mxu0 %v16861_v5  ;;  %11601 = vmatprep.subr.bf16.mxu1 %v11816_v50  ;;  %v8607_v55 = vor.u32 %v8606_v43, %v15638_v37  ;;  %v7470_v34 = vrot.slane %v7468_v58, 4  ;;  %v7473_v29 = vrot.slane %v7471_v12, 5  ;;  %v7481_v2 = vshrl.u32 %v15640_v35, 16  ;;  %v15677_v12 = vld [vmem:[#allocation4 + $0x74] sm:$0x1] }
 0x3a0   : > { %9167 = vmatprep.mubr.bf16.mxu0 %v15388_v0  ;;  %11560 = vmatpush3.bf16.msra.mxu0 %v11816_v50  ;;  %v8579_v44 = vsel %vm12235_vm1, %v8574_v56, %v15593_v10  ;;  %v15662_v5 = vsel %vm12164_vm8, %v10739_v18, %v7774_v15  ;;  %v15666_v0 = vsel %vm12164_vm8, %v7776_v24, %v7777_v6  ;;  %v7451_v1 = vrot.slane %v7450_v22, 4  ;;  %v7667_v22 = vld [vmem:[#allocation4 + $0x6c] sm:$0xe]  ;;  %v614_v35 = vld [vmem:[#allocation4 + $0xd4] sm:$0x1] }
 0x3a1   : > { %8181 = vmatmul.mubr.bf16.gmra.mrb[76].mxu1 %v15386_v33  ;;  %11561 = vmatprep.subr.bf16.mxu0 %v11819_v3  ;;  %v16862_v43 = vcombine.low %v15396_v52, %v15359_v41  ;;  %v8589_v33 = vsel %vm12235_vm1, %v8584_v57, %v8588_v27  ;;  %v7466_v10 = vsel %vm12235_vm1, %v7461_v16, %v7465_v17  ;;  %v8598_v15 = vrot.slane %v8597_v7, 4 }
 0x3a2   : > { %v8610_v58 = vshll.u32 %v8390_v59, 16  ;;  %11609 = vmatpush3.bf16.msra.mxu1 %v11816_v50  ;;  %v7783_v56 = vrot.slane %v7781_v51, 4  ;;  %v15681_v18 = vrot.slane %v7477_v45, 5  ;;  %v8624_v24 = vshll.u32 %v15654_v14, 16 }
 0x3a3   : > { %8188 = vmatprep.mubr.bf16.mxu1 %v16862_v43  ;;  %v8628_v41 = vshrl.u32 %v15654_v14, 16  ;;  %11602 = vmatprep.subr.bf16.mxu1 %v11819_v3  ;;  %v8608_v52 = vrot.slane %v8607_v55, 4  ;;  %v7474_v57 = vor.u32 %v7473_v29, %v7470_v34  ;;  %v7483_v6 = vrot.slane %v7481_v2, 4  ;;  %v15700_v55 = vld [vmem:[#allocation4 + $0x7c] sm:$0xf] }
 0x3a4   : > { %v8615_v16 = vshrl.u32 %v15668_v31, 16  ;;  %11562 = vmatpush3.bf16.msra.mxu0 %v11819_v3  ;;  %v10771_v50 = vcombine.low %v15662_v5, %v15666_v0  ;;  %v7456_v7 = vsel %vm12235_vm1, %v7451_v1, %v15598_v39  ;;  %v7784_v62 = vrot.slane %v15677_v12, 5  ;;  %v7254_v34 = vld [vmem:[#allocation4 + $0x78] sm:$0xf] }
 0x3a5   : > { %v8618_v32 = vshll.u32 %v15668_v31, 16  ;;  %v15693_v27 = vcombine.low %v8579_v44, %v8589_v33  ;;  %v15695_v17 = vcombine.low %v7456_v7, %v7466_v10  ;;  %v8603_v59 = vsel %vm12235_vm1, %v8598_v15, %v15638_v37 }
 0x3a6   : > { %v8612_v45 = vrot.slane %v8610_v58, 5  ;;  %11610 = vmatpush3.bf16.msra.mxu1 %v11819_v3  ;;  %v16863_v39 = vcombine.low %v15076_v46, %v15070_v28  ;;  %v10740_v29 = vrot.slane %v7667_v22, 9  ;;  %v15707_v2 = vsel %vm12164_vm8, %v7783_v56, %v7784_v62  ;;  %v15717_v28 = vld [vmem:[#allocation4 + $0x94] sm:$0xf]  ;;  %v8391_v46 = vld [vmem:[#allocation4 + $0x8c] sm:$0x1] }
 0x3a7   : > { %v15709_v44 = vrot.slane %v8624_v24, 5  ;;  %v8630_v1 = vrot.slane %v8628_v41, 4  ;;  %v15714_v43 = vrot.slane %v7474_v57, 4  ;;  %v7484_v3 = vor.u32 %v7483_v6, %v15681_v18  ;;  %v15734_v22 = vld [vmem:[#allocation4 + $0x90] sm:$0xf] }
 0x3a8   : > { %9168 = vmatmul.mubr.bf16.gmra.mrb[112].mxu0 %v16863_v39  ;;  %v8613_v37 = vsel %vm12235_vm1, %v8608_v52, %v8612_v45  ;;  %v8617_v33 = vrot.slane %v8615_v16, 4  ;;  %v8620_v10 = vrot.slane %v8618_v32, 5  ;;  %v7788_v15 = vrot.slane %v15700_v55, 5  ;;  %v7256_v62 = vld [vmem:[#allocation4 + $0x80] sm:$0x1] }
 0x3a9   : > { %9175 = vmatprep.mubr.bf16.mxu0 %v15529_v19  ;;  %8189 = vmatmul.mubr.bf16.gmra.mrb[80].mxu1 %v15527_v38  ;;  %v7492_v58 = vshrl.u32 %v7254_v34, 16  ;;  %v7495_v56 = vshll.u32 %v7254_v34, 16  ;;  %v16864_v19 = vcombine.low %v15535_v8, %v15519_v30  ;;  %v15728_v24 = vsel %vm12164_vm8, %v10740_v29, %v7781_v51  ;;  %v7668_v32 = vld [vmem:[#allocation4 + $0x78] sm:$0xe]  ;;  %v559_v29 = vld [vmem:[#allocation4 + $0xcc] sm:$0x1] }
 0x3aa   : > { %v10837_v41 = vcombine.low %v15668_v31, %v15654_v14  ;;  %v7501_v38 = vshll.u32 %v15700_v55, 16  ;;  %v7505_v52 = vshrl.u32 %v15700_v55, 16  ;;  %v10772_v57 = vcombine.low %v15728_v24, %v15707_v2 }
 0x3ab   : > { %8196 = vmatprep.mubr.bf16.mxu1 %v16864_v19  ;;  %v7487_v30 = vshll.u32 %v15677_v12, 16  ;;  %v8631_v8 = vor.u32 %v8630_v1, %v15709_v44  ;;  %v15742_v51 = vcombine.low %v8603_v59, %v8613_v37  ;;  %v7480_v6 = vsel %vm12235_vm1, %v15714_v43, %v15681_v18 }
 0x3ac   : > { %v7485_v16 = vrot.slane %v7484_v3, 4  ;;  %v8634_v7 = vshll.u32 %v8391_v46, 16  ;;  %v8621_v45 = vor.u32 %v8620_v10, %v8617_v33  ;;  %v7790_v12 = vrot.slane %v7788_v15, 4 }
 0x3ad   : > { %v7494_v34 = vrot.slane %v7492_v58, 4  ;;  %v7497_v39 = vrot.slane %v7495_v56, 5  ;;  %v15750_v1 = vrot.slane %v7501_v38, 5  ;;  %v7507_v59 = vrot.slane %v7505_v52, 4 }
 0x3ae   : > { %v8639_v37 = vshrl.u32 %v15734_v22, 16  ;;  %v8642_v19 = vshll.u32 %v15734_v22, 16  ;;  %v16865_v18 = vcombine.low %v15295_v53, %v15304_v40  ;;  %v7489_v43 = vrot.slane %v7487_v30, 5  ;;  %v15765_v30 = vld [vmem:[#allocation4 + $0x88] sm:$0xf] }
 0x3af   : > { %v8632_v3 = vrot.slane %v8631_v8, 4  ;;  %v8648_v33 = vshll.u32 %v15717_v28, 16  ;;  %v8652_v46 = vshrl.u32 %v15717_v28, 16  ;;  %v8636_v10 = vrot.slane %v8634_v7, 5  ;;  %v7257_v8 = vld [vmem:[#allocation4 + $0x84] sm:$0xf] }
 0x3b0   : > { %9176 = vmatmul.mubr.bf16.gmra.mrb[116].mxu0 %v16865_v18  ;;  %v10741_v58 = vrot.slane %v7668_v32, 9  ;;  %v7791_v56 = vrot.slane %v7256_v62, 5  ;;  %v560_v38 = vsel %vm13974_vm10, 0, %v559_v29  ;;  %v7490_v53 = vsel %vm12235_vm1, %v7485_v16, %v7489_v43 }
 0x3b1   : > { %9183 = vmatprep.mubr.bf16.mxu0 %v15589_v4  ;;  %8197 = vmatmul.mubr.bf16.gmra.mrb[84].mxu1 %v15551_v21  ;;  %v8622_v40 = vrot.slane %v8621_v45, 4  ;;  %v7498_v52 = vor.u32 %v7497_v39, %v7494_v34  ;;  %561 = vst [vmem:[#allocation4 + $0xcc] sm:$0x1] %v560_v38  ;;  %v615_v4 = vsel %vm13966_vm6, 0, %v614_v35  ;;  %v16867_v7 = vcombine.low %v15573_v36, %v15607_v13  ;;  %v7669_v38 = vld [vmem:[#allocation4 + $0x84] sm:$0xe] }
 0x3b2   : > { %v15774_v63 = vsel %vm12164_vm8, %v7790_v12, %v7791_v56  ;;  %v7508_v21 = vor.u32 %v7507_v59, %v15750_v1  ;;  %v8641_v16 = vrot.slane %v8639_v37, 4  ;;  %v8644_v32 = vrot.slane %v8642_v19, 5  ;;  %616 = vst [vmem:[#allocation4 + $0xd4] sm:$0x1] %v615_v4  ;;  %v8392_v19 = vld [vmem:[#allocation4 + $0x98] sm:$0x1] }
 0x3b3   : > { %8204 = vmatprep.mubr.bf16.mxu1 %v16867_v7  ;;  %v8637_v45 = vsel %vm12235_vm1, %v8632_v3, %v8636_v10  ;;  %v7511_v34 = vshll.u32 %v7256_v62, 16  ;;  %v15779_v39 = vrot.slane %v8648_v33, 5  ;;  %v8654_v35 = vrot.slane %v8652_v46, 4  ;;  %v11213_v3 = vpop.f32.mrb[64].mxu0  ;;  %v7259_v56 = vld [vmem:[#allocation4 + $0x8c] sm:$0x1] }
 0x3b4   : > { %v7516_v29 = vshrl.u32 %v7257_v8, 16  ;;  %v7519_v43 = vshll.u32 %v7257_v8, 16  ;;  %v7525_v36 = vshll.u32 %v15765_v30, 16  ;;  %v7529_v13 = vshrl.u32 %v15765_v30, 16 }
 0x3b5   : > { %v15783_v12 = vcombine.low %v7480_v6, %v7490_v53  ;;  %v8627_v59 = vsel %vm12235_vm1, %v8622_v40, %v15709_v44  ;;  %v15792_v62 = vsel %vm12164_vm8, %v10741_v58, %v7788_v15  ;;  %v7499_v37 = vrot.slane %v7498_v52, 4  ;;  %v11214_v53 = vpop.f32.mrb[65].mxu0  ;;  %v15803_v40 = vld [vmem:[#allocation4 + $0xa0] sm:$0xf] }
 0x3b6   : > { %v15794_v33 = vcombine.low %v8627_v59, %v8637_v45  ;;  %v10773_v46 = vcombine.low %v15792_v62, %v15774_v63  ;;  %v7509_v6 = vrot.slane %v7508_v21, 4  ;;  %v8645_v10 = vor.u32 %v8644_v32, %v8641_v16  ;;  %v11216_v8 = vpop.f32.mrb[66].mxu0  ;;  %v15832_v59 = vld [vmem:[#allocation4 + $0xa8] sm:$0xf] }
 0x3b7   : > { %v16868_v55 = vcombine.low %v15413_v20, %v15421_v47  ;;  %v7513_v44 = vrot.slane %v7511_v34, 5  ;;  %v8655_v15 = vor.u32 %v8654_v35, %v15779_v39  ;;  %v7795_v58 = vrot.slane %v15765_v30, 5  ;;  %v11217_v16 = vpop.f32.mrb[67].mxu0  ;;  %v15812_v30 = vld [vmem:[#allocation4 + $0x9c] sm:$0xf] }
 0x3b8   : > { %v11215_v52 = vadd.f32 %v11214_v53, %v11213_v3  ;;  %v7518_v18 = vrot.slane %v7516_v29, 4  ;;  %v7521_v4 = vrot.slane %v7519_v43, 5  ;;  %v15806_v7 = vrot.slane %v7525_v36, 5  ;;  %v15824_v36 = vld [vmem:[#allocation4 + $0xac] sm:$0xf] }
 0x3b9   : > { %9184 = vmatmul.mubr.bf16.gmra.mrb[120].mxu0 %v16868_v55  ;;  %v7531_v21 = vrot.slane %v7529_v13, 4  ;;  %8205 = vmatmul.mubr.bf16.gmra.mrb[88].mxu1 %v15635_v60  ;;  %v7504_v20 = vsel %vm12235_vm1, %v7499_v37, %v15750_v1  ;;  %v8658_v47 = vshll.u32 %v8392_v19, 16  ;;  %v11218_v45 = vadd.f32 %v11217_v16, %v11216_v8  ;;  %v15845_v55 = vld [vmem:[#allocation4 + $0x94] sm:$0xf] }
 0x3ba   : > { %9191 = vmatprep.mubr.bf16.mxu0 %v15693_v27  ;;  %v15815_v32 = vadd.f32 %v11215_v52, %v15619_v49  ;;  %8212 = vmatprep.mubr.bf16.mxu1 %v10771_v50  ;;  %v7514_v27 = vsel %vm12235_vm1, %v7509_v6, %v7513_v44  ;;  %v8646_v34 = vrot.slane %v8645_v10, 4  ;;  %v10742_v60 = vrot.slane %v7669_v38, 9  ;;  %v11219_v10 = vpop.f32.mrb[68].mxu0 }
 0x3bb   : > { %v10839_v35 = vcombine.low %v15812_v30, %v15803_v40  ;;  %v8656_v1 = vrot.slane %v8655_v15, 4  ;;  %v7797_v29 = vrot.slane %v7795_v58, 4  ;;  %v7535_v43 = vshll.u32 %v7259_v56, 16  ;;  %v11220_v44 = vpop.f32.mrb[69].mxu0 }
 0x3bc   : > { %v15827_v49 = vadd.f32 %v11218_v45, %v15631_v42  ;;  %v7522_v13 = vor.u32 %v7521_v4, %v7518_v18  ;;  %v7532_v5 = vor.u32 %v7531_v21, %v15806_v7  ;;  %v8663_v0 = vshrl.u32 %v15812_v30, 16  ;;  %v11107_v18 = vpop.f32.mrb[36].mxu1  ;;  %v11222_v21 = vpop.f32.mrb[70].mxu0 }
 0x3bd   : > { %v8666_v50 = vshll.u32 %v15812_v30, 16  ;;  %v8660_v37 = vrot.slane %v8658_v47, 5  ;;  %v7798_v19 = vrot.slane %v7259_v56, 5  ;;  %v8672_v3 = vshll.u32 %v15803_v40, 16 }
 0x3be   : > { %v8676_v6 = vshrl.u32 %v15803_v40, 16  ;;  %v15836_v38 = vcombine.low %v7504_v20, %v7514_v27  ;;  %v8651_v42 = vsel %vm12235_vm1, %v8646_v34, %v15779_v39  ;;  %v15843_v53 = vsel %vm12164_vm8, %v10742_v60, %v7795_v58  ;;  %v7260_v58 = vld [vmem:[#allocation4 + $0x90] sm:$0xf]  ;;  %v8393_v27 = vld [vmem:[#allocation4 + $0xa4] sm:$0x1] }
 0x3bf   : > { %v10840_v56 = vcombine.low %v15832_v59, %v15824_v36  ;;  %v16869_v15 = vcombine.low %v15464_v25, %v15455_v26  ;;  %v8661_v52 = vsel %vm12235_vm1, %v8656_v1, %v8660_v37  ;;  %v15856_v39 = vsel %vm12164_vm8, %v7797_v29, %v7798_v19  ;;  %v11108_v26 = vpop.f32.mrb[37].mxu1  ;;  %v11223_v25 = vpop.f32.mrb[71].mxu0  ;;  %v8396_v40 = vld [vmem:[#allocation4 + $0xc8] sm:$0x1] }
 0x3c0   : > { %v7537_v8 = vrot.slane %v7535_v43, 5  ;;  %v11221_v4 = vadd.f32 %v11220_v44, %v11219_v10  ;;  %v7523_v16 = vrot.slane %v7522_v13, 4  ;;  %v7533_v20 = vrot.slane %v7532_v5, 4  ;;  %v11110_v29 = vpop.f32.mrb[38].mxu1 }
 0x3c1   : > { %9192 = vmatmul.mubr.bf16.gmra.mrb[124].mxu0 %v16869_v15  ;;  %v8665_v47 = vrot.slane %v8663_v0, 4  ;;  %v8668_v45 = vrot.slane %v8666_v50, 5  ;;  %8213 = vmatmul.mubr.bf16.gmra.mrb[92].mxu1 %v15695_v17  ;;  %v15860_v34 = vrot.slane %v8672_v3, 5  ;;  %v8678_v60 = vrot.slane %v8676_v6, 4  ;;  %v11111_v50 = vpop.f32.mrb[39].mxu1 }
 0x3c2   : > { %9199 = vmatprep.mubr.bf16.mxu0 %v15742_v51  ;;  %v11109_v1 = vadd.f32 %v11108_v26, %v11107_v18  ;;  %v11224_v43 = vadd.f32 %v11223_v25, %v11222_v21  ;;  %8220 = vmatprep.mubr.bf16.mxu1 %v10772_v57  ;;  %v7540_v51 = vshrl.u32 %v7260_v58, 16  ;;  %v7543_v13 = vshll.u32 %v7260_v58, 16  ;;  %v7670_v58 = vld [vmem:[#allocation4 + $0x90] sm:$0xe] }
 0x3c3   : > { %v7549_v5 = vshll.u32 %v15845_v55, 16  ;;  %v7553_v0 = vshrl.u32 %v15845_v55, 16  ;;  %v8696_v17 = vshll.u32 %v15824_v36, 16  ;;  %v8700_v37 = vshrl.u32 %v15824_v36, 16 }
 0x3c4   : > { %v15869_v19 = vadd.f32 %v11221_v4, %v11109_v1  ;;  %v11112_v3 = vadd.f32 %v11111_v50, %v11110_v29  ;;  %v15871_v6 = vcombine.low %v8651_v42, %v8661_v52  ;;  %v10774_v2 = vcombine.low %v15843_v53, %v15856_v39  ;;  %v15883_v4 = vld [vmem:[#allocation4 + $0x98] sm:$0x1]  ;;  %v7263_v29 = vld [vmem:[#allocation4 + $0x9c] sm:$0xf] }
 0x3c5   : > { %v7528_v24 = vsel %vm12235_vm1, %v7523_v16, %v15806_v7  ;;  %v8682_v57 = vshll.u32 %v8393_v27, 16  ;;  %v7538_v10 = vsel %vm12235_vm1, %v7533_v20, %v7537_v8  ;;  %v8669_v44 = vor.u32 %v8668_v45, %v8665_v47  ;;  %v15894_v45 = vld [vmem:[#allocation4 + $0xa0] sm:$0xf]  ;;  %v8395_v39 = vld [vmem:[#allocation4 + $0xbc] sm:$0x1] }
 0x3c6   : > { %v8679_v15 = vor.u32 %v8678_v60, %v15860_v34  ;;  %v15881_v18 = vadd.f32 %v11224_v43, %v11112_v3  ;;  %v15885_v42 = vrot.slane %v7549_v5, 5  ;;  %v7555_v52 = vrot.slane %v7553_v0, 4  ;;  %v11113_v43 = vpop.f32.mrb[40].mxu1  ;;  %v8394_v0 = vld [vmem:[#allocation4 + $0xb0] sm:$0x1] }
 0x3c7   : > { %v8687_v21 = vshrl.u32 %v15832_v59, 16  ;;  %v8690_v26 = vshll.u32 %v15832_v59, 16  ;;  %v16870_v7 = vcombine.low %v15525_v61, %v15509_v48  ;;  %v7542_v8 = vrot.slane %v7540_v51, 4  ;;  %v11114_v5 = vpop.f32.mrb[41].mxu1 }
 0x3c8   : > { %v7545_v16 = vrot.slane %v7543_v13, 5  ;;  %v15892_v20 = vrot.slane %v8696_v17, 5  ;;  %v8702_v47 = vrot.slane %v8700_v37, 4  ;;  %v15897_v25 = vcombine.low %v7528_v24, %v7538_v10  ;;  %v11116_v37 = vpop.f32.mrb[42].mxu1 }
 0x3c9   : > { %9200 = vmatmul.mubr.bf16.gmra.mrb[128].mxu0 %v16870_v7  ;;  %v8684_v27 = vrot.slane %v8682_v57, 5  ;;  %v10743_v60 = vrot.slane %v7670_v58, 9  ;;  %v7802_v1 = vrot.slane %v15845_v55, 5  ;;  %8221 = vmatmul.mubr.bf16.gmra.mrb[96].mxu1 %v15783_v12  ;;  %v8670_v48 = vrot.slane %v8669_v44, 4  ;;  %v11117_v10 = vpop.f32.mrb[43].mxu1 }
 0x3ca   : > { %9207 = vmatprep.mubr.bf16.mxu0 %v15794_v33  ;;  %v8680_v61 = vrot.slane %v8679_v15, 4  ;;  %v7805_v51 = vrot.slane %v15883_v4, 5  ;;  %v7559_v13 = vshll.u32 %v15883_v4, 16  ;;  %8228 = vmatprep.mubr.bf16.mxu1 %v10773_v46  ;;  %v7556_v33 = vor.u32 %v7555_v52, %v15885_v42 }
 0x3cb   : > { %v8689_v50 = vrot.slane %v8687_v21, 4  ;;  %v8692_v55 = vrot.slane %v8690_v26, 5  ;;  %v15907_v17 = vadd.f32 %v11114_v5, %v11113_v43  ;;  %v7546_v12 = vor.u32 %v7545_v16, %v7542_v8  ;;  %v15922_v21 = vld [vmem:[#allocation4 + $0xb8] sm:$0xf] }
 0x3cc   : > { %v8703_v3 = vor.u32 %v8702_v47, %v15892_v20  ;;  %v7573_v24 = vshll.u32 %v15894_v45, 16  ;;  %v7577_v57 = vshrl.u32 %v15894_v45, 16  ;;  %v15914_v63 = vsel %vm12164_vm8, %v10743_v60, %v7802_v1 }
 0x3cd   : > { %v7564_v62 = vshrl.u32 %v7263_v29, 16  ;;  %v7567_v46 = vshll.u32 %v7263_v29, 16  ;;  %v15916_v44 = vadd.f32 %v11117_v10, %v11116_v37  ;;  %v8675_v15 = vsel %vm12235_vm1, %v8670_v48, %v15860_v34 }
 0x3ce   : > { %v7804_v58 = vrot.slane %v7802_v1, 4  ;;  %v8706_v4 = vshll.u32 %v8394_v0, 16  ;;  %v7809_v52 = vrot.slane %v15894_v45, 5  ;;  %v8685_v26 = vsel %vm12235_vm1, %v8680_v61, %v8684_v27  ;;  %v15931_v1 = vld [vmem:[#allocation4 + $0xb4] sm:$0xf] }
 0x3cf   : > { %v7557_v7 = vrot.slane %v7556_v33, 4  ;;  %v7561_v8 = vrot.slane %v7559_v13, 5  ;;  %v8693_v16 = vor.u32 %v8692_v55, %v8689_v50  ;;  %v7547_v47 = vrot.slane %v7546_v12, 4  ;;  %v7265_v45 = vld [vmem:[#allocation4 + $0xa4] sm:$0x1] }
 0x3d0   : > { %v8704_v60 = vrot.slane %v8703_v3, 4  ;;  %v15929_v29 = vrot.slane %v7573_v24, 5  ;;  %v7579_v34 = vrot.slane %v7577_v57, 4  ;;  %v7566_v43 = vrot.slane %v7564_v62, 4  ;;  %v7671_v33 = vld [vmem:[#allocation4 + $0x9c] sm:$0xe] }
 0x3d1   : > { %9208 = vmatmul.mubr.bf16.gmra.mrb[132].mxu0 %v10837_v41  ;;  %v7569_v48 = vrot.slane %v7567_v46, 5  ;;  %v8720_v27 = vshll.u32 %v15922_v21, 16  ;;  %v8724_v61 = vshrl.u32 %v15922_v21, 16  ;;  %8229 = vmatmul.mubr.bf16.gmra.mrb[100].mxu1 %v15836_v38  ;;  %v10855_v14 = vcombine.low %v8675_v15, %v8685_v26  ;;  %v7267_v24 = vld [vmem:[#allocation4 + $0xac] sm:$0xf] }
 0x3d2   : > { %9215 = vmatprep.mubr.bf16.mxu0 %v15871_v6  ;;  %v7806_v31 = vsel %vm12164_vm8, %v7804_v58, %v7805_v51  ;;  %v8708_v41 = vrot.slane %v8706_v4, 5  ;;  %v7811_v13 = vrot.slane %v7809_v52, 4  ;;  %8236 = vmatprep.mubr.bf16.mxu1 %v10774_v2  ;;  %v7562_v6 = vsel %vm12235_vm1, %v7557_v7, %v7561_v8  ;;  %v7266_v26 = vld [vmem:[#allocation4 + $0xa8] sm:$0xf] }
 0x3d3   : > { %v8694_v5 = vrot.slane %v8693_v16, 4  ;;  %v8711_v0 = vshrl.u32 %v15931_v1, 16  ;;  %v8714_v50 = vshll.u32 %v15931_v1, 16  ;;  %v7552_v38 = vsel %vm12235_vm1, %v7547_v47, %v15885_v42 }
 0x3d4   : > { %v8709_v51 = vsel %vm12235_vm1, %v8704_v60, %v8708_v41  ;;  %v7812_v55 = vrot.slane %v7265_v45, 5  ;;  %v7580_v53 = vor.u32 %v7579_v34, %v15929_v29  ;;  %v7570_v2 = vor.u32 %v7569_v48, %v7566_v43  ;;  %v15967_v60 = vld [vmem:[#allocation4 + $0xc0] sm:$0xf]  ;;  %v15971_v48 = vld [vmem:[#allocation4 + $0xb0] sm:$0x1] }
 0x3d5   : > { %v7583_v37 = vshll.u32 %v7265_v45, 16  ;;  %v15952_v12 = vrot.slane %v8720_v27, 5  ;;  %v8726_v3 = vrot.slane %v8724_v61, 4  ;;  %v10775_v57 = vcombine.low %v15914_v63, %v7806_v31  ;;  %v15973_v27 = vld [vmem:[#allocation4 + $0xc4] sm:$0xf] }
 0x3d6   : > { %v10759_v10 = vcombine.low %v7552_v38, %v7562_v6  ;;  %v10744_v62 = vrot.slane %v7671_v33, 9  ;;  %v15957_v42 = vsel %vm12164_vm8, %v7811_v13, %v7812_v55  ;;  %v8699_v46 = vsel %vm12235_vm1, %v8694_v5, %v15892_v20 }
 0x3d7   : > { %v8713_v15 = vrot.slane %v8711_v0, 4  ;;  %v8716_v58 = vrot.slane %v8714_v50, 5  ;;  %v8730_v4 = vshll.u32 %v8395_v39, 16  ;;  %v16871_v7 = vcombine.low %v15734_v22, %v15717_v28  ;;  %v7672_v28 = vld [vmem:[#allocation4 + $0xa8] sm:$0xe] }
 0x3d8   : > { %v10856_v8 = vcombine.low %v8699_v46, %v8709_v51  ;;  %v7810_v63 = vsel %vm12164_vm8, %v10744_v62, %v7809_v52  ;;  %v7581_v16 = vrot.slane %v7580_v53, 4  ;;  %v7816_v47 = vrot.slane %v7267_v24, 5  ;;  %v15990_v46 = vld [vmem:[#allocation4 + $0xcc] sm:$0xf] }
 0x3d9   : > { %9216 = vmatmul.mubr.bf16.gmra.mrb[136].mxu0 %v16871_v7  ;;  %v10776_v34 = vcombine.low %v7810_v63, %v15957_v42  ;;  %v7571_v20 = vrot.slane %v7570_v2, 4  ;;  %v7585_v45 = vrot.slane %v7583_v37, 5  ;;  %v8727_v43 = vor.u32 %v8726_v3, %v15952_v12  ;;  %8237 = vmatmul.mubr.bf16.gmra.mrb[104].mxu1 %v15897_v25  ;;  %v15988_v3 = vld [vmem:[#allocation4 + $0xd0] sm:$0xf] }
 0x3da   : > { %9223 = vmatprep.mubr.bf16.mxu0 %v10855_v14  ;;  %v7588_v22 = vshrl.u32 %v7266_v26, 16  ;;  %v7591_v52 = vshll.u32 %v7266_v26, 16  ;;  %v7597_v61 = vshll.u32 %v7267_v24, 16  ;;  %v7601_v31 = vshrl.u32 %v7267_v24, 16  ;;  %8244 = vmatprep.mubr.bf16.mxu1 %v10775_v57  ;;  %v16001_v26 = vld [vmem:[#allocation4 + $0xb8] sm:$0xf] }
 0x3db   : > { %v8717_v41 = vor.u32 %v8716_v58, %v8713_v15  ;;  %v8732_v14 = vrot.slane %v8730_v4, 5  ;;  %v8735_v13 = vshrl.u32 %v15967_v60, 16  ;;  %v8738_v6 = vshll.u32 %v15967_v60, 16 }
 0x3dc   : > { %v7586_v5 = vsel %vm12235_vm1, %v7581_v16, %v7585_v45  ;;  %v7818_v33 = vrot.slane %v7816_v47, 4  ;;  %v8744_v0 = vshll.u32 %v15973_v27, 16  ;;  %v8748_v25 = vshrl.u32 %v15973_v27, 16 }
 0x3dd   : > { %v7576_v50 = vsel %vm12235_vm1, %v7571_v20, %v15929_v29  ;;  %v8728_v38 = vrot.slane %v8727_v43, 4  ;;  %v10745_v51 = vrot.slane %v7672_v28, 9  ;;  %v7819_v55 = vrot.slane %v15971_v48, 5 }
 0x3de   : > { %v7590_v53 = vrot.slane %v7588_v22, 4  ;;  %v7593_v39 = vrot.slane %v7591_v52, 5  ;;  %v15986_v2 = vrot.slane %v7597_v61, 5  ;;  %v7603_v37 = vrot.slane %v7601_v31, 4 }
 0x3df   : > { %v10760_v24 = vcombine.low %v7576_v50, %v7586_v5  ;;  %v8718_v57 = vrot.slane %v8717_v41, 4  ;;  %v8737_v62 = vrot.slane %v8735_v13, 4  ;;  %v8740_v42 = vrot.slane %v8738_v6, 5  ;;  %v7269_v41 = vld [vmem:[#allocation4 + $0xb4] sm:$0xf] }
 0x3e0   : > { %v7817_v29 = vsel %vm12164_vm8, %v10745_v51, %v7816_v47  ;;  %v7820_v15 = vsel %vm12164_vm8, %v7818_v33, %v7819_v55  ;;  %v15999_v58 = vrot.slane %v8744_v0, 5  ;;  %v8750_v4 = vrot.slane %v8748_v25, 4  ;;  %v16022_v0 = vld [vmem:[#allocation4 + $0xbc] sm:$0x1] }
 0x3e1   : > { %9224 = vmatmul.mubr.bf16.gmra.mrb[140].mxu0 %v10839_v35  ;;  %v8733_v7 = vsel %vm12235_vm1, %v8728_v38, %v8732_v14  ;;  %v10841_v63 = vcombine.low %v15931_v1, %v15922_v21  ;;  %v8768_v30 = vshll.u32 %v15988_v3, 16  ;;  %v8772_v35 = vshrl.u32 %v15988_v3, 16  ;;  %8245 = vmatmul.mubr.bf16.gmra.mrb[108].mxu1 %v10759_v10  ;;  %v7673_v14 = vld [vmem:[#allocation4 + $0xb4] sm:$0xe]  ;;  %v7674_v21 = vld [vmem:[#allocation4 + $0xc0] sm:$0xe] }
 0x3e2   : > { %9231 = vmatprep.mubr.bf16.mxu0 %v10856_v8  ;;  %v7594_v16 = vor.u32 %v7593_v39, %v7590_v53  ;;  %v7604_v47 = vor.u32 %v7603_v37, %v15986_v2  ;;  %v8759_v20 = vshrl.u32 %v15990_v46, 16  ;;  %v8762_v45 = vshll.u32 %v15990_v46, 16  ;;  %8252 = vmatprep.mubr.bf16.mxu1 %v10776_v34  ;;  %v8397_v53 = vld [vmem:[#allocation4 + $0xd4] sm:$0x1] }
 0x3e3   : > { %v8723_v8 = vsel %vm12235_vm1, %v8718_v57, %v15952_v12  ;;  %v10777_v43 = vcombine.low %v7817_v29, %v7820_v15  ;;  %v8741_v28 = vor.u32 %v8740_v42, %v8737_v62  ;;  %v7823_v22 = vrot.slane %v16001_v26, 5 }
 0x3e4   : > { %v10857_v52 = vcombine.low %v8723_v8, %v8733_v7  ;;  %v7607_v61 = vshll.u32 %v15971_v48, 16  ;;  %v8751_v10 = vor.u32 %v8750_v4, %v15999_v58  ;;  %v8754_v31 = vshll.u32 %v8396_v40, 16  ;;  %v16032_v4 = vld [vmem:[#allocation4 + $0xc4] sm:$0xf] }
 0x3e5   : > { %v7621_v13 = vshll.u32 %v16001_v26, 16  ;;  %v7625_v34 = vshrl.u32 %v16001_v26, 16  ;;  %v16020_v6 = vrot.slane %v8768_v30, 5  ;;  %v8774_v5 = vrot.slane %v8772_v35, 4  ;;  %v11225_v30 = vpop.f32.mrb[72].mxu0 }
 0x3e6   : > { %v7595_v12 = vrot.slane %v7594_v16, 4  ;;  %v7605_v33 = vrot.slane %v7604_v47, 4  ;;  %v8761_v25 = vrot.slane %v8759_v20, 4  ;;  %v8764_v50 = vrot.slane %v8762_v45, 5  ;;  %v11226_v20 = vpop.f32.mrb[73].mxu0 }
 0x3e7   : > { %v8742_v38 = vrot.slane %v8741_v28, 4  ;;  %v7825_v48 = vrot.slane %v7823_v22, 4  ;;  %v7612_v51 = vshrl.u32 %v7269_v41, 16  ;;  %v7615_v55 = vshll.u32 %v7269_v41, 16  ;;  %v7272_v28 = vld [vmem:[#allocation4 + $0xc0] sm:$0xf] }
 0x3e8   : > { %v7609_v39 = vrot.slane %v7607_v61, 5  ;;  %v8752_v37 = vrot.slane %v8751_v10, 4  ;;  %v8756_v57 = vrot.slane %v8754_v31, 5  ;;  %v10746_v62 = vrot.slane %v7673_v14, 9 }
 0x3e9   : > { %9232 = vmatmul.mubr.bf16.gmra.mrb[144].mxu0 %v10840_v56  ;;  %v7826_v42 = vrot.slane %v16022_v0, 5  ;;  %v16030_v29 = vrot.slane %v7621_v13, 5  ;;  %v7627_v15 = vrot.slane %v7625_v34, 4  ;;  %v8775_v7 = vor.u32 %v8774_v5, %v16020_v6  ;;  %8253 = vmatmul.mubr.bf16.gmra.mrb[112].mxu1 %v10760_v24 }
 0x3ea   : > { %9239 = vmatprep.mubr.bf16.mxu0 %v10857_v52  ;;  %v7600_v36 = vsel %vm12235_vm1, %v7595_v12, %v15986_v2  ;;  %v7610_v59 = vsel %vm12235_vm1, %v7605_v33, %v7609_v39  ;;  %v8765_v56 = vor.u32 %v8764_v50, %v8761_v25  ;;  %v8778_v40 = vshll.u32 %v8397_v53, 16  ;;  %8260 = vmatprep.mubr.bf16.mxu1 %v10777_v43  ;;  %v11228_v43 = vpop.f32.mrb[74].mxu0  ;;  %v7274_v53 = vld [vmem:[#allocation4 + $0xc8] sm:$0x1] }
 0x3eb   : > { %v8747_v35 = vsel %vm12235_vm1, %v8742_v38, %v15999_v58  ;;  %v7827_v16 = vsel %vm12164_vm8, %v7825_v48, %v7826_v42  ;;  %v7614_v47 = vrot.slane %v7612_v51, 4  ;;  %v7617_v24 = vrot.slane %v7615_v55, 5  ;;  %v11229_v41 = vpop.f32.mrb[75].mxu0  ;;  %v16062_v48 = vld [vmem:[#allocation4 + $0x1c] sm:$0xf] }
 0x3ec   : > { %v8757_v2 = vsel %vm12235_vm1, %v8752_v37, %v8756_v57  ;;  %v7631_v45 = vshll.u32 %v16022_v0, 16  ;;  %v7830_v8 = vrot.slane %v16032_v4, 5  ;;  %v11227_v52 = vadd.f32 %v11226_v20, %v11225_v30  ;;  %v16074_v42 = vld [vmem:[#allocation4 + $0x34] sm:$0xf] }
 0x3ed   : > { %v7628_v61 = vor.u32 %v7627_v15, %v16030_v29  ;;  %v8776_v10 = vrot.slane %v8775_v7, 4  ;;  %v7645_v58 = vshll.u32 %v16032_v4, 16  ;;  %v7649_v31 = vshrl.u32 %v16032_v4, 16  ;;  %v11231_v7 = vpop.f32.mrb[76].mxu0 }
 0x3ee   : > { %v8766_v14 = vrot.slane %v8765_v56, 4  ;;  %v8780_v13 = vrot.slane %v8778_v40, 5  ;;  %v16053_v34 = vadd.f32 %v11227_v52, %v15907_v17  ;;  %v11230_v5 = vadd.f32 %v11229_v41, %v11228_v43  ;;  %v11232_v40 = vpop.f32.mrb[77].mxu0  ;;  %v9362_v43 = vld [vmem:[#allocation4 + $0x20] sm:$0x1] }
 0x3ef   : > { %v10858_v12 = vcombine.low %v8747_v35, %v8757_v2  ;;  %v7618_v33 = vor.u32 %v7617_v24, %v7614_v47  ;;  %v7636_v0 = vshrl.u32 %v7272_v28, 16  ;;  %v7639_v25 = vshll.u32 %v7272_v28, 16  ;;  %v11119_v47 = vpop.f32.mrb[44].mxu1  ;;  %v11234_v20 = vpop.f32.mrb[78].mxu0 }
 0x3f0   : > { %v10761_v50 = vcombine.low %v7600_v36, %v7610_v59  ;;  %v7824_v38 = vsel %vm12164_vm8, %v10746_v62, %v7823_v22  ;;  %v16065_v17 = vadd.f32 %v11230_v5, %v15916_v44  ;;  %v7629_v55 = vrot.slane %v7628_v61, 4  ;;  %v11120_v61 = vpop.f32.mrb[45].mxu1 }
 0x3f1   : > { %9240 = vmatmul.mubr.bf16.gmra.mrb[148].mxu0 %v10841_v63  ;;  %v10778_v51 = vcombine.low %v7824_v38, %v7827_v16  ;;  %v16067_v39 = vrot.slane %v7645_v58, 5  ;;  %v7651_v37 = vrot.slane %v7649_v31, 4  ;;  %v7832_v1 = vrot.slane %v7830_v8, 4  ;;  %v16090_v31 = vld [vmem:[#allocation4 + $0x28] sm:$0xf] }
 0x3f2   : > { %9247 = vmatprep.mubr.bf16.mxu0 %v10858_v12  ;;  %8261 = vmatmul.mubr.bf16.gmra.mrb[116].mxu1 %v10761_v50  ;;  %v8771_v26 = vsel %vm12235_vm1, %v8766_v14, %v16020_v6  ;;  %v8781_v63 = vsel %vm12235_vm1, %v8776_v10, %v8780_v13  ;;  %v7619_v44 = vrot.slane %v7618_v33, 4  ;;  %v7633_v22 = vrot.slane %v7631_v45, 5  ;;  %v9360_v10 = vld [vmem:[#allocation4 + $0x18] sm:$0xe]  ;;  %v11122_v14 = vpop.f32.mrb[46].mxu1 }
 0x3f3   : > { %8268 = vmatprep.mubr.bf16.mxu1 %v10778_v51  ;;  %v7638_v57 = vrot.slane %v7636_v0, 4  ;;  %v7641_v62 = vrot.slane %v7639_v25, 5  ;;  %v7833_v15 = vrot.slane %v7274_v53, 5  ;;  %v9458_v4 = vrot.slane %v16062_v48, 5  ;;  %v9368_v12 = vld [vmem:[#allocation4 + $0x38] sm:$0x1] }
 0x3f4   : > { %v7634_v36 = vsel %vm12235_vm1, %v7629_v55, %v7633_v22  ;;  %v10747_v59 = vrot.slane %v7674_v21, 9  ;;  %v10859_v56 = vcombine.low %v8771_v26, %v8781_v63  ;;  %v7652_v6 = vor.u32 %v7651_v37, %v16067_v39  ;;  %v11123_v33 = vpop.f32.mrb[47].mxu1  ;;  %v9366_v0 = vld [vmem:[#allocation4 + $0x30] sm:$0xe]  ;;  %v9370_v50 = vld [vmem:[#allocation4 + $0x40] sm:$0xf] }
 0x3f5   : > { %v10842_v30 = vcombine.low %v15967_v60, %v15973_v27  ;;  %v7834_v35 = vsel %vm12164_vm8, %v7832_v1, %v7833_v15  ;;  %v9472_v16 = vrot.slane %v16074_v42, 5  ;;  %v11233_v24 = vadd.f32 %v11232_v40, %v11231_v7  ;;  %v11235_v60 = vpop.f32.mrb[79].mxu0  ;;  %v9373_v21 = vld [vmem:[#allocation4 + $0x4c] sm:$0xf] }
 0x3f6   : > { %v7624_v2 = vsel %vm12235_vm1, %v7619_v44, %v16030_v29  ;;  %v7831_v45 = vsel %vm12164_vm8, %v10747_v59, %v7830_v8  ;;  %v7642_v28 = vor.u32 %v7641_v62, %v7638_v57  ;;  %v7655_v52 = vshll.u32 %v7274_v53, 16  ;;  %v9365_v7 = vld [vmem:[#allocation4 + $0x2c] sm:$0x1] }
 0x3f7   : > { %v10762_v27 = vcombine.low %v7624_v2, %v7634_v36  ;;  %v9460_v58 = vrot.slane %v9458_v4, 4  ;;  %v11121_v41 = vadd.f32 %v11120_v61, %v11119_v47  ;;  %v11236_v13 = vadd.f32 %v11235_v60, %v11234_v20 }
 0x3f8   : > { %v10779_v5 = vcombine.low %v7831_v45, %v7834_v35  ;;  %v7653_v29 = vrot.slane %v7652_v6, 4  ;;  %v9461_v8 = vrot.slane %v9362_v43, 5  ;;  %v9474_v25 = vrot.slane %v9472_v16, 4  ;;  %v9371_v35 = vld [vmem:[#allocation4 + $0x44] sm:$0x1] }
 0x3f9   : > { %9248 = vmatmul.mubr.bf16.gmra.mrb[152].mxu0 %v10842_v30  ;;  %v16092_v38 = vadd.f32 %v11233_v24, %v11121_v41  ;;  %v11124_v48 = vadd.f32 %v11123_v33, %v11122_v14  ;;  %v7643_v51 = vrot.slane %v7642_v28, 4  ;;  %v7657_v55 = vrot.slane %v7655_v52, 5  ;;  %v9374_v28 = vld [vmem:[#allocation4 + $0x50] sm:$0x1]  ;;  %v9376_v43 = vld [vmem:[#allocation4 + $0x58] sm:$0xf] }
 0x3fa   : > { %9255 = vmatprep.mubr.bf16.mxu0 %v10859_v56  ;;  %8269 = vmatmul.mubr.bf16.gmra.mrb[120].mxu1 %v10762_v27  ;;  %v10908_v53 = vrot.slane %v9360_v10, 9  ;;  %v9465_v37 = vrot.slane %v16090_v31, 5  ;;  %v10843_v1 = vcombine.low %v15990_v46, %v15988_v3  ;;  %v9462_v26 = vsel %vm12164_vm8, %v9460_v58, %v9461_v8  ;;  %v11125_v3 = vpop.f32.mrb[48].mxu1  ;;  %v9372_v10 = vld [vmem:[#allocation4 + $0x48] sm:$0xe] }
 0x3fb   : > { %8276 = vmatprep.mubr.bf16.mxu1 %v10779_v5  ;;  %v9475_v63 = vrot.slane %v9368_v12, 5  ;;  %v16099_v44 = vadd.f32 %v11236_v13, %v11124_v48  ;;  %v7658_v22 = vsel %vm12235_vm1, %v7653_v29, %v7657_v55  ;;  %v9479_v57 = vrot.slane %v9370_v50, 5  ;;  %v11126_v6 = vpop.f32.mrb[49].mxu1  ;;  %v9379_v58 = vld [vmem:[#allocation4 + $0x64] sm:$0xf] }
 0x3fc   : > { %v9459_v62 = vsel %vm12164_vm8, %v10908_v53, %v9458_v4  ;;  %v10910_v42 = vrot.slane %v9366_v0, 9  ;;  %v9486_v36 = vrot.slane %v9373_v21, 5  ;;  %v7648_v46 = vsel %vm12235_vm1, %v7643_v51, %v16067_v39  ;;  %v9363_v4 = vld [vmem:[#allocation4 + $0x24] sm:$0xe]  ;;  %v11128_v24 = vpop.f32.mrb[50].mxu1 }
 0x3fd   : > { %v9476_v15 = vsel %vm12164_vm8, %v9474_v25, %v9475_v63  ;;  %v10924_v59 = vcombine.low %v9459_v62, %v9462_v26  ;;  %v9467_v56 = vrot.slane %v9465_v37, 4  ;;  %v10763_v40 = vcombine.low %v7648_v46, %v7658_v22  ;;  %v11129_v9 = vpop.f32.mrb[51].mxu1  ;;  %v9369_v39 = vld [vmem:[#allocation4 + $0x3c] sm:$0xe]  ;;  %v9377_v48 = vld [vmem:[#allocation4 + $0x5c] sm:$0x1] }
 0x3fe   : > { %v9473_v30 = vsel %vm12164_vm8, %v10910_v42, %v9472_v16  ;;  %v16112_v47 = vadd.f32 %v11126_v6, %v11125_v3  ;;  %v9468_v2 = vrot.slane %v9365_v7, 5  ;;  %v9481_v45 = vrot.slane %v9479_v57, 4  ;;  %v9380_v53 = vld [vmem:[#allocation4 + $0x68] sm:$0x1]  ;;  %v9378_v63 = vld [vmem:[#allocation4 + $0x60] sm:$0xe] }
 0x3ff   : > { %v10926_v20 = vcombine.low %v9473_v30, %v9476_v15  ;;  %v9488_v52 = vrot.slane %v9486_v36, 4  ;;  %v16114_v61 = vadd.f32 %v11129_v9, %v11128_v24  ;;  %v10909_v60 = vrot.slane %v9363_v4, 9  ;;  %v9385_v22 = vld [vmem:[#allocation4 + $0x7c] sm:$0xf]  ;;  %v9383_v6 = vld [vmem:[#allocation4 + $0x74] sm:$0x1] }
 0x400   : > { %v9469_v16 = vsel %vm12164_vm8, %v9467_v56, %v9468_v2  ;;  %v9482_v27 = vrot.slane %v9371_v35, 5  ;;  %v9489_v31 = vrot.slane %v9374_v28, 5  ;;  %v10911_v14 = vrot.slane %v9369_v39, 9  ;;  %v9386_v4 = vld [vmem:[#allocation4 + $0x80] sm:$0x1] }
 0x401   : > { %9256 = vmatmul.mubr.bf16.gmra.mrb[156].mxu0 %v10843_v1  ;;  %v9466_v41 = vsel %vm12164_vm8, %v10909_v60, %v9465_v37  ;;  %v9493_v5 = vrot.slane %v9376_v43, 5  ;;  %v10912_v12 = vrot.slane %v9372_v10, 9  ;;  %v9500_v8 = vrot.slane %v9379_v58, 5  ;;  %v9375_v37 = vld [vmem:[#allocation4 + $0x54] sm:$0xe] }
 0x402   : > { %11563 = vmatprep.mubr.bf16.mxu0 %v10924_v59  ;;  %8277 = vmatmul.mubr.bf16.gmra.mrb[124].mxu1 %v10763_v40  ;;  %v9483_v13 = vsel %vm12164_vm8, %v9481_v45, %v9482_v27  ;;  %v10925_v29 = vcombine.low %v9466_v41, %v9469_v16  ;;  %v9490_v33 = vsel %vm12164_vm8, %v9488_v52, %v9489_v31  ;;  %v9382_v1 = vld [vmem:[#allocation4 + $0x70] sm:$0xf]  ;;  %v9496_v26 = vrot.slane %v9377_v48, 5  ;;  %v9381_v35 = vld [vmem:[#allocation4 + $0x6c] sm:$0xe] }
 0x403   : > { %11567 = vmatprep.mubr.bf16.mxu1 %v10926_v20  ;;  %v9480_v0 = vsel %vm12164_vm8, %v10911_v14, %v9479_v57  ;;  %v9487_v50 = vsel %vm12164_vm8, %v10912_v12, %v9486_v36  ;;  %v9495_v55 = vrot.slane %v9493_v5, 4  ;;  %v9502_v21 = vrot.slane %v9500_v8, 4  ;;  %v9388_v20 = vld [vmem:[#allocation4 + $0x88] sm:$0xf]  ;;  %v9384_v45 = vld [vmem:[#allocation4 + $0x78] sm:$0xe] }
 0x404   : > { %v10927_v25 = vcombine.low %v9480_v0, %v9483_v13  ;;  %v10928_v51 = vcombine.low %v9487_v50, %v9490_v33  ;;  %v9503_v62 = vrot.slane %v9380_v53, 5  ;;  %v10913_v42 = vrot.slane %v9375_v37, 9  ;;  %v9391_v28 = vld [vmem:[#allocation4 + $0x94] sm:$0xf]  ;;  %v9389_v41 = vld [vmem:[#allocation4 + $0x8c] sm:$0x1] }
 0x405   : > { %v9497_v57 = vsel %vm12164_vm8, %v9495_v55, %v9496_v26  ;;  %v9507_v15 = vrot.slane %v9382_v1, 5  ;;  %v10914_v7 = vrot.slane %v9378_v63, 9  ;;  %v9514_v3 = vrot.slane %v9385_v22, 5  ;;  %v9387_v13 = vld [vmem:[#allocation4 + $0x84] sm:$0xe] }
 0x406   : > { %v9504_v36 = vsel %vm12164_vm8, %v9502_v21, %v9503_v62  ;;  %v9494_v46 = vsel %vm12164_vm8, %v10913_v42, %v9493_v5  ;;  %v9510_v2 = vrot.slane %v9383_v6, 5  ;;  %v9517_v9 = vrot.slane %v9386_v4, 5  ;;  %v9390_v12 = vld [vmem:[#allocation4 + $0x90] sm:$0xe]  ;;  %v9397_v50 = vld [vmem:[#allocation4 + $0xac] sm:$0xf] }
 0x407   : > { %v10929_v59 = vcombine.low %v9494_v46, %v9497_v57  ;;  %v9501_v56 = vsel %vm12164_vm8, %v10914_v7, %v9500_v8  ;;  %v9509_v30 = vrot.slane %v9507_v15, 4  ;;  %v9516_v24 = vrot.slane %v9514_v3, 4  ;;  %v9394_v8 = vld [vmem:[#allocation4 + $0xa0] sm:$0xf]  ;;  %v9398_v6 = vld [vmem:[#allocation4 + $0xb0] sm:$0x1] }
 0x408   : > { %v10930_v40 = vcombine.low %v9501_v56, %v9504_v36  ;;  %v10915_v39 = vrot.slane %v9381_v35, 9  ;;  %v9521_v43 = vrot.slane %v9388_v20, 5  ;;  %v10916_v60 = vrot.slane %v9384_v45, 9  ;;  %v9396_v35 = vld [vmem:[#allocation4 + $0xa8] sm:$0xe] }
 0x409   : > { %11564 = vmatmul.mubr.bf16.vlgmr.msra.gmra.mrb[160].mxu0 %v10925_v29  ;;  %v9511_v52 = vsel %vm12164_vm8, %v9509_v30, %v9510_v2  ;;  %v9518_v16 = vsel %vm12164_vm8, %v9516_v24, %v9517_v9  ;;  %v9528_v27 = vrot.slane %v9391_v28, 5  ;;  %v9392_v29 = vld [vmem:[#allocation4 + $0x98] sm:$0x1]  ;;  %v10917_v37 = vrot.slane %v9387_v13, 9  ;;  %v9403_v24 = vld [vmem:[#allocation4 + $0xc4] sm:$0xf] }
 0x40a   : > { %11568 = vmatmul.mubr.bf16.vlgmr.msra.gmra.mrb[128].mxu1 %v10927_v25  ;;  %v9508_v10 = vsel %vm12164_vm8, %v10915_v39, %v9507_v15  ;;  %v9515_v31 = vsel %vm12164_vm8, %v10916_v60, %v9514_v3  ;;  %v9523_v5 = vrot.slane %v9521_v43, 4  ;;  %v9524_v25 = vrot.slane %v9389_v41, 5  ;;  %v9395_v3 = vld [vmem:[#allocation4 + $0xa4] sm:$0x1] }
 0x40b   : > { %11571 = vmatprep.mubr.bf16.mxu1 %v10928_v51  ;;  %v10931_v58 = vcombine.low %v9508_v10, %v9511_v52  ;;  %v10932_v14 = vcombine.low %v9515_v31, %v9518_v16  ;;  %v9530_v33 = vrot.slane %v9528_v27, 4  ;;  %v9531_v51 = vrot.slane %v9392_v29, 5  ;;  %v9401_v29 = vld [vmem:[#allocation4 + $0xbc] sm:$0x1] }
 0x40c   : > { %v9525_v21 = vsel %vm12164_vm8, %v9523_v5, %v9524_v25  ;;  %v10918_v1 = vrot.slane %v9390_v12, 9  ;;  %v9535_v26 = vrot.slane %v9394_v8, 5  ;;  %v9542_v62 = vrot.slane %v9397_v50, 5  ;;  %v9406_v8 = vld [vmem:[#allocation4 + $0xd0] sm:$0xf] }
 0x40d   : > { %v9532_v22 = vsel %vm12164_vm8, %v9530_v33, %v9531_v51  ;;  %v9522_v15 = vsel %vm12164_vm8, %v10917_v37, %v9521_v43  ;;  %v9538_v4 = vrot.slane %v9395_v3, 5  ;;  %v9545_v20 = vrot.slane %v9398_v6, 5  ;;  %v9399_v25 = vld [vmem:[#allocation4 + $0xb4] sm:$0xe] }
 0x40e   : > { %v10933_v7 = vcombine.low %v9522_v15, %v9525_v21  ;;  %v9529_v36 = vsel %vm12164_vm8, %v10918_v1, %v9528_v27  ;;  %v9537_v56 = vrot.slane %v9535_v26, 4  ;;  %v9544_v30 = vrot.slane %v9542_v62, 4  ;;  %v9402_v21 = vld [vmem:[#allocation4 + $0xc0] sm:$0xe] }
 0x40f   : > { %v10920_v52 = vrot.slane %v9396_v35, 9  ;;  %v9556_v60 = vrot.slane %v9403_v24, 5  ;;  %v9552_v37 = vrot.slane %v9401_v29, 5  ;;  %v10922_v3 = vrot.slane %v9402_v21, 9 }
 0x410   : > { %v9539_v28 = vsel %vm12164_vm8, %v9537_v56, %v9538_v4  ;;  %v9546_v43 = vsel %vm12164_vm8, %v9544_v30, %v9545_v20 }
 0x411   : > { %v9543_v5 = vsel %vm12164_vm8, %v10920_v52, %v9542_v62  ;;  %v9405_v62 = vld [vmem:[#allocation4 + $0xcc] sm:$0xe]  ;;  %v9557_v24 = vsel %vm12164_vm8, %v10922_v3, %v9556_v60 }
 0x412   : > { %11572 = vmatmul.mubr.bf16.gmra.mrb[132].mxu1 %v10929_v59  ;;  %v10934_v59 = vcombine.low %v9529_v36, %v9532_v22  ;;  %v10923_v6 = vrot.slane %v9405_v62, 9 }
 0x413   : > { %11575 = vmatprep.mubr.bf16.mxu1 %v10930_v40  ;;  %v9393_v40 = vld [vmem:[#allocation4 + $0x9c] sm:$0xe] }
 0x414   : > { %v11237_v0 = vpop.f32.mrb[80].mxu0  ;;  %v10919_v45 = vrot.slane %v9393_v40, 9 }
 0x415   : > { %v11238_v48 = vpop.f32.mrb[81].mxu0 }
 0x416   : > { %v11239_v55 = vadd.f32 %v11238_v48, %v11237_v0  ;;  %v11240_v53 = vpop.f32.mrb[82].mxu0  ;;  %v10936_v0 = vcombine.low %v9543_v5, %v9546_v43  ;;  %v9404_v48 = vld [vmem:[#allocation4 + $0xc8] sm:$0x1] }
 0x417   : > { %v11241_v63 = vpop.f32.mrb[83].mxu0  ;;  %v9559_v22 = vrot.slane %v9404_v48, 5 }
 0x418   : > { %v16149_v42 = vadd.f32 %v11239_v55, %v16112_v47  ;;  %v11242_v57 = vadd.f32 %v11241_v63, %v11240_v53  ;;  %v9400_v47 = vld [vmem:[#allocation4 + $0xb8] sm:$0xf]  ;;  %v9558_v53 = vrot.slane %v9556_v60, 4  ;;  %v10921_v63 = vrot.slane %v9399_v25, 9 }
 0x419   : > { %v9549_v9 = vrot.slane %v9400_v47, 5 }
 0x41a   : > { %11576 = vmatmul.mubr.bf16.gmra.mrb[136].mxu1 %v10931_v58  ;;  %v16156_v46 = vadd.f32 %v11242_v57, %v16114_v61  ;;  %v9536_v58 = vsel %vm12164_vm8, %v10919_v45, %v9535_v26  ;;  %v9563_v26 = vrot.slane %v9406_v8, 5  ;;  %v9407_v57 = vld [vmem:[#allocation4 + $0xd4] sm:$0x1] }
 0x41b   : > { %11579 = vmatprep.mubr.bf16.mxu1 %v10932_v14  ;;  %v10935_v13 = vcombine.low %v9536_v58, %v9539_v28  ;;  %v9551_v50 = vrot.slane %v9549_v9, 4  ;;  %v9550_v36 = vsel %vm12164_vm8, %v10921_v63, %v9549_v9  ;;  %v9566_v30 = vrot.slane %v9407_v57, 5 }
 0x41c   : > { %v9565_v40 = vrot.slane %v9563_v26, 4  ;;  %v9564_v28 = vsel %vm12164_vm8, %v10923_v6, %v9563_v26 }
 0x41d   : > { %v9553_v15 = vsel %vm12164_vm8, %v9551_v50, %v9552_v37 }
 0x41e   : > { %v11243_v2 = vpop.f32.mrb[84].mxu0  ;;  %v10937_v35 = vcombine.low %v9550_v36, %v9553_v15  ;;  %v9567_v9 = vsel %vm12164_vm8, %v9565_v40, %v9566_v30  ;;  %v16872_v36 = vld [vmem:[#allocation38_spill] sm:$0xff] }
 0x41f   : > { %v11131_v61 = vpop.f32.mrb[52].mxu1  ;;  %v11244_v39 = vpop.f32.mrb[85].mxu0 }
 0x420   : > { %v11245_v16 = vadd.f32 %v11244_v39, %v11243_v2  ;;  %v11132_v27 = vpop.f32.mrb[53].mxu1  ;;  %v11246_v10 = vpop.f32.mrb[86].mxu0 }
 0x421   : > { %v11133_v31 = vadd.f32 %v11132_v27, %v11131_v61  ;;  %v11134_v41 = vpop.f32.mrb[54].mxu1  ;;  %v11247_v14 = vpop.f32.mrb[87].mxu0  ;;  %v10939_v61 = vcombine.low %v9564_v28, %v9567_v9 }
 0x422   : > { %11580 = vmatmul.mubr.bf16.gmra.mrb[140].mxu1 %v10933_v7  ;;  %v11248_v12 = vadd.f32 %v11247_v14, %v11246_v10  ;;  %v11135_v33 = vpop.f32.mrb[55].mxu1 }
 0x423   : > { %11583 = vmatprep.mubr.bf16.mxu1 %v10934_v59  ;;  %v16166_v51 = vadd.f32 %v11245_v16, %v11133_v31  ;;  %v11136_v55 = vadd.f32 %v11135_v33, %v11134_v41  ;;  %v9560_v59 = vsel %vm12164_vm8, %v9558_v53, %v9559_v22 }
 0x424   : > { %v10938_v2 = vcombine.low %v9557_v24, %v9560_v59 }
 0x425   : > { %v16168_v1 = vadd.f32 %v11248_v12, %v11136_v55 }
 0x427   : > { %v11137_v7 = vpop.f32.mrb[56].mxu1 }
 0x428   : > { %v11138_v56 = vpop.f32.mrb[57].mxu1 }
 0x429   : > { %v11139_v47 = vadd.f32 %v11138_v56, %v11137_v7  ;;  %v11140_v4 = vpop.f32.mrb[58].mxu1  ;;  %v16873_v56 = vld [vmem:[#allocation39_spill] sm:$0xff] }
 0x42a   : > { %11584 = vmatmul.mubr.bf16.gmra.mrb[144].mxu1 %v10935_v13  ;;  %v11141_v20 = vpop.f32.mrb[59].mxu1 }
 0x42b   : > { %11587 = vmatprep.mubr.bf16.mxu1 %v10936_v0  ;;  %v11142_v45 = vadd.f32 %v11141_v20, %v11140_v4 }
 0x432   : > { %11588 = vmatmul.mubr.bf16.gmra.mrb[148].mxu1 %v10937_v35 }
 0x433   : > { %11591 = vmatprep.mubr.bf16.mxu1 %v10938_v2 }
 0x43a   : > { %11592 = vmatmul.mubr.bf16.gmra.mrb[152].mxu1 %v10939_v61 }
 0x448   : > { %v11249_v39 = vpop.f32.mrb[88].mxu0 }
 0x449   : > { %v11250_v52 = vpop.f32.mrb[89].mxu0 }
 0x44a   : > { %v11251_v43 = vadd.f32 %v11250_v52, %v11249_v39  ;;  %v11252_v16 = vpop.f32.mrb[90].mxu0  ;;  %v16874_v39 = vld [vmem:[#allocation40_spill] sm:$0xff] }
 0x44b   : > { %v11253_v27 = vpop.f32.mrb[91].mxu0 }
 0x44c   : > { %v16182_v10 = vadd.f32 %v11251_v43, %v11139_v47  ;;  %v11254_v60 = vadd.f32 %v11253_v27, %v11252_v16  ;;  %v16875_v27 = vld [vmem:[#allocation41_spill] sm:$0xff] }
 0x44e   : > { %v16184_v58 = vadd.f32 %v11254_v60, %v11142_v45 }
 0x450   : > { %v11255_v31 = vpop.f32.mrb[92].mxu0 }
 0x451   : > { %v11256_v41 = vpop.f32.mrb[93].mxu0 }
 0x452   : > { %v11257_v13 = vadd.f32 %v11256_v41, %v11255_v31  ;;  %v11258_v5 = vpop.f32.mrb[94].mxu0 }
 0x453   : > { %v11143_v14 = vpop.f32.mrb[60].mxu1  ;;  %v11259_v11 = vpop.f32.mrb[95].mxu0 }
 0x454   : > { %v11144_v29 = vpop.f32.mrb[61].mxu1  ;;  %v11260_v8 = vadd.f32 %v11259_v11, %v11258_v5 }
 0x455   : > { %v11145_v12 = vadd.f32 %v11144_v29, %v11143_v14  ;;  %v11146_v33 = vpop.f32.mrb[62].mxu1 }
 0x456   : > { %v11147_v0 = vpop.f32.mrb[63].mxu1 }
 0x457   : > { %v16186_v25 = vadd.f32 %v11257_v13, %v11145_v12  ;;  %v11148_v50 = vadd.f32 %v11147_v0, %v11146_v33 }
 0x459   : > { %v16188_v48 = vadd.f32 %v11260_v8, %v11148_v50 }
 0x45a   : > { %v11389_v55 = vpop.f32.mrb[96].mxu0 }
 0x45b   : > { %v11390_v53 = vpop.f32.mrb[97].mxu0 }
 0x45c   : > { %v11277_v37 = vpop.f32.mrb[64].mxu1  ;;  %v11391_v21 = vadd.f32 %v11390_v53, %v11389_v55  ;;  %v11392_v26 = vpop.f32.mrb[98].mxu0  ;;  %v16876_v53 = vld [vmem:[#allocation42_spill] sm:$0xff] }
 0x45d   : > { %v11278_v63 = vpop.f32.mrb[65].mxu1  ;;  %v11393_v22 = vpop.f32.mrb[99].mxu0 }
 0x45e   : > { %v11279_v62 = vadd.f32 %v11278_v63, %v11277_v37  ;;  %v11280_v57 = vpop.f32.mrb[66].mxu1  ;;  %v11394_v15 = vadd.f32 %v11393_v22, %v11392_v26  ;;  %v16877_v26 = vld [vmem:[#allocation43_spill] sm:$0xff] }
 0x45f   : > { %v11281_v7 = vpop.f32.mrb[67].mxu1 }
 0x460   : > { %v8285_v3 = vadd.f32 %v11279_v62, %v16872_v36  ;;  %v11282_v59 = vadd.f32 %v11281_v7, %v11280_v57 }
 0x462   : > { %v8286_v6 = vadd.f32 %v11282_v59, %v16873_v56  ;;  %v11395_v40 = vpop.f32.mrb[100].mxu0  ;;  %v16192_v2 = vadd.f32 %v11391_v21, %v8285_v3 }
 0x463   : > { %v11396_v30 = vpop.f32.mrb[101].mxu0 }
 0x464   : > { %v11283_v47 = vpop.f32.mrb[68].mxu1  ;;  %v11397_v4 = vadd.f32 %v11396_v30, %v11395_v40  ;;  %v11398_v35 = vpop.f32.mrb[102].mxu0  ;;  %v16195_v16 = vadd.f32 %v11394_v15, %v8286_v6 }
 0x465   : > { %v11284_v24 = vpop.f32.mrb[69].mxu1  ;;  %v11399_v20 = vpop.f32.mrb[103].mxu0 }
 0x466   : > { %v11285_v45 = vadd.f32 %v11284_v24, %v11283_v47  ;;  %v11286_v28 = vpop.f32.mrb[70].mxu1  ;;  %v11400_v9 = vadd.f32 %v11399_v20, %v11398_v35  ;;  %v16879_v20 = vld [vmem:[#allocation37_spill] sm:$0xff] }
 0x467   : > { %v11287_v61 = vpop.f32.mrb[71].mxu1 }
 0x468   : > { %v8287_v52 = vadd.f32 %v11285_v45, %v16874_v39  ;;  %v11288_v43 = vadd.f32 %v11287_v61, %v11286_v28 }
 0x46a   : > { %v8288_v60 = vadd.f32 %v11288_v43, %v16875_v27  ;;  %v11401_v31 = vpop.f32.mrb[104].mxu0  ;;  %v16198_v41 = vadd.f32 %v11397_v4, %v8287_v52  ;;  %v16878_v4 = vld [vmem:[#allocation36_spill] sm:$0xff] }
 0x46b   : > { %v11402_v14 = vpop.f32.mrb[105].mxu0 }
 0x46c   : > { %v11289_v13 = vpop.f32.mrb[72].mxu1  ;;  %v11403_v5 = vadd.f32 %v11402_v14, %v11401_v31  ;;  %v11404_v29 = vpop.f32.mrb[106].mxu0  ;;  %v16200_v11 = vadd.f32 %v11400_v9, %v8288_v60 }
 0x46d   : > { %v11290_v12 = vpop.f32.mrb[73].mxu1  ;;  %v11405_v33 = vpop.f32.mrb[107].mxu0 }
 0x46e   : > { %v11291_v8 = vadd.f32 %v11290_v12, %v11289_v13  ;;  %v11292_v0 = vpop.f32.mrb[74].mxu1  ;;  %v11406_v50 = vadd.f32 %v11405_v33, %v11404_v29  ;;  %v16880_v12 = vld [vmem:[#allocation34_spill] sm:$0xff] }
 0x46f   : > { %v11293_v55 = vpop.f32.mrb[75].mxu1 }
 0x470   : > { %v8289_v37 = vadd.f32 %v11291_v8, %v16876_v53  ;;  %v11294_v21 = vadd.f32 %v11293_v55, %v11292_v0  ;;  %v16881_v0 = vld [vmem:[#allocation15_spill] sm:$0xff] }
 0x472   : > { %v8290_v63 = vadd.f32 %v11294_v21, %v16877_v26  ;;  %v11407_v22 = vpop.f32.mrb[108].mxu0  ;;  %v16204_v62 = vadd.f32 %v11403_v5, %v8289_v37 }
 0x473   : > { %v11408_v57 = vpop.f32.mrb[109].mxu0 }
 0x474   : > { %v11295_v15 = vpop.f32.mrb[76].mxu1  ;;  %v11409_v7 = vadd.f32 %v11408_v57, %v11407_v22  ;;  %v11410_v36 = vpop.f32.mrb[110].mxu0  ;;  %v16206_v3 = vadd.f32 %v11406_v50, %v8290_v63 }
 0x475   : > { %v11296_v59 = vpop.f32.mrb[77].mxu1  ;;  %v11411_v56 = vpop.f32.mrb[111].mxu0 }
 0x476   : > { %v11297_v6 = vadd.f32 %v11296_v59, %v11295_v15  ;;  %v11298_v40 = vpop.f32.mrb[78].mxu1  ;;  %v11412_v30 = vadd.f32 %v11411_v56, %v11410_v36 }
 0x477   : > { %v11299_v47 = vpop.f32.mrb[79].mxu1 }
 0x478   : > { %v8291_v35 = vadd.f32 %v11297_v6, %v16878_v4  ;;  %v11300_v24 = vadd.f32 %v11299_v47, %v11298_v40  ;;  %v16882_v6 = vld [vmem:[#allocation35_spill] sm:$0xff]  ;;  %v16883_v47 = vld [vmem:[#allocation12_spill] sm:$0xff] }
 0x47a   : > { %v8292_v45 = vadd.f32 %v11300_v24, %v16879_v20  ;;  %v16210_v9 = vadd.f32 %v11409_v7, %v8291_v35 }
 0x47b   : > { %v11413_v28 = vpop.f32.mrb[112].mxu0 }
 0x47c   : > { %v11414_v61 = vpop.f32.mrb[113].mxu0  ;;  %v11301_v39 = vpop.f32.mrb[80].mxu1  ;;  %v16212_v27 = vadd.f32 %v11412_v30, %v8292_v45 }
 0x47d   : > { %v11415_v52 = vadd.f32 %v11414_v61, %v11413_v28  ;;  %v11416_v43 = vpop.f32.mrb[114].mxu0  ;;  %v11302_v60 = vpop.f32.mrb[81].mxu1 }
 0x47e   : > { %v11417_v31 = vpop.f32.mrb[115].mxu0  ;;  %v11303_v14 = vadd.f32 %v11302_v60, %v11301_v39  ;;  %v11304_v13 = vpop.f32.mrb[82].mxu1 }
 0x47f   : > { %v11418_v5 = vadd.f32 %v11417_v31, %v11416_v43  ;;  %v11305_v29 = vpop.f32.mrb[83].mxu1 }
 0x480   : > { %v8293_v33 = vadd.f32 %v11303_v14, %v16880_v12  ;;  %v11306_v8 = vadd.f32 %v11305_v29, %v11304_v13 }
 0x482   : > { %v8294_v50 = vadd.f32 %v11306_v8, %v16881_v0  ;;  %v16216_v53 = vadd.f32 %v11415_v52, %v8293_v33  ;;  %v16885_v33 = vld [vmem:[#allocation22_spill] sm:$0xff] }
 0x483   : > { %v11419_v55 = vpop.f32.mrb[116].mxu0 }
 0x484   : > { %v11420_v37 = vpop.f32.mrb[117].mxu0  ;;  %v11307_v21 = vpop.f32.mrb[84].mxu1  ;;  %v16218_v22 = vadd.f32 %v11418_v5, %v8294_v50  ;;  %v16884_v5 = vld [vmem:[#allocation14_spill] sm:$0xff] }
 0x485   : > { %v11421_v26 = vadd.f32 %v11420_v37, %v11419_v55  ;;  %v11422_v63 = vpop.f32.mrb[118].mxu0  ;;  %v11308_v57 = vpop.f32.mrb[85].mxu1 }
 0x486   : > { %v11423_v15 = vpop.f32.mrb[119].mxu0  ;;  %v11309_v7 = vadd.f32 %v11308_v57, %v11307_v21  ;;  %v11310_v36 = vpop.f32.mrb[86].mxu1 }
 0x487   : > { %v11424_v59 = vadd.f32 %v11423_v15, %v11422_v63  ;;  %v11311_v56 = vpop.f32.mrb[87].mxu1 }
 0x488   : > { %v8295_v40 = vadd.f32 %v11309_v7, %v16882_v6  ;;  %v11312_v30 = vadd.f32 %v11311_v56, %v11310_v36 }
 0x48a   : > { %v8296_v4 = vadd.f32 %v11312_v30, %v16883_v47  ;;  %v16222_v24 = vadd.f32 %v11421_v26, %v8295_v40 }
 0x48c   : > { %v11425_v35 = vpop.f32.mrb[120].mxu0  ;;  %v11313_v45 = vpop.f32.mrb[88].mxu1  ;;  %v16224_v39 = vadd.f32 %v11424_v59, %v8296_v4 }
 0x48d   : > { %v11426_v20 = vpop.f32.mrb[121].mxu0  ;;  %v11314_v52 = vpop.f32.mrb[89].mxu1 }
 0x48e   : > { %v11427_v28 = vadd.f32 %v11426_v20, %v11425_v35  ;;  %v11428_v61 = vpop.f32.mrb[122].mxu0  ;;  %v11315_v60 = vadd.f32 %v11314_v52, %v11313_v45  ;;  %v11316_v31 = vpop.f32.mrb[90].mxu1 }
 0x48f   : > { %v11429_v43 = vpop.f32.mrb[123].mxu0  ;;  %v11317_v13 = vpop.f32.mrb[91].mxu1 }
 0x490   : > { %v11430_v14 = vadd.f32 %v11429_v43, %v11428_v61  ;;  %v8297_v29 = vadd.f32 %v11315_v60, %v16884_v5  ;;  %v11318_v12 = vadd.f32 %v11317_v13, %v11316_v31 }
 0x492   : > { %v8298_v8 = vadd.f32 %v11318_v12, %v16885_v33  ;;  %v16228_v50 = vadd.f32 %v11427_v28, %v8297_v29 }
 0x494   : > { %v11431_v0 = vpop.f32.mrb[124].mxu0  ;;  %v11319_v37 = vpop.f32.mrb[92].mxu1  ;;  %v16230_v63 = vadd.f32 %v11430_v14, %v8298_v8 }
 0x495   : > { %v11432_v55 = vpop.f32.mrb[125].mxu0  ;;  %v11320_v57 = vpop.f32.mrb[93].mxu1 }
 0x496   : > { %v11433_v21 = vadd.f32 %v11432_v55, %v11431_v0  ;;  %v11434_v26 = vpop.f32.mrb[126].mxu0  ;;  %v11321_v7 = vadd.f32 %v11320_v57, %v11319_v37  ;;  %v11322_v36 = vpop.f32.mrb[94].mxu1 }
 0x497   : > { %v11435_v15 = vpop.f32.mrb[127].mxu0  ;;  %v11323_v56 = vpop.f32.mrb[95].mxu1 }
 0x498   : > { %v11436_v59 = vadd.f32 %v11435_v15, %v11434_v26  ;;  %v8299_v6 = vadd.f32 %v11321_v7, %v15587_v54  ;;  %v11324_v40 = vadd.f32 %v11323_v56, %v11322_v36 }
 0x49a   : > { %v8300_v30 = vadd.f32 %v11324_v40, %v15591_v23  ;;  %v16234_v4 = vadd.f32 %v11433_v21, %v8299_v6 }
 0x49c   : > { %v11437_v47 = vpop.f32.mrb[128].mxu0  ;;  %v11325_v20 = vpop.f32.mrb[96].mxu1  ;;  %v16236_v61 = vadd.f32 %v11436_v59, %v8300_v30 }
 0x49d   : > { %v11438_v35 = vpop.f32.mrb[129].mxu0  ;;  %v11326_v52 = vpop.f32.mrb[97].mxu1 }
 0x49e   : > { %v11439_v45 = vadd.f32 %v11438_v35, %v11437_v47  ;;  %v11440_v28 = vpop.f32.mrb[130].mxu0  ;;  %v11327_v60 = vadd.f32 %v11326_v52, %v11325_v20  ;;  %v11328_v31 = vpop.f32.mrb[98].mxu1 }
 0x49f   : > { %v11441_v43 = vpop.f32.mrb[131].mxu0  ;;  %v11329_v13 = vpop.f32.mrb[99].mxu1 }
 0x4a0   : > { %v11442_v14 = vadd.f32 %v11441_v43, %v11440_v28  ;;  %v8301_v54 = vadd.f32 %v11327_v60, %v15815_v32  ;;  %v11330_v5 = vadd.f32 %v11329_v13, %v11328_v31 }
 0x4a2   : > { %v8302_v23 = vadd.f32 %v11330_v5, %v15827_v49  ;;  %v16240_v12 = vadd.f32 %v11439_v45, %v8301_v54 }
 0x4a4   : > { %v11443_v29 = vpop.f32.mrb[132].mxu0  ;;  %v11331_v8 = vpop.f32.mrb[100].mxu1  ;;  %v16242_v37 = vadd.f32 %v11442_v14, %v8302_v23 }
 0x4a5   : > { %v11444_v33 = vpop.f32.mrb[133].mxu0  ;;  %v11332_v21 = vpop.f32.mrb[101].mxu1 }
 0x4a6   : > { %v11445_v0 = vadd.f32 %v11444_v33, %v11443_v29  ;;  %v11446_v55 = vpop.f32.mrb[134].mxu0  ;;  %v11333_v57 = vadd.f32 %v11332_v21, %v11331_v8  ;;  %v11334_v15 = vpop.f32.mrb[102].mxu1 }
 0x4a7   : > { %v11447_v26 = vpop.f32.mrb[135].mxu0  ;;  %v11335_v36 = vpop.f32.mrb[103].mxu1 }
 0x4a8   : > { %v11448_v7 = vadd.f32 %v11447_v26, %v11446_v55  ;;  %v8303_v32 = vadd.f32 %v11333_v57, %v15869_v19  ;;  %v11336_v59 = vadd.f32 %v11335_v36, %v11334_v15 }
 0x4aa   : > { %v8304_v49 = vadd.f32 %v11336_v59, %v15881_v18  ;;  %v16246_v6 = vadd.f32 %v11445_v0, %v8303_v32 }
 0x4ac   : > { %v11449_v56 = vpop.f32.mrb[136].mxu0  ;;  %v11337_v30 = vpop.f32.mrb[104].mxu1  ;;  %v16248_v20 = vadd.f32 %v11448_v7, %v8304_v49 }
 0x4ad   : > { %v11450_v40 = vpop.f32.mrb[137].mxu0  ;;  %v11338_v45 = vpop.f32.mrb[105].mxu1 }
 0x4ae   : > { %v11451_v47 = vadd.f32 %v11450_v40, %v11449_v56  ;;  %v11452_v35 = vpop.f32.mrb[138].mxu0  ;;  %v11339_v52 = vadd.f32 %v11338_v45, %v11337_v30  ;;  %v11340_v43 = vpop.f32.mrb[106].mxu1 }
 0x4af   : > { %v11453_v28 = vpop.f32.mrb[139].mxu0  ;;  %v11341_v31 = vpop.f32.mrb[107].mxu1 }
 0x4b0   : > { %v11454_v60 = vadd.f32 %v11453_v28, %v11452_v35  ;;  %v8305_v19 = vadd.f32 %v11339_v52, %v16053_v34  ;;  %v11342_v14 = vadd.f32 %v11341_v31, %v11340_v43 }
 0x4b2   : > { %v8306_v18 = vadd.f32 %v11342_v14, %v16065_v17  ;;  %v16252_v54 = vadd.f32 %v11451_v47, %v8305_v19 }
 0x4b4   : > { %v11455_v13 = vpop.f32.mrb[140].mxu0  ;;  %v11343_v23 = vpop.f32.mrb[108].mxu1  ;;  %v16254_v8 = vadd.f32 %v11454_v60, %v8306_v18 }
 0x4b5   : > { %v11456_v5 = vpop.f32.mrb[141].mxu0  ;;  %v11344_v0 = vpop.f32.mrb[109].mxu1 }
 0x4b6   : > { %v11457_v29 = vadd.f32 %v11456_v5, %v11455_v13  ;;  %v11458_v33 = vpop.f32.mrb[142].mxu0  ;;  %v11345_v21 = vadd.f32 %v11344_v0, %v11343_v23  ;;  %v11346_v26 = vpop.f32.mrb[110].mxu1 }
 0x4b7   : > { %v11459_v55 = vpop.f32.mrb[143].mxu0  ;;  %v11347_v15 = vpop.f32.mrb[111].mxu1 }
 0x4b8   : > { %v11460_v57 = vadd.f32 %v11459_v55, %v11458_v33  ;;  %v8307_v34 = vadd.f32 %v11345_v21, %v16092_v38  ;;  %v11348_v7 = vadd.f32 %v11347_v15, %v11346_v26 }
 0x4ba   : > { %v8308_v17 = vadd.f32 %v11348_v7, %v16099_v44  ;;  %v16258_v32 = vadd.f32 %v11457_v29, %v8307_v34 }
 0x4bc   : > { %v11461_v36 = vpop.f32.mrb[144].mxu0  ;;  %v11349_v49 = vpop.f32.mrb[112].mxu1  ;;  %v16260_v30 = vadd.f32 %v11460_v57, %v8308_v17 }
 0x4bd   : > { %v11462_v59 = vpop.f32.mrb[145].mxu0  ;;  %v11350_v47 = vpop.f32.mrb[113].mxu1 }
 0x4be   : > { %v11463_v56 = vadd.f32 %v11462_v59, %v11461_v36  ;;  %v11464_v40 = vpop.f32.mrb[146].mxu0  ;;  %v11351_v45 = vadd.f32 %v11350_v47, %v11349_v49  ;;  %v11352_v28 = vpop.f32.mrb[114].mxu1 }
 0x4bf   : > { %v11465_v35 = vpop.f32.mrb[147].mxu0  ;;  %v11353_v43 = vpop.f32.mrb[115].mxu1 }
 0x4c0   : > { %v11466_v52 = vadd.f32 %v11465_v35, %v11464_v40  ;;  %v8309_v38 = vadd.f32 %v11351_v45, %v16149_v42  ;;  %v11354_v60 = vadd.f32 %v11353_v43, %v11352_v28 }
 0x4c2   : > { %v8310_v44 = vadd.f32 %v11354_v60, %v16156_v46  ;;  %v16264_v19 = vadd.f32 %v11463_v56, %v8309_v38 }
 0x4c4   : > { %v11467_v31 = vpop.f32.mrb[148].mxu0  ;;  %v16266_v23 = vadd.f32 %v11466_v52, %v8310_v44 }
 0x4c5   : > { %v11468_v14 = vpop.f32.mrb[149].mxu0  ;;  %v11355_v18 = vpop.f32.mrb[116].mxu1 }
 0x4c6   : > { %v11469_v13 = vadd.f32 %v11468_v14, %v11467_v31  ;;  %v11470_v5 = vpop.f32.mrb[150].mxu0  ;;  %v11356_v29 = vpop.f32.mrb[117].mxu1 }
 0x4c7   : > { %v11471_v33 = vpop.f32.mrb[151].mxu0  ;;  %v11357_v0 = vadd.f32 %v11356_v29, %v11355_v18  ;;  %v11358_v55 = vpop.f32.mrb[118].mxu1 }
 0x4c8   : > { %v11472_v21 = vadd.f32 %v11471_v33, %v11470_v5  ;;  %v11359_v26 = vpop.f32.mrb[119].mxu1 }
 0x4c9   : > { %v8311_v42 = vadd.f32 %v11357_v0, %v16166_v51  ;;  %v11360_v57 = vadd.f32 %v11359_v26, %v11358_v55 }
 0x4cb   : > { %v8312_v46 = vadd.f32 %v11360_v57, %v16168_v1  ;;  %v16270_v34 = vadd.f32 %v11469_v13, %v8311_v42  ;;  %v16286_v42 = vld [vmem:[%s16605_s5] ss:$0 sm:$0xff] }
 0x4cc   : > { %v11473_v15 = vpop.f32.mrb[152].mxu0 }
 0x4cd   : > { %v11474_v7 = vpop.f32.mrb[153].mxu0  ;;  %v11361_v17 = vpop.f32.mrb[120].mxu1  ;;  %v16272_v49 = vadd.f32 %v11472_v21, %v8312_v46 }
 0x4ce   : > { %v11475_v36 = vadd.f32 %v11474_v7, %v11473_v15  ;;  %v11476_v59 = vpop.f32.mrb[154].mxu0  ;;  %v11362_v56 = vpop.f32.mrb[121].mxu1 }
 0x4cf   : > { %v11477_v40 = vpop.f32.mrb[155].mxu0  ;;  %v11363_v47 = vadd.f32 %v11362_v56, %v11361_v17  ;;  %v11364_v35 = vpop.f32.mrb[122].mxu1 }
 0x4d0   : > { %v11478_v45 = vadd.f32 %v11477_v40, %v11476_v59  ;;  %v11365_v28 = vpop.f32.mrb[123].mxu1 }
 0x4d1   : > { %v8313_v51 = vadd.f32 %v11363_v47, %v16182_v10  ;;  %v11366_v52 = vadd.f32 %v11365_v28, %v11364_v35  ;;  %v16306_v35 = vstv %s375_s29 }
 0x4d3   : > { %v8314_v1 = vadd.f32 %v11366_v52, %v16184_v58  ;;  %v16276_v38 = vadd.f32 %v11475_v36, %v8313_v51 }
 0x4d4   : > { %v11479_v43 = vpop.f32.mrb[156].mxu0 }
 0x4d5   : > { %v11480_v60 = vpop.f32.mrb[157].mxu0  ;;  %v11367_v44 = vpop.f32.mrb[124].mxu1  ;;  %v16278_v18 = vadd.f32 %v11478_v45, %v8314_v1 }
 0x4d6   : > { %v11481_v31 = vadd.f32 %v11480_v60, %v11479_v43  ;;  %v11482_v14 = vpop.f32.mrb[158].mxu0  ;;  %v11368_v13 = vpop.f32.mrb[125].mxu1 }
 0x4d7   : > { %v11483_v5 = vpop.f32.mrb[159].mxu0  ;;  %v11369_v29 = vadd.f32 %v11368_v13, %v11367_v44  ;;  %v11370_v33 = vpop.f32.mrb[126].mxu1 }
 0x4d8   : > { %v11484_v0 = vadd.f32 %v11483_v5, %v11482_v14  ;;  %v11371_v10 = vpop.f32.mrb[127].mxu1 }
 0x4d9   : > { %v8315_v58 = vadd.f32 %v11369_v29, %v16186_v25  ;;  %v11372_v55 = vadd.f32 %v11371_v10, %v11370_v33  ;;  %v16298_v25 = vstv %s12146_s23 }
 0x4db   : > { %v8316_v21 = vadd.f32 %v11372_v55, %v16188_v48  ;;  %v16288_v57 = vadd.f32 %v11481_v31, %v8315_v58  ;;  %v11952_v31 = vld [vmem:[%s12172_s28 + $0x10] sm:$0xff] }
 0x4dc   : > { %v11565_v26 = vpop.f32.mrb[160].mxu0  ;;  %v11954_v55 = vld [vmem:[%s12172_s28 + $0x30] sm:$0xff] }
 0x4dd   : > { %v9859_v46 = vadd.f32 %v11565_v26, %v16198_v41  ;;  %v9730_v15 = vpop.f32.mrb[161].mxu0  ;;  %v11569_v7 = vpop.f32.mrb[128].mxu1  ;;  %v16301_v36 = vadd.f32 %v11484_v0, %v8316_v21  ;;  %v11955_v26 = vld [vmem:[%s12172_s28 + $0x18] sm:$0xff] }
 0x4de   : > { %v9857_v48 = vadd.f32 %v9730_v15, %v16192_v2  ;;  %v11566_v17 = vpop.f32.mrb[162].mxu0  ;;  %v9863_v41 = vadd.f32 %v11569_v7, %v16210_v9  ;;  %v9746_v40 = vpop.f32.mrb[129].mxu1  ;;  %v11956_v7 = vld [vmem:[%s12172_s28 + $0x20] sm:$0xff] }
 0x4df   : > { %v9962_v59 = vadd.f32 %v16286_v42, %v9859_v46  ;;  %v9860_v56 = vadd.f32 %v11566_v17, %v16200_v11  ;;  %v9733_v47 = vpop.f32.mrb[163].mxu0  ;;  %v9861_v2 = vadd.f32 %v9746_v40, %v16204_v62  ;;  %v11570_v51 = vpop.f32.mrb[130].mxu1 }
 0x4e0   : > { %v9960_v45 = vadd.f32 %v16286_v42, %v9857_v48  ;;  %v9858_v28 = vadd.f32 %v9733_v47, %v16195_v16  ;;  %v9966_v11 = vadd.f32 %v16286_v42, %v9863_v41  ;;  %v9864_v1 = vadd.f32 %v11570_v51, %v16212_v27  ;;  %v9749_v43 = vpop.f32.mrb[131].mxu1 }
 0x4e1   : > { %9995 = vst.msk [vmem:[%s16295_s10 + $0x10] sm:$0xff] %vm9992_vm3, %v9962_v59  ;;  %v10028_v9 = vmul.f32 %v16298_v25, %v9962_v59  ;;  %v9963_v52 = vadd.f32 %v16286_v42, %v9860_v56  ;;  %v9964_v62 = vadd.f32 %v16286_v42, %v9861_v2  ;;  %v9862_v44 = vadd.f32 %v9749_v43, %v16206_v3  ;;  %v11953_v3 = vld [vmem:[%s12172_s28] sm:$0xff]  ;;  %v11957_v59 = vld [vmem:[%s12172_s28 + $0x8] sm:$0xff]  ;;  %v11958_v2 = vld [vmem:[%s12172_s28 + $0x38] sm:$0xff] }
 0x4e2   : > { %9993 = vst.msk [vmem:[%s16295_s10] sm:$0xff] %vm9992_vm3, %v9960_v45  ;;  %v10026_v16 = vmul.f32 %v16298_v25, %v9960_v45  ;;  %v9961_v60 = vadd.f32 %v16286_v42, %v9858_v28  ;;  %9999 = vst.msk [vmem:[%s16295_s10 + $0x30] sm:$0xff] %vm9992_vm3, %v9966_v11  ;;  %v10032_v27 = vmul.f32 %v16298_v25, %v9966_v11 }
 0x4e3   : > { %v10060_v14 = vsub.f32 %v11952_v31, %v10028_v9  ;;  %9996 = vst.msk [vmem:[%s16295_s10 + $0x18] sm:$0xff] %vm9992_vm3, %v9963_v52  ;;  %v10029_v13 = vmul.f32 %v16298_v25, %v9963_v52  ;;  %v9967_v5 = vadd.f32 %v16286_v42, %v9864_v1  ;;  %9997 = vst.msk [vmem:[%s16295_s10 + $0x20] sm:$0xff] %vm9992_vm3, %v9964_v62  ;;  %v11959_v1 = vld [vmem:[%s12172_s28 + $0x28] sm:$0xff] }
 0x4e4   : > { %v10058_v29 = vsub.f32 %v11953_v3, %v10026_v16  ;;  %v10030_v33 = vmul.f32 %v16298_v25, %v9964_v62  ;;  %9994 = vst.msk [vmem:[%s16295_s10 + $0x8] sm:$0xff] %vm9992_vm3, %v9961_v60  ;;  %v10027_v0 = vmul.f32 %v16298_v25, %v9961_v60  ;;  %v9965_v10 = vadd.f32 %v16286_v42, %v9862_v44 }
 0x4e5   : > { %v10093_v58 = vmul.f32 %v16306_v35, %v10060_v14  ;;  %v10064_v21 = vsub.f32 %v11954_v55, %v10032_v27  ;;  %v10061_v46 = vsub.f32 %v11955_v26, %v10029_v13  ;;  %10000 = vst.msk [vmem:[%s16295_s10 + $0x38] sm:$0xff] %vm9992_vm3, %v9967_v5  ;;  %v10033_v15 = vmul.f32 %v16298_v25, %v9967_v5  ;;  %v11573_v40 = vpop.f32.mrb[132].mxu1  ;;  %v11962_v26 = vld [vmem:[%s12172_s28 + $0x58] sm:$0xff] }
 0x4e6   : > { %v10091_v48 = vmul.f32 %v16306_v35, %v10058_v29  ;;  %v10062_v17 = vsub.f32 %v11956_v7, %v10030_v33  ;;  %v10059_v41 = vsub.f32 %v11957_v59, %v10027_v0  ;;  %9998 = vst.msk [vmem:[%s16295_s10 + $0x28] sm:$0xff] %vm9992_vm3, %v9965_v10  ;;  %v10031_v56 = vmul.f32 %v16298_v25, %v9965_v10  ;;  %v9762_v9 = vpop.f32.mrb[133].mxu1  ;;  %v11960_v29 = vld [vmem:[%s12172_s28 + $0x50] sm:$0xff]  ;;  %v11961_v0 = vld [vmem:[%s12172_s28 + $0x40] sm:$0xff] }
 0x4e7   : > { %10125 = vst.msk [vmem:[%s16335_s16 + $0x10] sm:$0xff] %vm9992_vm3, %v10093_v58  ;;  %v10097_v47 = vmul.f32 %v16306_v35, %v10064_v21  ;;  %v10094_v45 = vmul.f32 %v16306_v35, %v10061_v46  ;;  %v10065_v28 = vsub.f32 %v11958_v2, %v10033_v15  ;;  %v9867_v51 = vadd.f32 %v11573_v40, %v16222_v24  ;;  %v11574_v62 = vpop.f32.mrb[134].mxu1 }
 0x4e8   : > { %10123 = vst.msk [vmem:[%s16335_s16] sm:$0xff] %vm9992_vm3, %v10091_v48  ;;  %v10095_v11 = vmul.f32 %v16306_v35, %v10062_v17  ;;  %v10092_v52 = vmul.f32 %v16306_v35, %v10059_v41  ;;  %v10063_v43 = vsub.f32 %v11959_v1, %v10031_v56  ;;  %v9865_v16 = vadd.f32 %v9762_v9, %v16216_v53  ;;  %v9765_v31 = vpop.f32.mrb[135].mxu1  ;;  %v11963_v17 = vld [vmem:[%s12172_s28 + $0x48] sm:$0xff] }
 0x4e9   : > { %10129 = vst.msk [vmem:[%s16335_s16 + $0x30] sm:$0xff] %vm9992_vm3, %v10097_v47  ;;  %10126 = vst.msk [vmem:[%s16335_s16 + $0x18] sm:$0xff] %vm9992_vm3, %v10094_v45  ;;  %v10098_v24 = vmul.f32 %v16306_v35, %v10065_v28  ;;  %v9970_v60 = vadd.f32 %v16286_v42, %v9867_v51  ;;  %v9868_v44 = vadd.f32 %v11574_v62, %v16224_v39 }
 0x4ea   : > { %10127 = vst.msk [vmem:[%s16335_s16 + $0x20] sm:$0xff] %vm9992_vm3, %v10095_v11  ;;  %10124 = vst.msk [vmem:[%s16335_s16 + $0x8] sm:$0xff] %vm9992_vm3, %v10092_v52  ;;  %v10096_v53 = vmul.f32 %v16306_v35, %v10063_v43  ;;  %v9968_v14 = vadd.f32 %v16286_v42, %v9865_v16  ;;  %v9866_v27 = vadd.f32 %v9765_v31, %v16218_v22  ;;  %v11964_v52 = vld [vmem:[%s12172_s28 + $0x70] sm:$0xff]  ;;  %v11965_v43 = vld [vmem:[%s12172_s28 + $0x60] sm:$0xff] }
 0x4eb   : > { %10130 = vst.msk [vmem:[%s16335_s16 + $0x38] sm:$0xff] %vm9992_vm3, %v10098_v24  ;;  %10003 = vst.msk [vmem:[%s16295_s10 + $0x50] sm:$0xff] %vm9992_vm3, %v9970_v60  ;;  %v10036_v39 = vmul.f32 %v16298_v25, %v9970_v60  ;;  %v9971_v13 = vadd.f32 %v16286_v42, %v9868_v44  ;;  %v11966_v44 = vld [vmem:[%s12172_s28 + $0x78] sm:$0xff] }
 0x4ec   : > { %10128 = vst.msk [vmem:[%s16335_s16 + $0x28] sm:$0xff] %vm9992_vm3, %v10096_v53  ;;  %10001 = vst.msk [vmem:[%s16295_s10 + $0x40] sm:$0xff] %vm9992_vm3, %v9968_v14  ;;  %v10034_v5 = vmul.f32 %v16298_v25, %v9968_v14  ;;  %v9969_v3 = vadd.f32 %v16286_v42, %v9866_v27 }
 0x4ed   : > { %v10068_v22 = vsub.f32 %v11960_v29, %v10036_v39  ;;  %10004 = vst.msk [vmem:[%s16295_s10 + $0x58] sm:$0xff] %vm9992_vm3, %v9971_v13  ;;  %v10037_v33 = vmul.f32 %v16298_v25, %v9971_v13  ;;  %v11577_v55 = vpop.f32.mrb[136].mxu1  ;;  %v11967_v39 = vld [vmem:[%s12172_s28 + $0x68] sm:$0xff] }
 0x4ee   : > { %v10066_v10 = vsub.f32 %v11961_v0, %v10034_v5  ;;  %10002 = vst.msk [vmem:[%s16295_s10 + $0x48] sm:$0xff] %vm9992_vm3, %v9969_v3  ;;  %v10035_v58 = vmul.f32 %v16298_v25, %v9969_v3  ;;  %v9871_v15 = vadd.f32 %v11577_v55, %v16234_v4  ;;  %v9778_v48 = vpop.f32.mrb[137].mxu1 }
 0x4ef   : > { %v10101_v21 = vmul.f32 %v16306_v35, %v10068_v22  ;;  %v10069_v46 = vsub.f32 %v11962_v26, %v10037_v33  ;;  %v9869_v41 = vadd.f32 %v9778_v48, %v16228_v50  ;;  %v11578_v56 = vpop.f32.mrb[138].mxu1  ;;  %v11968_v26 = vld [vmem:[%s12172_s28 + $0x90] sm:$0xff] }
 0x4f0   : > { %v10099_v7 = vmul.f32 %v16306_v35, %v10066_v10  ;;  %v10067_v59 = vsub.f32 %v11963_v17, %v10035_v58  ;;  %v9974_v47 = vadd.f32 %v16286_v42, %v9871_v15  ;;  %v9872_v4 = vadd.f32 %v11578_v56, %v16236_v61  ;;  %v9781_v45 = vpop.f32.mrb[139].mxu1  ;;  %v11969_v15 = vld [vmem:[%s12172_s28 + $0x80] sm:$0xff] }
 0x4f1   : > { %10133 = vst.msk [vmem:[%s16335_s16 + $0x50] sm:$0xff] %vm9992_vm3, %v10101_v21  ;;  %v10102_v40 = vmul.f32 %v16306_v35, %v10069_v46  ;;  %v9972_v50 = vadd.f32 %v16286_v42, %v9869_v41  ;;  %v9870_v28 = vadd.f32 %v9781_v45, %v16230_v63  ;;  %v11970_v41 = vld [vmem:[%s12172_s28 + $0x98] sm:$0xff]  ;;  %v11971_v45 = vld [vmem:[%s12172_s28 + $0x88] sm:$0xff] }
 0x4f2   : > { %10131 = vst.msk [vmem:[%s16335_s16 + $0x40] sm:$0xff] %vm9992_vm3, %v10099_v7  ;;  %v10100_v2 = vmul.f32 %v16306_v35, %v10067_v59  ;;  %10007 = vst.msk [vmem:[%s16295_s10 + $0x70] sm:$0xff] %vm9992_vm3, %v9974_v47  ;;  %v10040_v51 = vmul.f32 %v16298_v25, %v9974_v47  ;;  %v9975_v61 = vadd.f32 %v16286_v42, %v9872_v4 }
 0x4f3   : > { %10134 = vst.msk [vmem:[%s16335_s16 + $0x58] sm:$0xff] %vm9992_vm3, %v10102_v40  ;;  %10005 = vst.msk [vmem:[%s16295_s10 + $0x60] sm:$0xff] %vm9992_vm3, %v9972_v50  ;;  %v10038_v9 = vmul.f32 %v16298_v25, %v9972_v50  ;;  %v9973_v11 = vadd.f32 %v16286_v42, %v9870_v28 }
 0x4f4   : > { %10132 = vst.msk [vmem:[%s16335_s16 + $0x48] sm:$0xff] %vm9992_vm3, %v10100_v2  ;;  %v10072_v63 = vsub.f32 %v11964_v52, %v10040_v51  ;;  %10008 = vst.msk [vmem:[%s16295_s10 + $0x78] sm:$0xff] %vm9992_vm3, %v9975_v61  ;;  %v10041_v1 = vmul.f32 %v16298_v25, %v9975_v61 }
 0x4f5   : > { %v10070_v16 = vsub.f32 %v11965_v43, %v10038_v9  ;;  %10006 = vst.msk [vmem:[%s16295_s10 + $0x68] sm:$0xff] %vm9992_vm3, %v9973_v11  ;;  %v10039_v62 = vmul.f32 %v16298_v25, %v9973_v11  ;;  %v11581_v24 = vpop.f32.mrb[140].mxu1 }
 0x4f6   : > { %v10105_v60 = vmul.f32 %v16306_v35, %v10072_v63  ;;  %v10073_v31 = vsub.f32 %v11966_v44, %v10041_v1  ;;  %v9875_v53 = vadd.f32 %v11581_v24, %v16246_v6  ;;  %v9794_v14 = vpop.f32.mrb[141].mxu1  ;;  %v11973_v24 = vld [vmem:[%s12172_s28 + $0xa0] sm:$0xff] }
 0x4f7   : > { %v10103_v27 = vmul.f32 %v16306_v35, %v10070_v16  ;;  %v10071_v13 = vsub.f32 %v11967_v39, %v10039_v62  ;;  %v9873_v5 = vadd.f32 %v9794_v14, %v16240_v12  ;;  %v11582_v3 = vpop.f32.mrb[142].mxu1  ;;  %v11972_v16 = vld [vmem:[%s12172_s28 + $0xb0] sm:$0xff]  ;;  %v11974_v14 = vld [vmem:[%s12172_s28 + $0xb8] sm:$0xff] }
 0x4f8   : > { %10137 = vst.msk [vmem:[%s16335_s16 + $0x70] sm:$0xff] %vm9992_vm3, %v10105_v60  ;;  %v10106_v29 = vmul.f32 %v16306_v35, %v10073_v31  ;;  %v9978_v22 = vadd.f32 %v16286_v42, %v9875_v53  ;;  %v9876_v6 = vadd.f32 %v11582_v3, %v16248_v20  ;;  %v9797_v33 = vpop.f32.mrb[143].mxu1  ;;  %v11975_v3 = vld [vmem:[%s12172_s28 + $0xa8] sm:$0xff] }
 0x4f9   : > { %10135 = vst.msk [vmem:[%s16335_s16 + $0x60] sm:$0xff] %vm9992_vm3, %v10103_v27  ;;  %v10104_v0 = vmul.f32 %v16306_v35, %v10071_v13  ;;  %v9976_v12 = vadd.f32 %v16286_v42, %v9873_v5  ;;  %v9874_v10 = vadd.f32 %v9797_v33, %v16242_v37 }
 0x4fa   : > { %10138 = vst.msk [vmem:[%s16335_s16 + $0x78] sm:$0xff] %vm9992_vm3, %v10106_v29  ;;  %10011 = vst.msk [vmem:[%s16295_s10 + $0x90] sm:$0xff] %vm9992_vm3, %v9978_v22  ;;  %v10044_v58 = vmul.f32 %v16298_v25, %v9978_v22  ;;  %v9979_v20 = vadd.f32 %v16286_v42, %v9876_v6 }
 0x4fb   : > { %10136 = vst.msk [vmem:[%s16335_s16 + $0x68] sm:$0xff] %vm9992_vm3, %v10104_v0  ;;  %10009 = vst.msk [vmem:[%s16295_s10 + $0x80] sm:$0xff] %vm9992_vm3, %v9976_v12  ;;  %v10042_v55 = vmul.f32 %v16298_v25, %v9976_v12  ;;  %v9977_v21 = vadd.f32 %v16286_v42, %v9874_v10 }
 0x4fc   : > { %v10076_v37 = vsub.f32 %v11968_v26, %v10044_v58  ;;  %10012 = vst.msk [vmem:[%s16295_s10 + $0x98] sm:$0xff] %vm9992_vm3, %v9979_v20  ;;  %v10045_v46 = vmul.f32 %v16298_v25, %v9979_v20  ;;  %v11976_v26 = vld [vmem:[%s12172_s28 + $0xd0] sm:$0xff] }
 0x4fd   : > { %v10074_v48 = vsub.f32 %v11969_v15, %v10042_v55  ;;  %10010 = vst.msk [vmem:[%s16295_s10 + $0x88] sm:$0xff] %vm9992_vm3, %v9977_v21  ;;  %v10043_v7 = vmul.f32 %v16298_v25, %v9977_v21  ;;  %v11585_v17 = vpop.f32.mrb[144].mxu1 }
 0x4fe   : > { %v10109_v59 = vmul.f32 %v16306_v35, %v10076_v37  ;;  %v10077_v56 = vsub.f32 %v11970_v41, %v10045_v46  ;;  %v9879_v40 = vadd.f32 %v11585_v17, %v16258_v32  ;;  %v9810_v47 = vpop.f32.mrb[145].mxu1  ;;  %v11977_v46 = vld [vmem:[%s12172_s28 + $0xc0] sm:$0xff] }
 0x4ff   : > { %v10107_v4 = vmul.f32 %v16306_v35, %v10074_v48  ;;  %v10075_v2 = vsub.f32 %v11971_v45, %v10043_v7  ;;  %v9877_v50 = vadd.f32 %v9810_v47, %v16252_v54  ;;  %v11586_v28 = vpop.f32.mrb[146].mxu1 }
 0x500   : > { %10141 = vst.msk [vmem:[%s16335_s16 + $0x90] sm:$0xff] %vm9992_vm3, %v10109_v59  ;;  %v10110_v51 = vmul.f32 %v16306_v35, %v10077_v56  ;;  %v9982_v61 = vadd.f32 %v16286_v42, %v9879_v40  ;;  %v9880_v32 = vadd.f32 %v11586_v28, %v16260_v30  ;;  %v9813_v9 = vpop.f32.mrb[147].mxu1  ;;  %v11978_v59 = vld [vmem:[%s12172_s28 + $0xd8] sm:$0xff] }
 0x501   : > { %10139 = vst.msk [vmem:[%s16335_s16 + $0x80] sm:$0xff] %vm9992_vm3, %v10107_v4  ;;  %v10108_v11 = vmul.f32 %v16306_v35, %v10075_v2  ;;  %v9980_v54 = vadd.f32 %v16286_v42, %v9877_v50  ;;  %v9878_v52 = vadd.f32 %v9813_v9, %v16254_v8  ;;  %v11979_v4 = vld [vmem:[%s12172_s28 + $0xc8] sm:$0xff] }
 0x502   : > { %10142 = vst.msk [vmem:[%s16335_s16 + $0x98] sm:$0xff] %vm9992_vm3, %v10110_v51  ;;  %10015 = vst.msk [vmem:[%s16295_s10 + $0xb0] sm:$0xff] %vm9992_vm3, %v9982_v61  ;;  %v10048_v63 = vmul.f32 %v16298_v25, %v9982_v61  ;;  %v9983_v30 = vadd.f32 %v16286_v42, %v9880_v32 }
 0x503   : > { %10140 = vst.msk [vmem:[%s16335_s16 + $0x88] sm:$0xff] %vm9992_vm3, %v10108_v11  ;;  %10013 = vst.msk [vmem:[%s16295_s10 + $0xa0] sm:$0xff] %vm9992_vm3, %v9980_v54  ;;  %v10046_v1 = vmul.f32 %v16298_v25, %v9980_v54  ;;  %v9981_v43 = vadd.f32 %v16286_v42, %v9878_v52 }
 0x504   : > { %v10080_v8 = vsub.f32 %v11972_v16, %v10048_v63  ;;  %10016 = vst.msk [vmem:[%s16295_s10 + $0xb8] sm:$0xff] %vm9992_vm3, %v9983_v30  ;;  %v10049_v62 = vmul.f32 %v16298_v25, %v9983_v30 }
 0x505   : > { %v10078_v60 = vsub.f32 %v11973_v24, %v10046_v1  ;;  %10014 = vst.msk [vmem:[%s16295_s10 + $0xa8] sm:$0xff] %vm9992_vm3, %v9981_v43  ;;  %v10047_v44 = vmul.f32 %v16298_v25, %v9981_v43  ;;  %v11589_v31 = vpop.f32.mrb[148].mxu1  ;;  %v11981_v1 = vld [vmem:[%s12172_s28 + $0xe0] sm:$0xff] }
 0x506   : > { %v10113_v53 = vmul.f32 %v16306_v35, %v10080_v8  ;;  %v10081_v27 = vsub.f32 %v11974_v14, %v10049_v62  ;;  %v9883_v39 = vadd.f32 %v11589_v31, %v16270_v34  ;;  %v9826_v13 = vpop.f32.mrb[149].mxu1  ;;  %v11982_v62 = vld [vmem:[%s12172_s28 + $0xf8] sm:$0xff] }
 0x507   : > { %v10111_v5 = vmul.f32 %v16306_v35, %v10078_v60  ;;  %v10079_v29 = vsub.f32 %v11975_v3, %v10047_v44  ;;  %v9881_v22 = vadd.f32 %v9826_v13, %v16264_v19  ;;  %v11590_v6 = vpop.f32.mrb[150].mxu1  ;;  %v11983_v60 = vld [vmem:[%s12172_s28 + $0xe8] sm:$0xff] }
 0x508   : > { %10145 = vst.msk [vmem:[%s16335_s16 + $0xb0] sm:$0xff] %vm9992_vm3, %v10113_v53  ;;  %v10114_v33 = vmul.f32 %v16306_v35, %v10081_v27  ;;  %v9986_v0 = vadd.f32 %v16286_v42, %v9883_v39  ;;  %v9884_v34 = vadd.f32 %v11590_v6, %v16272_v49  ;;  %v9829_v12 = vpop.f32.mrb[151].mxu1 }
 0x509   : > { %10143 = vst.msk [vmem:[%s16335_s16 + $0xa0] sm:$0xff] %vm9992_vm3, %v10111_v5  ;;  %v10112_v10 = vmul.f32 %v16306_v35, %v10079_v29  ;;  %v9984_v19 = vadd.f32 %v16286_v42, %v9881_v22  ;;  %v9882_v58 = vadd.f32 %v9829_v12, %v16266_v23 }
 0x50a   : > { %10146 = vst.msk [vmem:[%s16335_s16 + $0xb8] sm:$0xff] %vm9992_vm3, %v10114_v33  ;;  %10019 = vst.msk [vmem:[%s16295_s10 + $0xd0] sm:$0xff] %vm9992_vm3, %v9986_v0  ;;  %v10052_v20 = vmul.f32 %v16298_v25, %v9986_v0  ;;  %v9987_v49 = vadd.f32 %v16286_v42, %v9884_v34 }
 0x50b   : > { %10144 = vst.msk [vmem:[%s16335_s16 + $0xa8] sm:$0xff] %vm9992_vm3, %v10112_v10  ;;  %10017 = vst.msk [vmem:[%s16295_s10 + $0xc0] sm:$0xff] %vm9992_vm3, %v9984_v19  ;;  %v10050_v55 = vmul.f32 %v16298_v25, %v9984_v19  ;;  %v9985_v21 = vadd.f32 %v16286_v42, %v9882_v58 }
 0x50c   : > { %v10084_v23 = vsub.f32 %v11976_v26, %v10052_v20  ;;  %10020 = vst.msk [vmem:[%s16295_s10 + $0xd8] sm:$0xff] %vm9992_vm3, %v9987_v49  ;;  %v10053_v37 = vmul.f32 %v16298_v25, %v9987_v49 }
 0x50d   : > { %v10082_v15 = vsub.f32 %v11977_v46, %v10050_v55  ;;  %10018 = vst.msk [vmem:[%s16295_s10 + $0xc8] sm:$0xff] %vm9992_vm3, %v9985_v21  ;;  %v10051_v48 = vmul.f32 %v16298_v25, %v9985_v21  ;;  %v11593_v7 = vpop.f32.mrb[152].mxu1 }
 0x50e   : > { %v10117_v17 = vmul.f32 %v16306_v35, %v10084_v23  ;;  %v10085_v41 = vsub.f32 %v11978_v59, %v10053_v37  ;;  %v9887_v56 = vadd.f32 %v11593_v7, %v16288_v57  ;;  %v9842_v40 = vpop.f32.mrb[153].mxu1 }
 0x50f   : > { %v10115_v47 = vmul.f32 %v16306_v35, %v10082_v15  ;;  %v10083_v45 = vsub.f32 %v11979_v4, %v10051_v48  ;;  %v9885_v2 = vadd.f32 %v9842_v40, %v16276_v38  ;;  %v11594_v50 = vpop.f32.mrb[154].mxu1 }
 0x510   : > { %10149 = vst.msk [vmem:[%s16335_s16 + $0xd0] sm:$0xff] %vm9992_vm3, %v10117_v17  ;;  %v10118_v28 = vmul.f32 %v16306_v35, %v10085_v41  ;;  %v9990_v51 = vadd.f32 %v16286_v42, %v9887_v56  ;;  %v9888_v57 = vadd.f32 %v11594_v50, %v16301_v36  ;;  %v9845_v61 = vpop.f32.mrb[155].mxu1 }
 0x511   : > { %10147 = vst.msk [vmem:[%s16335_s16 + $0xc0] sm:$0xff] %vm9992_vm3, %v10115_v47  ;;  %v10116_v32 = vmul.f32 %v16306_v35, %v10083_v45  ;;  %v9988_v38 = vadd.f32 %v16286_v42, %v9885_v2  ;;  %v9886_v9 = vadd.f32 %v9845_v61, %v16278_v18  ;;  %v11980_v18 = vld [vmem:[%s12172_s28 + $0xf0] sm:$0xff] }
 0x512   : > { %10150 = vst.msk [vmem:[%s16335_s16 + $0xd8] sm:$0xff] %vm9992_vm3, %v10118_v28  ;;  %10023 = vst.msk [vmem:[%s16295_s10 + $0xf0] sm:$0xff] %vm9992_vm3, %v9990_v51  ;;  %v10056_v11 = vmul.f32 %v16298_v25, %v9990_v51  ;;  %v9991_v36 = vadd.f32 %v16286_v42, %v9888_v57 }
 0x513   : > { %10148 = vst.msk [vmem:[%s16335_s16 + $0xc8] sm:$0xff] %vm9992_vm3, %v10116_v32  ;;  %10021 = vst.msk [vmem:[%s16295_s10 + $0xe0] sm:$0xff] %vm9992_vm3, %v9988_v38  ;;  %v10054_v54 = vmul.f32 %v16298_v25, %v9988_v38  ;;  %v9989_v52 = vadd.f32 %v16286_v42, %v9886_v9 }
 0x514   : > { %v10088_v63 = vsub.f32 %v11980_v18, %v10056_v11  ;;  %10024 = vst.msk [vmem:[%s16295_s10 + $0xf8] sm:$0xff] %vm9992_vm3, %v9991_v36  ;;  %v10057_v30 = vmul.f32 %v16298_v25, %v9991_v36 }
 0x515   : > { %v10086_v43 = vsub.f32 %v11981_v1, %v10054_v54  ;;  %10022 = vst.msk [vmem:[%s16295_s10 + $0xe8] sm:$0xff] %vm9992_vm3, %v9989_v52  ;;  %v10055_v16 = vmul.f32 %v16298_v25, %v9989_v52 }
 0x516   : > { %v10121_v8 = vmul.f32 %v16306_v35, %v10088_v63  ;;  %v10089_v24 = vsub.f32 %v11982_v62, %v10057_v30 }
 0x517   : > { %v10119_v42 = vmul.f32 %v16306_v35, %v10086_v43  ;;  %v10087_v44 = vsub.f32 %v11983_v60, %v10055_v16 }
 0x518   : > { %10153 = vst.msk [vmem:[%s16335_s16 + $0xf0] sm:$0xff] %vm9992_vm3, %v10121_v8  ;;  %v10122_v31 = vmul.f32 %v16306_v35, %v10089_v24 }
 0x519   : > { %10151 = vst.msk [vmem:[%s16335_s16 + $0xe0] sm:$0xff] %vm9992_vm3, %v10119_v42  ;;  %v10120_v53 = vmul.f32 %v16306_v35, %v10087_v44 }
 0x51a   : > { %10154 = vst.msk [vmem:[%s16335_s16 + $0xf8] sm:$0xff] %vm9992_vm3, %v10122_v31 }
 0x51b   : > { %10152 = vst.msk [vmem:[%s16335_s16 + $0xe8] sm:$0xff] %vm9992_vm3, %v10120_v53 }
 0x51c PF: > { %s22_s30 = sadd.s32 1, %s12028_s30  }
 0x51d   : > { %p19_p12 = scmp.ge.s32.totalorder %s22_s30, 4  }
 0x51f   :  { %21 = sbr.rel (!%p19_p12) target bundleno = 2 (0x2), region = 112 }
 0x526   :  { %10192 = vsyncpa [#allocation7], 1 }
 0x527   :  { %10194 = vsyncpa [#allocation7 + $0x1], 1 }
 0x528   :  { %10195 = vsyncpa [#allocation9], 1 }

</bundles_post_ra>
